<compile_context>
chip_gen: v5e
topology: v5e:2x2
jax: 0.10.0
libtpu: 0.0.40
codegen_flags: <defaults>
</compile_context>

<pallas_src>
import functools

import jax
import jax.numpy as jnp
from jax.experimental import pallas as pl
from jax.experimental.pallas import tpu as pltpu


# ----------------------------- activations ---------------------------------

def _leaky_relu(y):
    return jnp.where(y > 0, y, 0.2 * y)          # spec: negative_slope=0.2


def _relu(y):
    return jnp.maximum(y, 0.0)


def _pick_tile(m, candidates=(256, 128, 64, 32, 16, 8)):
    for t in candidates:
        if m % t == 0:
            return t
    return m


# ----------------------------- Pallas kernels -------------------------------

def _matmul_bn_act_kernel(x_ref, w_ref, sc_ref, sh_ref, o_ref, *, act):
    """out = act((x @ w) * scale + shift) for one block.
    x/w may be bf16; MXU accumulate and the BN/act epilogue run in f32."""
    y = jnp.dot(x_ref[...], w_ref[...], preferred_element_type=jnp.float32)
    y = y * sc_ref[...] + sh_ref[...]
    o_ref[...] = act(y).astype(o_ref.dtype)


def matmul_bn_act_rowtiled(x, w, scale, shift, act, out_dtype=jnp.bfloat16):
    """Grid over M (rows); weight + scale/shift resident. Used for the
    conv-as-GEMM stages.  M axis is 'parallel' (megacore / v7x)."""
    M, K = x.shape
    _, N = w.shape
    tm = _pick_tile(M)
    kernel = functools.partial(_matmul_bn_act_kernel, act=act)
    return pl.pallas_call(
        kernel,
        out_shape=jax.ShapeDtypeStruct((M, N), out_dtype),
        grid=(M // tm,),
        in_specs=[
            pl.BlockSpec((tm, K), lambda i: (i, 0)),
            pl.BlockSpec((K, N), lambda i: (0, 0)),
            pl.BlockSpec((1, N), lambda i: (0, 0)),
            pl.BlockSpec((1, N), lambda i: (0, 0)),
        ],
        out_specs=pl.BlockSpec((tm, N), lambda i: (i, 0)),
        compiler_params=pltpu.CompilerParams(
            dimension_semantics=("parallel",)),
    )(x, w, scale, shift)


def matmul_bn_act_coltiled(x, w, scale, shift, act, out_dtype=jnp.bfloat16):
    """Grid over N (output columns) with the FULL K per step: no K reduction
    loop, no accumulator scratch.  Used for fc1 (weight-stream bound)."""
    M, K = x.shape
    _, N = w.shape
    tn = _pick_tile(N, candidates=(512, 256, 128))
    kernel = functools.partial(_matmul_bn_act_kernel, act=act)
    return pl.pallas_call(
        kernel,
        out_shape=jax.ShapeDtypeStruct((M, N), out_dtype),
        grid=(N // tn,),
        in_specs=[
            pl.BlockSpec((M, K), lambda j: (0, 0)),
            pl.BlockSpec((K, tn), lambda j: (0, j)),
            pl.BlockSpec((1, tn), lambda j: (0, j)),
            pl.BlockSpec((1, tn), lambda j: (0, j)),
        ],
        out_specs=pl.BlockSpec((M, tn), lambda j: (0, j)),
        compiler_params=pltpu.CompilerParams(
            dimension_semantics=("parallel",)),
    )(x, w, scale, shift)


def _fc_softmax_kernel(x_ref, w_ref, b_ref, o_ref):
    """out = softmax(x @ w + b, axis=-1), single block, f32 epilogue."""
    z = jnp.dot(x_ref[...], w_ref[...], preferred_element_type=jnp.float32)
    z = z + b_ref[...]
    z = z - jnp.max(z, axis=-1, keepdims=True)
    e = jnp.exp(z)
    s = jnp.sum(e, axis=-1, keepdims=True)
    o_ref[...] = (e * pl.reciprocal(s)).astype(o_ref.dtype)


def fc_softmax(x, w, b):
    M, K = x.shape
    _, N = w.shape
    return pl.pallas_call(
        _fc_softmax_kernel,
        out_shape=jax.ShapeDtypeStruct((M, N), jnp.float32),
        grid=(1,),
        in_specs=[
            pl.BlockSpec((M, K), lambda i: (0, 0)),
            pl.BlockSpec((K, N), lambda i: (0, 0)),
            pl.BlockSpec((1, N), lambda i: (0, 0)),
        ],
        out_specs=pl.BlockSpec((M, N), lambda i: (0, 0)),
    )(x, w, b)


# ------------------------------ glue (plain JAX) ----------------------------

def im2col_nhwc(x, k, stride, pad):
    """NHWC -> patch matrix (N*Ho*Wo, k*k*C), column order = (ki, kj, c)."""
    N, H, W, C = x.shape
    xp = jnp.pad(x, ((0, 0), (pad, pad), (pad, pad), (0, 0)))
    Ho = (H + 2 * pad - k) // stride + 1
    Wo = (W + 2 * pad - k) // stride + 1
    cols = []
    for i in range(k):
        for j in range(k):
            cols.append(xp[:, i:i + stride * Ho:stride,
                           j:j + stride * Wo:stride, :])
    p = jnp.stack(cols, axis=3)               # (N, Ho, Wo, k*k, C)
    p = p.reshape(N * Ho * Wo, k * k * C)
    return p, Ho, Wo


def _bn_scale_shift(gamma, beta, running_mean, running_var, bias, eps=1e-5):
    """Fold eval-mode BatchNorm (+ preceding layer bias) into scale/shift."""
    scale = gamma / jnp.sqrt(running_var + eps)
    shift = (bias - running_mean) * scale + beta
    return scale, shift


def prepare_params(p, img_dim, dim_s):
    """One-time layout / dtype prep (run OUTSIDE the jitted forward)."""
    del dim_s
    H2 = W2 = img_dim // 4
    C_PAD = 128
    bf = jnp.bfloat16

    # conv1: fold to (k*k*Cin, Cout), pad Cout 64 -> 128 (lane-dense output).
    w1 = p["conv1_w"].transpose(2, 3, 1, 0).reshape(-1, 64)        # (75, 64)
    sc1, sh1 = _bn_scale_shift(p["bn1_gamma"], p["bn1_beta"],
                               p["bn1_rm"], p["bn1_rv"], p["conv1_b"])
    w1 = jnp.pad(w1, ((0, 0), (0, C_PAD - 64)))                    # (75, 128)
    sc1 = jnp.pad(sc1, (0, C_PAD - 64))[None, :]
    sh1 = jnp.pad(sh1, (0, C_PAD - 64))[None, :]

    # conv2: pad Cin 64 -> 128 with zero rows (absorbs conv1's padded zeros).
    w2 = p["conv2_w"].transpose(2, 3, 1, 0)                        # (5,5,64,128)
    w2 = jnp.pad(w2, ((0, 0), (0, 0), (0, C_PAD - 64), (0, 0)))
    w2 = w2.reshape(-1, 128)                                       # (3200, 128)
    sc2, sh2 = _bn_scale_shift(p["bn2_gamma"], p["bn2_beta"],
                               p["bn2_rm"], p["bn2_rv"], p["conv2_b"])

    # fc1: permute in-features from NCHW-flatten (c,h,w) to NHWC-flatten
    # (h,w,c) order and pre-transpose to (K, N); done once, not in-jit.
    O = p["fc1_w"].shape[0]
    fc1_w = p["fc1_w"].reshape(O, 128, H2, W2).transpose(0, 2, 3, 1)
    fc1_w = fc1_w.reshape(O, -1).T                                 # (2048, O)
    sc3, sh3 = _bn_scale_shift(p["bn3_gamma"], p["bn3_beta"],
                               p["bn3_rm"], p["bn3_rv"], p["fc1_b"])

    # fc2: pre-transpose once.
    fc2_w = p["fc2_w"].T                                           # (O, dim_s)

    return {
        "w1": w1.astype(bf), "sc1": sc1, "sh1": sh1,
        "w2": w2.astype(bf), "sc2": sc2[None, :], "sh2": sh2[None, :],
        "fc1_w": fc1_w.astype(bf), "sc3": sc3[None, :], "sh3": sh3[None, :],
        "fc2_w": fc2_w.astype(bf), "fc2_b": p["fc2_b"][None, :],
    }


def init_params(key, img_dim, dim_s):
    num_features = 128 * (img_dim // 4) * (img_dim // 4)
    fc1_out = 512 * dim_s
    ks = jax.random.split(key, 20)

    def n(k, shape, fan_in):
        return jax.random.normal(k, shape, jnp.float32) / jnp.sqrt(fan_in)

    p = {
        "conv1_w": n(ks[0], (64, 3, 5, 5), 3 * 25),
        "conv1_b": 0.01 * jax.random.normal(ks[1], (64,), jnp.float32),
        "bn1_gamma": 1.0 + 0.1 * jax.random.normal(ks[2], (64,), jnp.float32),
        "bn1_beta": 0.1 * jax.random.normal(ks[3], (64,), jnp.float32),
        "bn1_rm": 0.1 * jax.random.normal(ks[4], (64,), jnp.float32),
        "bn1_rv": 1.0 + 0.1 * jax.random.uniform(ks[5], (64,), jnp.float32),
        "conv2_w": n(ks[6], (128, 64, 5, 5), 64 * 25),
        "conv2_b": 0.01 * jax.random.normal(ks[7], (128,), jnp.float32),
        "bn2_gamma": 1.0 + 0.1 * jax.random.normal(ks[8], (128,), jnp.float32),
        "bn2_beta": 0.1 * jax.random.normal(ks[9], (128,), jnp.float32),
        "bn2_rm": 0.1 * jax.random.normal(ks[10], (128,), jnp.float32),
        "bn2_rv": 1.0 + 0.1 * jax.random.uniform(ks[11], (128,), jnp.float32),
        "fc1_w": n(ks[12], (fc1_out, num_features), num_features),
        "fc1_b": 0.01 * jax.random.normal(ks[13], (fc1_out,), jnp.float32),
        "bn3_gamma": 1.0 + 0.1 * jax.random.normal(ks[14], (fc1_out,), jnp.float32),
        "bn3_beta": 0.1 * jax.random.normal(ks[15], (fc1_out,), jnp.float32),
        "bn3_rm": 0.1 * jax.random.normal(ks[16], (fc1_out,), jnp.float32),
        "bn3_rv": 1.0 + 0.1 * jax.random.uniform(ks[17], (fc1_out,), jnp.float32),
        "fc2_w": n(ks[18], (dim_s, fc1_out), fc1_out),
        "fc2_b": jnp.zeros((dim_s,), jnp.float32),
    }
    return p


def s_evaluator_forward(x, prep):
    N = x.shape[0]
    xh = x.astype(jnp.bfloat16).transpose(0, 2, 3, 1)        # NCHW -> NHWC (once)

    # conv1 + bn1 + leaky_relu   (Cout padded 64 -> 128; extra channels are 0)
    p1, Ho1, Wo1 = im2col_nhwc(xh, k=5, stride=2, pad=2)     # (N*Ho*Wo, 75)
    y1 = matmul_bn_act_rowtiled(p1, prep["w1"], prep["sc1"], prep["sh1"],
                                _leaky_relu)                 # (M1, 128) bf16
    h1 = y1.reshape(N, Ho1, Wo1, 128)

    # conv2 + bn2 + leaky_relu (NHWC kept; no activation transposes)
    p2, Ho2, Wo2 = im2col_nhwc(h1, k=5, stride=2, pad=2)     # (M2, 3200)
    y2 = matmul_bn_act_rowtiled(p2, prep["w2"], prep["sc2"], prep["sh2"],
                                _leaky_relu)                 # (M2, 128) bf16

    # flatten in NHWC order (fc1 weight columns were permuted to match)
    feat = y2.reshape(N, -1)                                 # (N, 2048) bf16

    # fc1 + bn3 + relu  (full-K, N-tiled, bf16 weight stream)
    y3 = matmul_bn_act_coltiled(feat, prep["fc1_w"], prep["sc3"], prep["sh3"],
                                _relu)                       # (N, 2048) bf16

    # fc2 + softmax (f32)
    return fc_softmax(y3, prep["fc2_w"], prep["fc2_b"])


# --------------------------------- main --------------------------------------

if __name__ == "__main__":
    img_dim = 16
    dim_s = 4
    batch = 2

    key = jax.random.PRNGKey(0)
    k_x, k_p = jax.random.split(key)
    x = jax.random.normal(k_x, (batch, 3, img_dim, img_dim), jnp.float32)
    raw_params = init_params(k_p, img_dim, dim_s)
    prep = prepare_params(raw_params, img_dim, dim_s)   # one-time, outside jit

    fwd = jax.jit(s_evaluator_forward)
    out = fwd(x, prep)
    out = jax.block_until_ready(out)

    assert out.shape == (batch, dim_s), out.shape
    assert bool(jnp.all(jnp.isfinite(out)))
    assert bool(jnp.allclose(jnp.sum(out, axis=1), 1.0, atol=1e-5))
    print("KERNEL_OK")
</pallas_src>

<mosaic_0001>
module attributes {stable_mosaic.version = 11 : i64} {
  func.func @_matmul_bn_act_kernel(%arg0: i32, %arg1: memref<128x75xbf16, #tpu.memory_space<vmem>>, %arg2: memref<75x128xbf16, #tpu.memory_space<vmem>>, %arg3: memref<1x128xf32, #tpu.memory_space<vmem>>, %arg4: memref<1x128xf32, #tpu.memory_space<vmem>>, %arg5: memref<128x128xbf16, #tpu.memory_space<vmem>>) attributes {dimension_semantics = [#tpu.dimension_semantics<parallel>], iteration_bounds = array<i64: 1>, scalar_prefetch = 0 : i64, scratch_operands = 0 : i64, tpu.core_type = #tpu.core_type<tc>, window_params = [{transform_indices = @transform_0, window_bounds = array<i64: 128, 75>}, {pipeline_mode = #tpu.pipeline_mode<synchronous>, transform_indices = @transform_1, window_bounds = array<i64: 75, 128>}, {pipeline_mode = #tpu.pipeline_mode<synchronous>, transform_indices = @transform_2, window_bounds = array<i64: 1, 128>}, {pipeline_mode = #tpu.pipeline_mode<synchronous>, transform_indices = @transform_3, window_bounds = array<i64: 1, 128>}, {transform_indices = @transform_4, window_bounds = array<i64: 128, 128>}]} {
    %c0 = arith.constant 0 : index
    %c0_0 = arith.constant 0 : index
    %0 = vector.load %arg1[%c0, %c0_0] : memref<128x75xbf16, #tpu.memory_space<vmem>>, vector<128x75xbf16>
    %c0_1 = arith.constant 0 : index
    %c0_2 = arith.constant 0 : index
    %1 = vector.load %arg2[%c0_1, %c0_2] : memref<75x128xbf16, #tpu.memory_space<vmem>>, vector<75x128xbf16>
    %cst = arith.constant dense<0.000000e+00> : vector<128x128xf32>
    %2 = tpu.matmul %0, %1, %cst {dimension_numbers = #tpu.dot_dimension_numbers<[1], [0], [0], [1], [0, 0, 1, 1], [], []>} : vector<128x75xbf16>, vector<75x128xbf16>, vector<128x128xf32> -> vector<128x128xf32>
    %c0_3 = arith.constant 0 : index
    %c0_4 = arith.constant 0 : index
    %3 = vector.load %arg3[%c0_3, %c0_4] : memref<1x128xf32, #tpu.memory_space<vmem>>, vector<1x128xf32>
    %4 = vector.broadcast %3 : vector<1x128xf32> to vector<128x128xf32>
    %5 = arith.mulf %2, %4 : vector<128x128xf32>
    %c0_5 = arith.constant 0 : index
    %c0_6 = arith.constant 0 : index
    %6 = vector.load %arg4[%c0_5, %c0_6] : memref<1x128xf32, #tpu.memory_space<vmem>>, vector<1x128xf32>
    %7 = vector.broadcast %6 : vector<1x128xf32> to vector<128x128xf32>
    %8 = arith.addf %5, %7 : vector<128x128xf32>
    %cst_7 = arith.constant 0.000000e+00 : f32
    %9 = vector.broadcast %cst_7 : f32 to vector<128x128xf32>
    %10 = arith.cmpf ogt, %8, %9 : vector<128x128xf32>
    %cst_8 = arith.constant 2.000000e-01 : f32
    %11 = vector.broadcast %cst_8 : f32 to vector<128x128xf32>
    %12 = arith.mulf %11, %8 : vector<128x128xf32>
    %13 = arith.select %10, %8, %12 : vector<128x128xi1>, vector<128x128xf32>
    %14 = arith.truncf %13 : vector<128x128xf32> to vector<128x128xbf16>
    %c0_9 = arith.constant 0 : index
    %c0_10 = arith.constant 0 : index
    %15 = vector.load %arg5[%c0_9, %c0_10] : memref<128x128xbf16, #tpu.memory_space<vmem>>, vector<128x128xbf16>
    tpu.vector_store %arg5[%c0_9, %c0_10], %14 {strides = array<i32>} : memref<128x128xbf16, #tpu.memory_space<vmem>>, vector<128x128xbf16>,
    return
  }
  func.func @transform_0(%arg0: i32) -> (i32, i32) {
    %c0_i32 = arith.constant 0 : i32
    %c0_i32_0 = arith.constant 0 : i32
    return %arg0, %c0_i32 : i32, i32
  }
  func.func @transform_1(%arg0: i32) -> (i32, i32) {
    %c0_i32 = arith.constant 0 : i32
    %c0_i32_0 = arith.constant 0 : i32
    %c0_i32_1 = arith.constant 0 : i32
    return %c0_i32, %c0_i32_0 : i32, i32
  }
  func.func @transform_2(%arg0: i32) -> (i32, i32) {
    %c0_i32 = arith.constant 0 : i32
    %c0_i32_0 = arith.constant 0 : i32
    %c0_i32_1 = arith.constant 0 : i32
    return %c0_i32, %c0_i32_0 : i32, i32
  }
  func.func @transform_3(%arg0: i32) -> (i32, i32) {
    %c0_i32 = arith.constant 0 : i32
    %c0_i32_0 = arith.constant 0 : i32
    %c0_i32_1 = arith.constant 0 : i32
    return %c0_i32, %c0_i32_0 : i32, i32
  }
  func.func @transform_4(%arg0: i32) -> (i32, i32) {
    %c0_i32 = arith.constant 0 : i32
    %c0_i32_0 = arith.constant 0 : i32
    return %arg0, %c0_i32 : i32, i32
  }
}

module attributes {stable_mosaic.version = 11 : i64} {
  func.func @_matmul_bn_act_kernel(%arg0: i32, %arg1: memref<2x2048xbf16, #tpu.memory_space<vmem>>, %arg2: memref<2048x512xbf16, #tpu.memory_space<vmem>>, %arg3: memref<1x512xf32, #tpu.memory_space<vmem>>, %arg4: memref<1x512xf32, #tpu.memory_space<vmem>>, %arg5: memref<2x512xbf16, #tpu.memory_space<vmem>>) attributes {dimension_semantics = [#tpu.dimension_semantics<parallel>], iteration_bounds = array<i64: 4>, scalar_prefetch = 0 : i64, scratch_operands = 0 : i64, tpu.core_type = #tpu.core_type<tc>, window_params = [{pipeline_mode = #tpu.pipeline_mode<synchronous>, transform_indices = @transform_0, window_bounds = array<i64: 2, 2048>}, {transform_indices = @transform_1, window_bounds = array<i64: 2048, 512>}, {transform_indices = @transform_2, window_bounds = array<i64: 1, 512>}, {transform_indices = @transform_3, window_bounds = array<i64: 1, 512>}, {transform_indices = @transform_4, window_bounds = array<i64: 2, 512>}]} {
    %c0 = arith.constant 0 : index
    %c0_0 = arith.constant 0 : index
    %0 = vector.load %arg1[%c0, %c0_0] : memref<2x2048xbf16, #tpu.memory_space<vmem>>, vector<2x2048xbf16>
    %c0_1 = arith.constant 0 : index
    %c0_2 = arith.constant 0 : index
    %1 = vector.load %arg2[%c0_1, %c0_2] : memref<2048x512xbf16, #tpu.memory_space<vmem>>, vector<2048x512xbf16>
    %cst = arith.constant dense<0.000000e+00> : vector<2x512xf32>
    %2 = tpu.matmul %0, %1, %cst {dimension_numbers = #tpu.dot_dimension_numbers<[1], [0], [0], [1], [0, 0, 1, 1], [], []>} : vector<2x2048xbf16>, vector<2048x512xbf16>, vector<2x512xf32> -> vector<2x512xf32>
    %c0_3 = arith.constant 0 : index
    %c0_4 = arith.constant 0 : index
    %3 = vector.load %arg3[%c0_3, %c0_4] : memref<1x512xf32, #tpu.memory_space<vmem>>, vector<1x512xf32>
    %4 = vector.broadcast %3 : vector<1x512xf32> to vector<2x512xf32>
    %5 = arith.mulf %2, %4 : vector<2x512xf32>
    %c0_5 = arith.constant 0 : index
    %c0_6 = arith.constant 0 : index
    %6 = vector.load %arg4[%c0_5, %c0_6] : memref<1x512xf32, #tpu.memory_space<vmem>>, vector<1x512xf32>
    %7 = vector.broadcast %6 : vector<1x512xf32> to vector<2x512xf32>
    %8 = arith.addf %5, %7 : vector<2x512xf32>
    %cst_7 = arith.constant 0.000000e+00 : f32
    %9 = vector.broadcast %cst_7 : f32 to vector<2x512xf32>
    %10 = arith.maximumf %8, %9 : vector<2x512xf32>
    %11 = arith.truncf %10 : vector<2x512xf32> to vector<2x512xbf16>
    %c0_8 = arith.constant 0 : index
    %c0_9 = arith.constant 0 : index
    %12 = vector.load %arg5[%c0_8, %c0_9] : memref<2x512xbf16, #tpu.memory_space<vmem>>, vector<2x512xbf16>
    tpu.vector_store %arg5[%c0_8, %c0_9], %11 {strides = array<i32>} : memref<2x512xbf16, #tpu.memory_space<vmem>>, vector<2x512xbf16>,
    return
  }
  func.func @transform_0(%arg0: i32) -> (i32, i32) {
    %c0_i32 = arith.constant 0 : i32
    %c0_i32_0 = arith.constant 0 : i32
    %c0_i32_1 = arith.constant 0 : i32
    return %c0_i32, %c0_i32_0 : i32, i32
  }
  func.func @transform_1(%arg0: i32) -> (i32, i32) {
    %c0_i32 = arith.constant 0 : i32
    %c0_i32_0 = arith.constant 0 : i32
    return %c0_i32, %arg0 : i32, i32
  }
  func.func @transform_2(%arg0: i32) -> (i32, i32) {
    %c0_i32 = arith.constant 0 : i32
    %c0_i32_0 = arith.constant 0 : i32
    return %c0_i32, %arg0 : i32, i32
  }
  func.func @transform_3(%arg0: i32) -> (i32, i32) {
    %c0_i32 = arith.constant 0 : i32
    %c0_i32_0 = arith.constant 0 : i32
    return %c0_i32, %arg0 : i32, i32
  }
  func.func @transform_4(%arg0: i32) -> (i32, i32) {
    %c0_i32 = arith.constant 0 : i32
    %c0_i32_0 = arith.constant 0 : i32
    return %c0_i32, %arg0 : i32, i32
  }
}

module attributes {stable_mosaic.version = 11 : i64} {
  func.func @_matmul_bn_act_kernel(%arg0: i32, %arg1: memref<32x3200xbf16, #tpu.memory_space<vmem>>, %arg2: memref<3200x128xbf16, #tpu.memory_space<vmem>>, %arg3: memref<1x128xf32, #tpu.memory_space<vmem>>, %arg4: memref<1x128xf32, #tpu.memory_space<vmem>>, %arg5: memref<32x128xbf16, #tpu.memory_space<vmem>>) attributes {dimension_semantics = [#tpu.dimension_semantics<parallel>], iteration_bounds = array<i64: 1>, scalar_prefetch = 0 : i64, scratch_operands = 0 : i64, tpu.core_type = #tpu.core_type<tc>, window_params = [{transform_indices = @transform_0, window_bounds = array<i64: 32, 3200>}, {pipeline_mode = #tpu.pipeline_mode<synchronous>, transform_indices = @transform_1, window_bounds = array<i64: 3200, 128>}, {pipeline_mode = #tpu.pipeline_mode<synchronous>, transform_indices = @transform_2, window_bounds = array<i64: 1, 128>}, {pipeline_mode = #tpu.pipeline_mode<synchronous>, transform_indices = @transform_3, window_bounds = array<i64: 1, 128>}, {transform_indices = @transform_4, window_bounds = array<i64: 32, 128>}]} {
    %c0 = arith.constant 0 : index
    %c0_0 = arith.constant 0 : index
    %0 = vector.load %arg1[%c0, %c0_0] : memref<32x3200xbf16, #tpu.memory_space<vmem>>, vector<32x3200xbf16>
    %c0_1 = arith.constant 0 : index
    %c0_2 = arith.constant 0 : index
    %1 = vector.load %arg2[%c0_1, %c0_2] : memref<3200x128xbf16, #tpu.memory_space<vmem>>, vector<3200x128xbf16>
    %cst = arith.constant dense<0.000000e+00> : vector<32x128xf32>
    %2 = tpu.matmul %0, %1, %cst {dimension_numbers = #tpu.dot_dimension_numbers<[1], [0], [0], [1], [0, 0, 1, 1], [], []>} : vector<32x3200xbf16>, vector<3200x128xbf16>, vector<32x128xf32> -> vector<32x128xf32>
    %c0_3 = arith.constant 0 : index
    %c0_4 = arith.constant 0 : index
    %3 = vector.load %arg3[%c0_3, %c0_4] : memref<1x128xf32, #tpu.memory_space<vmem>>, vector<1x128xf32>
    %4 = vector.broadcast %3 : vector<1x128xf32> to vector<32x128xf32>
    %5 = arith.mulf %2, %4 : vector<32x128xf32>
    %c0_5 = arith.constant 0 : index
    %c0_6 = arith.constant 0 : index
    %6 = vector.load %arg4[%c0_5, %c0_6] : memref<1x128xf32, #tpu.memory_space<vmem>>, vector<1x128xf32>
    %7 = vector.broadcast %6 : vector<1x128xf32> to vector<32x128xf32>
    %8 = arith.addf %5, %7 : vector<32x128xf32>
    %cst_7 = arith.constant 0.000000e+00 : f32
    %9 = vector.broadcast %cst_7 : f32 to vector<32x128xf32>
    %10 = arith.cmpf ogt, %8, %9 : vector<32x128xf32>
    %cst_8 = arith.constant 2.000000e-01 : f32
    %11 = vector.broadcast %cst_8 : f32 to vector<32x128xf32>
    %12 = arith.mulf %11, %8 : vector<32x128xf32>
    %13 = arith.select %10, %8, %12 : vector<32x128xi1>, vector<32x128xf32>
    %14 = arith.truncf %13 : vector<32x128xf32> to vector<32x128xbf16>
    %c0_9 = arith.constant 0 : index
    %c0_10 = arith.constant 0 : index
    %15 = vector.load %arg5[%c0_9, %c0_10] : memref<32x128xbf16, #tpu.memory_space<vmem>>, vector<32x128xbf16>
    tpu.vector_store %arg5[%c0_9, %c0_10], %14 {strides = array<i32>} : memref<32x128xbf16, #tpu.memory_space<vmem>>, vector<32x128xbf16>,
    return
  }
  func.func @transform_0(%arg0: i32) -> (i32, i32) {
    %c0_i32 = arith.constant 0 : i32
    %c0_i32_0 = arith.constant 0 : i32
    return %arg0, %c0_i32 : i32, i32
  }
  func.func @transform_1(%arg0: i32) -> (i32, i32) {
    %c0_i32 = arith.constant 0 : i32
    %c0_i32_0 = arith.constant 0 : i32
    %c0_i32_1 = arith.constant 0 : i32
    return %c0_i32, %c0_i32_0 : i32, i32
  }
  func.func @transform_2(%arg0: i32) -> (i32, i32) {
    %c0_i32 = arith.constant 0 : i32
    %c0_i32_0 = arith.constant 0 : i32
    %c0_i32_1 = arith.constant 0 : i32
    return %c0_i32, %c0_i32_0 : i32, i32
  }
  func.func @transform_3(%arg0: i32) -> (i32, i32) {
    %c0_i32 = arith.constant 0 : i32
    %c0_i32_0 = arith.constant 0 : i32
    %c0_i32_1 = arith.constant 0 : i32
    return %c0_i32, %c0_i32_0 : i32, i32
  }
  func.func @transform_4(%arg0: i32) -> (i32, i32) {
    %c0_i32 = arith.constant 0 : i32
    %c0_i32_0 = arith.constant 0 : i32
    return %arg0, %c0_i32 : i32, i32
  }
}

module attributes {stable_mosaic.version = 11 : i64} {
  func.func @_fc_softmax_kernel(%arg0: i32, %arg1: memref<2x2048xbf16, #tpu.memory_space<vmem>>, %arg2: memref<2048x4xbf16, #tpu.memory_space<vmem>>, %arg3: memref<1x4xf32, #tpu.memory_space<vmem>>, %arg4: memref<2x4xf32, #tpu.memory_space<vmem>>) attributes {dimension_semantics = [#tpu.dimension_semantics<arbitrary>], iteration_bounds = array<i64: 1>, scalar_prefetch = 0 : i64, scratch_operands = 0 : i64, tpu.core_type = #tpu.core_type<tc>, window_params = [{pipeline_mode = #tpu.pipeline_mode<synchronous>, transform_indices = @transform_0, window_bounds = array<i64: 2, 2048>}, {pipeline_mode = #tpu.pipeline_mode<synchronous>, transform_indices = @transform_1, window_bounds = array<i64: 2048, 4>}, {pipeline_mode = #tpu.pipeline_mode<synchronous>, transform_indices = @transform_2, window_bounds = array<i64: 1, 4>}, {pipeline_mode = #tpu.pipeline_mode<synchronous>, transform_indices = @transform_3, window_bounds = array<i64: 2, 4>}]} {
    %c0 = arith.constant 0 : index
    %c0_0 = arith.constant 0 : index
    %0 = vector.load %arg1[%c0, %c0_0] : memref<2x2048xbf16, #tpu.memory_space<vmem>>, vector<2x2048xbf16>
    %c0_1 = arith.constant 0 : index
    %c0_2 = arith.constant 0 : index
    %1 = vector.load %arg2[%c0_1, %c0_2] : memref<2048x4xbf16, #tpu.memory_space<vmem>>, vector<2048x4xbf16>
    %cst = arith.constant dense<0.000000e+00> : vector<2x4xf32>
    %2 = tpu.matmul %0, %1, %cst {dimension_numbers = #tpu.dot_dimension_numbers<[1], [0], [0], [1], [0, 0, 1, 1], [], []>} : vector<2x2048xbf16>, vector<2048x4xbf16>, vector<2x4xf32> -> vector<2x4xf32>
    %c0_3 = arith.constant 0 : index
    %c0_4 = arith.constant 0 : index
    %3 = vector.load %arg3[%c0_3, %c0_4] : memref<1x4xf32, #tpu.memory_space<vmem>>, vector<1x4xf32>
    %4 = vector.broadcast %3 : vector<1x4xf32> to vector<2x4xf32>
    %5 = arith.addf %2, %4 : vector<2x4xf32>
    %cst_5 = arith.constant dense<0xFF800000> : vector<2xf32>
    %6 = vector.multi_reduction <maximumf>, %5, %cst_5 [1] : vector<2x4xf32> to vector<2xf32>
    %7 = vector.shape_cast %6 : vector<2xf32> to vector<2x1xf32>
    %8 = vector.broadcast %7 : vector<2x1xf32> to vector<2x4xf32>
    %9 = arith.subf %5, %8 : vector<2x4xf32>
    %10 = math.exp %9 : vector<2x4xf32>
    %cst_6 = arith.constant dense<0.000000e+00> : vector<2xf32>
    %11 = vector.multi_reduction <add>, %10, %cst_6 [1] : vector<2x4xf32> to vector<2xf32>
    %12 = vector.shape_cast %11 : vector<2xf32> to vector<2x1xf32>
    %13 = tpu.reciprocal %12 : vector<2x1xf32> -> vector<2x1xf32>
    %14 = vector.broadcast %13 : vector<2x1xf32> to vector<2x4xf32>
    %15 = arith.mulf %10, %14 : vector<2x4xf32>
    %c0_7 = arith.constant 0 : index
    %c0_8 = arith.constant 0 : index
    %16 = vector.load %arg4[%c0_7, %c0_8] : memref<2x4xf32, #tpu.memory_space<vmem>>, vector<2x4xf32>
    tpu.vector_store %arg4[%c0_7, %c0_8], %15 {strides = array<i32>} : memref<2x4xf32, #tpu.memory_space<vmem>>, vector<2x4xf32>,
    return
  }
  func.func @transform_0(%arg0: i32) -> (i32, i32) {
    %c0_i32 = arith.constant 0 : i32
    %c0_i32_0 = arith.constant 0 : i32
    %c0_i32_1 = arith.constant 0 : i32
    return %c0_i32, %c0_i32_0 : i32, i32
  }
  func.func @transform_1(%arg0: i32) -> (i32, i32) {
    %c0_i32 = arith.constant 0 : i32
    %c0_i32_0 = arith.constant 0 : i32
    %c0_i32_1 = arith.constant 0 : i32
    return %c0_i32, %c0_i32_0 : i32, i32
  }
  func.func @transform_2(%arg0: i32) -> (i32, i32) {
    %c0_i32 = arith.constant 0 : i32
    %c0_i32_0 = arith.constant 0 : i32
    %c0_i32_1 = arith.constant 0 : i32
    return %c0_i32, %c0_i32_0 : i32, i32
  }
  func.func @transform_3(%arg0: i32) -> (i32, i32) {
    %c0_i32 = arith.constant 0 : i32
    %c0_i32_0 = arith.constant 0 : i32
    %c0_i32_1 = arith.constant 0 : i32
    return %c0_i32, %c0_i32_0 : i32, i32
  }
}

</mosaic_0001>

<bundles_post_ra>
// kernel: s_evaluator_forward.4
= control target key start
LH: loop header
LB: loop body
LE: loop exit
PB: predicated region body
PF: predicated region fallthrough
CT: control target
= control target key end

     0   :  { %9 = vsyncpa [#allocation3], 0  ;;  %s714_s0 = inlined_call_operand.vmem [shape: bf16[128,75], index: 0, kind: input, shape index: {}]   ;;  %s715_s1 = inlined_call_operand.hbm [shape: bf16[75,128], index: 1, kind: input, shape index: {}]   ;;  %s716_s2 = inlined_call_operand.hbm [shape: f32[1,128], index: 2, kind: input, shape index: {}]   ;;  %s717_s3 = inlined_call_operand.hbm [shape: f32[1,128], index: 3, kind: input, shape index: {}]   ;;  %s718_s4 = inlined_call_operand.vmem [shape: bf16[128,128], index: 4, kind: output, shape index: {}]  }
   0x1   :  { %10 = vsyncpa [#allocation5], 0  ;;  %s31_s17 = sshll.u32 %s716_s2, 4  ;;  %s582_s18 = smov [#allocation4]   ;;  %s32_s17 = int_to_ptr.hbm [resolvable:$true] %s31_s17 }
   0x2   :  { %s33_s19 = sshll.u32 %s582_s18, 4  ;;  %s17_s22 = sshll.u32 %s715_s1, 4  ;;  %s34_s19 = int_to_ptr.vmem [resolvable:$true] %s33_s19  ;;  %s18_s22 = int_to_ptr.hbm [resolvable:$true] %s17_s22 }
   0x3   :  { %36 = dma.hbm_to_vmem [thread:$0]  %s32_s17, 16, %s34_s19, [#allocation5]  }
   0x4   :  { %s583_s23 = smov [#allocation2]   ;;  %s584_s25 = smov 64  }
   0x5   :  { %s19_s24 = sshll.u32 %s583_s23, 4  ;;  %s585_s26 = smov 4   ;;  %s20_s24 = int_to_ptr.vmem [resolvable:$true] %s19_s24 }
   0x6   :  { %25 = dma.hbm_to_vmem [thread:$0]  %s18_s22, 640, %s20_s24, [#allocation3], %s584_s25, %s584_s25, %s585_s26  }
   0x7   :  { %s42_s2 = sshll.u32 %s717_s3, 4  ;;  %s586_s29 = smov [#allocation6]   ;;  %s43_s2 = int_to_ptr.hbm [resolvable:$true] %s42_s2 }
   0x8   :  { %s44_s30 = sshll.u32 %s586_s29, 4  ;;  %s45_s30 = int_to_ptr.vmem [resolvable:$true] %s44_s30 }
   0x9   :  { %47 = dma.hbm_to_vmem [thread:$0]  %s43_s2, 16, %s45_s30, [#allocation5]  }
   0xa   :  { %578 = dma.done.wait [#allocation3], 640  }
   0xb   :  { %579 = vsyncadd [#allocation3], 4294966656 }
   0xc   :  { %580 = dma.done.wait [#allocation5], 32  }
   0xd   :  { %581 = vsyncadd [#allocation5], 4294967264  ;;  %vm181_vm0 = vcmask 1044480   ;;  %vm182_vm1 = vcmask 1045504   ;;  %v587_v0 = vmov 65535   ;;  %v434_v7 = vld [vmem:[#allocation2 + $0x18] sm:$0xff] }
   0xe   :  { %v183_v1 = vsel %vm181_vm0, 4294967295, %v587_v0  ;;  %v413_v2 = vld [vmem:[#allocation2 + $0x20] sm:$0xf]  ;;  %v435_v3 = vld [vmem:[#allocation2 + $0x20] sm:$0x30]  ;;  %v433_v8 = vld [vmem:[#allocation2 + $0x10] sm:$0xff] }
   0xf   :  { %v184_v4 = vsel %vm182_vm1, %v183_v1, 0  ;;  %v414_v5 = vor.u32 %v435_v3, %v413_v2  ;;  %v432_v9 = vld [vmem:[#allocation2 + $0x8] sm:$0xff]  ;;  %v431_v10 = vld [vmem:[#allocation2] sm:$0xff]  ;;  %v425_v12 = vld [vmem:[%s714_s0 + $0x10] sm:$0xff]  ;;  %vm156_vm2 = vcmask 613376  }
  0x10   :  { %v423_v11 = vld [vmem:[%s714_s0] sm:$0xff]  ;;  %v429_v14 = vld [vmem:[%s714_s0 + $0x30] sm:$0xff]  ;;  %v424_v15 = vld [vmem:[%s714_s0 + $0x8] sm:$0xff] }
  0x11   :  { %v186_v6 = vand.u32 %v414_v5, %v184_v4  ;;  %v427_v13 = vld [vmem:[%s714_s0 + $0x20] sm:$0xff]  ;;  %v426_v16 = vld [vmem:[%s714_s0 + $0x18] sm:$0xff]  ;;  %v428_v17 = vld [vmem:[%s714_s0 + $0x28] sm:$0xff] }
  0x12   :  { %v430_v18 = vld [vmem:[%s714_s0 + $0x38] sm:$0xff]  ;;  %v654_v19 = vld [vmem:[#allocation4] ss:$0 sm:$0xff]  ;;  %v657_v23 = vld [vmem:[#allocation6] ss:$0 sm:$0xff] }
  0x13   :  { %191 = vmatpush.bf16.msra.mxu0 %v186_v6  ;;  %483 = vmatpush.bf16.msra.mxu1 %v186_v6 }
  0x14   :  { %484 = vmatpush.bf16.msra.mxu2 %v186_v6  ;;  %485 = vmatpush.bf16.msra.mxu3 %v186_v6 }
  0x17   :  { %192 = vmatpush.bf16.msra.mxu0 %v434_v7  ;;  %486 = vmatpush.bf16.msra.mxu1 %v434_v7 }
  0x18   :  { %487 = vmatpush.bf16.msra.mxu2 %v434_v7  ;;  %488 = vmatpush.bf16.msra.mxu3 %v434_v7 }
  0x1b   :  { %193 = vmatpush.bf16.msra.mxu0 %v433_v8  ;;  %489 = vmatpush.bf16.msra.mxu1 %v433_v8 }
  0x1c   :  { %490 = vmatpush.bf16.msra.mxu2 %v433_v8  ;;  %491 = vmatpush.bf16.msra.mxu3 %v433_v8 }
  0x1f   :  { %194 = vmatpush.bf16.msra.mxu0 %v432_v9  ;;  %492 = vmatpush.bf16.msra.mxu1 %v432_v9 }
  0x20   :  { %493 = vmatpush.bf16.msra.mxu2 %v432_v9  ;;  %494 = vmatpush.bf16.msra.mxu3 %v432_v9 }
  0x23   :  { %195 = vmatpush.bf16.msra.mxu0 %v431_v10  ;;  %495 = vmatpush.bf16.msra.mxu1 %v431_v10 }
  0x24   :  { %496 = vmatpush.bf16.msra.mxu2 %v431_v10  ;;  %497 = vmatpush.bf16.msra.mxu3 %v431_v10 }
  0x26   :  { %415 = vmatmul.msk.bf16.vlgmr.msra.gmra.mxu0 %vm156_vm2, %v423_v11  ;;  %417 = vmatmul.msk.bf16.vlgmr.msra.gmra.mxu1 %vm156_vm2, %v425_v12 }
  0x27   :  { %419 = vmatmul.msk.bf16.vlgmr.msra.gmra.mxu2 %vm156_vm2, %v427_v13  ;;  %421 = vmatmul.msk.bf16.vlgmr.msra.gmra.mxu3 %vm156_vm2, %v429_v14 }
  0x36   :  { %416 = vmatmul.msk.bf16.gmra.mxu0 %vm156_vm2, %v424_v15  ;;  %418 = vmatmul.msk.bf16.gmra.mxu1 %vm156_vm2, %v426_v16 }
  0x37   :  { %420 = vmatmul.msk.bf16.gmra.mxu2 %vm156_vm2, %v428_v17  ;;  %422 = vmatmul.msk.bf16.gmra.mxu3 %vm156_vm2, %v430_v18 }
  0xa3   :  { %v197_v20 = vpop.f32.mrf.mxu0  ;;  %v207_v21 = vpop.f32.mrf.mxu1 }
  0xa4   :  { %v241_v22 = vmul.f32 %v654_v19, %v197_v20  ;;  %v245_v24 = vmul.f32 %v654_v19, %v207_v21 }
  0xa6   :  { %v261_v25 = vadd.f32 %v657_v23, %v241_v22  ;;  %v265_v26 = vadd.f32 %v657_v23, %v245_v24 }
  0xa8   :  { %v293_v35 = vmul.f32 0.2, %v261_v25  ;;  %v297_v36 = vmul.f32 0.2, %v265_v26  ;;  %vm277_vm3 = vcmp.gt.f32.partialorder %v261_v25, 0.0  ;;  %vm281_vm4 = vcmp.gt.f32.partialorder %v265_v26, 0.0 }
  0xaa   :  { %v217_v27 = vpop.f32.mrf.mxu2  ;;  %v227_v28 = vpop.f32.mrf.mxu3  ;;  %v309_v43 = vsel %vm277_vm3, %v261_v25, %v293_v35  ;;  %v313_v44 = vsel %vm281_vm4, %v265_v26, %v297_v36 }
  0xab   :  { %v199_v29 = vpop.f32.mrf.mxu0  ;;  %v209_v30 = vpop.f32.mrf.mxu1  ;;  %v249_v33 = vmul.f32 %v654_v19, %v217_v27  ;;  %v253_v34 = vmul.f32 %v654_v19, %v227_v28 }
  0xac   :  { %v242_v31 = vmul.f32 %v654_v19, %v199_v29  ;;  %v246_v32 = vmul.f32 %v654_v19, %v209_v30 }
  0xad   :  { %v269_v41 = vadd.f32 %v657_v23, %v249_v33  ;;  %v273_v42 = vadd.f32 %v657_v23, %v253_v34 }
  0xae   :  { %v262_v37 = vadd.f32 %v657_v23, %v242_v31  ;;  %v266_v38 = vadd.f32 %v657_v23, %v246_v32 }
  0xaf   :  { %v301_v55 = vmul.f32 0.2, %v269_v41  ;;  %v305_v56 = vmul.f32 0.2, %v273_v42  ;;  %vm285_vm7 = vcmp.gt.f32.partialorder %v269_v41, 0.0  ;;  %vm289_vm8 = vcmp.gt.f32.partialorder %v273_v42, 0.0 }
  0xb0   :  { %vm278_vm5 = vcmp.gt.f32.partialorder %v262_v37, 0.0  ;;  %v294_v39 = vmul.f32 0.2, %v262_v37  ;;  %vm282_vm6 = vcmp.gt.f32.partialorder %v266_v38, 0.0  ;;  %v298_v40 = vmul.f32 0.2, %v266_v38 }
  0xb1   :  { %v317_v63 = vsel %vm285_vm7, %v269_v41, %v301_v55  ;;  %v321_v0 = vsel %vm289_vm8, %v273_v42, %v305_v56 }
  0xb2   :  { %v310_v45 = vsel %vm278_vm5, %v262_v37, %v294_v39  ;;  %v314_v46 = vsel %vm282_vm6, %v266_v38, %v298_v40  ;;  %v219_v47 = vpop.f32.mrf.mxu2  ;;  %v229_v48 = vpop.f32.mrf.mxu3 }
  0xb3   :  { %v439_v49 = vpack.c.bf16 %v310_v45, %v309_v43  ;;  %v449_v50 = vpack.c.bf16 %v314_v46, %v313_v44  ;;  %v250_v51 = vmul.f32 %v654_v19, %v219_v47  ;;  %v254_v52 = vmul.f32 %v654_v19, %v229_v48  ;;  %v202_v53 = vpop.f32.mrf.mxu0  ;;  %v212_v54 = vpop.f32.mrf.mxu1 }
  0xb4   :  { %v243_v59 = vmul.f32 %v654_v19, %v202_v53  ;;  %v247_v60 = vmul.f32 %v654_v19, %v212_v54 }
  0xb5   :  { %440 = vst [vmem:[%s718_s4] sm:$0xff] %v439_v49   ;;  %v270_v57 = vadd.f32 %v657_v23, %v250_v51  ;;  %v274_v58 = vadd.f32 %v657_v23, %v254_v52 }
  0xb6   :  { %477 = vst [vmem:[%s718_s4 + $0x10] sm:$0xff] %v449_v50   ;;  %v263_v5 = vadd.f32 %v657_v23, %v243_v59  ;;  %v267_v6 = vadd.f32 %v657_v23, %v247_v60 }
  0xb7   :  { %vm286_vm9 = vcmp.gt.f32.partialorder %v270_v57, 0.0  ;;  %v302_v61 = vmul.f32 0.2, %v270_v57  ;;  %vm290_vm10 = vcmp.gt.f32.partialorder %v274_v58, 0.0  ;;  %v306_v62 = vmul.f32 0.2, %v274_v58 }
  0xb8   :  { %v295_v15 = vmul.f32 0.2, %v263_v5  ;;  %v299_v16 = vmul.f32 0.2, %v267_v6  ;;  %vm279_vm11 = vcmp.gt.f32.partialorder %v263_v5, 0.0  ;;  %vm283_vm12 = vcmp.gt.f32.partialorder %v267_v6, 0.0 }
  0xb9   :  { %v318_v1 = vsel %vm286_vm9, %v270_v57, %v302_v61  ;;  %v322_v2 = vsel %vm290_vm10, %v274_v58, %v306_v62 }
  0xba   :  { %v459_v3 = vpack.c.bf16 %v318_v1, %v317_v63  ;;  %v469_v4 = vpack.c.bf16 %v322_v2, %v321_v0  ;;  %v222_v7 = vpop.f32.mrf.mxu2  ;;  %v232_v8 = vpop.f32.mrf.mxu3  ;;  %v311_v25 = vsel %vm279_vm11, %v263_v5, %v295_v15  ;;  %v315_v26 = vsel %vm283_vm12, %v267_v6, %v299_v16 }
  0xbb   :  { %v204_v9 = vpop.f32.mrf.mxu0  ;;  %v214_v10 = vpop.f32.mrf.mxu1  ;;  %v251_v13 = vmul.f32 %v654_v19, %v222_v7  ;;  %v255_v14 = vmul.f32 %v654_v19, %v232_v8 }
  0xbc   :  { %479 = vst [vmem:[%s718_s4 + $0x20] sm:$0xff] %v459_v3   ;;  %v244_v11 = vmul.f32 %v654_v19, %v204_v9  ;;  %v248_v12 = vmul.f32 %v654_v19, %v214_v10 }
  0xbd   :  { %481 = vst [vmem:[%s718_s4 + $0x30] sm:$0xff] %v469_v4   ;;  %v271_v22 = vadd.f32 %v657_v23, %v251_v13  ;;  %v275_v24 = vadd.f32 %v657_v23, %v255_v14 }
  0xbe   :  { %v264_v17 = vadd.f32 %v657_v23, %v244_v11  ;;  %v268_v18 = vadd.f32 %v657_v23, %v248_v12 }
  0xbf   :  { %v303_v35 = vmul.f32 0.2, %v271_v22  ;;  %v307_v36 = vmul.f32 0.2, %v275_v24  ;;  %vm287_vm15 = vcmp.gt.f32.partialorder %v271_v22, 0.0  ;;  %vm291_vm0 = vcmp.gt.f32.partialorder %v275_v24, 0.0 }
  0xc0   :  { %vm280_vm13 = vcmp.gt.f32.partialorder %v264_v17, 0.0  ;;  %v296_v20 = vmul.f32 0.2, %v264_v17  ;;  %vm284_vm14 = vcmp.gt.f32.partialorder %v268_v18, 0.0  ;;  %v300_v21 = vmul.f32 0.2, %v268_v18 }
  0xc1   :  { %v319_v40 = vsel %vm287_vm15, %v271_v22, %v303_v35  ;;  %v323_v41 = vsel %vm291_vm0, %v275_v24, %v307_v36 }
  0xc2   :  { %v312_v27 = vsel %vm280_vm13, %v264_v17, %v296_v20  ;;  %v316_v28 = vsel %vm284_vm14, %v268_v18, %v300_v21  ;;  %v224_v29 = vpop.f32.mrf.mxu2  ;;  %v234_v30 = vpop.f32.mrf.mxu3 }
  0xc3   :  { %v444_v31 = vpack.c.bf16 %v312_v27, %v311_v25  ;;  %v454_v32 = vpack.c.bf16 %v316_v28, %v315_v26  ;;  %v252_v33 = vmul.f32 %v654_v19, %v224_v29  ;;  %v256_v34 = vmul.f32 %v654_v19, %v234_v30 }
  0xc5   :  { %476 = vst [vmem:[%s718_s4 + $0x8] sm:$0xff] %v444_v31   ;;  %v272_v37 = vadd.f32 %v657_v23, %v252_v33  ;;  %v276_v38 = vadd.f32 %v657_v23, %v256_v34 }
  0xc6   :  { %478 = vst [vmem:[%s718_s4 + $0x18] sm:$0xff] %v454_v32  }
  0xc7   :  { %vm288_vm1 = vcmp.gt.f32.partialorder %v272_v37, 0.0  ;;  %v304_v39 = vmul.f32 0.2, %v272_v37  ;;  %vm292_vm2 = vcmp.gt.f32.partialorder %v276_v38, 0.0  ;;  %v308_v19 = vmul.f32 0.2, %v276_v38 }
  0xc9   :  { %v320_v42 = vsel %vm288_vm1, %v272_v37, %v304_v39  ;;  %v324_v43 = vsel %vm292_vm2, %v276_v38, %v308_v19 }
  0xca   :  { %v464_v44 = vpack.c.bf16 %v320_v42, %v319_v40  ;;  %v474_v45 = vpack.c.bf16 %v324_v43, %v323_v41 }
  0xcc   :  { %480 = vst [vmem:[%s718_s4 + $0x28] sm:$0xff] %v464_v44  }
  0xcd   :  { %482 = vst [vmem:[%s718_s4 + $0x38] sm:$0xff] %v474_v45  }
  0xce   :  { %361 = vsyncpa [#allocation3], 1 }
  0xcf   :  { %362 = vsyncpa [#allocation5], 1 }

// kernel: s_evaluator_forward.7
= control target key start
LH: loop header
LB: loop body
LE: loop exit
PB: predicated region body
PF: predicated region fallthrough
CT: control target
= control target key end

     0   :  { %8 = vsyncpa [#allocation3], 0  ;;  %s2466_s0 = inlined_call_operand.vmem [shape: bf16[2,2048], index: 0, kind: input, shape index: {}]   ;;  %s2467_s1 = inlined_call_operand.vmem [shape: bf16[2048,4], index: 1, kind: input, shape index: {}]   ;;  %s2468_s2 = inlined_call_operand.hbm [shape: f32[1,4], index: 2, kind: input, shape index: {}]   ;;  %s2469_s3 = inlined_call_operand.hbm [shape: f32[2,4], index: 3, kind: output, shape index: {}]  }
   0x1   :  { %9 = vsyncpa [#allocation4], 0  ;;  %s19_s14 = sshll.u32 %s2468_s2, 4  ;;  %s2045_s15 = smov [#allocation2]   ;;  %s20_s14 = int_to_ptr.hbm [resolvable:$true] %s19_s14 }
   0x2   :  { %s21_s16 = sshll.u32 %s2045_s15, 4  ;;  %s22_s16 = int_to_ptr.vmem [resolvable:$true] %s21_s16 }
   0x3   :  { %24 = dma.hbm_to_vmem [thread:$0]  %s20_s14, 16, %s22_s16, [#allocation3]  }
   0x4   :  { %2041 = dma.done.wait [#allocation3], 16  }
   0x5   :  { %2042 = vsyncadd [#allocation3], 4294967280  ;;  %v1865_v0 = vld [vmem:[%s2467_s1 + $0x38] sm:$0xff]  ;;  %v1864_v4 = vld [vmem:[%s2467_s1 + $0x30] sm:$0xff]  ;;  %vm1303_vm0 = vcmask 25600   ;;  %s1336_s22 = sshll.u32 %s2469_s3, 4  ;;  %s1337_s22 = int_to_ptr.hbm [resolvable:$true] %s1336_s22 }
   0x6   :  { %v1873_v1 = vld [vmem:[%s2467_s1 + $0x78] sm:$0xff]  ;;  %1095 = vmatpush.bf16.msra.mxu0 %v1865_v0  ;;  %v1872_v5 = vld [vmem:[%s2467_s1 + $0x70] sm:$0xff]  ;;  %v1863_v8 = vld [vmem:[%s2467_s1 + $0x28] sm:$0xff] }
   0x7   :  { %v1881_v2 = vld [vmem:[%s2467_s1 + $0xb8] sm:$0xff]  ;;  %1108 = vmatpush.bf16.msra.mxu1 %v1873_v1  ;;  %v1880_v6 = vld [vmem:[%s2467_s1 + $0xb0] sm:$0xff]  ;;  %v1871_v9 = vld [vmem:[%s2467_s1 + $0x68] sm:$0xff] }
   0x8   :  { %v1889_v3 = vld [vmem:[%s2467_s1 + $0xf8] sm:$0xff]  ;;  %1121 = vmatpush.bf16.msra.mxu2 %v1881_v2  ;;  %v1888_v7 = vld [vmem:[%s2467_s1 + $0xf0] sm:$0xff]  ;;  %v1879_v10 = vld [vmem:[%s2467_s1 + $0xa8] sm:$0xff] }
   0x9   :  { %1134 = vmatpush.bf16.msra.mxu3 %v1889_v3  ;;  %v1887_v11 = vld [vmem:[%s2467_s1 + $0xe8] sm:$0xff]  ;;  %v1862_v12 = vld [vmem:[%s2467_s1 + $0x20] sm:$0xff]  ;;  %v1861_v16 = vld [vmem:[%s2467_s1 + $0x18] sm:$0xff] }
   0xa   :  { %1096 = vmatpush.bf16.msra.mxu0 %v1864_v4  ;;  %v1870_v13 = vld [vmem:[%s2467_s1 + $0x60] sm:$0xff]  ;;  %v1869_v17 = vld [vmem:[%s2467_s1 + $0x58] sm:$0xff]  ;;  %v1860_v21 = vld [vmem:[%s2467_s1 + $0x10] sm:$0xff] }
   0xb   :  { %1109 = vmatpush.bf16.msra.mxu1 %v1872_v5  ;;  %v1878_v14 = vld [vmem:[%s2467_s1 + $0xa0] sm:$0xff]  ;;  %v1877_v18 = vld [vmem:[%s2467_s1 + $0x98] sm:$0xff]  ;;  %v1868_v22 = vld [vmem:[%s2467_s1 + $0x50] sm:$0xff] }
   0xc   :  { %1122 = vmatpush.bf16.msra.mxu2 %v1880_v6  ;;  %v1886_v15 = vld [vmem:[%s2467_s1 + $0xe0] sm:$0xff]  ;;  %v1885_v19 = vld [vmem:[%s2467_s1 + $0xd8] sm:$0xff]  ;;  %v1876_v23 = vld [vmem:[%s2467_s1 + $0x90] sm:$0xff] }
   0xd   :  { %1135 = vmatpush.bf16.msra.mxu3 %v1888_v7  ;;  %v29_v20 = vld [vmem:[%s2466_s0] sm:$0xff]  ;;  %v1884_v24 = vld [vmem:[%s2467_s1 + $0xd0] sm:$0xff]  ;;  %v1859_v25 = vld [vmem:[%s2467_s1 + $0x8] sm:$0xff] }
   0xe   :  { %1097 = vmatpush.bf16.msra.mxu0 %v1863_v8  ;;  %292 = vst [vmem:[#allocation1] ss:$9 sm:$0xff] %v29_v20  ;;  %v1867_v26 = vld [vmem:[%s2467_s1 + $0x48] sm:$0xff]  ;;  %v1858_v29 = vld [vmem:[%s2467_s1] sm:$0xff]  ;;  %v1897_v33 = vld [vmem:[%s2467_s1 + $0x138] sm:$0xff] }
   0xf   :  { %1110 = vmatpush.bf16.msra.mxu1 %v1871_v9  ;;  %v1875_v27 = vld [vmem:[%s2467_s1 + $0x88] sm:$0xff]  ;;  %v1866_v30 = vld [vmem:[%s2467_s1 + $0x40] sm:$0xff]  ;;  %v1905_v34 = vld [vmem:[%s2467_s1 + $0x178] sm:$0xff] }
  0x10   :  { %1123 = vmatpush.bf16.msra.mxu2 %v1879_v10  ;;  %v1883_v28 = vld [vmem:[%s2467_s1 + $0xc8] sm:$0xff]  ;;  %v1874_v31 = vld [vmem:[%s2467_s1 + $0x80] sm:$0xff]  ;;  %v1913_v35 = vld [vmem:[%s2467_s1 + $0x1b8] sm:$0xff] }
  0x11   :  { %1136 = vmatpush.bf16.msra.mxu3 %v1887_v11  ;;  %v1882_v32 = vld [vmem:[%s2467_s1 + $0xc0] sm:$0xff]  ;;  %v1921_v36 = vld [vmem:[%s2467_s1 + $0x1f8] sm:$0xff]  ;;  %v1896_v37 = vld [vmem:[%s2467_s1 + $0x130] sm:$0xff] }
  0x12   :  { %1098 = vmatpush.bf16.msra.mxu0 %v1862_v12  ;;  %v1904_v40 = vld [vmem:[%s2467_s1 + $0x170] sm:$0xff]  ;;  %v1895_v45 = vld [vmem:[%s2467_s1 + $0x128] sm:$0xff]  ;;  %v1894_v49 = vld [vmem:[%s2467_s1 + $0x120] sm:$0xff] }
  0x13   :  { %1111 = vmatpush.bf16.msra.mxu1 %v1870_v13  ;;  %v1912_v43 = vld [vmem:[%s2467_s1 + $0x1b0] sm:$0xff]  ;;  %v1903_v46 = vld [vmem:[%s2467_s1 + $0x168] sm:$0xff]  ;;  %v1902_v50 = vld [vmem:[%s2467_s1 + $0x160] sm:$0xff] }
  0x14   :  { %1124 = vmatpush.bf16.msra.mxu2 %v1878_v14  ;;  %v1920_v44 = vld [vmem:[%s2467_s1 + $0x1f0] sm:$0xff]  ;;  %v1911_v47 = vld [vmem:[%s2467_s1 + $0x1a8] sm:$0xff]  ;;  %v1910_v56 = vld [vmem:[%s2467_s1 + $0x1a0] sm:$0xff] }
  0x15   :  { %1137 = vmatpush.bf16.msra.mxu3 %v1886_v15  ;;  %v295_v38 = vld [vmem:[#allocation1 + $0x12] sm:$0xff]  ;;  %v293_v39 = vld [vmem:[#allocation1] sm:$0xff]  ;;  %v294_v42 = vld [vmem:[#allocation1 + $0x9] sm:$0xff] }
  0x16   :  { %1099 = vmatpush.bf16.msra.mxu0 %v1861_v16  ;;  %v296_v41 = vld [vmem:[#allocation1 + $0x1b] sm:$0xff]  ;;  %v1919_v48 = vld [vmem:[%s2467_s1 + $0x1e8] sm:$0xff]  ;;  %v1892_v62 = vld [vmem:[%s2467_s1 + $0x110] sm:$0xff] }
  0x17   :  { %1112 = vmatpush.bf16.msra.mxu1 %v1869_v17  ;;  %v299_v51 = vld [vmem:[#allocation1 + $0x36] sm:$0xff]  ;;  %v30_v52 = vld [vmem:[%s2466_s0 + $0x8] sm:$0xff]  ;;  %v300_v54 = vld [vmem:[#allocation1 + $0x3f] sm:$0xff] }
  0x18   :  { %1125 = vmatpush.bf16.msra.mxu2 %v1877_v18  ;;  %v297_v53 = vld [vmem:[#allocation1 + $0x24] sm:$0xff]  ;;  %v298_v55 = vld [vmem:[#allocation1 + $0x2d] sm:$0xff]  ;;  %v1893_v58 = vld [vmem:[%s2467_s1 + $0x118] sm:$0xff] }
  0x19   :  { %1138 = vmatpush.bf16.msra.mxu3 %v1885_v19  ;;  %v1918_v57 = vld [vmem:[%s2467_s1 + $0x1e0] sm:$0xff]  ;;  %302 = vst [vmem:[#allocation1] ss:$9 sm:$0xff] %v30_v52  ;;  %v1901_v59 = vld [vmem:[%s2467_s1 + $0x158] sm:$0xff]  ;;  %v1900_v63 = vld [vmem:[%s2467_s1 + $0x150] sm:$0xff] }
  0x1a   :  { %1100 = vmatpush.bf16.msra.mxu0 %v1860_v21  ;;  %v1909_v60 = vld [vmem:[%s2467_s1 + $0x198] sm:$0xff]  ;;  %v1908_v0 = vld [vmem:[%s2467_s1 + $0x190] sm:$0xff]  ;;  %v1891_v2 = vld [vmem:[%s2467_s1 + $0x108] sm:$0xff] }
  0x1b   :  { %1113 = vmatpush.bf16.msra.mxu1 %v1868_v22  ;;  %v1917_v61 = vld [vmem:[%s2467_s1 + $0x1d8] sm:$0xff]  ;;  %v1916_v1 = vld [vmem:[%s2467_s1 + $0x1d0] sm:$0xff]  ;;  %v1899_v3 = vld [vmem:[%s2467_s1 + $0x148] sm:$0xff] }
  0x1c   :  { %1126 = vmatpush.bf16.msra.mxu2 %v1876_v23  ;;  %v1907_v4 = vld [vmem:[%s2467_s1 + $0x188] sm:$0xff]  ;;  %v1890_v6 = vld [vmem:[%s2467_s1 + $0x100] sm:$0xff]  ;;  %v1929_v10 = vld [vmem:[%s2467_s1 + $0x238] sm:$0xff] }
  0x1d   :  { %1139 = vmatpush.bf16.msra.mxu3 %v1884_v24  ;;  %v1915_v5 = vld [vmem:[%s2467_s1 + $0x1c8] sm:$0xff]  ;;  %v1898_v7 = vld [vmem:[%s2467_s1 + $0x140] sm:$0xff]  ;;  %v1937_v11 = vld [vmem:[%s2467_s1 + $0x278] sm:$0xff] }
  0x1e   :  { %1101 = vmatpush.bf16.msra.mxu0 %v1859_v25  ;;  %v1906_v8 = vld [vmem:[%s2467_s1 + $0x180] sm:$0xff]  ;;  %v1945_v12 = vld [vmem:[%s2467_s1 + $0x2b8] sm:$0xff]  ;;  %v1928_v14 = vld [vmem:[%s2467_s1 + $0x230] sm:$0xff] }
  0x1f   :  { %1114 = vmatpush.bf16.msra.mxu1 %v1867_v26  ;;  %v1914_v9 = vld [vmem:[%s2467_s1 + $0x1c0] sm:$0xff]  ;;  %v1953_v13 = vld [vmem:[%s2467_s1 + $0x2f8] sm:$0xff]  ;;  %v1936_v15 = vld [vmem:[%s2467_s1 + $0x270] sm:$0xff] }
  0x20   :  { %1127 = vmatpush.bf16.msra.mxu2 %v1875_v27  ;;  %v1944_v16 = vld [vmem:[%s2467_s1 + $0x2b0] sm:$0xff]  ;;  %v1927_v18 = vld [vmem:[%s2467_s1 + $0x228] sm:$0xff]  ;;  %v1926_v22 = vld [vmem:[%s2467_s1 + $0x220] sm:$0xff] }
  0x21   :  { %1140 = vmatpush.bf16.msra.mxu3 %v1883_v28  ;;  %v1952_v17 = vld [vmem:[%s2467_s1 + $0x2f0] sm:$0xff]  ;;  %v1935_v19 = vld [vmem:[%s2467_s1 + $0x268] sm:$0xff]  ;;  %v1934_v23 = vld [vmem:[%s2467_s1 + $0x260] sm:$0xff] }
  0x22   :  { %1102 = vmatpush.bf16.msra.mxu0 %v1858_v29  ;;  %v1943_v20 = vld [vmem:[%s2467_s1 + $0x2a8] sm:$0xff]  ;;  %v1942_v24 = vld [vmem:[%s2467_s1 + $0x2a0] sm:$0xff]  ;;  %v1925_v26 = vld [vmem:[%s2467_s1 + $0x218] sm:$0xff] }
  0x23   :  { %1115 = vmatpush.bf16.msra.mxu1 %v1866_v30  ;;  %v1951_v21 = vld [vmem:[%s2467_s1 + $0x2e8] sm:$0xff]  ;;  %v1950_v25 = vld [vmem:[%s2467_s1 + $0x2e0] sm:$0xff]  ;;  %v1933_v27 = vld [vmem:[%s2467_s1 + $0x258] sm:$0xff] }
  0x24   :  { %1128 = vmatpush.bf16.msra.mxu2 %v1874_v31  ;;  %v1941_v28 = vld [vmem:[%s2467_s1 + $0x298] sm:$0xff]  ;;  %v1924_v30 = vld [vmem:[%s2467_s1 + $0x210] sm:$0xff] }
  0x25   :  { %1141 = vmatpush.bf16.msra.mxu3 %v1882_v32  ;;  %1103 = vmatmul.bf16.vlgmr.msra.gmra.mxu0 %v293_v39  ;;  %v1949_v29 = vld [vmem:[%s2467_s1 + $0x2d8] sm:$0xff]  ;;  %v1932_v31 = vld [vmem:[%s2467_s1 + $0x250] sm:$0xff]  ;;  %v1930_v39 = vld [vmem:[%s2467_s1 + $0x240] sm:$0xff] }
  0x26   :  { %1147 = vmatpush.bf16.msrb.mxu0 %v1897_v33  ;;  %1116 = vmatmul.bf16.vlgmr.msra.gmra.mxu1 %v294_v42  ;;  %v1940_v32 = vld [vmem:[%s2467_s1 + $0x290] sm:$0xff]  ;;  %v1961_v42 = vld [vmem:[%s2467_s1 + $0x338] sm:$0xff] }
  0x27   :  { %1160 = vmatpush.bf16.msrb.mxu1 %v1905_v34  ;;  %1129 = vmatmul.bf16.vlgmr.msra.gmra.mxu2 %v295_v38  ;;  %v1948_v33 = vld [vmem:[%s2467_s1 + $0x2d0] sm:$0xff]  ;;  %v1923_v34 = vld [vmem:[%s2467_s1 + $0x208] sm:$0xff]  ;;  %v1922_v38 = vld [vmem:[%s2467_s1 + $0x200] sm:$0xff] }
  0x28   :  { %1173 = vmatpush.bf16.msrb.mxu2 %v1913_v35  ;;  %1142 = vmatmul.bf16.vlgmr.msra.gmra.mxu3 %v296_v41  ;;  %v1931_v35 = vld [vmem:[%s2467_s1 + $0x248] sm:$0xff]  ;;  %v1946_v41 = vld [vmem:[%s2467_s1 + $0x2c0] sm:$0xff]  ;;  %v1976_v52 = vld [vmem:[%s2467_s1 + $0x3b0] sm:$0xff] }
  0x29   :  { %1186 = vmatpush.bf16.msrb.mxu3 %v1921_v36  ;;  %v1939_v36 = vld [vmem:[%s2467_s1 + $0x288] sm:$0xff] }
  0x2a   :  { %1148 = vmatpush.bf16.msrb.mxu0 %v1896_v37  ;;  %v1947_v37 = vld [vmem:[%s2467_s1 + $0x2c8] sm:$0xff] }
  0x2b   :  { %1161 = vmatpush.bf16.msrb.mxu1 %v1904_v40  ;;  %v1938_v40 = vld [vmem:[%s2467_s1 + $0x280] sm:$0xff] }
  0x2c   :  { %1174 = vmatpush.bf16.msrb.mxu2 %v1912_v43  ;;  %v1969_v43 = vld [vmem:[%s2467_s1 + $0x378] sm:$0xff] }
  0x2d   :  { %1187 = vmatpush.bf16.msrb.mxu3 %v1920_v44  ;;  %v1977_v44 = vld [vmem:[%s2467_s1 + $0x3b8] sm:$0xff] }
  0x2e   :  { %1149 = vmatpush.bf16.msrb.mxu0 %v1895_v45  ;;  %v1985_v45 = vld [vmem:[%s2467_s1 + $0x3f8] sm:$0xff] }
  0x2f   :  { %1162 = vmatpush.bf16.msrb.mxu1 %v1903_v46  ;;  %v303_v46 = vld [vmem:[#allocation1] sm:$0xff] }
  0x30   :  { %1175 = vmatpush.bf16.msrb.mxu2 %v1911_v47  ;;  %v305_v47 = vld [vmem:[#allocation1 + $0x12] sm:$0xff] }
  0x31   :  { %1188 = vmatpush.bf16.msrb.mxu3 %v1919_v48  ;;  %v304_v48 = vld [vmem:[#allocation1 + $0x9] sm:$0xff] }
  0x32   :  { %1150 = vmatpush.bf16.msrb.mxu0 %v1894_v49  ;;  %v306_v49 = vld [vmem:[#allocation1 + $0x1b] sm:$0xff] }
  0x33   :  { %1163 = vmatpush.bf16.msrb.mxu1 %v1902_v50  ;;  %v1960_v50 = vld [vmem:[%s2467_s1 + $0x330] sm:$0xff] }
  0x34   :  { %1176 = vmatpush.bf16.msrb.mxu2 %v1910_v56  ;;  %v1975_v56 = vld [vmem:[%s2467_s1 + $0x3a8] sm:$0xff] }
  0x35   :  { %1189 = vmatpush.bf16.msrb.mxu3 %v1918_v57  ;;  %v1983_v57 = vld [vmem:[%s2467_s1 + $0x3e8] sm:$0xff] }
  0x36   :  { %1151 = vmatpush.bf16.msrb.mxu0 %v1893_v58  ;;  %v1958_v58 = vld [vmem:[%s2467_s1 + $0x320] sm:$0xff] }
  0x37   :  { %1164 = vmatpush.bf16.msrb.mxu1 %v1901_v59  ;;  %v1966_v59 = vld [vmem:[%s2467_s1 + $0x360] sm:$0xff] }
  0x38   :  { %1177 = vmatpush.bf16.msrb.mxu2 %v1909_v60  ;;  %v1974_v60 = vld [vmem:[%s2467_s1 + $0x3a0] sm:$0xff] }
  0x39   :  { %1190 = vmatpush.bf16.msrb.mxu3 %v1917_v61  ;;  %v1982_v61 = vld [vmem:[%s2467_s1 + $0x3e0] sm:$0xff] }
  0x3a   :  { %1152 = vmatpush.bf16.msrb.mxu0 %v1892_v62  ;;  %v1957_v62 = vld [vmem:[%s2467_s1 + $0x318] sm:$0xff] }
  0x3b   :  { %1165 = vmatpush.bf16.msrb.mxu1 %v1900_v63  ;;  %v1965_v63 = vld [vmem:[%s2467_s1 + $0x358] sm:$0xff] }
  0x3c   :  { %1178 = vmatpush.bf16.msrb.mxu2 %v1908_v0  ;;  %v1973_v0 = vld [vmem:[%s2467_s1 + $0x398] sm:$0xff] }
  0x3d   :  { %1191 = vmatpush.bf16.msrb.mxu3 %v1916_v1  ;;  %v1981_v1 = vld [vmem:[%s2467_s1 + $0x3d8] sm:$0xff] }
  0x3e   :  { %1153 = vmatpush.bf16.msrb.mxu0 %v1891_v2  ;;  %v1956_v2 = vld [vmem:[%s2467_s1 + $0x310] sm:$0xff] }
  0x3f   :  { %1166 = vmatpush.bf16.msrb.mxu1 %v1899_v3  ;;  %v1964_v3 = vld [vmem:[%s2467_s1 + $0x350] sm:$0xff] }
  0x40   :  { %1179 = vmatpush.bf16.msrb.mxu2 %v1907_v4  ;;  %v1972_v4 = vld [vmem:[%s2467_s1 + $0x390] sm:$0xff] }
  0x41   :  { %1192 = vmatpush.bf16.msrb.mxu3 %v1915_v5  ;;  %v1980_v5 = vld [vmem:[%s2467_s1 + $0x3d0] sm:$0xff] }
  0x42   :  { %1154 = vmatpush.bf16.msrb.mxu0 %v1890_v6  ;;  %v1955_v6 = vld [vmem:[%s2467_s1 + $0x308] sm:$0xff] }
  0x43   :  { %1167 = vmatpush.bf16.msrb.mxu1 %v1898_v7  ;;  %v1963_v7 = vld [vmem:[%s2467_s1 + $0x348] sm:$0xff] }
  0x44   :  { %1180 = vmatpush.bf16.msrb.mxu2 %v1906_v8  ;;  %v1971_v8 = vld [vmem:[%s2467_s1 + $0x388] sm:$0xff] }
  0x45   :  { %1193 = vmatpush.bf16.msrb.mxu3 %v1914_v9  ;;  %1155 = vmatmul.bf16.vlgmr.msrb.gmra.mxu0 %v297_v53  ;;  %v1984_v53 = vld [vmem:[%s2467_s1 + $0x3f0] sm:$0xff]  ;;  %v1979_v9 = vld [vmem:[%s2467_s1 + $0x3c8] sm:$0xff] }
  0x46   :  { %1199 = vmatpush.bf16.msra.mxu0 %v1929_v10  ;;  %1168 = vmatmul.bf16.vlgmr.msrb.gmra.mxu1 %v298_v55  ;;  %v1967_v55 = vld [vmem:[%s2467_s1 + $0x368] sm:$0xff]  ;;  %v1954_v10 = vld [vmem:[%s2467_s1 + $0x300] sm:$0xff] }
  0x47   :  { %1212 = vmatpush.bf16.msra.mxu1 %v1937_v11  ;;  %1181 = vmatmul.bf16.vlgmr.msrb.gmra.mxu2 %v299_v51  ;;  %v1968_v51 = vld [vmem:[%s2467_s1 + $0x370] sm:$0xff]  ;;  %v1962_v11 = vld [vmem:[%s2467_s1 + $0x340] sm:$0xff] }
  0x48   :  { %1225 = vmatpush.bf16.msra.mxu2 %v1945_v12  ;;  %1194 = vmatmul.bf16.vlgmr.msrb.gmra.mxu3 %v300_v54  ;;  %v1959_v54 = vld [vmem:[%s2467_s1 + $0x328] sm:$0xff]  ;;  %v1970_v12 = vld [vmem:[%s2467_s1 + $0x380] sm:$0xff] }
  0x49   :  { %1238 = vmatpush.bf16.msra.mxu3 %v1953_v13  ;;  %v1978_v13 = vld [vmem:[%s2467_s1 + $0x3c0] sm:$0xff]  ;;  %s2046_s1 = smov [#allocation5]  }
  0x4a   :  { %1200 = vmatpush.bf16.msra.mxu0 %v1928_v14  ;;  %v307_v14 = vld [vmem:[#allocation1 + $0x24] sm:$0xff]  ;;  %s1334_s19 = sshll.u32 %s2046_s1, 4  ;;  %s1335_s19 = int_to_ptr.vmem [resolvable:$true] %s1334_s19 }
  0x4b   :  { %1213 = vmatpush.bf16.msra.mxu1 %v1936_v15  ;;  %v308_v15 = vld [vmem:[#allocation1 + $0x2d] sm:$0xff] }
  0x4c   :  { %1226 = vmatpush.bf16.msra.mxu2 %v1944_v16  ;;  %v309_v16 = vld [vmem:[#allocation1 + $0x36] sm:$0xff] }
  0x4d   :  { %1239 = vmatpush.bf16.msra.mxu3 %v1952_v17  ;;  %v310_v17 = vld [vmem:[#allocation1 + $0x3f] sm:$0xff] }
  0x4e   :  { %1201 = vmatpush.bf16.msra.mxu0 %v1927_v18  ;;  %v1988_v18 = vld [vmem:[#allocation2] ss:$0 sm:$0xff] }
  0x4f   :  { %1214 = vmatpush.bf16.msra.mxu1 %v1935_v19 }
  0x50   :  { %1227 = vmatpush.bf16.msra.mxu2 %v1943_v20 }
  0x51   :  { %1240 = vmatpush.bf16.msra.mxu3 %v1951_v21 }
  0x52   :  { %1202 = vmatpush.bf16.msra.mxu0 %v1926_v22 }
  0x53   :  { %1215 = vmatpush.bf16.msra.mxu1 %v1934_v23 }
  0x54   :  { %1228 = vmatpush.bf16.msra.mxu2 %v1942_v24 }
  0x55   :  { %1241 = vmatpush.bf16.msra.mxu3 %v1950_v25 }
  0x56   :  { %1203 = vmatpush.bf16.msra.mxu0 %v1925_v26 }
  0x57   :  { %1216 = vmatpush.bf16.msra.mxu1 %v1933_v27 }
  0x58   :  { %1229 = vmatpush.bf16.msra.mxu2 %v1941_v28 }
  0x59   :  { %1242 = vmatpush.bf16.msra.mxu3 %v1949_v29 }
  0x5a   :  { %1204 = vmatpush.bf16.msra.mxu0 %v1924_v30 }
  0x5b   :  { %1217 = vmatpush.bf16.msra.mxu1 %v1932_v31 }
  0x5c   :  { %1230 = vmatpush.bf16.msra.mxu2 %v1940_v32 }
  0x5d   :  { %1243 = vmatpush.bf16.msra.mxu3 %v1948_v33 }
  0x5e   :  { %1205 = vmatpush.bf16.msra.mxu0 %v1923_v34 }
  0x5f   :  { %1218 = vmatpush.bf16.msra.mxu1 %v1931_v35 }
  0x60   :  { %1231 = vmatpush.bf16.msra.mxu2 %v1939_v36 }
  0x61   :  { %1244 = vmatpush.bf16.msra.mxu3 %v1947_v37 }
  0x62   :  { %1206 = vmatpush.bf16.msra.mxu0 %v1922_v38 }
  0x63   :  { %1219 = vmatpush.bf16.msra.mxu1 %v1930_v39 }
  0x64   :  { %1232 = vmatpush.bf16.msra.mxu2 %v1938_v40 }
  0x65   :  { %1245 = vmatpush.bf16.msra.mxu3 %v1946_v41  ;;  %1207 = vmatmul.bf16.vlgmr.msra.gmra.mxu0 %v303_v46 }
  0x66   :  { %1251 = vmatpush.bf16.msrb.mxu0 %v1961_v42  ;;  %1220 = vmatmul.bf16.vlgmr.msra.gmra.mxu1 %v304_v48 }
  0x67   :  { %1264 = vmatpush.bf16.msrb.mxu1 %v1969_v43  ;;  %1233 = vmatmul.bf16.vlgmr.msra.gmra.mxu2 %v305_v47 }
  0x68   :  { %1277 = vmatpush.bf16.msrb.mxu2 %v1977_v44  ;;  %1246 = vmatmul.bf16.vlgmr.msra.gmra.mxu3 %v306_v49 }
  0x69   :  { %1290 = vmatpush.bf16.msrb.mxu3 %v1985_v45 }
  0x6a   :  { %1252 = vmatpush.bf16.msrb.mxu0 %v1960_v50 }
  0x6b   :  { %1265 = vmatpush.bf16.msrb.mxu1 %v1968_v51 }
  0x6c   :  { %1278 = vmatpush.bf16.msrb.mxu2 %v1976_v52 }
  0x6d   :  { %1291 = vmatpush.bf16.msrb.mxu3 %v1984_v53 }
  0x6e   :  { %1253 = vmatpush.bf16.msrb.mxu0 %v1959_v54 }
  0x6f   :  { %1266 = vmatpush.bf16.msrb.mxu1 %v1967_v55 }
  0x70   :  { %1279 = vmatpush.bf16.msrb.mxu2 %v1975_v56 }
  0x71   :  { %1292 = vmatpush.bf16.msrb.mxu3 %v1983_v57 }
  0x72   :  { %1254 = vmatpush.bf16.msrb.mxu0 %v1958_v58 }
  0x73   :  { %1267 = vmatpush.bf16.msrb.mxu1 %v1966_v59 }
  0x74   :  { %1280 = vmatpush.bf16.msrb.mxu2 %v1974_v60 }
  0x75   :  { %1293 = vmatpush.bf16.msrb.mxu3 %v1982_v61 }
  0x76   :  { %1255 = vmatpush.bf16.msrb.mxu0 %v1957_v62 }
  0x77   :  { %1268 = vmatpush.bf16.msrb.mxu1 %v1965_v63 }
  0x78   :  { %1281 = vmatpush.bf16.msrb.mxu2 %v1973_v0 }
  0x79   :  { %1294 = vmatpush.bf16.msrb.mxu3 %v1981_v1 }
  0x7a   :  { %1256 = vmatpush.bf16.msrb.mxu0 %v1956_v2 }
  0x7b   :  { %1269 = vmatpush.bf16.msrb.mxu1 %v1964_v3 }
  0x7c   :  { %1282 = vmatpush.bf16.msrb.mxu2 %v1972_v4 }
  0x7d   :  { %1295 = vmatpush.bf16.msrb.mxu3 %v1980_v5 }
  0x7e   :  { %1257 = vmatpush.bf16.msrb.mxu0 %v1955_v6 }
  0x7f   :  { %1270 = vmatpush.bf16.msrb.mxu1 %v1963_v7 }
  0x80   :  { %1283 = vmatpush.bf16.msrb.mxu2 %v1971_v8 }
  0x81   :  { %1296 = vmatpush.bf16.msrb.mxu3 %v1979_v9 }
  0x82   :  { %1258 = vmatpush.bf16.msrb.mxu0 %v1954_v10 }
  0x83   :  { %1271 = vmatpush.bf16.msrb.mxu1 %v1962_v11 }
  0x84   :  { %1284 = vmatpush.bf16.msrb.mxu2 %v1970_v12 }
  0x85   :  { %1297 = vmatpush.bf16.msrb.mxu3 %v1978_v13  ;;  %1259 = vmatmul.bf16.vlgmr.msrb.gmra.mxu0 %v307_v14 }
  0x86   :  { %1272 = vmatmul.bf16.vlgmr.msrb.gmra.mxu1 %v308_v15 }
  0x87   :  { %1285 = vmatmul.bf16.vlgmr.msrb.gmra.mxu2 %v309_v16 }
  0x88   :  { %1298 = vmatmul.bf16.vlgmr.msrb.gmra.mxu3 %v310_v17 }
  0xa2   :  { %v1104_v19 = vpop.f32.mrf.mxu0 }
  0xa3   :  { %v1105_v20 = vadd.f32 %v1988_v18, %v1104_v19  ;;  %v1117_v21 = vpop.f32.mrf.mxu1 }
  0xa5   :  { %v1118_v22 = vadd.f32 %v1117_v21, %v1105_v20 }
  0xaa   :  { %v1130_v23 = vpop.f32.mrf.mxu2  ;;  %v1106_v26 = vpop.f32.mrf.mxu0 }
  0xab   :  { %v1131_v24 = vadd.f32 %v1130_v23, %v1118_v22  ;;  %v1143_v25 = vpop.f32.mrf.mxu3  ;;  %v1119_v28 = vpop.f32.mrf.mxu1 }
  0xad   :  { %v1144_v27 = vadd.f32 %v1143_v25, %v1131_v24 }
  0xb2   :  { %v1132_v29 = vpop.f32.mrf.mxu2 }
  0xb3   :  { %v1145_v30 = vpop.f32.mrf.mxu3 }
  0xc2   :  { %v1156_v31 = vpop.f32.mrf.mxu0 }
  0xc3   :  { %v1169_v32 = vpop.f32.mrf.mxu1  ;;  %v1157_v41 = vadd.f32 %v1156_v31, %v1144_v27 }
  0xc5   :  { %v1170_v45 = vadd.f32 %v1169_v32, %v1157_v41 }
  0xca   :  { %v1182_v33 = vpop.f32.mrf.mxu2  ;;  %v1158_v35 = vpop.f32.mrf.mxu0 }
  0xcb   :  { %v1195_v34 = vpop.f32.mrf.mxu3  ;;  %v1171_v36 = vpop.f32.mrf.mxu1  ;;  %v1183_v47 = vadd.f32 %v1182_v33, %v1170_v45 }
  0xcd   :  { %v1196_v50 = vadd.f32 %v1195_v34, %v1183_v47 }
  0xd2   :  { %v1184_v37 = vpop.f32.mrf.mxu2 }
  0xd3   :  { %v1197_v38 = vpop.f32.mrf.mxu3 }
  0xe2   :  { %v1208_v39 = vpop.f32.mrf.mxu0 }
  0xe3   :  { %v1221_v40 = vpop.f32.mrf.mxu1  ;;  %v1209_v51 = vadd.f32 %v1208_v39, %v1196_v50 }
  0xe5   :  { %v1222_v52 = vadd.f32 %v1221_v40, %v1209_v51 }
  0xea   :  { %v1234_v42 = vpop.f32.mrf.mxu2  ;;  %v1210_v44 = vpop.f32.mrf.mxu0 }
  0xeb   :  { %v1247_v43 = vpop.f32.mrf.mxu3  ;;  %v1223_v46 = vpop.f32.mrf.mxu1  ;;  %v1235_v53 = vadd.f32 %v1234_v42, %v1222_v52 }
  0xed   :  { %v1248_v54 = vadd.f32 %v1247_v43, %v1235_v53 }
  0xf2   :  { %v1236_v48 = vpop.f32.mrf.mxu2 }
  0xf3   :  { %v1249_v49 = vpop.f32.mrf.mxu3 }
 0x102   :  { %v1260_v55 = vpop.f32.mrf.mxu0 }
 0x103   :  { %v1273_v56 = vpop.f32.mrf.mxu1  ;;  %v1261_v57 = vadd.f32 %v1260_v55, %v1248_v54 }
 0x105   :  { %v1274_v58 = vadd.f32 %v1273_v56, %v1261_v57 }
 0x10a   :  { %v1286_v59 = vpop.f32.mrf.mxu2  ;;  %v1262_v62 = vpop.f32.mrf.mxu0 }
 0x10b   :  { %v1299_v60 = vpop.f32.mrf.mxu3  ;;  %v1287_v61 = vadd.f32 %v1286_v59, %v1274_v58  ;;  %v1275_v63 = vpop.f32.mrf.mxu1 }
 0x10d   :  { %v1300_v0 = vadd.f32 %v1299_v60, %v1287_v61 }
 0x10f   :  { %v1304_v1 = vsel %vm1303_vm0, %v1300_v0, -inf }
 0x110   :  { %1305 = vmax.xlane.f32.xlu0 %v1304_v1 }
 0x112   :  { %v1288_v2 = vpop.f32.mrf.mxu2 }
 0x113   :  { %v1301_v3 = vpop.f32.mrf.mxu3 }
 0x183   :  { %v1306_v4 = vpop.xlane.xlu0 %1305 }
 0x184   :  { %v1307_v5 = vsub.f32 %v1300_v0, %v1306_v4 }
 0x186   :  { %v1308_v6 = vmul.f32 1.442695, %v1307_v5 }
 0x188   :  { %1989 = vpow2.f32 %v1308_v6 }
 0x18e   :  { %v1990_v7 = vpop.eup %1989 }
 0x18f   :  { %v1310_v8 = vsel %vm1303_vm0, %v1990_v7, 0.0 }
 0x190   :  { %1311 = vadd.xlane.f32.xlu0 %v1310_v8 }
 0x203   :  { %v1312_v9 = vpop.xlane.xlu0 %1311 }
 0x204   :  { %1991 = vrcp.f32 %v1312_v9  ;;  %v1324_v13 = vand.u32 2147483648, %v1312_v9  ;;  %v1322_v15 = vand.u32 2147483647, %v1312_v9  ;;  %vm1318_vm2 = vweird.f32 %v1312_v9 }
 0x206   :  { %v1325_v17 = vor.u32 1.1754944e-38, %v1324_v13  ;;  %vm1323_vm4 = vcmp.eq.f32.partialorder %v1322_v15, 8.507059e+37 }
 0x20a   :  { %v1992_v10 = vpop.eup %1991 }
 0x20b   :  { %v1314_v11 = vmul.f32 %v1992_v10, %v1312_v9  ;;  %vm1319_vm1 = vweird.f32 %v1992_v10 }
 0x20c   :  { %vm1320_vm3 = vmor %vm1318_vm2, %vm1319_vm1 }
 0x20d   :  { %v1315_v12 = vsub.f32 1.0, %v1314_v11 }
 0x20f   :  { %v1316_v14 = vmul.f32 %v1992_v10, %v1315_v12 }
 0x211   :  { %v1317_v16 = vadd.f32 %v1992_v10, %v1316_v14 }
 0x213   :  { %v1321_v18 = vsel %vm1320_vm3, %v1992_v10, %v1317_v16 }
 0x214   :  { %v1326_v19 = vsel %vm1323_vm4, %v1325_v17, %v1321_v18 }
 0x215   :  { %v1327_v20 = vmul.f32 %v1990_v7, %v1326_v19 }
 0x217   :  { %1328 = vst.msk [vmem:[#allocation5] sm:$0x3] %vm1303_vm0, %v1327_v20 }
 0x218   :  { %1339 = dma.vmem_to_hbm [thread:$0]  %s1335_s19, 32, %s1337_s22, [#allocation4]  }
 0x219   :  { %2043 = dma.done.wait [#allocation4], 32  }
 0x21a   :  { %2044 = vsyncadd [#allocation4], 4294967264 }
 0x21b   :  { %1344 = vsyncpa [#allocation3], 1 }
 0x21c   :  { %1345 = vsyncpa [#allocation4], 1 }

// kernel: s_evaluator_forward.5
= control target key start
LH: loop header
LB: loop body
LE: loop exit
PB: predicated region body
PF: predicated region fallthrough
CT: control target
= control target key end

     0   :  { %9 = vsyncpa [#allocation3], 0  ;;  %s4187_s0 = inlined_call_operand.vmem [shape: bf16[32,3200], index: 0, kind: input, shape index: {}]   ;;  %s4188_s1 = inlined_call_operand.hbm [shape: bf16[3200,128], index: 1, kind: input, shape index: {}]   ;;  %s4189_s2 = inlined_call_operand.hbm [shape: f32[1,128], index: 2, kind: input, shape index: {}]   ;;  %s4190_s3 = inlined_call_operand.hbm [shape: f32[1,128], index: 3, kind: input, shape index: {}]   ;;  %s4191_s4 = inlined_call_operand.vmem [shape: bf16[32,128], index: 4, kind: output, shape index: {}]  }
   0x1   :  { %10 = vsyncpa [#allocation5], 0  ;;  %s31_s17 = sshll.u32 %s4189_s2, 4  ;;  %s3833_s18 = smov [#allocation4]   ;;  %s32_s17 = int_to_ptr.hbm [resolvable:$true] %s31_s17 }
   0x2   :  { %s33_s19 = sshll.u32 %s3833_s18, 4  ;;  %s17_s22 = sshll.u32 %s4188_s1, 4  ;;  %s34_s19 = int_to_ptr.vmem [resolvable:$true] %s33_s19  ;;  %s18_s22 = int_to_ptr.hbm [resolvable:$true] %s17_s22 }
   0x3   :  { %36 = dma.hbm_to_vmem [thread:$0]  %s32_s17, 16, %s34_s19, [#allocation5]  }
   0x4   :  { %s3834_s23 = smov [#allocation2]   ;;  %s3835_s25 = smov 64  }
   0x5   :  { %s19_s24 = sshll.u32 %s3834_s23, 4  ;;  %s3836_s26 = smov 4   ;;  %s20_s24 = int_to_ptr.vmem [resolvable:$true] %s19_s24 }
   0x6   :  { %25 = dma.hbm_to_vmem [thread:$0]  %s18_s22, 25600, %s20_s24, [#allocation3], %s3835_s25, %s3835_s25, %s3836_s26  }
   0x7   :  { %s42_s2 = sshll.u32 %s4190_s3, 4  ;;  %s3837_s29 = smov [#allocation6]   ;;  %s43_s2 = int_to_ptr.hbm [resolvable:$true] %s42_s2 }
   0x8   :  { %s44_s30 = sshll.u32 %s3837_s29, 4  ;;  %s45_s30 = int_to_ptr.vmem [resolvable:$true] %s44_s30 }
   0x9   :  { %47 = dma.hbm_to_vmem [thread:$0]  %s43_s2, 16, %s45_s30, [#allocation5]  }
   0xa   :  { %3829 = dma.done.wait [#allocation3], 25600  }
   0xb   :  { %3830 = vsyncadd [#allocation3], 4294941696 }
   0xc   :  { %3831 = dma.done.wait [#allocation5], 32  }
   0xd   :  { %3832 = vsyncadd [#allocation5], 4294967264  ;;  %v3538_v0 = vld [vmem:[#allocation2 + $0x38] sm:$0xff]  ;;  %v3537_v4 = vld [vmem:[#allocation2 + $0x30] sm:$0xff] }
   0xe   :  { %v3546_v1 = vld [vmem:[#allocation2 + $0x78] sm:$0xff]  ;;  %1964 = vmatpush.bf16.msra.mxu0 %v3538_v0  ;;  %v3545_v5 = vld [vmem:[#allocation2 + $0x70] sm:$0xff]  ;;  %v3536_v8 = vld [vmem:[#allocation2 + $0x28] sm:$0xff] }
   0xf   :  { %v3554_v2 = vld [vmem:[#allocation2 + $0xb8] sm:$0xff]  ;;  %1983 = vmatpush.bf16.msra.mxu1 %v3546_v1  ;;  %v3553_v6 = vld [vmem:[#allocation2 + $0xb0] sm:$0xff]  ;;  %v3544_v9 = vld [vmem:[#allocation2 + $0x68] sm:$0xff] }
  0x10   :  { %v3562_v3 = vld [vmem:[#allocation2 + $0xf8] sm:$0xff]  ;;  %2002 = vmatpush.bf16.msra.mxu2 %v3554_v2  ;;  %v3561_v7 = vld [vmem:[#allocation2 + $0xf0] sm:$0xff]  ;;  %v3552_v10 = vld [vmem:[#allocation2 + $0xa8] sm:$0xff] }
  0x11   :  { %2021 = vmatpush.bf16.msra.mxu3 %v3562_v3  ;;  %v3560_v11 = vld [vmem:[#allocation2 + $0xe8] sm:$0xff]  ;;  %v3535_v12 = vld [vmem:[#allocation2 + $0x20] sm:$0xff]  ;;  %v3534_v16 = vld [vmem:[#allocation2 + $0x18] sm:$0xff] }
  0x12   :  { %1965 = vmatpush.bf16.msra.mxu0 %v3537_v4  ;;  %v3543_v13 = vld [vmem:[#allocation2 + $0x60] sm:$0xff]  ;;  %v3542_v17 = vld [vmem:[#allocation2 + $0x58] sm:$0xff]  ;;  %v3533_v20 = vld [vmem:[#allocation2 + $0x10] sm:$0xff] }
  0x13   :  { %1984 = vmatpush.bf16.msra.mxu1 %v3545_v5  ;;  %v3551_v14 = vld [vmem:[#allocation2 + $0xa0] sm:$0xff]  ;;  %v3550_v18 = vld [vmem:[#allocation2 + $0x98] sm:$0xff]  ;;  %v3541_v21 = vld [vmem:[#allocation2 + $0x50] sm:$0xff] }
  0x14   :  { %2003 = vmatpush.bf16.msra.mxu2 %v3553_v6  ;;  %v3559_v15 = vld [vmem:[#allocation2 + $0xe0] sm:$0xff]  ;;  %v3558_v19 = vld [vmem:[#allocation2 + $0xd8] sm:$0xff]  ;;  %v3549_v22 = vld [vmem:[#allocation2 + $0x90] sm:$0xff] }
  0x15   :  { %2022 = vmatpush.bf16.msra.mxu3 %v3561_v7  ;;  %v3557_v23 = vld [vmem:[#allocation2 + $0xd0] sm:$0xff]  ;;  %v3532_v24 = vld [vmem:[#allocation2 + $0x8] sm:$0xff]  ;;  %v3531_v28 = vld [vmem:[#allocation2] sm:$0xff] }
  0x16   :  { %1966 = vmatpush.bf16.msra.mxu0 %v3536_v8  ;;  %v3540_v25 = vld [vmem:[#allocation2 + $0x48] sm:$0xff]  ;;  %v3539_v29 = vld [vmem:[#allocation2 + $0x40] sm:$0xff]  ;;  %v2493_v39 = vld [vmem:[%s4187_s0 + $0x6c] sm:$0xf0] }
  0x17   :  { %1985 = vmatpush.bf16.msra.mxu1 %v3544_v9  ;;  %v3548_v26 = vld [vmem:[#allocation2 + $0x88] sm:$0xff]  ;;  %v2483_v30 = vld [vmem:[%s4187_s0] sm:$0xf]  ;;  %v3493_v33 = vld [vmem:[%s4187_s0 + $0x60] sm:$0xf0] }
  0x18   :  { %2004 = vmatpush.bf16.msra.mxu2 %v3552_v10  ;;  %v3556_v27 = vld [vmem:[#allocation2 + $0xc8] sm:$0xff]  ;;  %v3547_v31 = vld [vmem:[#allocation2 + $0x80] sm:$0xff]  ;;  %v3570_v40 = vld [vmem:[#allocation2 + $0x138] sm:$0xff]  ;;  %v2484_v42 = vor.u32 %v3493_v33, %v2483_v30 }
  0x19   :  { %2023 = vmatpush.bf16.msra.mxu3 %v3560_v11  ;;  %v3555_v32 = vld [vmem:[#allocation2 + $0xc0] sm:$0xff]  ;;  %v2485_v35 = vld [vmem:[%s4187_s0 + $0x64] sm:$0xf0]  ;;  %v3494_v37 = vld [vmem:[%s4187_s0 + $0x68] sm:$0xf0] }
  0x1a   :  { %1967 = vmatpush.bf16.msra.mxu0 %v3535_v12  ;;  %v3481_v34 = vld [vmem:[%s4187_s0 + $0x4] sm:$0xf]  ;;  %v2491_v36 = vld [vmem:[%s4187_s0 + $0x8] sm:$0xf]  ;;  %v3482_v38 = vld [vmem:[%s4187_s0 + $0xc] sm:$0xf] }
  0x1b   :  { %1986 = vmatpush.bf16.msra.mxu1 %v3543_v13  ;;  %v3578_v41 = vld [vmem:[#allocation2 + $0x178] sm:$0xff]  ;;  %v2488_v43 = vor.u32 %v3481_v34, %v2485_v35  ;;  %v2492_v44 = vor.u32 %v3494_v37, %v2491_v36  ;;  %v2496_v45 = vor.u32 %v3482_v38, %v2493_v39  ;;  %v3569_v48 = vld [vmem:[#allocation2 + $0x130] sm:$0xff]  ;;  %v3568_v52 = vld [vmem:[#allocation2 + $0x128] sm:$0xff] }
  0x1c   :  { %2005 = vmatpush.bf16.msra.mxu2 %v3551_v14  ;;  %v3586_v46 = vld [vmem:[#allocation2 + $0x1b8] sm:$0xff]  ;;  %v3577_v49 = vld [vmem:[#allocation2 + $0x170] sm:$0xff]  ;;  %v3576_v53 = vld [vmem:[#allocation2 + $0x168] sm:$0xff] }
  0x1d   :  { %2024 = vmatpush.bf16.msra.mxu3 %v3559_v15  ;;  %v3594_v47 = vld [vmem:[#allocation2 + $0x1f8] sm:$0xff]  ;;  %v3585_v50 = vld [vmem:[#allocation2 + $0x1b0] sm:$0xff]  ;;  %v3584_v54 = vld [vmem:[#allocation2 + $0x1a8] sm:$0xff] }
  0x1e   :  { %1968 = vmatpush.bf16.msra.mxu0 %v3534_v16  ;;  %v3593_v51 = vld [vmem:[#allocation2 + $0x1f0] sm:$0xff]  ;;  %v3592_v55 = vld [vmem:[#allocation2 + $0x1e8] sm:$0xff]  ;;  %v3567_v56 = vld [vmem:[#allocation2 + $0x120] sm:$0xff] }
  0x1f   :  { %1987 = vmatpush.bf16.msra.mxu1 %v3542_v17  ;;  %v3575_v57 = vld [vmem:[#allocation2 + $0x160] sm:$0xff]  ;;  %v2583_v60 = vld [vmem:[%s4187_s0 + $0xc8] sm:$0xf]  ;;  %v3518_v61 = vld [vmem:[%s4187_s0 + $0x128] sm:$0xf0] }
  0x20   :  { %2006 = vmatpush.bf16.msra.mxu2 %v3550_v18  ;;  %v3583_v58 = vld [vmem:[#allocation2 + $0x1a0] sm:$0xff]  ;;  %v3506_v62 = vld [vmem:[%s4187_s0 + $0xcc] sm:$0xf]  ;;  %v2585_v63 = vld [vmem:[%s4187_s0 + $0x12c] sm:$0xf0]  ;;  %v2584_v6 = vor.u32 %v3518_v61, %v2583_v60 }
  0x21   :  { %2025 = vmatpush.bf16.msra.mxu3 %v3558_v19  ;;  %v3591_v59 = vld [vmem:[#allocation2 + $0x1e0] sm:$0xff]  ;;  %v2591_v0 = vld [vmem:[%s4187_s0 + $0xd0] sm:$0xf]  ;;  %v3519_v1 = vld [vmem:[%s4187_s0 + $0x130] sm:$0xf0]  ;;  %v2588_v7 = vor.u32 %v3506_v62, %v2585_v63 }
  0x22   :  { %1969 = vmatpush.bf16.msra.mxu0 %v3533_v20  ;;  %v3507_v2 = vld [vmem:[%s4187_s0 + $0xd4] sm:$0xf]  ;;  %v2593_v3 = vld [vmem:[%s4187_s0 + $0x134] sm:$0xf0]  ;;  %v2592_v8 = vor.u32 %v3519_v1, %v2591_v0  ;;  %v3564_v16 = vld [vmem:[#allocation2 + $0x108] sm:$0xff] }
  0x23   :  { %1988 = vmatpush.bf16.msra.mxu1 %v3541_v21  ;;  %v3566_v4 = vld [vmem:[#allocation2 + $0x118] sm:$0xff]  ;;  %v2596_v9 = vor.u32 %v3507_v2, %v2593_v3  ;;  %v3565_v12 = vld [vmem:[#allocation2 + $0x110] sm:$0xff]  ;;  %v3572_v17 = vld [vmem:[#allocation2 + $0x148] sm:$0xff] }
  0x24   :  { %2007 = vmatpush.bf16.msra.mxu2 %v3549_v22  ;;  %v3574_v5 = vld [vmem:[#allocation2 + $0x158] sm:$0xff]  ;;  %v3573_v13 = vld [vmem:[#allocation2 + $0x150] sm:$0xff]  ;;  %v3580_v18 = vld [vmem:[#allocation2 + $0x188] sm:$0xff] }
  0x25   :  { %2026 = vmatpush.bf16.msra.mxu3 %v3557_v23  ;;  %v3582_v10 = vld [vmem:[#allocation2 + $0x198] sm:$0xff]  ;;  %v3581_v14 = vld [vmem:[#allocation2 + $0x190] sm:$0xff]  ;;  %v3588_v19 = vld [vmem:[#allocation2 + $0x1c8] sm:$0xff] }
  0x26   :  { %1970 = vmatpush.bf16.msra.mxu0 %v3532_v24  ;;  %v3590_v11 = vld [vmem:[#allocation2 + $0x1d8] sm:$0xff]  ;;  %v3589_v15 = vld [vmem:[#allocation2 + $0x1d0] sm:$0xff]  ;;  %v3563_v20 = vld [vmem:[#allocation2 + $0x100] sm:$0xff] }
  0x27   :  { %1989 = vmatpush.bf16.msra.mxu1 %v3540_v25  ;;  %v3571_v21 = vld [vmem:[#allocation2 + $0x140] sm:$0xff]  ;;  %v2499_v22 = vld [vmem:[%s4187_s0 + $0x10] sm:$0xf]  ;;  %v3495_v25 = vld [vmem:[%s4187_s0 + $0x70] sm:$0xf0] }
  0x28   :  { %2008 = vmatpush.bf16.msra.mxu2 %v3548_v26  ;;  %v3579_v23 = vld [vmem:[#allocation2 + $0x180] sm:$0xff]  ;;  %v3602_v26 = vld [vmem:[#allocation2 + $0x238] sm:$0xff]  ;;  %v2500_v36 = vor.u32 %v3495_v25, %v2499_v22  ;;  %v2523_v22 = vld [vmem:[%s4187_s0 + $0x28] sm:$0xf] }
  0x29   :  { %2027 = vmatpush.bf16.msra.mxu3 %v3556_v27  ;;  %v3587_v24 = vld [vmem:[#allocation2 + $0x1c0] sm:$0xff]  ;;  %v3610_v27 = vld [vmem:[#allocation2 + $0x278] sm:$0xff]  ;;  %v3498_v25 = vld [vmem:[%s4187_s0 + $0x88] sm:$0xf0] }
  0x2a   :  { %1971 = vmatpush.bf16.msra.mxu0 %v3531_v28  ;;  %v3483_v28 = vld [vmem:[%s4187_s0 + $0x14] sm:$0xf]  ;;  %v2507_v30 = vld [vmem:[%s4187_s0 + $0x18] sm:$0xf]  ;;  %v2509_v33 = vld [vmem:[%s4187_s0 + $0x7c] sm:$0xf0] }
  0x2b   :  { %1990 = vmatpush.bf16.msra.mxu1 %v3539_v29  ;;  %v2501_v29 = vld [vmem:[%s4187_s0 + $0x74] sm:$0xf0] }
  0x2c   :  { %2009 = vmatpush.bf16.msra.mxu2 %v3547_v31  ;;  %v3496_v31 = vld [vmem:[%s4187_s0 + $0x78] sm:$0xf0]  ;;  %v2504_v37 = vor.u32 %v3483_v28, %v2501_v29 }
  0x2d   :  { %2028 = vmatpush.bf16.msra.mxu3 %v3555_v32  ;;  %1972 = vmatmul.bf16.vlgmr.msra.gmra.mxu0 %v2484_v42  ;;  %v3484_v32 = vld [vmem:[%s4187_s0 + $0x1c] sm:$0xf]  ;;  %v2508_v38 = vor.u32 %v3496_v31, %v2507_v30  ;;  %v3617_v42 = vld [vmem:[#allocation2 + $0x2b0] sm:$0xff]  ;;  %v2524_v30 = vor.u32 %v3498_v25, %v2523_v22 }
  0x2e   :  { %2040 = vmatpush.bf16.msrb.mxu0 %v3570_v40  ;;  %1991 = vmatmul.bf16.vlgmr.msra.gmra.mxu1 %v2488_v43  ;;  %v3618_v34 = vld [vmem:[#allocation2 + $0x2b8] sm:$0xff]  ;;  %v2512_v39 = vor.u32 %v3484_v32, %v2509_v33  ;;  %v3601_v40 = vld [vmem:[#allocation2 + $0x230] sm:$0xff] }
  0x2f   :  { %2059 = vmatpush.bf16.msrb.mxu1 %v3578_v41  ;;  %2010 = vmatmul.bf16.vlgmr.msra.gmra.mxu2 %v2492_v44  ;;  %v3626_v35 = vld [vmem:[#allocation2 + $0x2f8] sm:$0xff]  ;;  %v3609_v41 = vld [vmem:[#allocation2 + $0x270] sm:$0xff]  ;;  %v3600_v44 = vld [vmem:[#allocation2 + $0x228] sm:$0xff] }
  0x30   :  { %2029 = vmatmul.bf16.vlgmr.msra.gmra.mxu3 %v2496_v45  ;;  %2078 = vmatpush.bf16.msrb.mxu2 %v3586_v46  ;;  %v3625_v43 = vld [vmem:[#allocation2 + $0x2f0] sm:$0xff]  ;;  %v3608_v45 = vld [vmem:[#allocation2 + $0x268] sm:$0xff]  ;;  %v3598_v60 = vld [vmem:[#allocation2 + $0x218] sm:$0xff] }
  0x31   :  { %2097 = vmatpush.bf16.msrb.mxu3 %v3594_v47  ;;  %v3616_v46 = vld [vmem:[#allocation2 + $0x2a8] sm:$0xff]  ;;  %v3606_v61 = vld [vmem:[#allocation2 + $0x258] sm:$0xff]  ;;  %v3633_v32 = vld [vmem:[#allocation2 + $0x330] sm:$0xff] }
  0x32   :  { %2041 = vmatpush.bf16.msrb.mxu0 %v3569_v48  ;;  %v3624_v47 = vld [vmem:[#allocation2 + $0x2e8] sm:$0xff]  ;;  %v3599_v48 = vld [vmem:[#allocation2 + $0x220] sm:$0xff]  ;;  %v3614_v62 = vld [vmem:[#allocation2 + $0x298] sm:$0xff] }
  0x33   :  { %2060 = vmatpush.bf16.msrb.mxu1 %v3577_v49  ;;  %v3607_v49 = vld [vmem:[#allocation2 + $0x260] sm:$0xff]  ;;  %v3622_v63 = vld [vmem:[#allocation2 + $0x2d8] sm:$0xff]  ;;  %v3641_v33 = vld [vmem:[#allocation2 + $0x370] sm:$0xff] }
  0x34   :  { %2079 = vmatpush.bf16.msrb.mxu2 %v3585_v50  ;;  %v3615_v50 = vld [vmem:[#allocation2 + $0x2a0] sm:$0xff]  ;;  %v3673_v25 = vld [vmem:[#allocation2 + $0x470] sm:$0xff] }
  0x35   :  { %2098 = vmatpush.bf16.msrb.mxu3 %v3593_v51  ;;  %v3623_v51 = vld [vmem:[#allocation2 + $0x2e0] sm:$0xff] }
  0x36   :  { %2042 = vmatpush.bf16.msrb.mxu0 %v3568_v52  ;;  %v2599_v52 = vld [vmem:[%s4187_s0 + $0xd8] sm:$0xf] }
  0x37   :  { %2061 = vmatpush.bf16.msrb.mxu1 %v3576_v53  ;;  %v3520_v53 = vld [vmem:[%s4187_s0 + $0x138] sm:$0xf0] }
  0x38   :  { %2080 = vmatpush.bf16.msrb.mxu2 %v3584_v54  ;;  %v3508_v54 = vld [vmem:[%s4187_s0 + $0xdc] sm:$0xf]  ;;  %v2600_v0 = vor.u32 %v3520_v53, %v2599_v52 }
  0x39   :  { %2099 = vmatpush.bf16.msrb.mxu3 %v3592_v55  ;;  %v2601_v55 = vld [vmem:[%s4187_s0 + $0x13c] sm:$0xf0]  ;;  %v3630_v52 = vld [vmem:[#allocation2 + $0x318] sm:$0xff] }
  0x3a   :  { %2043 = vmatpush.bf16.msrb.mxu0 %v3567_v56  ;;  %v2607_v56 = vld [vmem:[%s4187_s0 + $0xe0] sm:$0xf]  ;;  %v2604_v1 = vor.u32 %v3508_v54, %v2601_v55  ;;  %v3638_v53 = vld [vmem:[#allocation2 + $0x358] sm:$0xff] }
  0x3b   :  { %2062 = vmatpush.bf16.msrb.mxu1 %v3575_v57  ;;  %v3521_v57 = vld [vmem:[%s4187_s0 + $0x140] sm:$0xf0]  ;;  %v3646_v54 = vld [vmem:[#allocation2 + $0x398] sm:$0xff] }
  0x3c   :  { %2081 = vmatpush.bf16.msrb.mxu2 %v3583_v58  ;;  %v3509_v58 = vld [vmem:[%s4187_s0 + $0xe4] sm:$0xf]  ;;  %v2608_v2 = vor.u32 %v3521_v57, %v2607_v56  ;;  %v3654_v55 = vld [vmem:[#allocation2 + $0x3d8] sm:$0xff] }
  0x3d   :  { %2100 = vmatpush.bf16.msrb.mxu3 %v3591_v59  ;;  %1977 = vmatmul.bf16.gmra.mxu0 %v2584_v6  ;;  %v2609_v59 = vld [vmem:[%s4187_s0 + $0x144] sm:$0xf0]  ;;  %v3613_v6 = vld [vmem:[#allocation2 + $0x290] sm:$0xff] }
  0x3e   :  { %2044 = vmatpush.bf16.msrb.mxu0 %v3566_v4  ;;  %1996 = vmatmul.bf16.gmra.mxu1 %v2588_v7  ;;  %v2612_v3 = vor.u32 %v3509_v58, %v2609_v59  ;;  %v3597_v4 = vld [vmem:[#allocation2 + $0x210] sm:$0xff] }
  0x3f   :  { %2063 = vmatpush.bf16.msrb.mxu1 %v3574_v5  ;;  %2015 = vmatmul.bf16.gmra.mxu2 %v2592_v8  ;;  %v3605_v5 = vld [vmem:[#allocation2 + $0x250] sm:$0xff]  ;;  %v3596_v8 = vld [vmem:[#allocation2 + $0x208] sm:$0xff] }
  0x40   :  { %2034 = vmatmul.bf16.gmra.mxu3 %v2596_v9  ;;  %2082 = vmatpush.bf16.msrb.mxu2 %v3582_v10  ;;  %v3621_v7 = vld [vmem:[#allocation2 + $0x2d0] sm:$0xff]  ;;  %v3604_v9 = vld [vmem:[#allocation2 + $0x248] sm:$0xff] }
  0x41   :  { %2101 = vmatpush.bf16.msrb.mxu3 %v3590_v11  ;;  %v3612_v10 = vld [vmem:[#allocation2 + $0x288] sm:$0xff] }
  0x42   :  { %2045 = vmatpush.bf16.msrb.mxu0 %v3565_v12  ;;  %v3620_v11 = vld [vmem:[#allocation2 + $0x2c8] sm:$0xff]  ;;  %v3595_v12 = vld [vmem:[#allocation2 + $0x200] sm:$0xff] }
  0x43   :  { %2064 = vmatpush.bf16.msrb.mxu1 %v3573_v13  ;;  %v3603_v13 = vld [vmem:[#allocation2 + $0x240] sm:$0xff] }
  0x44   :  { %2083 = vmatpush.bf16.msrb.mxu2 %v3581_v14  ;;  %v3611_v14 = vld [vmem:[#allocation2 + $0x280] sm:$0xff] }
  0x45   :  { %2102 = vmatpush.bf16.msrb.mxu3 %v3589_v15  ;;  %v3619_v15 = vld [vmem:[#allocation2 + $0x2c0] sm:$0xff] }
  0x46   :  { %2046 = vmatpush.bf16.msrb.mxu0 %v3564_v16  ;;  %v2515_v16 = vld [vmem:[%s4187_s0 + $0x20] sm:$0xf] }
  0x47   :  { %2065 = vmatpush.bf16.msrb.mxu1 %v3572_v17  ;;  %v3497_v17 = vld [vmem:[%s4187_s0 + $0x80] sm:$0xf0] }
  0x48   :  { %2084 = vmatpush.bf16.msrb.mxu2 %v3580_v18  ;;  %v3485_v18 = vld [vmem:[%s4187_s0 + $0x24] sm:$0xf]  ;;  %v2516_v28 = vor.u32 %v3497_v17, %v2515_v16  ;;  %v3690_v16 = vld [vmem:[#allocation2 + $0x4f8] sm:$0xff] }
  0x49   :  { %2103 = vmatpush.bf16.msrb.mxu3 %v3588_v19  ;;  %v2517_v19 = vld [vmem:[%s4187_s0 + $0x84] sm:$0xf0]  ;;  %v3500_v17 = vld [vmem:[%s4187_s0 + $0x98] sm:$0xf0] }
  0x4a   :  { %2047 = vmatpush.bf16.msrb.mxu0 %v3563_v20  ;;  %v3634_v20 = vld [vmem:[#allocation2 + $0x338] sm:$0xff]  ;;  %v2520_v29 = vor.u32 %v3485_v18, %v2517_v19  ;;  %v2541_v19 = vld [vmem:[%s4187_s0 + $0x9c] sm:$0xf0] }
  0x4b   :  { %2066 = vmatpush.bf16.msrb.mxu1 %v3571_v21  ;;  %v3642_v21 = vld [vmem:[#allocation2 + $0x378] sm:$0xff] }
  0x4c   :  { %2085 = vmatpush.bf16.msrb.mxu2 %v3579_v23  ;;  %v3650_v23 = vld [vmem:[#allocation2 + $0x3b8] sm:$0xff] }
  0x4d   :  { %2104 = vmatpush.bf16.msrb.mxu3 %v3587_v24  ;;  %2048 = vmatmul.bf16.vlgmr.msrb.gmra.mxu0 %v2500_v36  ;;  %v3658_v24 = vld [vmem:[#allocation2 + $0x3f8] sm:$0xff]  ;;  %v3632_v36 = vld [vmem:[#allocation2 + $0x328] sm:$0xff] }
  0x4e   :  { %2116 = vmatpush.bf16.msra.mxu0 %v3602_v26  ;;  %2067 = vmatmul.bf16.vlgmr.msrb.gmra.mxu1 %v2504_v37  ;;  %v3486_v26 = vld [vmem:[%s4187_s0 + $0x2c] sm:$0xf]  ;;  %v3488_v18 = vld [vmem:[%s4187_s0 + $0x3c] sm:$0xf] }
  0x4f   :  { %2135 = vmatpush.bf16.msra.mxu1 %v3610_v27  ;;  %2086 = vmatmul.bf16.vlgmr.msrb.gmra.mxu2 %v2508_v38  ;;  %v2525_v27 = vld [vmem:[%s4187_s0 + $0x8c] sm:$0xf0]  ;;  %v3640_v37 = vld [vmem:[#allocation2 + $0x368] sm:$0xff] }
  0x50   :  { %2154 = vmatpush.bf16.msra.mxu2 %v3618_v34  ;;  %2105 = vmatmul.bf16.vlgmr.msrb.gmra.mxu3 %v2512_v39  ;;  %v2528_v31 = vor.u32 %v3486_v26, %v2525_v27  ;;  %v3649_v34 = vld [vmem:[#allocation2 + $0x3b0] sm:$0xff]  ;;  %v3648_v38 = vld [vmem:[#allocation2 + $0x3a8] sm:$0xff] }
  0x51   :  { %2173 = vmatpush.bf16.msra.mxu3 %v3626_v35  ;;  %v3657_v35 = vld [vmem:[#allocation2 + $0x3f0] sm:$0xff]  ;;  %v3656_v39 = vld [vmem:[#allocation2 + $0x3e8] sm:$0xff] }
  0x52   :  { %2117 = vmatpush.bf16.msra.mxu0 %v3601_v40  ;;  %v3631_v40 = vld [vmem:[#allocation2 + $0x320] sm:$0xff]  ;;  %v3681_v26 = vld [vmem:[#allocation2 + $0x4b0] sm:$0xff] }
  0x53   :  { %2136 = vmatpush.bf16.msra.mxu1 %v3609_v41  ;;  %v3639_v41 = vld [vmem:[#allocation2 + $0x360] sm:$0xff]  ;;  %v3689_v27 = vld [vmem:[#allocation2 + $0x4f0] sm:$0xff] }
  0x54   :  { %2155 = vmatpush.bf16.msra.mxu2 %v3617_v42  ;;  %v3647_v42 = vld [vmem:[#allocation2 + $0x3a0] sm:$0xff] }
  0x55   :  { %2174 = vmatpush.bf16.msra.mxu3 %v3625_v43  ;;  %v3655_v43 = vld [vmem:[#allocation2 + $0x3e0] sm:$0xff] }
  0x56   :  { %2118 = vmatpush.bf16.msra.mxu0 %v3600_v44  ;;  %v2615_v44 = vld [vmem:[%s4187_s0 + $0xe8] sm:$0xf] }
  0x57   :  { %2137 = vmatpush.bf16.msra.mxu1 %v3608_v45  ;;  %v3522_v45 = vld [vmem:[%s4187_s0 + $0x148] sm:$0xf0] }
  0x58   :  { %2156 = vmatpush.bf16.msra.mxu2 %v3616_v46  ;;  %v3510_v46 = vld [vmem:[%s4187_s0 + $0xec] sm:$0xf]  ;;  %v2616_v56 = vor.u32 %v3522_v45, %v2615_v44  ;;  %v3662_v44 = vld [vmem:[#allocation2 + $0x418] sm:$0xff] }
  0x59   :  { %2175 = vmatpush.bf16.msra.mxu3 %v3624_v47  ;;  %v2617_v47 = vld [vmem:[%s4187_s0 + $0x14c] sm:$0xf0]  ;;  %v3670_v45 = vld [vmem:[#allocation2 + $0x458] sm:$0xff] }
  0x5a   :  { %2119 = vmatpush.bf16.msra.mxu0 %v3599_v48  ;;  %v2623_v48 = vld [vmem:[%s4187_s0 + $0xf0] sm:$0xf]  ;;  %v2620_v57 = vor.u32 %v3510_v46, %v2617_v47  ;;  %v3678_v46 = vld [vmem:[#allocation2 + $0x498] sm:$0xff] }
  0x5b   :  { %2138 = vmatpush.bf16.msra.mxu1 %v3607_v49  ;;  %v3523_v49 = vld [vmem:[%s4187_s0 + $0x150] sm:$0xf0]  ;;  %v3686_v47 = vld [vmem:[#allocation2 + $0x4d8] sm:$0xff] }
  0x5c   :  { %2157 = vmatpush.bf16.msra.mxu2 %v3615_v50  ;;  %v3511_v50 = vld [vmem:[%s4187_s0 + $0xf4] sm:$0xf]  ;;  %v2624_v58 = vor.u32 %v3523_v49, %v2623_v48 }
  0x5d   :  { %2176 = vmatpush.bf16.msra.mxu3 %v3623_v51  ;;  %2053 = vmatmul.bf16.gmra.mxu0 %v2600_v0  ;;  %v2625_v51 = vld [vmem:[%s4187_s0 + $0x154] sm:$0xf0]  ;;  %v3628_v0 = vld [vmem:[#allocation2 + $0x308] sm:$0xff] }
  0x5e   :  { %2120 = vmatpush.bf16.msra.mxu0 %v3598_v60  ;;  %2072 = vmatmul.bf16.gmra.mxu1 %v2604_v1  ;;  %v2628_v59 = vor.u32 %v3511_v50, %v2625_v51  ;;  %v3629_v60 = vld [vmem:[#allocation2 + $0x310] sm:$0xff]  ;;  %v3636_v1 = vld [vmem:[#allocation2 + $0x348] sm:$0xff] }
  0x5f   :  { %2139 = vmatpush.bf16.msra.mxu1 %v3606_v61  ;;  %2091 = vmatmul.bf16.gmra.mxu2 %v2608_v2  ;;  %v3637_v61 = vld [vmem:[#allocation2 + $0x350] sm:$0xff]  ;;  %v3644_v2 = vld [vmem:[#allocation2 + $0x388] sm:$0xff] }
  0x60   :  { %2158 = vmatpush.bf16.msra.mxu2 %v3614_v62  ;;  %2110 = vmatmul.bf16.gmra.mxu3 %v2612_v3  ;;  %v3645_v62 = vld [vmem:[#allocation2 + $0x390] sm:$0xff]  ;;  %v3652_v3 = vld [vmem:[#allocation2 + $0x3c8] sm:$0xff] }
  0x61   :  { %2177 = vmatpush.bf16.msra.mxu3 %v3622_v63  ;;  %v3653_v63 = vld [vmem:[#allocation2 + $0x3d0] sm:$0xff] }
  0x62   :  { %2121 = vmatpush.bf16.msra.mxu0 %v3597_v4  ;;  %v3627_v4 = vld [vmem:[#allocation2 + $0x300] sm:$0xff] }
  0x63   :  { %2140 = vmatpush.bf16.msra.mxu1 %v3605_v5  ;;  %v3635_v5 = vld [vmem:[#allocation2 + $0x340] sm:$0xff] }
  0x64   :  { %2159 = vmatpush.bf16.msra.mxu2 %v3613_v6  ;;  %v3643_v6 = vld [vmem:[#allocation2 + $0x380] sm:$0xff] }
  0x65   :  { %2178 = vmatpush.bf16.msra.mxu3 %v3621_v7  ;;  %v3651_v7 = vld [vmem:[#allocation2 + $0x3c0] sm:$0xff] }
  0x66   :  { %2122 = vmatpush.bf16.msra.mxu0 %v3596_v8  ;;  %v2531_v8 = vld [vmem:[%s4187_s0 + $0x30] sm:$0xf] }
  0x67   :  { %2141 = vmatpush.bf16.msra.mxu1 %v3604_v9  ;;  %v3499_v9 = vld [vmem:[%s4187_s0 + $0x90] sm:$0xf0] }
  0x68   :  { %2160 = vmatpush.bf16.msra.mxu2 %v3612_v10  ;;  %v3487_v10 = vld [vmem:[%s4187_s0 + $0x34] sm:$0xf] }
  0x69   :  { %2179 = vmatpush.bf16.msra.mxu3 %v3620_v11  ;;  %v2533_v11 = vld [vmem:[%s4187_s0 + $0x94] sm:$0xf0] }
  0x6a   :  { %2123 = vmatpush.bf16.msra.mxu0 %v3595_v12  ;;  %v3666_v12 = vld [vmem:[#allocation2 + $0x438] sm:$0xff] }
  0x6b   :  { %2142 = vmatpush.bf16.msra.mxu1 %v3603_v13  ;;  %v3674_v13 = vld [vmem:[#allocation2 + $0x478] sm:$0xff] }
  0x6c   :  { %2161 = vmatpush.bf16.msra.mxu2 %v3611_v14  ;;  %v2539_v14 = vld [vmem:[%s4187_s0 + $0x38] sm:$0xf] }
  0x6d   :  { %2180 = vmatpush.bf16.msra.mxu3 %v3619_v15  ;;  %2124 = vmatmul.bf16.vlgmr.msra.gmra.mxu0 %v2516_v28  ;;  %v3682_v15 = vld [vmem:[#allocation2 + $0x4b8] sm:$0xff]  ;;  %v2540_v22 = vor.u32 %v3500_v17, %v2539_v14  ;;  %v3664_v28 = vld [vmem:[#allocation2 + $0x428] sm:$0xff] }
  0x6e   :  { %2192 = vmatpush.bf16.msrb.mxu0 %v3634_v20  ;;  %2143 = vmatmul.bf16.vlgmr.msra.gmra.mxu1 %v2520_v29  ;;  %v2532_v20 = vor.u32 %v3499_v9, %v2531_v8  ;;  %v3672_v29 = vld [vmem:[#allocation2 + $0x468] sm:$0xff]  ;;  %v3722_v8 = vld [vmem:[#allocation2 + $0x5f8] sm:$0xff] }
  0x6f   :  { %2211 = vmatpush.bf16.msrb.mxu1 %v3642_v21  ;;  %2162 = vmatmul.bf16.vlgmr.msra.gmra.mxu2 %v2524_v30  ;;  %v2536_v21 = vor.u32 %v3487_v10, %v2533_v11  ;;  %v3680_v30 = vld [vmem:[#allocation2 + $0x4a8] sm:$0xff]  ;;  %v2557_v11 = vld [vmem:[%s4187_s0 + $0xac] sm:$0xf0] }
  0x70   :  { %2230 = vmatpush.bf16.msrb.mxu2 %v3650_v23  ;;  %2181 = vmatmul.bf16.vlgmr.msra.gmra.mxu3 %v2528_v31  ;;  %v2544_v23 = vor.u32 %v3488_v18, %v2541_v19  ;;  %v3688_v31 = vld [vmem:[#allocation2 + $0x4e8] sm:$0xff]  ;;  %v3697_v19 = vld [vmem:[#allocation2 + $0x530] sm:$0xff] }
  0x71   :  { %2249 = vmatpush.bf16.msrb.mxu3 %v3658_v24  ;;  %v3665_v24 = vld [vmem:[#allocation2 + $0x430] sm:$0xff]  ;;  %v3502_v9 = vld [vmem:[%s4187_s0 + $0xa8] sm:$0xf0] }
  0x72   :  { %2193 = vmatpush.bf16.msrb.mxu0 %v3633_v32  ;;  %v3663_v32 = vld [vmem:[#allocation2 + $0x420] sm:$0xff]  ;;  %v3490_v10 = vld [vmem:[%s4187_s0 + $0x4c] sm:$0xf] }
  0x73   :  { %2212 = vmatpush.bf16.msrb.mxu1 %v3641_v33  ;;  %v3671_v33 = vld [vmem:[#allocation2 + $0x460] sm:$0xff]  ;;  %v2560_v17 = vor.u32 %v3490_v10, %v2557_v11 }
  0x74   :  { %2231 = vmatpush.bf16.msrb.mxu2 %v3649_v34  ;;  %v3679_v34 = vld [vmem:[#allocation2 + $0x4a0] sm:$0xff] }
  0x75   :  { %2250 = vmatpush.bf16.msrb.mxu3 %v3657_v35  ;;  %v3687_v35 = vld [vmem:[#allocation2 + $0x4e0] sm:$0xff] }
  0x76   :  { %2194 = vmatpush.bf16.msrb.mxu0 %v3632_v36  ;;  %v2631_v36 = vld [vmem:[%s4187_s0 + $0xf8] sm:$0xf]  ;;  %v3691_v11 = vld [vmem:[#allocation2 + $0x500] sm:$0xff] }
  0x77   :  { %2213 = vmatpush.bf16.msrb.mxu1 %v3640_v37  ;;  %v3524_v37 = vld [vmem:[%s4187_s0 + $0x158] sm:$0xf0] }
  0x78   :  { %2232 = vmatpush.bf16.msrb.mxu2 %v3648_v38  ;;  %v3512_v38 = vld [vmem:[%s4187_s0 + $0xfc] sm:$0xf]  ;;  %v2632_v48 = vor.u32 %v3524_v37, %v2631_v36  ;;  %v3711_v36 = vld [vmem:[#allocation2 + $0x5a0] sm:$0xff] }
  0x79   :  { %2251 = vmatpush.bf16.msrb.mxu3 %v3656_v39  ;;  %v2633_v39 = vld [vmem:[%s4187_s0 + $0x15c] sm:$0xf0] }
  0x7a   :  { %2195 = vmatpush.bf16.msrb.mxu0 %v3631_v40  ;;  %v2639_v40 = vld [vmem:[%s4187_s0 + $0x100] sm:$0xf]  ;;  %v2636_v49 = vor.u32 %v3512_v38, %v2633_v39  ;;  %v2647_v38 = vld [vmem:[%s4187_s0 + $0x108] sm:$0xf]  ;;  %v3526_v39 = vld [vmem:[%s4187_s0 + $0x168] sm:$0xf0] }
  0x7b   :  { %2214 = vmatpush.bf16.msrb.mxu1 %v3639_v41  ;;  %v3525_v41 = vld [vmem:[%s4187_s0 + $0x160] sm:$0xf0] }
  0x7c   :  { %2233 = vmatpush.bf16.msrb.mxu2 %v3647_v42  ;;  %v3513_v42 = vld [vmem:[%s4187_s0 + $0x104] sm:$0xf]  ;;  %v2640_v50 = vor.u32 %v3525_v41, %v2639_v40  ;;  %v3514_v40 = vld [vmem:[%s4187_s0 + $0x10c] sm:$0xf]  ;;  %v2649_v41 = vld [vmem:[%s4187_s0 + $0x16c] sm:$0xf0] }
  0x7d   :  { %2252 = vmatpush.bf16.msrb.mxu3 %v3655_v43  ;;  %2129 = vmatmul.bf16.gmra.mxu0 %v2616_v56  ;;  %v2641_v43 = vld [vmem:[%s4187_s0 + $0x164] sm:$0xf0]  ;;  %v3719_v37 = vld [vmem:[#allocation2 + $0x5e0] sm:$0xff] }
  0x7e   :  { %2196 = vmatpush.bf16.msrb.mxu0 %v3630_v52  ;;  %2148 = vmatmul.bf16.gmra.mxu1 %v2620_v57  ;;  %v2644_v51 = vor.u32 %v3513_v42, %v2641_v43  ;;  %v3661_v52 = vld [vmem:[#allocation2 + $0x410] sm:$0xff]  ;;  %v3660_v56 = vld [vmem:[#allocation2 + $0x408] sm:$0xff] }
  0x7f   :  { %2215 = vmatpush.bf16.msrb.mxu1 %v3638_v53  ;;  %2167 = vmatmul.bf16.gmra.mxu2 %v2624_v58  ;;  %v3669_v53 = vld [vmem:[#allocation2 + $0x450] sm:$0xff]  ;;  %v3668_v57 = vld [vmem:[#allocation2 + $0x448] sm:$0xff] }
  0x80   :  { %2234 = vmatpush.bf16.msrb.mxu2 %v3646_v54  ;;  %2186 = vmatmul.bf16.gmra.mxu3 %v2628_v59  ;;  %v3677_v54 = vld [vmem:[#allocation2 + $0x490] sm:$0xff]  ;;  %v3676_v58 = vld [vmem:[#allocation2 + $0x488] sm:$0xff] }
  0x81   :  { %2253 = vmatpush.bf16.msrb.mxu3 %v3654_v55  ;;  %v3685_v55 = vld [vmem:[#allocation2 + $0x4d0] sm:$0xff]  ;;  %v3684_v59 = vld [vmem:[#allocation2 + $0x4c8] sm:$0xff] }
  0x82   :  { %2197 = vmatpush.bf16.msrb.mxu0 %v3629_v60  ;;  %v3659_v60 = vld [vmem:[#allocation2 + $0x400] sm:$0xff]  ;;  %v2655_v42 = vld [vmem:[%s4187_s0 + $0x110] sm:$0xf]  ;;  %v3527_v43 = vld [vmem:[%s4187_s0 + $0x170] sm:$0xf0] }
  0x83   :  { %2216 = vmatpush.bf16.msrb.mxu1 %v3637_v61  ;;  %v3667_v61 = vld [vmem:[#allocation2 + $0x440] sm:$0xff] }
  0x84   :  { %2235 = vmatpush.bf16.msrb.mxu2 %v3645_v62  ;;  %v3675_v62 = vld [vmem:[#allocation2 + $0x480] sm:$0xff] }
  0x85   :  { %2254 = vmatpush.bf16.msrb.mxu3 %v3653_v63  ;;  %v3683_v63 = vld [vmem:[#allocation2 + $0x4c0] sm:$0xff] }
  0x86   :  { %2198 = vmatpush.bf16.msrb.mxu0 %v3628_v0  ;;  %v2547_v0 = vld [vmem:[%s4187_s0 + $0x40] sm:$0xf] }
  0x87   :  { %2217 = vmatpush.bf16.msrb.mxu1 %v3636_v1  ;;  %v3501_v1 = vld [vmem:[%s4187_s0 + $0xa0] sm:$0xf0] }
  0x88   :  { %2236 = vmatpush.bf16.msrb.mxu2 %v3644_v2  ;;  %v3489_v2 = vld [vmem:[%s4187_s0 + $0x44] sm:$0xf] }
  0x89   :  { %2255 = vmatpush.bf16.msrb.mxu3 %v3652_v3  ;;  %v2549_v3 = vld [vmem:[%s4187_s0 + $0xa4] sm:$0xf0] }
  0x8a   :  { %2199 = vmatpush.bf16.msrb.mxu0 %v3627_v4  ;;  %v3698_v4 = vld [vmem:[#allocation2 + $0x538] sm:$0xff] }
  0x8b   :  { %2218 = vmatpush.bf16.msrb.mxu1 %v3635_v5  ;;  %v3706_v5 = vld [vmem:[#allocation2 + $0x578] sm:$0xff] }
  0x8c   :  { %2237 = vmatpush.bf16.msrb.mxu2 %v3643_v6  ;;  %v2555_v6 = vld [vmem:[%s4187_s0 + $0x48] sm:$0xf] }
  0x8d   :  { %2256 = vmatpush.bf16.msrb.mxu3 %v3651_v7  ;;  %2200 = vmatmul.bf16.vlgmr.msrb.gmra.mxu0 %v2532_v20  ;;  %v3714_v7 = vld [vmem:[#allocation2 + $0x5b8] sm:$0xff]  ;;  %v3705_v20 = vld [vmem:[#allocation2 + $0x570] sm:$0xff] }
  0x8e   :  { %2268 = vmatpush.bf16.msra.mxu0 %v3666_v12  ;;  %2219 = vmatmul.bf16.vlgmr.msrb.gmra.mxu1 %v2536_v21  ;;  %v2548_v12 = vor.u32 %v3501_v1, %v2547_v0  ;;  %v3713_v21 = vld [vmem:[#allocation2 + $0x5b0] sm:$0xff]  ;;  %v3692_v1 = vld [vmem:[#allocation2 + $0x508] sm:$0xff] }
  0x8f   :  { %2287 = vmatpush.bf16.msra.mxu1 %v3674_v13  ;;  %2238 = vmatmul.bf16.vlgmr.msrb.gmra.mxu2 %v2540_v22  ;;  %v2552_v13 = vor.u32 %v3489_v2, %v2549_v3  ;;  %v3721_v22 = vld [vmem:[#allocation2 + $0x5f0] sm:$0xff]  ;;  %v3700_v2 = vld [vmem:[#allocation2 + $0x548] sm:$0xff] }
  0x90   :  { %2306 = vmatpush.bf16.msra.mxu2 %v3682_v15  ;;  %2257 = vmatmul.bf16.vlgmr.msrb.gmra.mxu3 %v2544_v23  ;;  %v3696_v23 = vld [vmem:[#allocation2 + $0x528] sm:$0xff]  ;;  %v3717_v0 = vld [vmem:[#allocation2 + $0x5d0] sm:$0xff] }
  0x91   :  { %2325 = vmatpush.bf16.msra.mxu3 %v3690_v16  ;;  %v2556_v16 = vor.u32 %v3502_v9, %v2555_v6  ;;  %v3708_v3 = vld [vmem:[#allocation2 + $0x588] sm:$0xff] }
  0x92   :  { %2269 = vmatpush.bf16.msra.mxu0 %v3665_v24  ;;  %v3704_v24 = vld [vmem:[#allocation2 + $0x568] sm:$0xff] }
  0x93   :  { %2288 = vmatpush.bf16.msra.mxu1 %v3673_v25  ;;  %v3712_v25 = vld [vmem:[#allocation2 + $0x5a8] sm:$0xff] }
  0x94   :  { %2307 = vmatpush.bf16.msra.mxu2 %v3681_v26  ;;  %v3720_v26 = vld [vmem:[#allocation2 + $0x5e8] sm:$0xff] }
  0x95   :  { %2326 = vmatpush.bf16.msra.mxu3 %v3689_v27 }
  0x96   :  { %2270 = vmatpush.bf16.msra.mxu0 %v3664_v28 }
  0x97   :  { %2289 = vmatpush.bf16.msra.mxu1 %v3672_v29 }
  0x98   :  { %2308 = vmatpush.bf16.msra.mxu2 %v3680_v30 }
  0x99   :  { %2327 = vmatpush.bf16.msra.mxu3 %v3688_v31 }
  0x9a   :  { %2271 = vmatpush.bf16.msra.mxu0 %v3663_v32 }
  0x9b   :  { %2290 = vmatpush.bf16.msra.mxu1 %v3671_v33  ;;  %v3695_v33 = vld [vmem:[#allocation2 + $0x520] sm:$0xff] }
  0x9c   :  { %2309 = vmatpush.bf16.msra.mxu2 %v3679_v34  ;;  %v3703_v34 = vld [vmem:[#allocation2 + $0x560] sm:$0xff] }
  0x9d   :  { %2328 = vmatpush.bf16.msra.mxu3 %v3687_v35  ;;  %2205 = vmatmul.bf16.gmra.mxu0 %v2632_v48  ;;  %v3710_v48 = vld [vmem:[#allocation2 + $0x598] sm:$0xff] }
  0x9e   :  { %2272 = vmatpush.bf16.msra.mxu0 %v3662_v44  ;;  %2224 = vmatmul.bf16.gmra.mxu1 %v2636_v49  ;;  %v3515_v44 = vld [vmem:[%s4187_s0 + $0x114] sm:$0xf]  ;;  %v3718_v49 = vld [vmem:[#allocation2 + $0x5d8] sm:$0xff] }
  0x9f   :  { %2291 = vmatpush.bf16.msra.mxu1 %v3670_v45  ;;  %2243 = vmatmul.bf16.gmra.mxu2 %v2640_v50  ;;  %v2657_v45 = vld [vmem:[%s4187_s0 + $0x174] sm:$0xf0] }
  0xa0   :  { %2310 = vmatpush.bf16.msra.mxu2 %v3678_v46  ;;  %2262 = vmatmul.bf16.gmra.mxu3 %v2644_v51  ;;  %v3694_v46 = vld [vmem:[#allocation2 + $0x518] sm:$0xff] }
  0xa1   :  { %2329 = vmatpush.bf16.msra.mxu3 %v3686_v47  ;;  %v3702_v47 = vld [vmem:[#allocation2 + $0x558] sm:$0xff] }
  0xa2   :  { %2273 = vmatpush.bf16.msra.mxu0 %v3661_v52  ;;  %v2648_v52 = vor.u32 %v3526_v39, %v2647_v38  ;;  %v3728_v39 = vld [vmem:[#allocation2 + $0x628] sm:$0xff] }
  0xa3   :  { %2292 = vmatpush.bf16.msra.mxu1 %v3669_v53  ;;  %v2652_v53 = vor.u32 %v3514_v40, %v2649_v41 }
  0xa4   :  { %2311 = vmatpush.bf16.msra.mxu2 %v3677_v54 }
  0xa5   :  { %2330 = vmatpush.bf16.msra.mxu3 %v3685_v55 }
  0xa6   :  { %2274 = vmatpush.bf16.msra.mxu0 %v3660_v56 }
  0xa7   :  { %2293 = vmatpush.bf16.msra.mxu1 %v3668_v57  ;;  %v2656_v57 = vor.u32 %v3527_v43, %v2655_v42 }
  0xa8   :  { %2312 = vmatpush.bf16.msra.mxu2 %v3676_v58  ;;  %v2660_v58 = vor.u32 %v3515_v44, %v2657_v45 }
  0xa9   :  { %2331 = vmatpush.bf16.msra.mxu3 %v3684_v59 }
  0xaa   :  { %2275 = vmatpush.bf16.msra.mxu0 %v3659_v60  ;;  %v1973_v14 = vpop.f32.mrf.mxu0  ;;  %v3693_v60 = vld [vmem:[#allocation2 + $0x510] sm:$0xff] }
  0xab   :  { %2294 = vmatpush.bf16.msra.mxu1 %v3667_v61  ;;  %v1992_v15 = vpop.f32.mrf.mxu1  ;;  %v3701_v61 = vld [vmem:[#allocation2 + $0x550] sm:$0xff] }
  0xac   :  { %2313 = vmatpush.bf16.msra.mxu2 %v3675_v62  ;;  %v1993_v18 = vadd.f32 %v1992_v15, %v1973_v14  ;;  %v3707_v14 = vld [vmem:[#allocation2 + $0x580] sm:$0xff] }
  0xad   :  { %2332 = vmatpush.bf16.msra.mxu3 %v3683_v63  ;;  %2276 = vmatmul.bf16.vlgmr.msra.gmra.mxu0 %v2548_v12  ;;  %v3709_v63 = vld [vmem:[#allocation2 + $0x590] sm:$0xff]  ;;  %v3699_v12 = vld [vmem:[#allocation2 + $0x540] sm:$0xff] }
  0xae   :  { %2344 = vmatpush.bf16.msrb.mxu0 %v3698_v4  ;;  %2295 = vmatmul.bf16.vlgmr.msra.gmra.mxu1 %v2552_v13  ;;  %v3716_v4 = vld [vmem:[#allocation2 + $0x5c8] sm:$0xff]  ;;  %v3715_v15 = vld [vmem:[#allocation2 + $0x5c0] sm:$0xff] }
  0xaf   :  { %2363 = vmatpush.bf16.msrb.mxu1 %v3706_v5  ;;  %2314 = vmatmul.bf16.vlgmr.msra.gmra.mxu2 %v2556_v16  ;;  %v2563_v16 = vld [vmem:[%s4187_s0 + $0x50] sm:$0xf] }
  0xb0   :  { %2382 = vmatpush.bf16.msrb.mxu2 %v3714_v7  ;;  %2333 = vmatmul.bf16.vlgmr.msra.gmra.mxu3 %v2560_v17  ;;  %v3503_v17 = vld [vmem:[%s4187_s0 + $0xb0] sm:$0xf0] }
  0xb1   :  { %2401 = vmatpush.bf16.msrb.mxu3 %v3722_v8 }
  0xb2   :  { %2345 = vmatpush.bf16.msrb.mxu0 %v3697_v19  ;;  %v2011_v27 = vpop.f32.mrf.mxu2  ;;  %v1975_v30 = vpop.f32.mrf.mxu0  ;;  %v3491_v19 = vld [vmem:[%s4187_s0 + $0x54] sm:$0xf] }
  0xb3   :  { %2364 = vmatpush.bf16.msrb.mxu1 %v3705_v20  ;;  %v2030_v28 = vpop.f32.mrf.mxu3  ;;  %v2012_v29 = vadd.f32 %v2011_v27, %v1993_v18  ;;  %v1994_v31 = vpop.f32.mrf.mxu1  ;;  %v3730_v18 = vld [vmem:[#allocation2 + $0x638] sm:$0xff]  ;;  %v2564_v27 = vor.u32 %v3503_v17, %v2563_v16  ;;  %v2579_v16 = vld [vmem:[%s4187_s0 + $0x60] sm:$0xf]  ;;  %v3505_v17 = vld [vmem:[%s4187_s0 + $0xc0] sm:$0xf0] }
  0xb4   :  { %2383 = vmatpush.bf16.msrb.mxu2 %v3713_v21  ;;  %v1995_v32 = vadd.f32 %v1994_v31, %v1975_v30  ;;  %v2565_v20 = vld [vmem:[%s4187_s0 + $0xb4] sm:$0xf0] }
  0xb5   :  { %2402 = vmatpush.bf16.msrb.mxu3 %v3721_v22  ;;  %v4088_v35 = vadd.f32 %v2030_v28, %v2012_v29  ;;  %v2571_v21 = vld [vmem:[%s4187_s0 + $0x58] sm:$0xf]  ;;  %v3504_v22 = vld [vmem:[%s4187_s0 + $0xb8] sm:$0xf0]  ;;  %v2568_v28 = vor.u32 %v3491_v19, %v2565_v20  ;;  %v3530_v19 = vld [vmem:[%s4187_s0 + $0x188] sm:$0xf0] }
  0xb6   :  { %2346 = vmatpush.bf16.msrb.mxu0 %v3696_v23  ;;  %v3492_v23 = vld [vmem:[%s4187_s0 + $0x5c] sm:$0xf] }
  0xb7   :  { %2365 = vmatpush.bf16.msrb.mxu1 %v3704_v24  ;;  %v2573_v24 = vld [vmem:[%s4187_s0 + $0xbc] sm:$0xf0] }
  0xb8   :  { %2384 = vmatpush.bf16.msrb.mxu2 %v3712_v25 }
  0xb9   :  { %2403 = vmatpush.bf16.msrb.mxu3 %v3720_v26 }
  0xba   :  { %2347 = vmatpush.bf16.msrb.mxu0 %v3695_v33  ;;  %v2013_v50 = vpop.f32.mrf.mxu2  ;;  %v1978_v55 = vpop.f32.mrf.mxu0  ;;  %v2576_v33 = vor.u32 %v3492_v23, %v2573_v24 }
  0xbb   :  { %2366 = vmatpush.bf16.msrb.mxu1 %v3703_v34  ;;  %v2032_v51 = vpop.f32.mrf.mxu3  ;;  %v2014_v54 = vadd.f32 %v2013_v50, %v1995_v32  ;;  %v1997_v56 = vpop.f32.mrf.mxu1  ;;  %v2572_v32 = vor.u32 %v3504_v22, %v2571_v21  ;;  %v3516_v50 = vld [vmem:[%s4187_s0 + $0x11c] sm:$0xf]  ;;  %v2580_v22 = vor.u32 %v3505_v17, %v2579_v16 }
  0xbc   :  { %2385 = vmatpush.bf16.msrb.mxu2 %v3711_v36  ;;  %v1998_v59 = vadd.f32 %v1997_v56, %v1978_v55  ;;  %v3729_v36 = vld [vmem:[#allocation2 + $0x630] sm:$0xff]  ;;  %v2673_v55 = vld [vmem:[%s4187_s0 + $0x184] sm:$0xf0]  ;;  %v3726_v56 = vld [vmem:[#allocation2 + $0x618] sm:$0xff] }
  0xbd   :  { %2404 = vmatpush.bf16.msrb.mxu3 %v3719_v37  ;;  %v4114_v62 = vadd.f32 %v2032_v51, %v2014_v54  ;;  %2281 = vmatmul.bf16.gmra.mxu0 %v2648_v52  ;;  %v2665_v51 = vld [vmem:[%s4187_s0 + $0x17c] sm:$0xf0]  ;;  %v3517_v54 = vld [vmem:[%s4187_s0 + $0x124] sm:$0xf] }
  0xbe   :  { %2348 = vmatpush.bf16.msrb.mxu0 %v3694_v46  ;;  %2300 = vmatmul.bf16.gmra.mxu1 %v2652_v53  ;;  %v2671_v52 = vld [vmem:[%s4187_s0 + $0x120] sm:$0xf]  ;;  %v3529_v53 = vld [vmem:[%s4187_s0 + $0x180] sm:$0xf0] }
  0xbf   :  { %2367 = vmatpush.bf16.msrb.mxu1 %v3702_v47  ;;  %2319 = vmatmul.bf16.gmra.mxu2 %v2656_v57 }
  0xc0   :  { %2386 = vmatpush.bf16.msrb.mxu2 %v3710_v48  ;;  %2338 = vmatmul.bf16.gmra.mxu3 %v2660_v58  ;;  %v2663_v48 = vld [vmem:[%s4187_s0 + $0x118] sm:$0xf] }
  0xc1   :  { %2405 = vmatpush.bf16.msrb.mxu3 %v3718_v49  ;;  %v3528_v49 = vld [vmem:[%s4187_s0 + $0x178] sm:$0xf0] }
  0xc2   :  { %2349 = vmatpush.bf16.msrb.mxu0 %v3693_v60  ;;  %v2016_v5 = vpop.f32.mrf.mxu2  ;;  %v1980_v8 = vpop.f32.mrf.mxu0  ;;  %v2668_v60 = vor.u32 %v3516_v50, %v2665_v51 }
  0xc3   :  { %2368 = vmatpush.bf16.msrb.mxu1 %v3701_v61  ;;  %v2035_v6 = vpop.f32.mrf.mxu3  ;;  %v2017_v7 = vadd.f32 %v2016_v5, %v1998_v59  ;;  %v1999_v9 = vpop.f32.mrf.mxu1  ;;  %v2664_v59 = vor.u32 %v3528_v49, %v2663_v48 }
  0xc4   :  { %2387 = vmatpush.bf16.msrb.mxu2 %v3709_v63  ;;  %v2000_v10 = vadd.f32 %v1999_v9, %v1980_v8 }
  0xc5   :  { %2406 = vmatpush.bf16.msrb.mxu3 %v3717_v0  ;;  %v4116_v13 = vadd.f32 %v2035_v6, %v2017_v7  ;;  %v2672_v0 = vor.u32 %v3529_v53, %v2671_v52  ;;  %v3724_v6 = vld [vmem:[#allocation2 + $0x608] sm:$0xff] }
  0xc6   :  { %2350 = vmatpush.bf16.msrb.mxu0 %v3692_v1  ;;  %v2676_v1 = vor.u32 %v3517_v54, %v2673_v55 }
  0xc7   :  { %2369 = vmatpush.bf16.msrb.mxu1 %v3700_v2 }
  0xc8   :  { %2388 = vmatpush.bf16.msrb.mxu2 %v3708_v3  ;;  %v3725_v3 = vld [vmem:[#allocation2 + $0x610] sm:$0xff] }
  0xc9   :  { %2407 = vmatpush.bf16.msrb.mxu3 %v3716_v4 }
  0xca   :  { %2351 = vmatpush.bf16.msrb.mxu0 %v3691_v11  ;;  %v2018_v25 = vpop.f32.mrf.mxu2  ;;  %v2049_v30 = vpop.f32.mrf.mxu0 }
  0xcb   :  { %2370 = vmatpush.bf16.msrb.mxu1 %v3699_v12  ;;  %v2037_v26 = vpop.f32.mrf.mxu3  ;;  %v2019_v29 = vadd.f32 %v2018_v25, %v2000_v10  ;;  %v2068_v31 = vpop.f32.mrf.mxu1  ;;  %v2050_v34 = vadd.f32 %v2049_v30, %v4088_v35  ;;  %v3727_v35 = vld [vmem:[#allocation2 + $0x620] sm:$0xff] }
  0xcc   :  { %2389 = vmatpush.bf16.msrb.mxu2 %v3707_v14 }
  0xcd   :  { %2408 = vmatpush.bf16.msrb.mxu3 %v3715_v15  ;;  %v2038_v37 = vadd.f32 %v2037_v26, %v2019_v29  ;;  %v2069_v38 = vadd.f32 %v2068_v31, %v2050_v34  ;;  %2352 = vmatmul.bf16.vlgmr.msrb.gmra.mxu0 %v2564_v27 }
  0xce   :  { %2420 = vmatpush.bf16.msra.mxu0 %v3730_v18  ;;  %2371 = vmatmul.bf16.vlgmr.msrb.gmra.mxu1 %v2568_v28 }
  0xcf   :  { %3742 = vmatpush.bf16.msra.mxu1 %v3730_v18  ;;  %2390 = vmatmul.bf16.vlgmr.msrb.gmra.mxu2 %v2572_v32  ;;  %v2679_v18 = vld [vmem:[%s4187_s0 + $0x128] sm:$0xf] }
  0xd0   :  { %2409 = vmatmul.bf16.vlgmr.msrb.gmra.mxu3 %v2576_v33  ;;  %v2680_v23 = vor.u32 %v3530_v19, %v2679_v18 }
  0xd2   :  { %2421 = vmatpush.bf16.msra.mxu0 %v3729_v36  ;;  %v2087_v40 = vpop.f32.mrf.mxu2  ;;  %v2051_v43 = vpop.f32.mrf.mxu0 }
  0xd3   :  { %3743 = vmatpush.bf16.msra.mxu1 %v3729_v36  ;;  %v2106_v41 = vpop.f32.mrf.mxu3  ;;  %v2088_v42 = vadd.f32 %v2087_v40, %v2069_v38  ;;  %v2070_v44 = vpop.f32.mrf.mxu1  ;;  %v2052_v45 = vadd.f32 %v2051_v43, %v4114_v62 }
  0xd5   :  { %v2107_v46 = vadd.f32 %v2106_v41, %v2088_v42  ;;  %v2071_v47 = vadd.f32 %v2070_v44, %v2052_v45 }
  0xd6   :  { %2422 = vmatpush.bf16.msra.mxu0 %v3728_v39 }
  0xd7   :  { %3744 = vmatpush.bf16.msra.mxu1 %v3728_v39 }
  0xda   :  { %2423 = vmatpush.bf16.msra.mxu0 %v3727_v35  ;;  %v2089_v57 = vpop.f32.mrf.mxu2  ;;  %v2054_v62 = vpop.f32.mrf.mxu0 }
  0xdb   :  { %3745 = vmatpush.bf16.msra.mxu1 %v3727_v35  ;;  %v2108_v58 = vpop.f32.mrf.mxu3  ;;  %v2090_v61 = vadd.f32 %v2089_v57, %v2071_v47  ;;  %v2073_v63 = vpop.f32.mrf.mxu1  ;;  %v2055_v2 = vadd.f32 %v2054_v62, %v4116_v13  ;;  %v3723_v13 = vld [vmem:[#allocation2 + $0x600] sm:$0xff] }
  0xdd   :  { %v2109_v4 = vadd.f32 %v2108_v58, %v2090_v61  ;;  %v2074_v5 = vadd.f32 %v2073_v63, %v2055_v2  ;;  %2357 = vmatmul.bf16.gmra.mxu0 %v2664_v59 }
  0xde   :  { %2424 = vmatpush.bf16.msra.mxu0 %v3726_v56  ;;  %2376 = vmatmul.bf16.gmra.mxu1 %v2668_v60 }
  0xdf   :  { %3746 = vmatpush.bf16.msra.mxu1 %v3726_v56  ;;  %2395 = vmatmul.bf16.gmra.mxu2 %v2672_v0 }
  0xe0   :  { %2414 = vmatmul.bf16.gmra.mxu3 %v2676_v1 }
  0xe2   :  { %2425 = vmatpush.bf16.msra.mxu0 %v3725_v3  ;;  %v2092_v7 = vpop.f32.mrf.mxu2  ;;  %v2056_v10 = vpop.f32.mrf.mxu0 }
  0xe3   :  { %3747 = vmatpush.bf16.msra.mxu1 %v3725_v3  ;;  %v2111_v8 = vpop.f32.mrf.mxu3  ;;  %v2093_v9 = vadd.f32 %v2092_v7, %v2074_v5  ;;  %v2075_v11 = vpop.f32.mrf.mxu1  ;;  %v2057_v12 = vadd.f32 %v2056_v10, %v2038_v37 }
  0xe5   :  { %v2112_v14 = vadd.f32 %v2111_v8, %v2093_v9  ;;  %v2076_v15 = vadd.f32 %v2075_v11, %v2057_v12 }
  0xe6   :  { %2426 = vmatpush.bf16.msra.mxu0 %v3724_v6 }
  0xe7   :  { %3748 = vmatpush.bf16.msra.mxu1 %v3724_v6 }
  0xea   :  { %2427 = vmatpush.bf16.msra.mxu0 %v3723_v13  ;;  %v2094_v20 = vpop.f32.mrf.mxu2  ;;  %v2125_v25 = vpop.f32.mrf.mxu0 }
  0xeb   :  { %3749 = vmatpush.bf16.msra.mxu1 %v3723_v13  ;;  %v2113_v21 = vpop.f32.mrf.mxu3  ;;  %v2095_v24 = vadd.f32 %v2094_v20, %v2076_v15  ;;  %v2144_v26 = vpop.f32.mrf.mxu1  ;;  %v2126_v27 = vadd.f32 %v2125_v25, %v2107_v46 }
  0xed   :  { %v2114_v28 = vadd.f32 %v2113_v21, %v2095_v24  ;;  %v2145_v29 = vadd.f32 %v2144_v26, %v2126_v27  ;;  %2428 = vmatmul.bf16.vlgmr.msra.gmra.mxu0 %v2580_v22 }
  0xee   :  { %2433 = vmatmul.bf16.vlgmr.msra.gmra.mxu1 %v2680_v23 }
  0xf2   :  { %v2163_v30 = vpop.f32.mrf.mxu2  ;;  %v2127_v33 = vpop.f32.mrf.mxu0 }
  0xf3   :  { %v2182_v31 = vpop.f32.mrf.mxu3  ;;  %v2164_v32 = vadd.f32 %v2163_v30, %v2145_v29  ;;  %v2146_v34 = vpop.f32.mrf.mxu1  ;;  %v2128_v36 = vadd.f32 %v2127_v33, %v2109_v4 }
  0xf5   :  { %v2183_v37 = vadd.f32 %v2182_v31, %v2164_v32  ;;  %v2147_v38 = vadd.f32 %v2146_v34, %v2128_v36 }
  0xfa   :  { %v2165_v39 = vpop.f32.mrf.mxu2  ;;  %v2130_v42 = vpop.f32.mrf.mxu0 }
  0xfb   :  { %v2184_v40 = vpop.f32.mrf.mxu3  ;;  %v2166_v41 = vadd.f32 %v2165_v39, %v2147_v38  ;;  %v2149_v43 = vpop.f32.mrf.mxu1  ;;  %v2131_v44 = vadd.f32 %v2130_v42, %v2112_v14 }
  0xfd   :  { %v2185_v45 = vadd.f32 %v2184_v40, %v2166_v41  ;;  %v2150_v35 = vadd.f32 %v2149_v43, %v2131_v44 }
 0x102   :  { %v2168_v46 = vpop.f32.mrf.mxu2  ;;  %v2132_v49 = vpop.f32.mrf.mxu0 }
 0x103   :  { %v2187_v47 = vpop.f32.mrf.mxu3  ;;  %v2169_v48 = vadd.f32 %v2168_v46, %v2150_v35  ;;  %v2151_v50 = vpop.f32.mrf.mxu1  ;;  %v2133_v51 = vadd.f32 %v2132_v49, %v2114_v28 }
 0x105   :  { %v2188_v52 = vadd.f32 %v2187_v47, %v2169_v48  ;;  %v2152_v53 = vadd.f32 %v2151_v50, %v2133_v51 }
 0x10a   :  { %v2170_v54 = vpop.f32.mrf.mxu2  ;;  %v2201_v57 = vpop.f32.mrf.mxu0 }
 0x10b   :  { %v2189_v55 = vpop.f32.mrf.mxu3  ;;  %v2171_v56 = vadd.f32 %v2170_v54, %v2152_v53  ;;  %v2220_v58 = vpop.f32.mrf.mxu1  ;;  %v2202_v59 = vadd.f32 %v2201_v57, %v2183_v37 }
 0x10d   :  { %v2190_v60 = vadd.f32 %v2189_v55, %v2171_v56  ;;  %v2221_v61 = vadd.f32 %v2220_v58, %v2202_v59 }
 0x112   :  { %v2239_v62 = vpop.f32.mrf.mxu2  ;;  %v2203_v1 = vpop.f32.mrf.mxu0 }
 0x113   :  { %v2258_v63 = vpop.f32.mrf.mxu3  ;;  %v2240_v0 = vadd.f32 %v2239_v62, %v2221_v61  ;;  %v2222_v2 = vpop.f32.mrf.mxu1  ;;  %v2204_v3 = vadd.f32 %v2203_v1, %v2185_v45 }
 0x115   :  { %v2259_v4 = vadd.f32 %v2258_v63, %v2240_v0  ;;  %v2223_v5 = vadd.f32 %v2222_v2, %v2204_v3 }
 0x11a   :  { %v2241_v6 = vpop.f32.mrf.mxu2  ;;  %v2206_v8 = vpop.f32.mrf.mxu0 }
 0x11b   :  { %v2260_v7 = vpop.f32.mrf.mxu3  ;;  %v2225_v9 = vpop.f32.mrf.mxu1  ;;  %v2207_v10 = vadd.f32 %v2206_v8, %v2188_v52  ;;  %v2242_v46 = vadd.f32 %v2241_v6, %v2223_v5 }
 0x11d   :  { %v2226_v11 = vadd.f32 %v2225_v9, %v2207_v10  ;;  %v2261_v50 = vadd.f32 %v2260_v7, %v2242_v46 }
 0x122   :  { %v2244_v12 = vpop.f32.mrf.mxu2  ;;  %v2208_v14 = vpop.f32.mrf.mxu0 }
 0x123   :  { %v2263_v13 = vpop.f32.mrf.mxu3  ;;  %v2227_v15 = vpop.f32.mrf.mxu1  ;;  %v2245_v37 = vadd.f32 %v2244_v12, %v2226_v11  ;;  %v2209_v38 = vadd.f32 %v2208_v14, %v2190_v60 }
 0x125   :  { %v2264_v39 = vadd.f32 %v2263_v13, %v2245_v37  ;;  %v2228_v44 = vadd.f32 %v2227_v15, %v2209_v38 }
 0x12a   :  { %v2246_v16 = vpop.f32.mrf.mxu2  ;;  %v2277_v18 = vpop.f32.mrf.mxu0 }
 0x12b   :  { %v2265_v17 = vpop.f32.mrf.mxu3  ;;  %v2296_v19 = vpop.f32.mrf.mxu1  ;;  %v2278_v45 = vadd.f32 %v2277_v18, %v2259_v4  ;;  %v2247_v47 = vadd.f32 %v2246_v16, %v2228_v44 }
 0x12d   :  { %v2297_v48 = vadd.f32 %v2296_v19, %v2278_v45  ;;  %v2266_v51 = vadd.f32 %v2265_v17, %v2247_v47 }
 0x132   :  { %v2315_v20 = vpop.f32.mrf.mxu2  ;;  %v2279_v22 = vpop.f32.mrf.mxu0 }
 0x133   :  { %v2334_v21 = vpop.f32.mrf.mxu3  ;;  %v2298_v23 = vpop.f32.mrf.mxu1  ;;  %v2316_v52 = vadd.f32 %v2315_v20, %v2297_v48  ;;  %v2280_v57 = vadd.f32 %v2279_v22, %v2261_v50 }
 0x135   :  { %v2335_v60 = vadd.f32 %v2334_v21, %v2316_v52  ;;  %v2299_v62 = vadd.f32 %v2298_v23, %v2280_v57 }
 0x13a   :  { %v2317_v24 = vpop.f32.mrf.mxu2  ;;  %v2282_v26 = vpop.f32.mrf.mxu0 }
 0x13b   :  { %v2336_v25 = vpop.f32.mrf.mxu3  ;;  %v2301_v27 = vpop.f32.mrf.mxu1  ;;  %v2283_v35 = vadd.f32 %v2282_v26, %v2264_v39  ;;  %v2318_v2 = vadd.f32 %v2317_v24, %v2299_v62  ;;  %v3755_v24 = vld [vmem:[#allocation4] ss:$0 sm:$0xff] }
 0x13d   :  { %v2302_v49 = vadd.f32 %v2301_v27, %v2283_v35  ;;  %v2337_v9 = vadd.f32 %v2336_v25, %v2318_v2  ;;  %v3756_v25 = vld [vmem:[#allocation6] ss:$0 sm:$0xff] }
 0x142   :  { %v2320_v28 = vpop.f32.mrf.mxu2  ;;  %v2284_v30 = vpop.f32.mrf.mxu0 }
 0x143   :  { %v2339_v29 = vpop.f32.mrf.mxu3  ;;  %v2303_v31 = vpop.f32.mrf.mxu1  ;;  %v2321_v53 = vadd.f32 %v2320_v28, %v2302_v49  ;;  %v2285_v58 = vadd.f32 %v2284_v30, %v2266_v51 }
 0x145   :  { %v2340_v61 = vadd.f32 %v2339_v29, %v2321_v53  ;;  %v2304_v63 = vadd.f32 %v2303_v31, %v2285_v58 }
 0x14a   :  { %v2322_v32 = vpop.f32.mrf.mxu2  ;;  %v2353_v34 = vpop.f32.mrf.mxu0 }
 0x14b   :  { %v2341_v33 = vpop.f32.mrf.mxu3  ;;  %v2372_v36 = vpop.f32.mrf.mxu1  ;;  %v2354_v0 = vadd.f32 %v2353_v34, %v2335_v60  ;;  %v2323_v3 = vadd.f32 %v2322_v32, %v2304_v63 }
 0x14d   :  { %v2373_v7 = vadd.f32 %v2372_v36, %v2354_v0  ;;  %v2342_v10 = vadd.f32 %v2341_v33, %v2323_v3 }
 0x152   :  { %v2391_v40 = vpop.f32.mrf.mxu2  ;;  %v2355_v42 = vpop.f32.mrf.mxu0 }
 0x153   :  { %v2410_v41 = vpop.f32.mrf.mxu3  ;;  %v2374_v43 = vpop.f32.mrf.mxu1  ;;  %v2392_v11 = vadd.f32 %v2391_v40, %v2373_v7  ;;  %v2356_v14 = vadd.f32 %v2355_v42, %v2337_v9 }
 0x155   :  { %v2411_v16 = vadd.f32 %v2410_v41, %v2392_v11  ;;  %v2375_v21 = vadd.f32 %v2374_v43, %v2356_v14 }
 0x15a   :  { %v2393_v54 = vpop.f32.mrf.mxu2  ;;  %v2358_v55 = vpop.f32.mrf.mxu0 }
 0x15b   :  { %v2377_v56 = vpop.f32.mrf.mxu1  ;;  %v2412_v59 = vpop.f32.mrf.mxu3  ;;  %v2359_v1 = vadd.f32 %v2358_v55, %v2340_v61  ;;  %v2394_v27 = vadd.f32 %v2393_v54, %v2375_v21 }
 0x15d   :  { %v2378_v8 = vadd.f32 %v2377_v56, %v2359_v1  ;;  %v2413_v32 = vadd.f32 %v2412_v59, %v2394_v27 }
 0x162   :  { %v2396_v4 = vpop.f32.mrf.mxu2  ;;  %v2360_v5 = vpop.f32.mrf.mxu0 }
 0x163   :  { %v2379_v6 = vpop.f32.mrf.mxu1  ;;  %v2397_v12 = vadd.f32 %v2396_v4, %v2378_v8  ;;  %v2415_v13 = vpop.f32.mrf.mxu3  ;;  %v2361_v15 = vadd.f32 %v2360_v5, %v2342_v10 }
 0x165   :  { %v2416_v17 = vadd.f32 %v2415_v13, %v2397_v12  ;;  %v2380_v22 = vadd.f32 %v2379_v6, %v2361_v15 }
 0x16a   :  { %v2398_v18 = vpop.f32.mrf.mxu2  ;;  %v2429_v19 = vpop.f32.mrf.mxu0 }
 0x16b   :  { %v2434_v20 = vpop.f32.mrf.mxu1  ;;  %v2430_v23 = vadd.f32 %v2429_v19, %v2411_v16  ;;  %v2399_v28 = vadd.f32 %v2398_v18, %v2380_v22  ;;  %v2417_v31 = vpop.f32.mrf.mxu3 }
 0x16c   :  { %v2435_v26 = vadd.f32 %v2434_v20, %v2416_v17 }
 0x16d   :  { %v2443_v29 = vmul.f32 %v3755_v24, %v2430_v23  ;;  %v2418_v33 = vadd.f32 %v2417_v31, %v2399_v28 }
 0x16e   :  { %v2445_v30 = vmul.f32 %v3755_v24, %v2435_v26 }
 0x16f   :  { %v2451_v37 = vadd.f32 %v3756_v25, %v2443_v29 }
 0x170   :  { %v2453_v38 = vadd.f32 %v3756_v25, %v2445_v30 }
 0x171   :  { %v2459_v43 = vmul.f32 0.2, %v2451_v37  ;;  %vm2455_vm0 = vcmp.gt.f32.partialorder %v2451_v37, 0.0 }
 0x172   :  { %v2431_v34 = vpop.f32.mrf.mxu0  ;;  %v2461_v44 = vmul.f32 0.2, %v2453_v38  ;;  %vm2457_vm1 = vcmp.gt.f32.partialorder %v2453_v38, 0.0 }
 0x173   :  { %v2436_v36 = vpop.f32.mrf.mxu1  ;;  %v2432_v39 = vadd.f32 %v2431_v34, %v2413_v32  ;;  %v2463_v48 = vsel %vm2455_vm0, %v2451_v37, %v2459_v43 }
 0x174   :  { %v2437_v40 = vadd.f32 %v2436_v36, %v2418_v33  ;;  %v2465_v49 = vsel %vm2457_vm1, %v2453_v38, %v2461_v44 }
 0x175   :  { %v2444_v41 = vmul.f32 %v3755_v24, %v2432_v39 }
 0x176   :  { %v2446_v42 = vmul.f32 %v3755_v24, %v2437_v40 }
 0x177   :  { %v2452_v45 = vadd.f32 %v3756_v25, %v2444_v41 }
 0x178   :  { %v2454_v35 = vadd.f32 %v3756_v25, %v2446_v42 }
 0x179   :  { %vm2456_vm2 = vcmp.gt.f32.partialorder %v2452_v45, 0.0  ;;  %v2460_v46 = vmul.f32 0.2, %v2452_v45 }
 0x17a   :  { %vm2458_vm3 = vcmp.gt.f32.partialorder %v2454_v35, 0.0  ;;  %v2462_v47 = vmul.f32 0.2, %v2454_v35 }
 0x17b   :  { %v2464_v50 = vsel %vm2456_vm2, %v2452_v45, %v2460_v46 }
 0x17c   :  { %v2466_v51 = vsel %vm2458_vm3, %v2454_v35, %v2462_v47  ;;  %v3734_v52 = vpack.c.bf16 %v2464_v50, %v2463_v48 }
 0x17d   :  { %v3739_v53 = vpack.c.bf16 %v2466_v51, %v2465_v49 }
 0x17e   :  { %3735 = vst [vmem:[%s4191_s4] sm:$0xff] %v3734_v52  }
 0x17f   :  { %3741 = vst [vmem:[%s4191_s4 + $0x8] sm:$0xff] %v3739_v53  }
 0x180   :  { %2479 = vsyncpa [#allocation3], 1 }
 0x181   :  { %2480 = vsyncpa [#allocation5], 1 }

// kernel: s_evaluator_forward.6
= control target key start
LH: loop header
LB: loop body
LE: loop exit
PB: predicated region body
PF: predicated region fallthrough
CT: control target
= control target key end

     0   :  { %s8487_s0 = inlined_call_operand.vmem [shape: bf16[2,2048], index: 0, kind: input, shape index: {}]   ;;  %s8488_s1 = inlined_call_operand.hbm [shape: bf16[2048,2048], index: 1, kind: input, shape index: {}]   ;;  %s8489_s2 = inlined_call_operand.hbm [shape: f32[1,2048], index: 2, kind: input, shape index: {}]   ;;  %s8490_s3 = inlined_call_operand.hbm [shape: f32[1,2048], index: 3, kind: input, shape index: {}]   ;;  %s8491_s4 = inlined_call_operand.vmem [shape: bf16[2,2048], index: 4, kind: output, shape index: {}]  }
   0x1   :  { %8492 = sst [smem:[#allocation9_spill]] %s8488_s1 }
   0x2   :  { %9 = vsyncpa [#allocation3], 0 }
   0x3   :  { %11 = vsyncpa [#allocation3 + $0x1], 0 }
   0x4   :  { %12 = vsyncpa [#allocation5], 0 }
   0x5   :  { %14 = vsyncpa [#allocation5 + $0x1], 0  ;;  %s7209_s15 = smov 0   ;;  %s7211_s16 = smov 0  }
   0x6   :  { %s7213_s17 = smov 0   ;;  %s7215_s18 = smov 0  }
   0x7 LB: > { %s7228_s19 = sadd.s32 4294967295, %s7179_s18   ;;  %s7231_s20 = sadd.s32 1, %s7179_s18   ;;  %s7179_s18 = sphi %s7215_s18, %s8500_s18   ;;  %s7175_s17 = sphi %s7213_s17, %s8499_s17   ;;  %s7171_s16 = sphi %s7211_s16, %s8498_s16   ;;  %s7167_s15 = sphi %s7209_s15, %s8497_s15  }
   0x8   : > { %s45_s21 = ssub.s32 %s7179_s18, %s7231_s20  ;;  %s48_s22 = sadd.s32 1, %s7175_s17 }
   0x9   : > { %p46_p0 = scmp.eq.s32.totalorder %s45_s21, 0  ;;  %p55_p1 = scmp.ne.s32.totalorder %s7175_s17, %s7171_s16 }
   0xa   : > { %p56_p2 = scmp.eq.s32.totalorder %s7179_s18, 0  ;;  %p61_p3 = scmp.ne.s32.totalorder %s7171_s16, %s7167_s15 }
   0xb   : > { %s7241_s23 = scalar_select %p46_p0, %s7175_s17, %s48_s22  }
   0xc   : > { %p57_p4 = por %p56_p2, %p55_p1  ;;  %p62_p5 = scmp.eq.s32.totalorder %s7228_s19, 0 }
   0xd   : > { %p6989_p6 = scmp.lt.s32.totalorder %s7179_s18, 4  ;;  %s7250_s25 = sand.u32 1, %s7175_s17  }
   0xe   : > { %p7245_p7 = por %p62_p5, %p61_p3  ;;  %s4398_s26 = sshll.u32 %s7250_s25, 12 }
   0xf   : > { %p7253_p8 = pnand %p6989_p6, %p57_p4  ;;  %s170_s28 = scalar_lea.vmem [#allocation2], %s4398_s26 }
  0x10   : > { %s178_s29 = sshll.u32 %s170_s28, 4  ;;  %s188_s30 = sand.u32 1, %s7179_s18   ;;  %s7258_s29 = int_to_ptr.vmem [resolvable:$true] %s178_s29 }
  0x11   : > { %s4401_s5 = sshll.u32 %s7250_s25, 2  ;;  %s4402_s6 = sshll.u32 %s7179_s18, 2 }
  0x12   : > { %s196_s9 = scalar_lea.hbm %s8489_s2, %s4402_s6  ;;  %s192_s10 = scalar_lea.vmem [#allocation4], %s4401_s5 }
  0x13   : > { %s200_s11 = sshll.u32 %s192_s10, 4  ;;  %s198_s12 = sshll.u32 %s196_s9, 4  ;;  %s201_s11 = int_to_ptr.vmem [resolvable:$true] %s200_s11  ;;  %s199_s12 = int_to_ptr.hbm [resolvable:$true] %s198_s12 }
  0x14   : > { %s7267_s13 = scalar_lea.sflag [#allocation5], %s188_s30  ;;  %s7051_s14 = sshra.s32 %s199_s12, 4  ;;  %s7052_s14 = int_to_ptr.hbm [resolvable:$true] %s7051_s14 }
  0x15   : > { %s7053_s15 = scalar_lea.hbm %s7052_s14, 4  ;;  %p7055_p10 = pneg %p7253_p8 }
  0x16   : > { %p7054_p9 = scmp.ne.s32.totalorder %s7052_s14, %s7053_s15  ;;  %s7058_s26 = scalar_lea.hbm %s8489_s2, 16 }
  0x17   : > { %p7059_p13 = scmp.lt.s32.totalorder %s7052_s14, %s8489_s2  ;;  %p7060_p0 = scmp.lt.s32.totalorder %s7058_s26, %s7053_s15 }
  0x18   : > { %p7056_p11 = pnand %p7055_p10, %p7054_p9 }
  0x19   : > { %p7061_p1 = por %p7060_p0, %p7059_p13 }
  0x1a   : > { %p7057_p12 = pneg %p7056_p11 }
  0x1c   : > { %p7062_p2 = pnand %p7061_p1, %p7057_p12 }
  0x1e   : > { %7065 = shalt.err (!%p7062_p2)
}
  0x1f   : > { %6985 = dma.hbm_to_vmem [thread:$0]  (!%p7253_p8), %s199_s12, 64, %s201_s11, %s7267_s13  }
  0x20   : > { %s7286_s9 = scalar_lea.hbm %s8490_s3, %s4402_s6  ;;  %p4405_p3 = scmp.ge.s32.totalorder %s7179_s18, 1 }
  0x21   : > { %p224_p4 = scmp.lt.s32.totalorder %s7179_s18, 5  ;;  %s6460_s10 = sshll.u32 %s7179_s18, 4 }
  0x22   : > { %s8495_s1 = sld [smem:[#allocation9_spill]]  ;;  %s217_s11 = sshll.u32 %s7286_s9, 4  ;;  %s218_s11 = int_to_ptr.hbm [resolvable:$true] %s217_s11 }
  0x23   : > { %p7294_p5 = pnand %p4405_p3, %p224_p4  ;;  %s167_s12 = scalar_lea.sflag [#allocation3], %s7250_s25 }
  0x28   : > { %s175_s21 = scalar_lea.hbm %s8495_s1, %s6460_s10  ;;  %s7088_s30 = scalar_lea.hbm %s8495_s1, 16384 }
  0x29   : > { %s176_s26 = sshll.u32 %s175_s21, 4  ;;  %s177_s26 = int_to_ptr.hbm [resolvable:$true] %s176_s26 }
  0x2a   : > { %s7081_s28 = sshra.s32 %s177_s26, 4  ;;  %s7082_s28 = int_to_ptr.hbm [resolvable:$true] %s7081_s28 }
  0x2b   : > { %s7083_s6 = scalar_lea.hbm %s7082_s28, 4096  ;;  %p7089_p12 = scmp.lt.s32.totalorder %s7082_s28, %s8495_s1 }
  0x2c   : > { %p7084_p6 = scmp.ne.s32.totalorder %s7082_s28, %s7083_s6  ;;  %p7090_p13 = scmp.lt.s32.totalorder %s7088_s30, %s7083_s6 }
  0x2e   : > { %p7086_p9 = pnand %p7084_p6, %p7055_p10  ;;  %p7091_p0 = por %p7090_p13, %p7089_p12 }
  0x30   : > { %p7087_p11 = pneg %p7086_p9 }
  0x32   : > { %p7092_p1 = pnand %p7091_p0, %p7087_p11 }
  0x34   : > { %7095 = shalt.err (!%p7092_p1)
}
  0x35   : > { %s7181_s9 = smov 1024   ;;  %s7182_s14 = smov 256  }
  0x36   : > { %s7183_s15 = smov 16   ;;  %s211_s21 = scalar_lea.vmem [#allocation6], %s4401_s5 }
  0x37   : > { %6982 = dma.hbm_to_vmem [thread:$0]  (!%p7253_p8), %s177_s26, 65536, %s7258_s29, %s167_s12, %s7181_s9, %s7182_s14, %s7183_s15  }
  0x38   : > { %s219_s18 = sshll.u32 %s211_s21, 4  ;;  %s7111_s7 = sshra.s32 %s218_s11, 4  ;;  %s220_s18 = int_to_ptr.vmem [resolvable:$true] %s219_s18  ;;  %s7112_s7 = int_to_ptr.hbm [resolvable:$true] %s7111_s7 }
  0x39   : > { %s7113_s28 = scalar_lea.hbm %s7112_s7, 4  ;;  %s7118_s8 = scalar_lea.hbm %s8490_s3, 16 }
  0x3a   : > { %p7114_p2 = scmp.ne.s32.totalorder %s7112_s7, %s7113_s28  ;;  %p7119_p6 = scmp.lt.s32.totalorder %s7112_s7, %s8490_s3 }
  0x3b   : > { %p7120_p9 = scmp.lt.s32.totalorder %s7118_s8, %s7113_s28 }
  0x3c   : > { %p7116_p3 = pnand %p7114_p2, %p7055_p10 }
  0x3d   : > { %p7121_p11 = por %p7120_p9, %p7119_p6 }
  0x3e   : > { %p7117_p4 = pneg %p7116_p3 }
  0x40   : > { %p7122_p12 = pnand %p7121_p11, %p7117_p4 }
  0x42   : > { %7125 = shalt.err (!%p7122_p12)
}
  0x43   : > { %6988 = dma.hbm_to_vmem [thread:$0]  (!%p7253_p8), %s218_s11, 64, %s220_s18, %s7267_s13  }
  0x44   : > { %228 = sbr.rel (%p7294_p5) target bundleno = 746 (0x2ea), region = 36  ;;  %s7329_s25 = sand.u32 (!%p7294_p5), 1, %s7171_s16  }
  0x45   : > { %s4406_s29 = sshll.u32 (!%p7294_p5), %s7329_s25, 12  ;;  %s231_s1 = scalar_lea.sflag (!%p7294_p5), [#allocation3], %s7329_s25 }
  0x46   : > { %s7333_s5 = scalar_lea.vmem (!%p7294_p5), [#allocation2], %s4406_s29 }
  0x49   : > { %7158 = dma.done.wait (%p7245_p7), %s231_s1, 65536  }
  0x4a   : > { %7160 = vsyncadd (%p7245_p7), %s231_s1, 4294901760  ;;  %s240_s27 = sand.u32 1, %s7228_s19   ;;  %s4407_s13 = sshll.u32 %s7329_s25, 2 }
  0x4b   : > { %s241_s22 = scalar_lea.sflag [#allocation5], %s240_s27  ;;  %s7343_s26 = scalar_lea.vmem [#allocation4], %s4407_s13 }
  0x4c   : > { %7162 = dma.done.wait (%p7245_p7), %s241_s22, 128  }
  0x4d   : > { %7164 = vsyncadd (%p7245_p7), %s241_s22, 4294967168  ;;  %v4524_v0 = vld [vmem:[%s7333_s5 + $0xe0] sm:$0xf]  ;;  %v6491_v1 = vld [vmem:[%s7333_s5 + $0xec] sm:$0xf0]  ;;  %s8229_s14 = scalar_lea.vmem [#allocation6], %s4407_s13 }
  0x4e   : > { %v4652_v2 = vld [vmem:[%s7333_s5 + $0x1e0] sm:$0xf]  ;;  %v4525_v3 = vor.u32 %v6491_v1, %v4524_v0  ;;  %v6523_v4 = vld [vmem:[%s7333_s5 + $0x1ec] sm:$0xf0]  ;;  %s4409_s15 = sshll.u32 %s7228_s19, 2  ;;  %vm4278_vm0 = vcmask 1040384  }
  0x4f   : > { %v4780_v5 = vld [vmem:[%s7333_s5 + $0x2e0] sm:$0xf]  ;;  %v6555_v6 = vld [vmem:[%s7333_s5 + $0x2ec] sm:$0xf0]  ;;  %v4653_v7 = vor.u32 %v6523_v4, %v4652_v2  ;;  %p293_p7 = scmp.lt.s32.totalorder %s4409_s15, 15  ;;  %vm4282_vm1 = vcmask 1042434  }
  0x50   : > { %v4781_v8 = vor.u32 %v6555_v6, %v4780_v5  ;;  %v4908_v9 = vld [vmem:[%s7333_s5 + $0x3e0] sm:$0xf]  ;;  %v6587_v10 = vld [vmem:[%s7333_s5 + $0x3ec] sm:$0xf0]  ;;  %3407 = vmatpush.bf16.msra.mxu0 %v4525_v3  ;;  %vm4286_vm2 = vcmask 1041408  }
  0x51   : > { %v4508_v11 = vld [vmem:[%s7333_s5 + $0xc0] sm:$0xf]  ;;  %v4909_v12 = vor.u32 %v6587_v10, %v4908_v9  ;;  %v6487_v13 = vld [vmem:[%s7333_s5 + $0xcc] sm:$0xf0]  ;;  %3420 = vmatpush.bf16.msra.mxu1 %v4653_v7  ;;  %s8502_s15 = smov (!%p293_p7, %s4409_s15), 15 }
  0x52   : > { %v4636_v14 = vld [vmem:[%s7333_s5 + $0x1c0] sm:$0xf]  ;;  %v6519_v15 = vld [vmem:[%s7333_s5 + $0x1cc] sm:$0xf0]  ;;  %3433 = vmatpush.bf16.msra.mxu2 %v4781_v8  ;;  %v4509_v16 = vor.u32 %v6487_v13, %v4508_v11  ;;  %s295_s18 = scalar_lea.vmem %s8491_s4, %s8502_s15 }
  0x53   : > { %v4637_v17 = vor.u32 %v6519_v15, %v4636_v14  ;;  %v4764_v18 = vld [vmem:[%s7333_s5 + $0x2c0] sm:$0xf]  ;;  %v6551_v19 = vld [vmem:[%s7333_s5 + $0x2cc] sm:$0xf0]  ;;  %3446 = vmatpush.bf16.msra.mxu3 %v4909_v12 }
  0x54   : > { %v4892_v20 = vld [vmem:[%s7333_s5 + $0x3c0] sm:$0xf]  ;;  %v4765_v21 = vor.u32 %v6551_v19, %v4764_v18  ;;  %v6583_v22 = vld [vmem:[%s7333_s5 + $0x3cc] sm:$0xf0]  ;;  %3408 = vmatpush.bf16.msra.mxu0 %v4509_v16 }
  0x55   : > { %v4492_v23 = vld [vmem:[%s7333_s5 + $0xa0] sm:$0xf]  ;;  %v6483_v24 = vld [vmem:[%s7333_s5 + $0xac] sm:$0xf0]  ;;  %v4893_v25 = vor.u32 %v6583_v22, %v4892_v20  ;;  %3421 = vmatpush.bf16.msra.mxu1 %v4637_v17 }
  0x56   : > { %v4620_v26 = vld [vmem:[%s7333_s5 + $0x1a0] sm:$0xf]  ;;  %v6515_v27 = vld [vmem:[%s7333_s5 + $0x1ac] sm:$0xf0]  ;;  %v4493_v29 = vor.u32 %v6483_v24, %v4492_v23  ;;  %3434 = vmatpush.bf16.msra.mxu2 %v4765_v21 }
  0x57   : > { %v4748_v28 = vld [vmem:[%s7333_s5 + $0x2a0] sm:$0xf]  ;;  %v6547_v30 = vld [vmem:[%s7333_s5 + $0x2ac] sm:$0xf0]  ;;  %v4621_v33 = vor.u32 %v6515_v27, %v4620_v26  ;;  %3447 = vmatpush.bf16.msra.mxu3 %v4893_v25 }
  0x58   : > { %v4876_v31 = vld [vmem:[%s7333_s5 + $0x3a0] sm:$0xf]  ;;  %v6579_v32 = vld [vmem:[%s7333_s5 + $0x3ac] sm:$0xf0]  ;;  %v4749_v34 = vor.u32 %v6547_v30, %v4748_v28  ;;  %3409 = vmatpush.bf16.msra.mxu0 %v4493_v29 }
  0x59   : > { %v4476_v35 = vld [vmem:[%s7333_s5 + $0x80] sm:$0xf]  ;;  %v6479_v36 = vld [vmem:[%s7333_s5 + $0x8c] sm:$0xf0]  ;;  %v4877_v38 = vor.u32 %v6579_v32, %v4876_v31  ;;  %3422 = vmatpush.bf16.msra.mxu1 %v4621_v33 }
  0x5a   : > { %v4604_v37 = vld [vmem:[%s7333_s5 + $0x180] sm:$0xf]  ;;  %v6511_v39 = vld [vmem:[%s7333_s5 + $0x18c] sm:$0xf0]  ;;  %v4477_v44 = vor.u32 %v6479_v36, %v4476_v35  ;;  %3435 = vmatpush.bf16.msra.mxu2 %v4749_v34 }
  0x5b   : > { %v4732_v40 = vld [vmem:[%s7333_s5 + $0x280] sm:$0xf]  ;;  %v6543_v41 = vld [vmem:[%s7333_s5 + $0x28c] sm:$0xf0]  ;;  %v4605_v45 = vor.u32 %v6511_v39, %v4604_v37  ;;  %3448 = vmatpush.bf16.msra.mxu3 %v4877_v38 }
  0x5c   : > { %v4860_v42 = vld [vmem:[%s7333_s5 + $0x380] sm:$0xf]  ;;  %v6575_v43 = vld [vmem:[%s7333_s5 + $0x38c] sm:$0xf0]  ;;  %v4733_v46 = vor.u32 %v6543_v41, %v4732_v40  ;;  %3410 = vmatpush.bf16.msra.mxu0 %v4477_v44 }
  0x5d   : > { %v4460_v47 = vld [vmem:[%s7333_s5 + $0x60] sm:$0xf]  ;;  %v6475_v48 = vld [vmem:[%s7333_s5 + $0x6c] sm:$0xf0]  ;;  %v4861_v50 = vor.u32 %v6575_v43, %v4860_v42  ;;  %3423 = vmatpush.bf16.msra.mxu1 %v4605_v45 }
  0x5e   : > { %v4588_v49 = vld [vmem:[%s7333_s5 + $0x160] sm:$0xf]  ;;  %v6507_v51 = vld [vmem:[%s7333_s5 + $0x16c] sm:$0xf0]  ;;  %v4461_v56 = vor.u32 %v6475_v48, %v4460_v47  ;;  %3436 = vmatpush.bf16.msra.mxu2 %v4733_v46 }
  0x5f   : > { %v4716_v52 = vld [vmem:[%s7333_s5 + $0x260] sm:$0xf]  ;;  %v6539_v53 = vld [vmem:[%s7333_s5 + $0x26c] sm:$0xf0]  ;;  %v4589_v57 = vor.u32 %v6507_v51, %v4588_v49  ;;  %3449 = vmatpush.bf16.msra.mxu3 %v4861_v50 }
  0x60   : > { %v4844_v54 = vld [vmem:[%s7333_s5 + $0x360] sm:$0xf]  ;;  %v6571_v55 = vld [vmem:[%s7333_s5 + $0x36c] sm:$0xf0]  ;;  %v4717_v58 = vor.u32 %v6539_v53, %v4716_v52  ;;  %3411 = vmatpush.bf16.msra.mxu0 %v4461_v56 }
  0x61   : > { %v4444_v59 = vld [vmem:[%s7333_s5 + $0x40] sm:$0xf]  ;;  %v6471_v60 = vld [vmem:[%s7333_s5 + $0x4c] sm:$0xf0]  ;;  %v4845_v62 = vor.u32 %v6571_v55, %v4844_v54  ;;  %3424 = vmatpush.bf16.msra.mxu1 %v4589_v57 }
  0x62   : > { %v4572_v61 = vld [vmem:[%s7333_s5 + $0x140] sm:$0xf]  ;;  %v6503_v63 = vld [vmem:[%s7333_s5 + $0x14c] sm:$0xf0]  ;;  %v4445_v4 = vor.u32 %v6471_v60, %v4444_v59  ;;  %3437 = vmatpush.bf16.msra.mxu2 %v4717_v58  ;;  %v297_v59 = vld [vmem:[%s8487_s0] sm:$0xff] }
  0x63   : > { %v4700_v0 = vld [vmem:[%s7333_s5 + $0x240] sm:$0xf]  ;;  %v6535_v1 = vld [vmem:[%s7333_s5 + $0x24c] sm:$0xf0]  ;;  %v4573_v5 = vor.u32 %v6503_v63, %v4572_v61  ;;  %3450 = vmatpush.bf16.msra.mxu3 %v4845_v62  ;;  %812 = vst [vmem:[#allocation1] ss:$9 sm:$0xff] %v297_v59 }
  0x64   : > { %v4828_v2 = vld [vmem:[%s7333_s5 + $0x340] sm:$0xf]  ;;  %v6567_v3 = vld [vmem:[%s7333_s5 + $0x34c] sm:$0xf0]  ;;  %v4701_v6 = vor.u32 %v6535_v1, %v4700_v0  ;;  %3412 = vmatpush.bf16.msra.mxu0 %v4445_v4 }
  0x65   : > { %v4428_v7 = vld [vmem:[%s7333_s5 + $0x20] sm:$0xf]  ;;  %v6467_v8 = vld [vmem:[%s7333_s5 + $0x2c] sm:$0xf0]  ;;  %v4829_v10 = vor.u32 %v6567_v3, %v4828_v2  ;;  %3425 = vmatpush.bf16.msra.mxu1 %v4573_v5 }
  0x66   : > { %v4556_v9 = vld [vmem:[%s7333_s5 + $0x120] sm:$0xf]  ;;  %v6499_v11 = vld [vmem:[%s7333_s5 + $0x12c] sm:$0xf0]  ;;  %v4429_v16 = vor.u32 %v6467_v8, %v4428_v7  ;;  %3438 = vmatpush.bf16.msra.mxu2 %v4701_v6 }
  0x67   : > { %v4684_v12 = vld [vmem:[%s7333_s5 + $0x220] sm:$0xf]  ;;  %v6531_v13 = vld [vmem:[%s7333_s5 + $0x22c] sm:$0xf0]  ;;  %v4557_v19 = vor.u32 %v6499_v11, %v4556_v9  ;;  %3451 = vmatpush.bf16.msra.mxu3 %v4829_v10 }
  0x68   : > { %v4812_v14 = vld [vmem:[%s7333_s5 + $0x320] sm:$0xf]  ;;  %v6563_v15 = vld [vmem:[%s7333_s5 + $0x32c] sm:$0xf0]  ;;  %v4685_v20 = vor.u32 %v6531_v13, %v4684_v12  ;;  %3413 = vmatpush.bf16.msra.mxu0 %v4429_v16 }
  0x69   : > { %v4412_v17 = vld [vmem:[%s7333_s5] sm:$0xf]  ;;  %v6463_v18 = vld [vmem:[%s7333_s5 + $0xc] sm:$0xf0]  ;;  %v4813_v24 = vor.u32 %v6563_v15, %v4812_v14  ;;  %3426 = vmatpush.bf16.msra.mxu1 %v4557_v19 }
  0x6a   : > { %v4540_v21 = vld [vmem:[%s7333_s5 + $0x100] sm:$0xf]  ;;  %v6495_v22 = vld [vmem:[%s7333_s5 + $0x10c] sm:$0xf0]  ;;  %v4413_v31 = vor.u32 %v6463_v18, %v4412_v17  ;;  %3439 = vmatpush.bf16.msra.mxu2 %v4685_v20 }
  0x6b   : > { %v4668_v23 = vld [vmem:[%s7333_s5 + $0x200] sm:$0xf]  ;;  %v6527_v25 = vld [vmem:[%s7333_s5 + $0x20c] sm:$0xf0]  ;;  %v4541_v35 = vor.u32 %v6495_v22, %v4540_v21  ;;  %3452 = vmatpush.bf16.msra.mxu3 %v4813_v24  ;;  %v7454_v21 = vld [vmem:[#allocation1] sm:$0xff] }
  0x6c   : > { %v4796_v26 = vld [vmem:[%s7333_s5 + $0x300] sm:$0xf]  ;;  %v6559_v27 = vld [vmem:[%s7333_s5 + $0x30c] sm:$0xf0]  ;;  %v4669_v36 = vor.u32 %v6527_v25, %v4668_v23  ;;  %3414 = vmatpush.bf16.msra.mxu0 %v4413_v31 }
  0x6d   : > { %v5036_v28 = vld [vmem:[%s7333_s5 + $0x4e0] sm:$0xf]  ;;  %v6619_v29 = vld [vmem:[%s7333_s5 + $0x4ec] sm:$0xf0]  ;;  %v4797_v39 = vor.u32 %v6559_v27, %v4796_v26  ;;  %3427 = vmatpush.bf16.msra.mxu1 %v4541_v35 }
  0x6e   : > { %v5164_v30 = vld [vmem:[%s7333_s5 + $0x5e0] sm:$0xf]  ;;  %v6651_v32 = vld [vmem:[%s7333_s5 + $0x5ec] sm:$0xf0]  ;;  %v5037_v40 = vor.u32 %v6619_v29, %v5036_v28  ;;  %3440 = vmatpush.bf16.msra.mxu2 %v4669_v36 }
  0x6f   : > { %v5292_v33 = vld [vmem:[%s7333_s5 + $0x6e0] sm:$0xf]  ;;  %v6683_v34 = vld [vmem:[%s7333_s5 + $0x6ec] sm:$0xf0]  ;;  %v5165_v41 = vor.u32 %v6651_v32, %v5164_v30  ;;  %3453 = vmatpush.bf16.msra.mxu3 %v4797_v39  ;;  %3415 = vmatmul.bf16.vlgmr.msra.gmra.mxu0 %v7454_v21 }
  0x70   : > { %v5420_v37 = vld [vmem:[%s7333_s5 + $0x7e0] sm:$0xf]  ;;  %v6715_v38 = vld [vmem:[%s7333_s5 + $0x7ec] sm:$0xf0]  ;;  %v5293_v42 = vor.u32 %v6683_v34, %v5292_v33  ;;  %3459 = vmatpush.bf16.msrb.mxu0 %v5037_v40 }
  0x71   : > { %v5020_v43 = vld [vmem:[%s7333_s5 + $0x4c0] sm:$0xf]  ;;  %v6615_v44 = vld [vmem:[%s7333_s5 + $0x4cc] sm:$0xf0]  ;;  %v5421_v46 = vor.u32 %v6715_v38, %v5420_v37  ;;  %3472 = vmatpush.bf16.msrb.mxu1 %v5165_v41 }
  0x72   : > { %v5148_v45 = vld [vmem:[%s7333_s5 + $0x5c0] sm:$0xf]  ;;  %v6647_v47 = vld [vmem:[%s7333_s5 + $0x5cc] sm:$0xf0]  ;;  %v5021_v52 = vor.u32 %v6615_v44, %v5020_v43  ;;  %3485 = vmatpush.bf16.msrb.mxu2 %v5293_v42 }
  0x73   : > { %v5276_v48 = vld [vmem:[%s7333_s5 + $0x6c0] sm:$0xf]  ;;  %v6679_v49 = vld [vmem:[%s7333_s5 + $0x6cc] sm:$0xf0]  ;;  %v5149_v55 = vor.u32 %v6647_v47, %v5148_v45  ;;  %3498 = vmatpush.bf16.msrb.mxu3 %v5421_v46 }
  0x74   : > { %v5404_v50 = vld [vmem:[%s7333_s5 + $0x7c0] sm:$0xf]  ;;  %v6711_v51 = vld [vmem:[%s7333_s5 + $0x7cc] sm:$0xf0]  ;;  %v5277_v56 = vor.u32 %v6679_v49, %v5276_v48  ;;  %3460 = vmatpush.bf16.msrb.mxu0 %v5021_v52 }
  0x75   : > { %v5004_v53 = vld [vmem:[%s7333_s5 + $0x4a0] sm:$0xf]  ;;  %v6611_v54 = vld [vmem:[%s7333_s5 + $0x4ac] sm:$0xf0]  ;;  %v5405_v60 = vor.u32 %v6711_v51, %v5404_v50  ;;  %3473 = vmatpush.bf16.msrb.mxu1 %v5149_v55 }
  0x76   : > { %v5132_v57 = vld [vmem:[%s7333_s5 + $0x5a0] sm:$0xf]  ;;  %v6643_v58 = vld [vmem:[%s7333_s5 + $0x5ac] sm:$0xf0]  ;;  %v5005_v1 = vor.u32 %v6611_v54, %v5004_v53  ;;  %3486 = vmatpush.bf16.msrb.mxu2 %v5277_v56 }
  0x77   : > { %v5260_v61 = vld [vmem:[%s7333_s5 + $0x6a0] sm:$0xf]  ;;  %v6675_v62 = vld [vmem:[%s7333_s5 + $0x6ac] sm:$0xf0]  ;;  %v5133_v2 = vor.u32 %v6643_v58, %v5132_v57  ;;  %3499 = vmatpush.bf16.msrb.mxu3 %v5405_v60 }
  0x78   : > { %v5388_v63 = vld [vmem:[%s7333_s5 + $0x7a0] sm:$0xf]  ;;  %v6707_v0 = vld [vmem:[%s7333_s5 + $0x7ac] sm:$0xf0]  ;;  %v5261_v3 = vor.u32 %v6675_v62, %v5260_v61  ;;  %3461 = vmatpush.bf16.msrb.mxu0 %v5005_v1 }
  0x79   : > { %v4988_v4 = vld [vmem:[%s7333_s5 + $0x480] sm:$0xf]  ;;  %v6607_v5 = vld [vmem:[%s7333_s5 + $0x48c] sm:$0xf0]  ;;  %v5389_v7 = vor.u32 %v6707_v0, %v5388_v63  ;;  %3474 = vmatpush.bf16.msrb.mxu1 %v5133_v2 }
  0x7a   : > { %v5116_v6 = vld [vmem:[%s7333_s5 + $0x580] sm:$0xf]  ;;  %v6639_v8 = vld [vmem:[%s7333_s5 + $0x58c] sm:$0xf0]  ;;  %v4989_v14 = vor.u32 %v6607_v5, %v4988_v4  ;;  %3487 = vmatpush.bf16.msrb.mxu2 %v5261_v3 }
  0x7b   : > { %v5244_v9 = vld [vmem:[%s7333_s5 + $0x680] sm:$0xf]  ;;  %v6671_v10 = vld [vmem:[%s7333_s5 + $0x68c] sm:$0xf0]  ;;  %v5117_v18 = vor.u32 %v6639_v8, %v5116_v6  ;;  %3500 = vmatpush.bf16.msrb.mxu3 %v5389_v7 }
  0x7c   : > { %v5372_v11 = vld [vmem:[%s7333_s5 + $0x780] sm:$0xf]  ;;  %v6703_v12 = vld [vmem:[%s7333_s5 + $0x78c] sm:$0xf0]  ;;  %v5245_v19 = vor.u32 %v6671_v10, %v5244_v9  ;;  %3462 = vmatpush.bf16.msrb.mxu0 %v4989_v14 }
  0x7d   : > { %v4972_v13 = vld [vmem:[%s7333_s5 + $0x460] sm:$0xf]  ;;  %v6603_v15 = vld [vmem:[%s7333_s5 + $0x46c] sm:$0xf0]  ;;  %v5373_v23 = vor.u32 %v6703_v12, %v5372_v11  ;;  %3475 = vmatpush.bf16.msrb.mxu1 %v5117_v18 }
  0x7e   : > { %v5100_v16 = vld [vmem:[%s7333_s5 + $0x560] sm:$0xf]  ;;  %v6635_v17 = vld [vmem:[%s7333_s5 + $0x56c] sm:$0xf0]  ;;  %v4973_v29 = vor.u32 %v6603_v15, %v4972_v13  ;;  %3488 = vmatpush.bf16.msrb.mxu2 %v5245_v19 }
  0x7f   : > { %v7452_v20 = vld [vmem:[#allocation1 + $0x12] sm:$0xff]  ;;  %v7456_v22 = vld [vmem:[#allocation1 + $0x1b] sm:$0xff]  ;;  %v5228_v24 = vld [vmem:[%s7333_s5 + $0x660] sm:$0xf]  ;;  %v5101_v30 = vor.u32 %v6635_v17, %v5100_v16  ;;  %3501 = vmatpush.bf16.msrb.mxu3 %v5373_v23 }
  0x80   : > { %v6667_v25 = vld [vmem:[%s7333_s5 + $0x66c] sm:$0xf0]  ;;  %3441 = vmatmul.bf16.vlgmr.msra.gmra.mxu2 %v7452_v20  ;;  %v7461_v26 = vld [vmem:[#allocation1 + $0x9] sm:$0xff]  ;;  %3454 = vmatmul.bf16.vlgmr.msra.gmra.mxu3 %v7456_v22 }
  0x81   : > { %v5356_v27 = vld [vmem:[%s7333_s5 + $0x760] sm:$0xf]  ;;  %v6699_v28 = vld [vmem:[%s7333_s5 + $0x76c] sm:$0xf0]  ;;  %3428 = vmatmul.bf16.vlgmr.msra.gmra.mxu1 %v7461_v26  ;;  %v5229_v31 = vor.u32 %v6667_v25, %v5228_v24  ;;  %3463 = vmatpush.bf16.msrb.mxu0 %v4973_v29 }
  0x82   : > { %v4956_v32 = vld [vmem:[%s7333_s5 + $0x440] sm:$0xf]  ;;  %v6599_v33 = vld [vmem:[%s7333_s5 + $0x44c] sm:$0xf0]  ;;  %v5357_v35 = vor.u32 %v6699_v28, %v5356_v27  ;;  %3476 = vmatpush.bf16.msrb.mxu1 %v5101_v30 }
  0x83   : > { %v5084_v34 = vld [vmem:[%s7333_s5 + $0x540] sm:$0xf]  ;;  %v6631_v36 = vld [vmem:[%s7333_s5 + $0x54c] sm:$0xf0]  ;;  %v4957_v41 = vor.u32 %v6599_v33, %v4956_v32  ;;  %3489 = vmatpush.bf16.msrb.mxu2 %v5229_v31  ;;  %v7512_v32 = vld [vmem:[#allocation1 + $0x3f] sm:$0xff] }
  0x84   : > { %v5212_v37 = vld [vmem:[%s7333_s5 + $0x640] sm:$0xf]  ;;  %v6663_v38 = vld [vmem:[%s7333_s5 + $0x64c] sm:$0xf0]  ;;  %v5085_v42 = vor.u32 %v6631_v36, %v5084_v34  ;;  %3502 = vmatpush.bf16.msrb.mxu3 %v5357_v35 }
  0x85   : > { %v5340_v39 = vld [vmem:[%s7333_s5 + $0x740] sm:$0xf]  ;;  %v6695_v40 = vld [vmem:[%s7333_s5 + $0x74c] sm:$0xf0]  ;;  %v5213_v43 = vor.u32 %v6663_v38, %v5212_v37  ;;  %3464 = vmatpush.bf16.msrb.mxu0 %v4957_v41  ;;  %v7517_v38 = vld [vmem:[#allocation1 + $0x2d] sm:$0xff] }
  0x86   : > { %v4940_v44 = vld [vmem:[%s7333_s5 + $0x420] sm:$0xf]  ;;  %v6595_v45 = vld [vmem:[%s7333_s5 + $0x42c] sm:$0xf0]  ;;  %v5341_v47 = vor.u32 %v6695_v40, %v5340_v39  ;;  %3477 = vmatpush.bf16.msrb.mxu1 %v5085_v42 }
  0x87   : > { %v5068_v46 = vld [vmem:[%s7333_s5 + $0x520] sm:$0xf]  ;;  %v6627_v48 = vld [vmem:[%s7333_s5 + $0x52c] sm:$0xf0]  ;;  %v4941_v53 = vor.u32 %v6595_v45, %v4940_v44  ;;  %3490 = vmatpush.bf16.msrb.mxu2 %v5213_v43 }
  0x88   : > { %v5196_v49 = vld [vmem:[%s7333_s5 + $0x620] sm:$0xf]  ;;  %v6659_v50 = vld [vmem:[%s7333_s5 + $0x62c] sm:$0xf0]  ;;  %v5069_v56 = vor.u32 %v6627_v48, %v5068_v46  ;;  %3503 = vmatpush.bf16.msrb.mxu3 %v5341_v47 }
  0x89   : > { %v5324_v51 = vld [vmem:[%s7333_s5 + $0x720] sm:$0xf]  ;;  %v6691_v52 = vld [vmem:[%s7333_s5 + $0x72c] sm:$0xf0]  ;;  %v5197_v57 = vor.u32 %v6659_v50, %v5196_v49  ;;  %3465 = vmatpush.bf16.msrb.mxu0 %v4941_v53 }
  0x8a   : > { %v4924_v54 = vld [vmem:[%s7333_s5 + $0x400] sm:$0xf]  ;;  %v6591_v55 = vld [vmem:[%s7333_s5 + $0x40c] sm:$0xf0]  ;;  %v5325_v61 = vor.u32 %v6691_v52, %v5324_v51  ;;  %3478 = vmatpush.bf16.msrb.mxu1 %v5069_v56 }
  0x8b   : > { %v5052_v58 = vld [vmem:[%s7333_s5 + $0x500] sm:$0xf]  ;;  %v6623_v59 = vld [vmem:[%s7333_s5 + $0x50c] sm:$0xf0]  ;;  %v4925_v4 = vor.u32 %v6591_v55, %v4924_v54  ;;  %3491 = vmatpush.bf16.msrb.mxu2 %v5197_v57 }
  0x8c   : > { %v5180_v60 = vld [vmem:[%s7333_s5 + $0x600] sm:$0xf]  ;;  %v6655_v62 = vld [vmem:[%s7333_s5 + $0x60c] sm:$0xf0]  ;;  %v5053_v8 = vor.u32 %v6623_v59, %v5052_v58  ;;  %3504 = vmatpush.bf16.msrb.mxu3 %v5325_v61 }
  0x8d   : > { %v5308_v63 = vld [vmem:[%s7333_s5 + $0x700] sm:$0xf]  ;;  %v6687_v0 = vld [vmem:[%s7333_s5 + $0x70c] sm:$0xf0]  ;;  %v5181_v9 = vor.u32 %v6655_v62, %v5180_v60  ;;  %3466 = vmatpush.bf16.msrb.mxu0 %v4925_v4 }
  0x8e   : > { %v5548_v1 = vld [vmem:[%s7333_s5 + $0x8e0] sm:$0xf]  ;;  %v6747_v2 = vld [vmem:[%s7333_s5 + $0x8ec] sm:$0xf0]  ;;  %v5309_v12 = vor.u32 %v6687_v0, %v5308_v63  ;;  %3479 = vmatpush.bf16.msrb.mxu1 %v5053_v8 }
  0x8f   : > { %v5676_v3 = vld [vmem:[%s7333_s5 + $0x9e0] sm:$0xf]  ;;  %v6779_v5 = vld [vmem:[%s7333_s5 + $0x9ec] sm:$0xf0]  ;;  %v5549_v13 = vor.u32 %v6747_v2, %v5548_v1  ;;  %3492 = vmatpush.bf16.msrb.mxu2 %v5181_v9 }
  0x90   : > { %v5804_v6 = vld [vmem:[%s7333_s5 + $0xae0] sm:$0xf]  ;;  %v6811_v7 = vld [vmem:[%s7333_s5 + $0xaec] sm:$0xf0]  ;;  %v5677_v14 = vor.u32 %v6779_v5, %v5676_v3  ;;  %3505 = vmatpush.bf16.msrb.mxu3 %v5309_v12 }
  0x91   : > { %v5932_v10 = vld [vmem:[%s7333_s5 + $0xbe0] sm:$0xf]  ;;  %v6843_v11 = vld [vmem:[%s7333_s5 + $0xbec] sm:$0xf0]  ;;  %v5805_v15 = vor.u32 %v6811_v7, %v5804_v6  ;;  %3511 = vmatpush.bf16.msra.mxu0 %v5549_v13  ;;  %3480 = vmatmul.bf16.vlgmr.msrb.gmra.mxu1 %v7517_v38 }
  0x92   : > { %v5532_v16 = vld [vmem:[%s7333_s5 + $0x8c0] sm:$0xf]  ;;  %v6743_v17 = vld [vmem:[%s7333_s5 + $0x8cc] sm:$0xf0]  ;;  %v5933_v19 = vor.u32 %v6843_v11, %v5932_v10  ;;  %3524 = vmatpush.bf16.msra.mxu1 %v5677_v14 }
  0x93   : > { %v5660_v18 = vld [vmem:[%s7333_s5 + $0x9c0] sm:$0xf]  ;;  %v6775_v23 = vld [vmem:[%s7333_s5 + $0x9cc] sm:$0xf0]  ;;  %v5533_v30 = vor.u32 %v6743_v17, %v5532_v16  ;;  %3537 = vmatpush.bf16.msra.mxu2 %v5805_v15  ;;  %3506 = vmatmul.bf16.vlgmr.msrb.gmra.mxu3 %v7512_v32 }
  0x94   : > { %v5788_v24 = vld [vmem:[%s7333_s5 + $0xac0] sm:$0xf]  ;;  %v6807_v25 = vld [vmem:[%s7333_s5 + $0xacc] sm:$0xf0]  ;;  %v5661_v34 = vor.u32 %v6775_v23, %v5660_v18  ;;  %3550 = vmatpush.bf16.msra.mxu3 %v5933_v19 }
  0x95   : > { %v5916_v27 = vld [vmem:[%s7333_s5 + $0xbc0] sm:$0xf]  ;;  %v6839_v28 = vld [vmem:[%s7333_s5 + $0xbcc] sm:$0xf0]  ;;  %v5789_v35 = vor.u32 %v6807_v25, %v5788_v24  ;;  %3512 = vmatpush.bf16.msra.mxu0 %v5533_v30 }
  0x96   : > { %v7508_v29 = vld [vmem:[#allocation1 + $0x36] sm:$0xff]  ;;  %v7510_v31 = vld [vmem:[#allocation1 + $0x24] sm:$0xff]  ;;  %v5917_v39 = vor.u32 %v6839_v28, %v5916_v27  ;;  %3525 = vmatpush.bf16.msra.mxu1 %v5661_v34 }
  0x97   : > { %v5516_v33 = vld [vmem:[%s7333_s5 + $0x8a0] sm:$0xf]  ;;  %v6739_v36 = vld [vmem:[%s7333_s5 + $0x8ac] sm:$0xf0]  ;;  %3493 = vmatmul.bf16.vlgmr.msrb.gmra.mxu2 %v7508_v29  ;;  %3467 = vmatmul.bf16.vlgmr.msrb.gmra.mxu0 %v7510_v31 }
  0x98   : > { %v5644_v37 = vld [vmem:[%s7333_s5 + $0x9a0] sm:$0xf]  ;;  %v6771_v40 = vld [vmem:[%s7333_s5 + $0x9ac] sm:$0xf0]  ;;  %v5517_v45 = vor.u32 %v6739_v36, %v5516_v33  ;;  %3538 = vmatpush.bf16.msra.mxu2 %v5789_v35  ;;  %3551 = vmatpush.bf16.msra.mxu3 %v5917_v39 }
  0x99   : > { %v5772_v41 = vld [vmem:[%s7333_s5 + $0xaa0] sm:$0xf]  ;;  %v6803_v42 = vld [vmem:[%s7333_s5 + $0xaac] sm:$0xf0]  ;;  %v5645_v46 = vor.u32 %v6771_v40, %v5644_v37 }
  0x9a   : > { %v5900_v43 = vld [vmem:[%s7333_s5 + $0xba0] sm:$0xf]  ;;  %v6835_v44 = vld [vmem:[%s7333_s5 + $0xbac] sm:$0xf0]  ;;  %v5773_v47 = vor.u32 %v6803_v42, %v5772_v41  ;;  %3513 = vmatpush.bf16.msra.mxu0 %v5517_v45 }
  0x9b   : > { %v5500_v48 = vld [vmem:[%s7333_s5 + $0x880] sm:$0xf]  ;;  %v6735_v49 = vld [vmem:[%s7333_s5 + $0x88c] sm:$0xf0]  ;;  %v5901_v51 = vor.u32 %v6835_v44, %v5900_v43  ;;  %3526 = vmatpush.bf16.msra.mxu1 %v5645_v46 }
  0x9c   : > { %v5628_v50 = vld [vmem:[%s7333_s5 + $0x980] sm:$0xf]  ;;  %v6767_v52 = vld [vmem:[%s7333_s5 + $0x98c] sm:$0xf0]  ;;  %v5501_v58 = vor.u32 %v6735_v49, %v5500_v48  ;;  %3539 = vmatpush.bf16.msra.mxu2 %v5773_v47 }
  0x9d   : > { %v5756_v53 = vld [vmem:[%s7333_s5 + $0xa80] sm:$0xf]  ;;  %v6799_v54 = vld [vmem:[%s7333_s5 + $0xa8c] sm:$0xf0]  ;;  %v5629_v59 = vor.u32 %v6767_v52, %v5628_v50  ;;  %3552 = vmatpush.bf16.msra.mxu3 %v5901_v51 }
  0x9e   : > { %v5884_v55 = vld [vmem:[%s7333_s5 + $0xb80] sm:$0xf]  ;;  %v6831_v56 = vld [vmem:[%s7333_s5 + $0xb8c] sm:$0xf0]  ;;  %v5757_v60 = vor.u32 %v6799_v54, %v5756_v53  ;;  %3514 = vmatpush.bf16.msra.mxu0 %v5501_v58 }
  0x9f   : > { %v298_v57 = vld [vmem:[%s8487_s0 + $0x8] sm:$0xff]  ;;  %v6731_v62 = vld [vmem:[%s7333_s5 + $0x86c] sm:$0xf0]  ;;  %v5885_v0 = vor.u32 %v6831_v56, %v5884_v55  ;;  %3527 = vmatpush.bf16.msra.mxu1 %v5629_v59 }
  0xa0   : > { %822 = vst [vmem:[#allocation1] ss:$9 sm:$0xff] %v298_v57  ;;  %v5484_v61 = vld [vmem:[%s7333_s5 + $0x860] sm:$0xf]  ;;  %v6763_v1 = vld [vmem:[%s7333_s5 + $0x96c] sm:$0xf0]  ;;  %3540 = vmatpush.bf16.msra.mxu2 %v5757_v60 }
  0xa1   : > { %v5612_v63 = vld [vmem:[%s7333_s5 + $0x960] sm:$0xf]  ;;  %v6795_v3 = vld [vmem:[%s7333_s5 + $0xa6c] sm:$0xf0]  ;;  %v5485_v6 = vor.u32 %v6731_v62, %v5484_v61  ;;  %3553 = vmatpush.bf16.msra.mxu3 %v5885_v0 }
  0xa2   : > { %v5740_v2 = vld [vmem:[%s7333_s5 + $0xa60] sm:$0xf]  ;;  %v6827_v5 = vld [vmem:[%s7333_s5 + $0xb6c] sm:$0xf0]  ;;  %v5613_v7 = vor.u32 %v6763_v1, %v5612_v63 }
  0xa3   : > { %v5868_v4 = vld [vmem:[%s7333_s5 + $0xb60] sm:$0xf]  ;;  %v5741_v8 = vor.u32 %v6795_v3, %v5740_v2  ;;  %v6727_v10 = vld [vmem:[%s7333_s5 + $0x84c] sm:$0xf0]  ;;  %3515 = vmatpush.bf16.msra.mxu0 %v5485_v6 }
  0xa4   : > { %v5468_v9 = vld [vmem:[%s7333_s5 + $0x840] sm:$0xf]  ;;  %v5869_v12 = vor.u32 %v6827_v5, %v5868_v4  ;;  %v6759_v13 = vld [vmem:[%s7333_s5 + $0x94c] sm:$0xf0]  ;;  %3528 = vmatpush.bf16.msra.mxu1 %v5613_v7 }
  0xa5   : > { %v5596_v11 = vld [vmem:[%s7333_s5 + $0x940] sm:$0xf]  ;;  %v6791_v15 = vld [vmem:[%s7333_s5 + $0xa4c] sm:$0xf0]  ;;  %v5469_v18 = vor.u32 %v6727_v10, %v5468_v9  ;;  %3541 = vmatpush.bf16.msra.mxu2 %v5741_v8 }
  0xa6   : > { %v5724_v14 = vld [vmem:[%s7333_s5 + $0xa40] sm:$0xf]  ;;  %v6823_v17 = vld [vmem:[%s7333_s5 + $0xb4c] sm:$0xf0]  ;;  %v5597_v19 = vor.u32 %v6759_v13, %v5596_v11  ;;  %3554 = vmatpush.bf16.msra.mxu3 %v5869_v12 }
  0xa7   : > { %v5852_v16 = vld [vmem:[%s7333_s5 + $0xb40] sm:$0xf]  ;;  %v5725_v23 = vor.u32 %v6791_v15, %v5724_v14  ;;  %v6723_v25 = vld [vmem:[%s7333_s5 + $0x82c] sm:$0xf0]  ;;  %3516 = vmatpush.bf16.msra.mxu0 %v5469_v18  ;;  %v823_v8 = vld [vmem:[#allocation1] sm:$0xff] }
  0xa8   : > { %v5452_v24 = vld [vmem:[%s7333_s5 + $0x820] sm:$0xf]  ;;  %v5853_v28 = vor.u32 %v6823_v17, %v5852_v16  ;;  %v6755_v30 = vld [vmem:[%s7333_s5 + $0x92c] sm:$0xf0]  ;;  %3529 = vmatpush.bf16.msra.mxu1 %v5597_v19 }
  0xa9   : > { %v5580_v27 = vld [vmem:[%s7333_s5 + $0x920] sm:$0xf]  ;;  %v6787_v34 = vld [vmem:[%s7333_s5 + $0xa2c] sm:$0xf0]  ;;  %v5453_v37 = vor.u32 %v6723_v25, %v5452_v24  ;;  %3542 = vmatpush.bf16.msra.mxu2 %v5725_v23 }
  0xaa   : > { %v5708_v33 = vld [vmem:[%s7333_s5 + $0xa20] sm:$0xf]  ;;  %v6819_v36 = vld [vmem:[%s7333_s5 + $0xb2c] sm:$0xf0]  ;;  %v5581_v41 = vor.u32 %v6755_v30, %v5580_v27  ;;  %3555 = vmatpush.bf16.msra.mxu3 %v5853_v28 }
  0xab   : > { %v5836_v35 = vld [vmem:[%s7333_s5 + $0xb20] sm:$0xf]  ;;  %v6719_v40 = vld [vmem:[%s7333_s5 + $0x80c] sm:$0xf0]  ;;  %v5709_v42 = vor.u32 %v6787_v34, %v5708_v33  ;;  %3517 = vmatpush.bf16.msra.mxu0 %v5453_v37 }
  0xac   : > { %v5436_v39 = vld [vmem:[%s7333_s5 + $0x800] sm:$0xf]  ;;  %v6751_v44 = vld [vmem:[%s7333_s5 + $0x90c] sm:$0xf0]  ;;  %v5837_v46 = vor.u32 %v6819_v36, %v5836_v35  ;;  %3530 = vmatpush.bf16.msra.mxu1 %v5581_v41 }
  0xad   : > { %v5564_v43 = vld [vmem:[%s7333_s5 + $0x900] sm:$0xf]  ;;  %v6783_v47 = vld [vmem:[%s7333_s5 + $0xa0c] sm:$0xf0]  ;;  %v5437_v53 = vor.u32 %v6719_v40, %v5436_v39  ;;  %3543 = vmatpush.bf16.msra.mxu2 %v5709_v42 }
  0xae   : > { %v5692_v45 = vld [vmem:[%s7333_s5 + $0xa00] sm:$0xf]  ;;  %v6815_v49 = vld [vmem:[%s7333_s5 + $0xb0c] sm:$0xf0]  ;;  %v5565_v57 = vor.u32 %v6751_v44, %v5564_v43  ;;  %3556 = vmatpush.bf16.msra.mxu3 %v5837_v46 }
  0xaf   : > { %v5820_v48 = vld [vmem:[%s7333_s5 + $0xb00] sm:$0xf]  ;;  %v6875_v51 = vld [vmem:[%s7333_s5 + $0xcec] sm:$0xf0]  ;;  %v5693_v58 = vor.u32 %v6783_v47, %v5692_v45  ;;  %3518 = vmatpush.bf16.msra.mxu0 %v5437_v53 }
  0xb0   : > { %v6060_v50 = vld [vmem:[%s7333_s5 + $0xce0] sm:$0xf]  ;;  %v6907_v54 = vld [vmem:[%s7333_s5 + $0xdec] sm:$0xf0]  ;;  %v5821_v61 = vor.u32 %v6815_v49, %v5820_v48  ;;  %3531 = vmatpush.bf16.msra.mxu1 %v5565_v57 }
  0xb1   : > { %v6188_v52 = vld [vmem:[%s7333_s5 + $0xde0] sm:$0xf]  ;;  %v6939_v56 = vld [vmem:[%s7333_s5 + $0xeec] sm:$0xf0]  ;;  %v6061_v62 = vor.u32 %v6875_v51, %v6060_v50  ;;  %3544 = vmatpush.bf16.msra.mxu2 %v5693_v58 }
  0xb2   : > { %v6316_v55 = vld [vmem:[%s7333_s5 + $0xee0] sm:$0xf]  ;;  %v6971_v60 = vld [vmem:[%s7333_s5 + $0xfec] sm:$0xf0]  ;;  %v6189_v63 = vor.u32 %v6907_v54, %v6188_v52  ;;  %3557 = vmatpush.bf16.msra.mxu3 %v5821_v61  ;;  %3519 = vmatmul.bf16.vlgmr.msra.gmra.mxu0 %v823_v8 }
  0xb3   : > { %v6444_v59 = vld [vmem:[%s7333_s5 + $0xfe0] sm:$0xf]  ;;  %v6317_v0 = vor.u32 %v6939_v56, %v6316_v55  ;;  %v6871_v2 = vld [vmem:[%s7333_s5 + $0xccc] sm:$0xf0]  ;;  %3563 = vmatpush.bf16.msrb.mxu0 %v6061_v62 }
  0xb4   : > { %v6044_v1 = vld [vmem:[%s7333_s5 + $0xcc0] sm:$0xf]  ;;  %v6445_v4 = vor.u32 %v6971_v60, %v6444_v59  ;;  %v6903_v5 = vld [vmem:[%s7333_s5 + $0xdcc] sm:$0xf0]  ;;  %3576 = vmatpush.bf16.msrb.mxu1 %v6189_v63 }
  0xb5   : > { %v6172_v3 = vld [vmem:[%s7333_s5 + $0xdc0] sm:$0xf]  ;;  %v6935_v7 = vld [vmem:[%s7333_s5 + $0xecc] sm:$0xf0]  ;;  %v6045_v13 = vor.u32 %v6871_v2, %v6044_v1  ;;  %3589 = vmatpush.bf16.msrb.mxu2 %v6317_v0 }
  0xb6   : > { %v6300_v6 = vld [vmem:[%s7333_s5 + $0xec0] sm:$0xf]  ;;  %v6967_v10 = vld [vmem:[%s7333_s5 + $0xfcc] sm:$0xf0]  ;;  %v6173_v16 = vor.u32 %v6903_v5, %v6172_v3  ;;  %3602 = vmatpush.bf16.msrb.mxu3 %v6445_v4 }
  0xb7   : > { %v6428_v9 = vld [vmem:[%s7333_s5 + $0xfc0] sm:$0xf]  ;;  %v825_v11 = vld [vmem:[#allocation1 + $0x12] sm:$0xff]  ;;  %v826_v15 = vld [vmem:[#allocation1 + $0x1b] sm:$0xff]  ;;  %v6301_v17 = vor.u32 %v6935_v7, %v6300_v6  ;;  %3564 = vmatpush.bf16.msrb.mxu0 %v6045_v13 }
  0xb8   : > { %v824_v12 = vld [vmem:[#allocation1 + $0x9] sm:$0xff]  ;;  %v6867_v18 = vld [vmem:[%s7333_s5 + $0xcac] sm:$0xf0]  ;;  %v6429_v23 = vor.u32 %v6967_v10, %v6428_v9  ;;  %3545 = vmatmul.bf16.vlgmr.msra.gmra.mxu2 %v825_v11  ;;  %3558 = vmatmul.bf16.vlgmr.msra.gmra.mxu3 %v826_v15 }
  0xb9   : > { %v6028_v14 = vld [vmem:[%s7333_s5 + $0xca0] sm:$0xf]  ;;  %v6899_v24 = vld [vmem:[%s7333_s5 + $0xdac] sm:$0xf0]  ;;  %3532 = vmatmul.bf16.vlgmr.msra.gmra.mxu1 %v824_v12  ;;  %3590 = vmatpush.bf16.msrb.mxu2 %v6301_v17 }
  0xba   : > { %v6156_v19 = vld [vmem:[%s7333_s5 + $0xda0] sm:$0xf]  ;;  %v6931_v27 = vld [vmem:[%s7333_s5 + $0xeac] sm:$0xf0]  ;;  %v6029_v33 = vor.u32 %v6867_v18, %v6028_v14  ;;  %3577 = vmatpush.bf16.msrb.mxu1 %v6173_v16  ;;  %3603 = vmatpush.bf16.msrb.mxu3 %v6429_v23 }
  0xbb   : > { %v6284_v25 = vld [vmem:[%s7333_s5 + $0xea0] sm:$0xf]  ;;  %v6963_v30 = vld [vmem:[%s7333_s5 + $0xfac] sm:$0xf0]  ;;  %v6157_v34 = vor.u32 %v6899_v24, %v6156_v19 }
  0xbc   : > { %v6412_v28 = vld [vmem:[%s7333_s5 + $0xfa0] sm:$0xf]  ;;  %v6285_v35 = vor.u32 %v6931_v27, %v6284_v25  ;;  %v6863_v37 = vld [vmem:[%s7333_s5 + $0xc8c] sm:$0xf0]  ;;  %3565 = vmatpush.bf16.msrb.mxu0 %v6029_v33 }
  0xbd   : > { %v6012_v36 = vld [vmem:[%s7333_s5 + $0xc80] sm:$0xf]  ;;  %v6413_v40 = vor.u32 %v6963_v30, %v6412_v28  ;;  %v6895_v41 = vld [vmem:[%s7333_s5 + $0xd8c] sm:$0xf0] }
  0xbe   : > { %v6140_v39 = vld [vmem:[%s7333_s5 + $0xd80] sm:$0xf]  ;;  %v6927_v43 = vld [vmem:[%s7333_s5 + $0xe8c] sm:$0xf0]  ;;  %v6013_v46 = vor.u32 %v6863_v37, %v6012_v36  ;;  %3578 = vmatpush.bf16.msrb.mxu1 %v6157_v34  ;;  %3591 = vmatpush.bf16.msrb.mxu2 %v6285_v35  ;;  %v6489_v37 = vld [vmem:[%s7333_s5 + $0xe4] sm:$0xf] }
  0xbf   : > { %v6268_v42 = vld [vmem:[%s7333_s5 + $0xe80] sm:$0xf]  ;;  %v6959_v45 = vld [vmem:[%s7333_s5 + $0xf8c] sm:$0xf0]  ;;  %v6141_v47 = vor.u32 %v6895_v41, %v6140_v39  ;;  %3604 = vmatpush.bf16.msrb.mxu3 %v6413_v40  ;;  %v4526_v39 = vld [vmem:[%s7333_s5 + $0xf0] sm:$0xf0] }
  0xc0   : > { %v6396_v44 = vld [vmem:[%s7333_s5 + $0xf80] sm:$0xf]  ;;  %v6269_v48 = vor.u32 %v6927_v43, %v6268_v42  ;;  %v6859_v50 = vld [vmem:[%s7333_s5 + $0xc6c] sm:$0xf0]  ;;  %3566 = vmatpush.bf16.msrb.mxu0 %v6013_v46  ;;  %v6521_v40 = vld [vmem:[%s7333_s5 + $0x1e4] sm:$0xf] }
  0xc1   : > { %v5996_v49 = vld [vmem:[%s7333_s5 + $0xc60] sm:$0xf]  ;;  %v6397_v52 = vor.u32 %v6959_v45, %v6396_v44  ;;  %v6891_v53 = vld [vmem:[%s7333_s5 + $0xd6c] sm:$0xf0]  ;;  %v4654_v42 = vld [vmem:[%s7333_s5 + $0x1f0] sm:$0xf0] }
  0xc2   : > { %v6124_v51 = vld [vmem:[%s7333_s5 + $0xd60] sm:$0xf]  ;;  %v6923_v55 = vld [vmem:[%s7333_s5 + $0xe6c] sm:$0xf0]  ;;  %v5997_v58 = vor.u32 %v6859_v50, %v5996_v49  ;;  %3579 = vmatpush.bf16.msrb.mxu1 %v6141_v47  ;;  %3592 = vmatpush.bf16.msrb.mxu2 %v6269_v48  ;;  %v6553_v43 = vld [vmem:[%s7333_s5 + $0x2e4] sm:$0xf]  ;;  %v4529_v50 = vor.u32 %v6489_v37, %v4526_v39 }
  0xc3   : > { %v6252_v54 = vld [vmem:[%s7333_s5 + $0xe60] sm:$0xf]  ;;  %v6955_v57 = vld [vmem:[%s7333_s5 + $0xf6c] sm:$0xf0]  ;;  %v6125_v59 = vor.u32 %v6891_v53, %v6124_v51  ;;  %3605 = vmatpush.bf16.msrb.mxu3 %v6397_v52  ;;  %v4782_v44 = vld [vmem:[%s7333_s5 + $0x2f0] sm:$0xf0]  ;;  %v4657_v51 = vor.u32 %v6521_v40, %v4654_v42 }
  0xc4   : > { %v6380_v56 = vld [vmem:[%s7333_s5 + $0xf60] sm:$0xf]  ;;  %v6253_v60 = vor.u32 %v6923_v55, %v6252_v54  ;;  %v6855_v62 = vld [vmem:[%s7333_s5 + $0xc4c] sm:$0xf0]  ;;  %3567 = vmatpush.bf16.msrb.mxu0 %v5997_v58  ;;  %v6585_v47 = vld [vmem:[%s7333_s5 + $0x3e4] sm:$0xf]  ;;  %v4785_v52 = vor.u32 %v6553_v43, %v4782_v44 }
  0xc5   : > { %v5980_v61 = vld [vmem:[%s7333_s5 + $0xc40] sm:$0xf]  ;;  %v6381_v0 = vor.u32 %v6955_v57, %v6380_v56  ;;  %v6887_v1 = vld [vmem:[%s7333_s5 + $0xd4c] sm:$0xf0]  ;;  %v4910_v48 = vld [vmem:[%s7333_s5 + $0x3f0] sm:$0xf0] }
  0xc6   : > { %v6108_v63 = vld [vmem:[%s7333_s5 + $0xd40] sm:$0xf]  ;;  %v6919_v3 = vld [vmem:[%s7333_s5 + $0xe4c] sm:$0xf0]  ;;  %v5981_v6 = vor.u32 %v6855_v62, %v5980_v61  ;;  %3580 = vmatpush.bf16.msrb.mxu1 %v6125_v59  ;;  %3593 = vmatpush.bf16.msrb.mxu2 %v6253_v60  ;;  %v6485_v53 = vld [vmem:[%s7333_s5 + $0xc4] sm:$0xf]  ;;  %v4913_v56 = vor.u32 %v6585_v47, %v4910_v48 }
  0xc7   : > { %v6236_v2 = vld [vmem:[%s7333_s5 + $0xe40] sm:$0xf]  ;;  %v6951_v5 = vld [vmem:[%s7333_s5 + $0xf4c] sm:$0xf0]  ;;  %v6109_v7 = vor.u32 %v6887_v1, %v6108_v63  ;;  %3606 = vmatpush.bf16.msrb.mxu3 %v6381_v0  ;;  %v4510_v54 = vld [vmem:[%s7333_s5 + $0xd0] sm:$0xf0] }
  0xc8   : > { %v6364_v4 = vld [vmem:[%s7333_s5 + $0xf40] sm:$0xf]  ;;  %v6237_v8 = vor.u32 %v6919_v3, %v6236_v2  ;;  %v6851_v10 = vld [vmem:[%s7333_s5 + $0xc2c] sm:$0xf0]  ;;  %3568 = vmatpush.bf16.msrb.mxu0 %v5981_v6  ;;  %v6517_v55 = vld [vmem:[%s7333_s5 + $0x1c4] sm:$0xf]  ;;  %v4513_v2 = vor.u32 %v6485_v53, %v4510_v54 }
  0xc9   : > { %v5964_v9 = vld [vmem:[%s7333_s5 + $0xc20] sm:$0xf]  ;;  %v6365_v12 = vor.u32 %v6951_v5, %v6364_v4  ;;  %v6883_v13 = vld [vmem:[%s7333_s5 + $0xd2c] sm:$0xf0]  ;;  %v4638_v57 = vld [vmem:[%s7333_s5 + $0x1d0] sm:$0xf0] }
  0xca   : > { %v6092_v11 = vld [vmem:[%s7333_s5 + $0xd20] sm:$0xf]  ;;  %v6915_v15 = vld [vmem:[%s7333_s5 + $0xe2c] sm:$0xf0]  ;;  %v5965_v18 = vor.u32 %v6851_v10, %v5964_v9  ;;  %3581 = vmatpush.bf16.msrb.mxu1 %v6109_v7  ;;  %3594 = vmatpush.bf16.msrb.mxu2 %v6237_v8  ;;  %v6549_v58 = vld [vmem:[%s7333_s5 + $0x2c4] sm:$0xf]  ;;  %v4641_v3 = vor.u32 %v6517_v55, %v4638_v57 }
  0xcb   : > { %v6220_v14 = vld [vmem:[%s7333_s5 + $0xe20] sm:$0xf]  ;;  %v6947_v17 = vld [vmem:[%s7333_s5 + $0xf2c] sm:$0xf0]  ;;  %v6093_v24 = vor.u32 %v6883_v13, %v6092_v11  ;;  %3607 = vmatpush.bf16.msrb.mxu3 %v6365_v12  ;;  %v4766_v59 = vld [vmem:[%s7333_s5 + $0x2d0] sm:$0xf0] }
  0xcc   : > { %v6348_v16 = vld [vmem:[%s7333_s5 + $0xf20] sm:$0xf]  ;;  %v6847_v23 = vld [vmem:[%s7333_s5 + $0xc0c] sm:$0xf0]  ;;  %v6221_v25 = vor.u32 %v6915_v15, %v6220_v14  ;;  %3569 = vmatpush.bf16.msrb.mxu0 %v5965_v18  ;;  %v6581_v61 = vld [vmem:[%s7333_s5 + $0x3c4] sm:$0xf]  ;;  %v4769_v4 = vor.u32 %v6549_v58, %v4766_v59 }
  0xcd   : > { %v5948_v19 = vld [vmem:[%s7333_s5 + $0xc00] sm:$0xf]  ;;  %v6879_v28 = vld [vmem:[%s7333_s5 + $0xd0c] sm:$0xf0]  ;;  %v6349_v33 = vor.u32 %v6947_v17, %v6348_v16  ;;  %v4894_v62 = vld [vmem:[%s7333_s5 + $0x3d0] sm:$0xf0] }
  0xce   : > { %v6076_v27 = vld [vmem:[%s7333_s5 + $0xd00] sm:$0xf]  ;;  %v6911_v34 = vld [vmem:[%s7333_s5 + $0xe0c] sm:$0xf0]  ;;  %v5949_v41 = vor.u32 %v6847_v23, %v5948_v19  ;;  %3582 = vmatpush.bf16.msrb.mxu1 %v6093_v24  ;;  %3595 = vmatpush.bf16.msrb.mxu2 %v6221_v25  ;;  %v828_v0 = vld [vmem:[#allocation1 + $0x2d] sm:$0xff]  ;;  %v4897_v8 = vor.u32 %v6581_v61, %v4894_v62 }
  0xcf   : > { %v6204_v30 = vld [vmem:[%s7333_s5 + $0xe00] sm:$0xf]  ;;  %v6943_v36 = vld [vmem:[%s7333_s5 + $0xf0c] sm:$0xf0]  ;;  %v6077_v45 = vor.u32 %v6879_v28, %v6076_v27  ;;  %3608 = vmatpush.bf16.msrb.mxu3 %v6349_v33  ;;  %v830_v1 = vld [vmem:[#allocation1 + $0x3f] sm:$0xff] }
  0xd0   : > { %v6332_v35 = vld [vmem:[%s7333_s5 + $0xf00] sm:$0xf]  ;;  %v6205_v46 = vor.u32 %v6911_v34, %v6204_v30  ;;  %3570 = vmatpush.bf16.msrb.mxu0 %v5949_v41  ;;  %v829_v63 = vld [vmem:[#allocation1 + $0x36] sm:$0xff]  ;;  %v6481_v5 = vld [vmem:[%s7333_s5 + $0xa4] sm:$0xf] }
  0xd1   : > { %v6333_v49 = vor.u32 %v6943_v36, %v6332_v35  ;;  %v827_v60 = vld [vmem:[#allocation1 + $0x24] sm:$0xff]  ;;  %v4494_v6 = vld [vmem:[%s7333_s5 + $0xb0] sm:$0xf0]  ;;  %v6513_v7 = vld [vmem:[%s7333_s5 + $0x1a4] sm:$0xf] }
  0xd2   : > { %3583 = vmatpush.bf16.msrb.mxu1 %v6077_v45  ;;  %3596 = vmatpush.bf16.msrb.mxu2 %v6205_v46  ;;  %v4622_v9 = vld [vmem:[%s7333_s5 + $0x1b0] sm:$0xf0]  ;;  %v6545_v10 = vld [vmem:[%s7333_s5 + $0x2a4] sm:$0xf]  ;;  %v4497_v14 = vor.u32 %v6481_v5, %v4494_v6 }
  0xd3   : > { %3609 = vmatpush.bf16.msrb.mxu3 %v6333_v49  ;;  %3571 = vmatmul.bf16.vlgmr.msrb.gmra.mxu0 %v827_v60  ;;  %v4750_v11 = vld [vmem:[%s7333_s5 + $0x2b0] sm:$0xf0]  ;;  %v6577_v12 = vld [vmem:[%s7333_s5 + $0x3a4] sm:$0xf]  ;;  %v4625_v15 = vor.u32 %v6513_v7, %v4622_v9 }
  0xd4   : > { %3615 = vmatpush.bf16.msra.mxu0 %v4529_v50  ;;  %v4878_v13 = vld [vmem:[%s7333_s5 + $0x3b0] sm:$0xf0]  ;;  %v4753_v16 = vor.u32 %v6545_v10, %v4750_v11  ;;  %v6477_v17 = vld [vmem:[%s7333_s5 + $0x84] sm:$0xf] }
  0xd5   : > { %3597 = vmatmul.bf16.vlgmr.msrb.gmra.mxu2 %v829_v63  ;;  %3584 = vmatmul.bf16.vlgmr.msrb.gmra.mxu1 %v828_v0  ;;  %v4478_v18 = vld [vmem:[%s7333_s5 + $0x90] sm:$0xf0]  ;;  %v6509_v19 = vld [vmem:[%s7333_s5 + $0x184] sm:$0xf]  ;;  %v4881_v23 = vor.u32 %v6577_v12, %v4878_v13 }
  0xd6   : > { %3628 = vmatpush.bf16.msra.mxu1 %v4657_v51  ;;  %3641 = vmatpush.bf16.msra.mxu2 %v4785_v52  ;;  %v4606_v24 = vld [vmem:[%s7333_s5 + $0x190] sm:$0xf0]  ;;  %v6541_v25 = vld [vmem:[%s7333_s5 + $0x284] sm:$0xf]  ;;  %v4481_v33 = vor.u32 %v6477_v17, %v4478_v18 }
  0xd7   : > { %3654 = vmatpush.bf16.msra.mxu3 %v4913_v56  ;;  %v4734_v27 = vld [vmem:[%s7333_s5 + $0x290] sm:$0xf0]  ;;  %v6573_v28 = vld [vmem:[%s7333_s5 + $0x384] sm:$0xf]  ;;  %v4609_v34 = vor.u32 %v6509_v19, %v4606_v24 }
  0xd8   : > { %3610 = vmatmul.bf16.vlgmr.msrb.gmra.mxu3 %v830_v1  ;;  %3616 = vmatpush.bf16.msra.mxu0 %v4513_v2  ;;  %v4862_v30 = vld [vmem:[%s7333_s5 + $0x390] sm:$0xf0]  ;;  %v4737_v35 = vor.u32 %v6541_v25, %v4734_v27  ;;  %v6473_v36 = vld [vmem:[%s7333_s5 + $0x64] sm:$0xf] }
  0xd9   : > { %v4462_v37 = vld [vmem:[%s7333_s5 + $0x70] sm:$0xf0]  ;;  %v6505_v39 = vld [vmem:[%s7333_s5 + $0x164] sm:$0xf]  ;;  %v4865_v40 = vor.u32 %v6573_v28, %v4862_v30 }
  0xda   : > { %3629 = vmatpush.bf16.msra.mxu1 %v4641_v3  ;;  %3642 = vmatpush.bf16.msra.mxu2 %v4769_v4  ;;  %v4590_v41 = vld [vmem:[%s7333_s5 + $0x170] sm:$0xf0]  ;;  %v6537_v42 = vld [vmem:[%s7333_s5 + $0x264] sm:$0xf]  ;;  %v4465_v46 = vor.u32 %v6473_v36, %v4462_v37 }
  0xdb   : > { %3655 = vmatpush.bf16.msra.mxu3 %v4897_v8  ;;  %v4718_v43 = vld [vmem:[%s7333_s5 + $0x270] sm:$0xf0]  ;;  %v6569_v44 = vld [vmem:[%s7333_s5 + $0x364] sm:$0xf]  ;;  %v4593_v47 = vor.u32 %v6505_v39, %v4590_v41 }
  0xdc   : > { %3617 = vmatpush.bf16.msra.mxu0 %v4497_v14  ;;  %v4846_v45 = vld [vmem:[%s7333_s5 + $0x370] sm:$0xf0]  ;;  %v4721_v48 = vor.u32 %v6537_v42, %v4718_v43  ;;  %v6469_v49 = vld [vmem:[%s7333_s5 + $0x44] sm:$0xf] }
  0xdd   : > { %v4446_v50 = vld [vmem:[%s7333_s5 + $0x50] sm:$0xf0]  ;;  %v6501_v51 = vld [vmem:[%s7333_s5 + $0x144] sm:$0xf]  ;;  %v4849_v52 = vor.u32 %v6569_v44, %v4846_v45 }
  0xde   : > { %3630 = vmatpush.bf16.msra.mxu1 %v4625_v15  ;;  %3643 = vmatpush.bf16.msra.mxu2 %v4753_v16  ;;  %v4574_v53 = vld [vmem:[%s7333_s5 + $0x150] sm:$0xf0]  ;;  %v6533_v54 = vld [vmem:[%s7333_s5 + $0x244] sm:$0xf]  ;;  %v4449_v58 = vor.u32 %v6469_v49, %v4446_v50 }
  0xdf   : > { %3656 = vmatpush.bf16.msra.mxu3 %v4881_v23  ;;  %v4702_v55 = vld [vmem:[%s7333_s5 + $0x250] sm:$0xf0]  ;;  %v6565_v56 = vld [vmem:[%s7333_s5 + $0x344] sm:$0xf]  ;;  %v4577_v59 = vor.u32 %v6501_v51, %v4574_v53 }
  0xe0   : > { %3618 = vmatpush.bf16.msra.mxu0 %v4481_v33  ;;  %v4830_v57 = vld [vmem:[%s7333_s5 + $0x350] sm:$0xf0]  ;;  %v4705_v60 = vor.u32 %v6533_v54, %v4702_v55  ;;  %v6465_v61 = vld [vmem:[%s7333_s5 + $0x24] sm:$0xf] }
  0xe1   : > { %v4430_v62 = vld [vmem:[%s7333_s5 + $0x30] sm:$0xf0]  ;;  %v6497_v63 = vld [vmem:[%s7333_s5 + $0x124] sm:$0xf]  ;;  %v4833_v0 = vor.u32 %v6565_v56, %v4830_v57 }
  0xe2   : > { %3631 = vmatpush.bf16.msra.mxu1 %v4609_v34  ;;  %3644 = vmatpush.bf16.msra.mxu2 %v4737_v35  ;;  %v4558_v1 = vld [vmem:[%s7333_s5 + $0x130] sm:$0xf0]  ;;  %v6529_v2 = vld [vmem:[%s7333_s5 + $0x224] sm:$0xf]  ;;  %v4433_v6 = vor.u32 %v6465_v61, %v4430_v62 }
  0xe3   : > { %3657 = vmatpush.bf16.msra.mxu3 %v4865_v40  ;;  %v4686_v3 = vld [vmem:[%s7333_s5 + $0x230] sm:$0xf0]  ;;  %v6561_v4 = vld [vmem:[%s7333_s5 + $0x324] sm:$0xf]  ;;  %v4561_v9 = vor.u32 %v6497_v63, %v4558_v1 }
  0xe4   : > { %3619 = vmatpush.bf16.msra.mxu0 %v4465_v46  ;;  %v4814_v5 = vld [vmem:[%s7333_s5 + $0x330] sm:$0xf0]  ;;  %v6461_v7 = vld [vmem:[%s7333_s5 + $0x4] sm:$0xf]  ;;  %v4689_v10 = vor.u32 %v6529_v2, %v4686_v3 }
  0xe5   : > { %v4414_v8 = vld [vmem:[%s7333_s5 + $0x10] sm:$0xf0]  ;;  %v6493_v11 = vld [vmem:[%s7333_s5 + $0x104] sm:$0xf]  ;;  %v4817_v14 = vor.u32 %v6561_v4, %v4814_v5 }
  0xe6   : > { %3632 = vmatpush.bf16.msra.mxu1 %v4593_v47  ;;  %3645 = vmatpush.bf16.msra.mxu2 %v4721_v48  ;;  %v4542_v12 = vld [vmem:[%s7333_s5 + $0x110] sm:$0xf0]  ;;  %v6525_v13 = vld [vmem:[%s7333_s5 + $0x204] sm:$0xf]  ;;  %v4417_v24 = vor.u32 %v6461_v7, %v4414_v8 }
  0xe7   : > { %3658 = vmatpush.bf16.msra.mxu3 %v4849_v52  ;;  %v4670_v15 = vld [vmem:[%s7333_s5 + $0x210] sm:$0xf0]  ;;  %v6557_v16 = vld [vmem:[%s7333_s5 + $0x304] sm:$0xf]  ;;  %v4545_v30 = vor.u32 %v6493_v11, %v4542_v12 }
  0xe8   : > { %3620 = vmatpush.bf16.msra.mxu0 %v4449_v58  ;;  %v4798_v17 = vld [vmem:[%s7333_s5 + $0x310] sm:$0xf0]  ;;  %v6617_v18 = vld [vmem:[%s7333_s5 + $0x4e4] sm:$0xf]  ;;  %v4673_v33 = vor.u32 %v6525_v13, %v4670_v15 }
  0xe9   : > { %v5038_v19 = vld [vmem:[%s7333_s5 + $0x4f0] sm:$0xf0]  ;;  %v6649_v23 = vld [vmem:[%s7333_s5 + $0x5e4] sm:$0xf]  ;;  %v4801_v36 = vor.u32 %v6557_v16, %v4798_v17 }
  0xea   : > { %3633 = vmatpush.bf16.msra.mxu1 %v4577_v59  ;;  %3646 = vmatpush.bf16.msra.mxu2 %v4705_v60  ;;  %v5166_v25 = vld [vmem:[%s7333_s5 + $0x5f0] sm:$0xf0]  ;;  %v6681_v27 = vld [vmem:[%s7333_s5 + $0x6e4] sm:$0xf]  ;;  %v5041_v37 = vor.u32 %v6617_v18, %v5038_v19 }
  0xeb   : > { %3659 = vmatpush.bf16.msra.mxu3 %v4833_v0  ;;  %v5294_v28 = vld [vmem:[%s7333_s5 + $0x6f0] sm:$0xf0]  ;;  %v6713_v34 = vld [vmem:[%s7333_s5 + $0x7e4] sm:$0xf]  ;;  %v5169_v39 = vor.u32 %v6649_v23, %v5166_v25 }
  0xec   : > { %3621 = vmatpush.bf16.msra.mxu0 %v4433_v6  ;;  %v5422_v35 = vld [vmem:[%s7333_s5 + $0x7f0] sm:$0xf0]  ;;  %v5297_v40 = vor.u32 %v6681_v27, %v5294_v28  ;;  %v6613_v41 = vld [vmem:[%s7333_s5 + $0x4c4] sm:$0xf] }
  0xed   : > { %v5022_v42 = vld [vmem:[%s7333_s5 + $0x4d0] sm:$0xf0]  ;;  %v6645_v43 = vld [vmem:[%s7333_s5 + $0x5c4] sm:$0xf]  ;;  %v5425_v44 = vor.u32 %v6713_v34, %v5422_v35 }
  0xee   : > { %3634 = vmatpush.bf16.msra.mxu1 %v4561_v9  ;;  %3647 = vmatpush.bf16.msra.mxu2 %v4689_v10  ;;  %v5150_v45 = vld [vmem:[%s7333_s5 + $0x5d0] sm:$0xf0]  ;;  %v6677_v46 = vld [vmem:[%s7333_s5 + $0x6c4] sm:$0xf]  ;;  %v5025_v50 = vor.u32 %v6613_v41, %v5022_v42 }
  0xef   : > { %3660 = vmatpush.bf16.msra.mxu3 %v4817_v14  ;;  %v5278_v47 = vld [vmem:[%s7333_s5 + $0x6d0] sm:$0xf0]  ;;  %v6709_v48 = vld [vmem:[%s7333_s5 + $0x7c4] sm:$0xf]  ;;  %v5153_v51 = vor.u32 %v6645_v43, %v5150_v45  ;;  %v3416_v43 = vpop.f32.mrf.mxu0 }
  0xf0   : > { %3622 = vmatpush.bf16.msra.mxu0 %v4417_v24  ;;  %v5406_v49 = vld [vmem:[%s7333_s5 + $0x7d0] sm:$0xf0]  ;;  %v5281_v52 = vor.u32 %v6677_v46, %v5278_v47  ;;  %v6609_v53 = vld [vmem:[%s7333_s5 + $0x4a4] sm:$0xf] }
  0xf1   : > { %v5006_v54 = vld [vmem:[%s7333_s5 + $0x4b0] sm:$0xf0]  ;;  %v6641_v55 = vld [vmem:[%s7333_s5 + $0x5a4] sm:$0xf]  ;;  %v5409_v56 = vor.u32 %v6709_v48, %v5406_v49 }
  0xf2   : > { %3635 = vmatpush.bf16.msra.mxu1 %v4545_v30  ;;  %3648 = vmatpush.bf16.msra.mxu2 %v4673_v33  ;;  %v5134_v57 = vld [vmem:[%s7333_s5 + $0x5b0] sm:$0xf0]  ;;  %v6673_v58 = vld [vmem:[%s7333_s5 + $0x6a4] sm:$0xf]  ;;  %v5009_v62 = vor.u32 %v6609_v53, %v5006_v54 }
  0xf3   : > { %3661 = vmatpush.bf16.msra.mxu3 %v4801_v36  ;;  %v5262_v59 = vld [vmem:[%s7333_s5 + $0x6b0] sm:$0xf0]  ;;  %v6705_v60 = vld [vmem:[%s7333_s5 + $0x7a4] sm:$0xf]  ;;  %3623 = vmatmul.bf16.vlgmr.msra.gmra.mxu0 %v7454_v21  ;;  %v5137_v63 = vor.u32 %v6641_v55, %v5134_v57 }
  0xf4   : > { %3667 = vmatpush.bf16.msrb.mxu0 %v5041_v37  ;;  %v5390_v61 = vld [vmem:[%s7333_s5 + $0x7b0] sm:$0xf0]  ;;  %v5265_v0 = vor.u32 %v6673_v58, %v5262_v59  ;;  %v6605_v1 = vld [vmem:[%s7333_s5 + $0x484] sm:$0xf] }
  0xf5   : > { %3649 = vmatmul.bf16.vlgmr.msra.gmra.mxu2 %v7452_v20  ;;  %3636 = vmatmul.bf16.vlgmr.msra.gmra.mxu1 %v7461_v26  ;;  %v4990_v2 = vld [vmem:[%s7333_s5 + $0x490] sm:$0xf0]  ;;  %v6637_v3 = vld [vmem:[%s7333_s5 + $0x584] sm:$0xf]  ;;  %v5393_v4 = vor.u32 %v6705_v60, %v5390_v61 }
  0xf6   : > { %3680 = vmatpush.bf16.msrb.mxu1 %v5169_v39  ;;  %3693 = vmatpush.bf16.msrb.mxu2 %v5297_v40  ;;  %v5118_v5 = vld [vmem:[%s7333_s5 + $0x590] sm:$0xf0]  ;;  %v6669_v6 = vld [vmem:[%s7333_s5 + $0x684] sm:$0xf]  ;;  %v4993_v10 = vor.u32 %v6605_v1, %v4990_v2 }
  0xf7   : > { %3706 = vmatpush.bf16.msrb.mxu3 %v5425_v44  ;;  %v5246_v7 = vld [vmem:[%s7333_s5 + $0x690] sm:$0xf0]  ;;  %v6701_v8 = vld [vmem:[%s7333_s5 + $0x784] sm:$0xf]  ;;  %v5121_v11 = vor.u32 %v6637_v3, %v5118_v5 }
  0xf8   : > { %3662 = vmatmul.bf16.vlgmr.msra.gmra.mxu3 %v7456_v22  ;;  %3668 = vmatpush.bf16.msrb.mxu0 %v5025_v50  ;;  %v5374_v9 = vld [vmem:[%s7333_s5 + $0x790] sm:$0xf0]  ;;  %v5249_v12 = vor.u32 %v6669_v6, %v5246_v7  ;;  %v6601_v13 = vld [vmem:[%s7333_s5 + $0x464] sm:$0xf] }
  0xf9   : > { %v4974_v14 = vld [vmem:[%s7333_s5 + $0x470] sm:$0xf0]  ;;  %v6633_v15 = vld [vmem:[%s7333_s5 + $0x564] sm:$0xf]  ;;  %v5377_v16 = vor.u32 %v6701_v8, %v5374_v9 }
  0xfa   : > { %3681 = vmatpush.bf16.msrb.mxu1 %v5153_v51  ;;  %3694 = vmatpush.bf16.msrb.mxu2 %v5281_v52  ;;  %v5102_v17 = vld [vmem:[%s7333_s5 + $0x570] sm:$0xf0]  ;;  %v6665_v18 = vld [vmem:[%s7333_s5 + $0x664] sm:$0xf]  ;;  %v4977_v25 = vor.u32 %v6601_v13, %v4974_v14 }
  0xfb   : > { %3707 = vmatpush.bf16.msrb.mxu3 %v5409_v56  ;;  %v5230_v19 = vld [vmem:[%s7333_s5 + $0x670] sm:$0xf0]  ;;  %v6697_v23 = vld [vmem:[%s7333_s5 + $0x764] sm:$0xf]  ;;  %v5105_v27 = vor.u32 %v6633_v15, %v5102_v17 }
  0xfc   : > { %3669 = vmatpush.bf16.msrb.mxu0 %v5009_v62  ;;  %v5358_v24 = vld [vmem:[%s7333_s5 + $0x770] sm:$0xf0]  ;;  %v5233_v28 = vor.u32 %v6665_v18, %v5230_v19  ;;  %v6597_v30 = vld [vmem:[%s7333_s5 + $0x444] sm:$0xf] }
  0xfd   : > { %v4958_v33 = vld [vmem:[%s7333_s5 + $0x450] sm:$0xf0]  ;;  %v6629_v34 = vld [vmem:[%s7333_s5 + $0x544] sm:$0xf]  ;;  %v5361_v35 = vor.u32 %v6697_v23, %v5358_v24 }
  0xfe   : > { %3682 = vmatpush.bf16.msrb.mxu1 %v5137_v63  ;;  %3695 = vmatpush.bf16.msrb.mxu2 %v5265_v0  ;;  %v5086_v36 = vld [vmem:[%s7333_s5 + $0x550] sm:$0xf0]  ;;  %v6661_v37 = vld [vmem:[%s7333_s5 + $0x644] sm:$0xf]  ;;  %v4961_v42 = vor.u32 %v6597_v30, %v4958_v33  ;;  %v3429_v49 = vpop.f32.mrf.mxu1 }
  0xff   : > { %3708 = vmatpush.bf16.msrb.mxu3 %v5393_v4  ;;  %v5214_v39 = vld [vmem:[%s7333_s5 + $0x650] sm:$0xf0]  ;;  %v6693_v40 = vld [vmem:[%s7333_s5 + $0x744] sm:$0xf]  ;;  %v5089_v44 = vor.u32 %v6629_v34, %v5086_v36  ;;  %v3430_v54 = vadd.f32 %v3429_v49, %v3416_v43 }
 0x100   : > { %3670 = vmatpush.bf16.msrb.mxu0 %v4993_v10  ;;  %v5342_v41 = vld [vmem:[%s7333_s5 + $0x750] sm:$0xf0]  ;;  %v5217_v45 = vor.u32 %v6661_v37, %v5214_v39  ;;  %v6593_v46 = vld [vmem:[%s7333_s5 + $0x424] sm:$0xf] }
 0x101   : > { %v4942_v47 = vld [vmem:[%s7333_s5 + $0x430] sm:$0xf0]  ;;  %v6625_v48 = vld [vmem:[%s7333_s5 + $0x524] sm:$0xf]  ;;  %v5345_v50 = vor.u32 %v6693_v40, %v5342_v41 }
 0x102   : > { %3683 = vmatpush.bf16.msrb.mxu1 %v5121_v11  ;;  %3696 = vmatpush.bf16.msrb.mxu2 %v5249_v12  ;;  %v5070_v51 = vld [vmem:[%s7333_s5 + $0x530] sm:$0xf0]  ;;  %v6657_v52 = vld [vmem:[%s7333_s5 + $0x624] sm:$0xf]  ;;  %v4945_v57 = vor.u32 %v6593_v46, %v4942_v47 }
 0x103   : > { %3709 = vmatpush.bf16.msrb.mxu3 %v5377_v16  ;;  %v5198_v53 = vld [vmem:[%s7333_s5 + $0x630] sm:$0xf0]  ;;  %v6689_v55 = vld [vmem:[%s7333_s5 + $0x724] sm:$0xf]  ;;  %v5073_v60 = vor.u32 %v6625_v48, %v5070_v51  ;;  %v3442_v1 = vpop.f32.mrf.mxu2  ;;  %v3455_v7 = vpop.f32.mrf.mxu3 }
 0x104   : > { %3671 = vmatpush.bf16.msrb.mxu0 %v4977_v25  ;;  %v5326_v56 = vld [vmem:[%s7333_s5 + $0x730] sm:$0xf0]  ;;  %v6589_v58 = vld [vmem:[%s7333_s5 + $0x404] sm:$0xf]  ;;  %v5201_v61 = vor.u32 %v6657_v52, %v5198_v53  ;;  %v3443_v6 = vadd.f32 %v3442_v1, %v3430_v54  ;;  %v3418_v16 = vpop.f32.mrf.mxu0 }
 0x105   : > { %v4926_v59 = vld [vmem:[%s7333_s5 + $0x410] sm:$0xf0]  ;;  %v6621_v62 = vld [vmem:[%s7333_s5 + $0x504] sm:$0xf]  ;;  %v5329_v2 = vor.u32 %v6689_v55, %v5326_v56 }
 0x106   : > { %3684 = vmatpush.bf16.msrb.mxu1 %v5105_v27  ;;  %3697 = vmatpush.bf16.msrb.mxu2 %v5233_v28  ;;  %v5054_v63 = vld [vmem:[%s7333_s5 + $0x510] sm:$0xf0]  ;;  %v6653_v0 = vld [vmem:[%s7333_s5 + $0x604] sm:$0xf]  ;;  %v4929_v11 = vor.u32 %v6589_v58, %v4926_v59  ;;  %v7773_v15 = vadd.f32 %v3455_v7, %v3443_v6  ;;  %v3431_v24 = vpop.f32.mrf.mxu1 }
 0x107   : > { %3710 = vmatpush.bf16.msrb.mxu3 %v5361_v35  ;;  %v5182_v3 = vld [vmem:[%s7333_s5 + $0x610] sm:$0xf0]  ;;  %v6685_v4 = vld [vmem:[%s7333_s5 + $0x704] sm:$0xf]  ;;  %v5057_v17 = vor.u32 %v6621_v62, %v5054_v63 }
 0x108   : > { %3672 = vmatpush.bf16.msrb.mxu0 %v4961_v42  ;;  %v5310_v5 = vld [vmem:[%s7333_s5 + $0x710] sm:$0xf0]  ;;  %v6745_v8 = vld [vmem:[%s7333_s5 + $0x8e4] sm:$0xf]  ;;  %v5185_v18 = vor.u32 %v6653_v0, %v5182_v3 }
 0x109   : > { %v5550_v9 = vld [vmem:[%s7333_s5 + $0x8f0] sm:$0xf0]  ;;  %v6777_v10 = vld [vmem:[%s7333_s5 + $0x9e4] sm:$0xf]  ;;  %v5313_v25 = vor.u32 %v6685_v4, %v5310_v5 }
 0x10a   : > { %3685 = vmatpush.bf16.msrb.mxu1 %v5089_v44  ;;  %3698 = vmatpush.bf16.msrb.mxu2 %v5217_v45  ;;  %v5678_v12 = vld [vmem:[%s7333_s5 + $0x9f0] sm:$0xf0]  ;;  %v6809_v13 = vld [vmem:[%s7333_s5 + $0xae4] sm:$0xf]  ;;  %v5553_v27 = vor.u32 %v6745_v8, %v5550_v9 }
 0x10b   : > { %3711 = vmatpush.bf16.msrb.mxu3 %v5345_v50  ;;  %v5806_v14 = vld [vmem:[%s7333_s5 + $0xaf0] sm:$0xf0]  ;;  %v6841_v19 = vld [vmem:[%s7333_s5 + $0xbe4] sm:$0xf]  ;;  %v5681_v28 = vor.u32 %v6777_v10, %v5678_v12  ;;  %v3444_v43 = vpop.f32.mrf.mxu2  ;;  %v3457_v45 = vpop.f32.mrf.mxu3 }
 0x10c   : > { %3673 = vmatpush.bf16.msrb.mxu0 %v4945_v57  ;;  %v5934_v23 = vld [vmem:[%s7333_s5 + $0xbf0] sm:$0xf0]  ;;  %v5809_v30 = vor.u32 %v6809_v13, %v5806_v14  ;;  %v6741_v33 = vld [vmem:[%s7333_s5 + $0x8c4] sm:$0xf] }
 0x10d   : > { %v5534_v34 = vld [vmem:[%s7333_s5 + $0x8d0] sm:$0xf0]  ;;  %v6773_v35 = vld [vmem:[%s7333_s5 + $0x9c4] sm:$0xf]  ;;  %v5937_v36 = vor.u32 %v6841_v19, %v5934_v23 }
 0x10e   : > { %3686 = vmatpush.bf16.msrb.mxu1 %v5073_v60  ;;  %3699 = vmatpush.bf16.msrb.mxu2 %v5201_v61  ;;  %v5662_v37 = vld [vmem:[%s7333_s5 + $0x9d0] sm:$0xf0]  ;;  %v6805_v39 = vld [vmem:[%s7333_s5 + $0xac4] sm:$0xf]  ;;  %v5537_v44 = vor.u32 %v6741_v33, %v5534_v34  ;;  %v3481_v13 = vpop.f32.mrf.mxu1 }
 0x10f   : > { %3712 = vmatpush.bf16.msrb.mxu3 %v5329_v2  ;;  %v5790_v40 = vld [vmem:[%s7333_s5 + $0xad0] sm:$0xf0]  ;;  %v6837_v41 = vld [vmem:[%s7333_s5 + $0xbc4] sm:$0xf]  ;;  %v5665_v46 = vor.u32 %v6773_v35, %v5662_v37 }
 0x110   : > { %3674 = vmatpush.bf16.msrb.mxu0 %v4929_v11  ;;  %v5918_v42 = vld [vmem:[%s7333_s5 + $0xbd0] sm:$0xf0]  ;;  %v5793_v47 = vor.u32 %v6805_v39, %v5790_v40  ;;  %v6737_v48 = vld [vmem:[%s7333_s5 + $0x8a4] sm:$0xf] }
 0x111   : > { %v5518_v49 = vld [vmem:[%s7333_s5 + $0x8b0] sm:$0xf0]  ;;  %v6769_v50 = vld [vmem:[%s7333_s5 + $0x9a4] sm:$0xf]  ;;  %v5921_v51 = vor.u32 %v6837_v41, %v5918_v42 }
 0x112   : > { %3687 = vmatpush.bf16.msrb.mxu1 %v5057_v17  ;;  %3700 = vmatpush.bf16.msrb.mxu2 %v5185_v18  ;;  %v5646_v52 = vld [vmem:[%s7333_s5 + $0x9b0] sm:$0xf0]  ;;  %v6801_v53 = vld [vmem:[%s7333_s5 + $0xaa4] sm:$0xf]  ;;  %v5521_v57 = vor.u32 %v6737_v48, %v5518_v49 }
 0x113   : > { %3713 = vmatpush.bf16.msrb.mxu3 %v5313_v25  ;;  %v5774_v54 = vld [vmem:[%s7333_s5 + $0xab0] sm:$0xf0]  ;;  %3675 = vmatmul.bf16.vlgmr.msrb.gmra.mxu0 %v7510_v31  ;;  %v6833_v55 = vld [vmem:[%s7333_s5 + $0xba4] sm:$0xf]  ;;  %v5649_v58 = vor.u32 %v6769_v50, %v5646_v52 }
 0x114   : > { %3719 = vmatpush.bf16.msra.mxu0 %v5553_v27  ;;  %v5902_v56 = vld [vmem:[%s7333_s5 + $0xbb0] sm:$0xf0]  ;;  %v5777_v59 = vor.u32 %v6801_v53, %v5774_v54  ;;  %v6733_v60 = vld [vmem:[%s7333_s5 + $0x884] sm:$0xf]  ;;  %v3468_v6 = vpop.f32.mrf.mxu0 }
 0x115   : > { %3701 = vmatmul.bf16.vlgmr.msrb.gmra.mxu2 %v7508_v29  ;;  %3688 = vmatmul.bf16.vlgmr.msrb.gmra.mxu1 %v7517_v38  ;;  %v5502_v61 = vld [vmem:[%s7333_s5 + $0x890] sm:$0xf0]  ;;  %v6765_v62 = vld [vmem:[%s7333_s5 + $0x984] sm:$0xf]  ;;  %v5905_v63 = vor.u32 %v6833_v55, %v5902_v56  ;;  %v3469_v12 = vadd.f32 %v3468_v6, %v7773_v15 }
 0x116   : > { %3732 = vmatpush.bf16.msra.mxu1 %v5681_v28  ;;  %3745 = vmatpush.bf16.msra.mxu2 %v5809_v30  ;;  %v5630_v0 = vld [vmem:[%s7333_s5 + $0x990] sm:$0xf0]  ;;  %v6797_v1 = vld [vmem:[%s7333_s5 + $0xa84] sm:$0xf]  ;;  %v5505_v5 = vor.u32 %v6733_v60, %v5502_v61  ;;  %v3507_v41 = vpop.f32.mrf.mxu3  ;;  %v3483_v52 = vpop.f32.mrf.mxu1 }
 0x117   : > { %3758 = vmatpush.bf16.msra.mxu3 %v5937_v36  ;;  %v5758_v2 = vld [vmem:[%s7333_s5 + $0xa90] sm:$0xf0]  ;;  %v6829_v3 = vld [vmem:[%s7333_s5 + $0xb84] sm:$0xf]  ;;  %v5633_v7 = vor.u32 %v6765_v62, %v5630_v0  ;;  %v3482_v24 = vadd.f32 %v3481_v13, %v3469_v12 }
 0x118   : > { %3714 = vmatmul.bf16.vlgmr.msrb.gmra.mxu3 %v7512_v32  ;;  %3720 = vmatpush.bf16.msra.mxu0 %v5537_v44  ;;  %v5886_v4 = vld [vmem:[%s7333_s5 + $0xb90] sm:$0xf0]  ;;  %v5761_v8 = vor.u32 %v6797_v1, %v5758_v2  ;;  %v6729_v9 = vld [vmem:[%s7333_s5 + $0x864] sm:$0xf] }
 0x119   : > { %v5486_v10 = vld [vmem:[%s7333_s5 + $0x870] sm:$0xf0]  ;;  %v6761_v11 = vld [vmem:[%s7333_s5 + $0x964] sm:$0xf]  ;;  %v5889_v14 = vor.u32 %v6829_v3, %v5886_v4 }
 0x11a   : > { %3733 = vmatpush.bf16.msra.mxu1 %v5665_v46  ;;  %3746 = vmatpush.bf16.msra.mxu2 %v5793_v47  ;;  %v5614_v16 = vld [vmem:[%s7333_s5 + $0x970] sm:$0xf0]  ;;  %v6793_v17 = vld [vmem:[%s7333_s5 + $0xa64] sm:$0xf]  ;;  %v5489_v25 = vor.u32 %v6729_v9, %v5486_v10  ;;  %v3494_v34 = vpop.f32.mrf.mxu2 }
 0x11b   : > { %3759 = vmatpush.bf16.msra.mxu3 %v5921_v51  ;;  %v5742_v18 = vld [vmem:[%s7333_s5 + $0xa70] sm:$0xf0]  ;;  %v6825_v19 = vld [vmem:[%s7333_s5 + $0xb64] sm:$0xf]  ;;  %v5617_v15 = vor.u32 %v6761_v11, %v5614_v16  ;;  %v3495_v40 = vadd.f32 %v3494_v34, %v3482_v24 }
 0x11c   : > { %3721 = vmatpush.bf16.msra.mxu0 %v5521_v57  ;;  %v5870_v23 = vld [vmem:[%s7333_s5 + $0xb70] sm:$0xf0]  ;;  %v5745_v27 = vor.u32 %v6793_v17, %v5742_v18  ;;  %v6725_v28 = vld [vmem:[%s7333_s5 + $0x844] sm:$0xf]  ;;  %v3470_v46 = vpop.f32.mrf.mxu0 }
 0x11d   : > { %v5470_v30 = vld [vmem:[%s7333_s5 + $0x850] sm:$0xf0]  ;;  %v6757_v33 = vld [vmem:[%s7333_s5 + $0x944] sm:$0xf]  ;;  %v5873_v35 = vor.u32 %v6825_v19, %v5870_v23  ;;  %v7822_v45 = vadd.f32 %v3507_v41, %v3495_v40 }
 0x11e   : > { %3734 = vmatpush.bf16.msra.mxu1 %v5649_v58  ;;  %3747 = vmatpush.bf16.msra.mxu2 %v5777_v59  ;;  %v5598_v36 = vld [vmem:[%s7333_s5 + $0x950] sm:$0xf0]  ;;  %v6789_v37 = vld [vmem:[%s7333_s5 + $0xa44] sm:$0xf]  ;;  %v5473_v44 = vor.u32 %v6725_v28, %v5470_v30 }
 0x11f   : > { %3760 = vmatpush.bf16.msra.mxu3 %v5905_v63  ;;  %v5726_v39 = vld [vmem:[%s7333_s5 + $0xa50] sm:$0xf0]  ;;  %v6821_v42 = vld [vmem:[%s7333_s5 + $0xb44] sm:$0xf]  ;;  %v5601_v47 = vor.u32 %v6757_v33, %v5598_v36 }
 0x120   : > { %3722 = vmatpush.bf16.msra.mxu0 %v5505_v5  ;;  %v5854_v43 = vld [vmem:[%s7333_s5 + $0xb50] sm:$0xf0]  ;;  %v5729_v48 = vor.u32 %v6789_v37, %v5726_v39  ;;  %v6721_v49 = vld [vmem:[%s7333_s5 + $0x824] sm:$0xf] }
 0x121   : > { %v5454_v50 = vld [vmem:[%s7333_s5 + $0x830] sm:$0xf0]  ;;  %v6753_v51 = vld [vmem:[%s7333_s5 + $0x924] sm:$0xf]  ;;  %v5857_v53 = vor.u32 %v6821_v42, %v5854_v43 }
 0x122   : > { %3735 = vmatpush.bf16.msra.mxu1 %v5633_v7  ;;  %3748 = vmatpush.bf16.msra.mxu2 %v5761_v8  ;;  %v5582_v54 = vld [vmem:[%s7333_s5 + $0x930] sm:$0xf0]  ;;  %v6785_v55 = vld [vmem:[%s7333_s5 + $0xa24] sm:$0xf]  ;;  %v5457_v59 = vor.u32 %v6721_v49, %v5454_v50  ;;  %v3496_v3 = vpop.f32.mrf.mxu2  ;;  %v3509_v8 = vpop.f32.mrf.mxu3 }
 0x123   : > { %3761 = vmatpush.bf16.msra.mxu3 %v5889_v14  ;;  %v5710_v56 = vld [vmem:[%s7333_s5 + $0xa30] sm:$0xf0]  ;;  %v6817_v57 = vld [vmem:[%s7333_s5 + $0xb24] sm:$0xf]  ;;  %v5585_v62 = vor.u32 %v6753_v51, %v5582_v54 }
 0x124   : > { %3723 = vmatpush.bf16.msra.mxu0 %v5489_v25  ;;  %v5838_v58 = vld [vmem:[%s7333_s5 + $0xb30] sm:$0xf0]  ;;  %v6717_v60 = vld [vmem:[%s7333_s5 + $0x804] sm:$0xf]  ;;  %v5713_v63 = vor.u32 %v6785_v55, %v5710_v56 }
 0x125   : > { %v5438_v61 = vld [vmem:[%s7333_s5 + $0x810] sm:$0xf0]  ;;  %v6749_v0 = vld [vmem:[%s7333_s5 + $0x904] sm:$0xf]  ;;  %v5841_v4 = vor.u32 %v6817_v57, %v5838_v58 }
 0x126   : > { %3736 = vmatpush.bf16.msra.mxu1 %v5617_v15  ;;  %3749 = vmatpush.bf16.msra.mxu2 %v5745_v27  ;;  %v5566_v1 = vld [vmem:[%s7333_s5 + $0x910] sm:$0xf0]  ;;  %v6781_v2 = vld [vmem:[%s7333_s5 + $0xa04] sm:$0xf]  ;;  %v5441_v12 = vor.u32 %v6717_v60, %v5438_v61 }
 0x127   : > { %3762 = vmatpush.bf16.msra.mxu3 %v5873_v35  ;;  %v5694_v5 = vld [vmem:[%s7333_s5 + $0xa10] sm:$0xf0]  ;;  %v6813_v6 = vld [vmem:[%s7333_s5 + $0xb04] sm:$0xf]  ;;  %v5569_v17 = vor.u32 %v6749_v0, %v5566_v1 }
 0x128   : > { %3724 = vmatpush.bf16.msra.mxu0 %v5473_v44  ;;  %v5822_v7 = vld [vmem:[%s7333_s5 + $0xb10] sm:$0xf0]  ;;  %v6873_v9 = vld [vmem:[%s7333_s5 + $0xce4] sm:$0xf]  ;;  %v5697_v18 = vor.u32 %v6781_v2, %v5694_v5 }
 0x129   : > { %v6062_v10 = vld [vmem:[%s7333_s5 + $0xcf0] sm:$0xf0]  ;;  %v6905_v11 = vld [vmem:[%s7333_s5 + $0xde4] sm:$0xf]  ;;  %v5825_v24 = vor.u32 %v6813_v6, %v5822_v7 }
 0x12a   : > { %3737 = vmatpush.bf16.msra.mxu1 %v5601_v47  ;;  %3750 = vmatpush.bf16.msra.mxu2 %v5729_v48  ;;  %v6190_v13 = vld [vmem:[%s7333_s5 + $0xdf0] sm:$0xf0]  ;;  %v6937_v14 = vld [vmem:[%s7333_s5 + $0xee4] sm:$0xf]  ;;  %v6065_v25 = vor.u32 %v6873_v9, %v6062_v10  ;;  %v7025_v48 = vld [vmem:[#allocation1] sm:$0xff] }
 0x12b   : > { %3763 = vmatpush.bf16.msra.mxu3 %v5857_v53  ;;  %v6318_v16 = vld [vmem:[%s7333_s5 + $0xef0] sm:$0xf0]  ;;  %v6969_v19 = vld [vmem:[%s7333_s5 + $0xfe4] sm:$0xf]  ;;  %v6193_v15 = vor.u32 %v6905_v11, %v6190_v13  ;;  %v7026_v53 = vld [vmem:[#allocation1 + $0x12] sm:$0xff] }
 0x12c   : > { %3725 = vmatpush.bf16.msra.mxu0 %v5457_v59  ;;  %v6446_v23 = vld [vmem:[%s7333_s5 + $0xff0] sm:$0xf0]  ;;  %v6321_v27 = vor.u32 %v6937_v14, %v6318_v16  ;;  %v6869_v28 = vld [vmem:[%s7333_s5 + $0xcc4] sm:$0xf] }
 0x12d   : > { %v6046_v30 = vld [vmem:[%s7333_s5 + $0xcd0] sm:$0xf0]  ;;  %v6901_v33 = vld [vmem:[%s7333_s5 + $0xdc4] sm:$0xf]  ;;  %v6449_v34 = vor.u32 %v6969_v19, %v6446_v23 }
 0x12e   : > { %3738 = vmatpush.bf16.msra.mxu1 %v5585_v62  ;;  %3751 = vmatpush.bf16.msra.mxu2 %v5713_v63  ;;  %v6174_v35 = vld [vmem:[%s7333_s5 + $0xdd0] sm:$0xf0]  ;;  %v6933_v36 = vld [vmem:[%s7333_s5 + $0xec4] sm:$0xf]  ;;  %v6049_v41 = vor.u32 %v6869_v28, %v6046_v30 }
 0x12f   : > { %3764 = vmatpush.bf16.msra.mxu3 %v5841_v4  ;;  %v6302_v37 = vld [vmem:[%s7333_s5 + $0xed0] sm:$0xf0]  ;;  %v6965_v39 = vld [vmem:[%s7333_s5 + $0xfc4] sm:$0xf]  ;;  %v6177_v42 = vor.u32 %v6901_v33, %v6174_v35  ;;  %v3520_v4 = vpop.f32.mrf.mxu0 }
 0x130   : > { %3726 = vmatpush.bf16.msra.mxu0 %v5441_v12  ;;  %v6430_v40 = vld [vmem:[%s7333_s5 + $0xfd0] sm:$0xf0]  ;;  %v6305_v43 = vor.u32 %v6933_v36, %v6302_v37  ;;  %v6865_v44 = vld [vmem:[%s7333_s5 + $0xca4] sm:$0xf]  ;;  %v3521_v7 = vadd.f32 %v3520_v4, %v7822_v45 }
 0x131   : > { %v6030_v46 = vld [vmem:[%s7333_s5 + $0xcb0] sm:$0xf0]  ;;  %v6897_v47 = vld [vmem:[%s7333_s5 + $0xda4] sm:$0xf]  ;;  %v6433_v49 = vor.u32 %v6965_v39, %v6430_v40 }
 0x132   : > { %3739 = vmatpush.bf16.msra.mxu1 %v5569_v17  ;;  %3752 = vmatpush.bf16.msra.mxu2 %v5697_v18  ;;  %v6158_v50 = vld [vmem:[%s7333_s5 + $0xdb0] sm:$0xf0]  ;;  %v6929_v51 = vld [vmem:[%s7333_s5 + $0xea4] sm:$0xf]  ;;  %v6033_v58 = vor.u32 %v6865_v44, %v6030_v46 }
 0x133   : > { %3765 = vmatpush.bf16.msra.mxu3 %v5825_v24  ;;  %3727 = vmatmul.bf16.vlgmr.msra.gmra.mxu0 %v7025_v48  ;;  %v6286_v52 = vld [vmem:[%s7333_s5 + $0xeb0] sm:$0xf0]  ;;  %v7027_v54 = vld [vmem:[#allocation1 + $0x9] sm:$0xff]  ;;  %v6161_v59 = vor.u32 %v6897_v47, %v6158_v50 }
 0x134   : > { %3771 = vmatpush.bf16.msrb.mxu0 %v6065_v25  ;;  %v6961_v55 = vld [vmem:[%s7333_s5 + $0xfa4] sm:$0xf]  ;;  %v6414_v56 = vld [vmem:[%s7333_s5 + $0xfb0] sm:$0xf0]  ;;  %v6289_v60 = vor.u32 %v6929_v51, %v6286_v52 }
 0x135   : > { %3753 = vmatmul.bf16.vlgmr.msra.gmra.mxu2 %v7026_v53  ;;  %3740 = vmatmul.bf16.vlgmr.msra.gmra.mxu1 %v7027_v54  ;;  %v7028_v57 = vld [vmem:[#allocation1 + $0x1b] sm:$0xff]  ;;  %v6861_v61 = vld [vmem:[%s7333_s5 + $0xc84] sm:$0xf]  ;;  %v6417_v0 = vor.u32 %v6961_v55, %v6414_v56 }
 0x136   : > { %3784 = vmatpush.bf16.msrb.mxu1 %v6193_v15  ;;  %3797 = vmatpush.bf16.msrb.mxu2 %v6321_v27  ;;  %v6014_v62 = vld [vmem:[%s7333_s5 + $0xc90] sm:$0xf0]  ;;  %v6893_v63 = vld [vmem:[%s7333_s5 + $0xd84] sm:$0xf]  ;;  %v3533_v9 = vpop.f32.mrf.mxu1 }
 0x137   : > { %3810 = vmatpush.bf16.msrb.mxu3 %v6449_v34  ;;  %v6142_v1 = vld [vmem:[%s7333_s5 + $0xd90] sm:$0xf0]  ;;  %v6925_v2 = vld [vmem:[%s7333_s5 + $0xe84] sm:$0xf]  ;;  %v6017_v8 = vor.u32 %v6861_v61, %v6014_v62  ;;  %v3534_v17 = vadd.f32 %v3533_v9, %v3521_v7  ;;  %v3522_v44 = vpop.f32.mrf.mxu0  ;;  %v4532_v9 = vld [vmem:[%s7333_s5 + $0xe8] sm:$0xf] }
 0x138   : > { %3766 = vmatmul.bf16.vlgmr.msra.gmra.mxu3 %v7028_v57  ;;  %3772 = vmatpush.bf16.msrb.mxu0 %v6049_v41  ;;  %v6270_v3 = vld [vmem:[%s7333_s5 + $0xe90] sm:$0xf0]  ;;  %v6957_v5 = vld [vmem:[%s7333_s5 + $0xf84] sm:$0xf]  ;;  %v6145_v10 = vor.u32 %v6893_v63, %v6142_v1  ;;  %v4500_v44 = vld [vmem:[%s7333_s5 + $0xa8] sm:$0xf] }
 0x139   : > { %v6398_v6 = vld [vmem:[%s7333_s5 + $0xf90] sm:$0xf0]  ;;  %v6273_v11 = vor.u32 %v6925_v2, %v6270_v3  ;;  %v6857_v12 = vld [vmem:[%s7333_s5 + $0xc64] sm:$0xf] }
 0x13a   : > { %3785 = vmatpush.bf16.msrb.mxu1 %v6177_v42  ;;  %3798 = vmatpush.bf16.msrb.mxu2 %v6305_v43  ;;  %v5998_v13 = vld [vmem:[%s7333_s5 + $0xc70] sm:$0xf0]  ;;  %v6889_v14 = vld [vmem:[%s7333_s5 + $0xd64] sm:$0xf]  ;;  %v6401_v16 = vor.u32 %v6957_v5, %v6398_v6 }
 0x13b   : > { %3811 = vmatpush.bf16.msrb.mxu3 %v6433_v49  ;;  %v6126_v18 = vld [vmem:[%s7333_s5 + $0xd70] sm:$0xf0]  ;;  %v6921_v19 = vld [vmem:[%s7333_s5 + $0xe64] sm:$0xf]  ;;  %v6001_v25 = vor.u32 %v6857_v12, %v5998_v13  ;;  %v3546_v35 = vpop.f32.mrf.mxu2  ;;  %v3559_v41 = vpop.f32.mrf.mxu3 }
 0x13c   : > { %3773 = vmatpush.bf16.msrb.mxu0 %v6033_v58  ;;  %v6254_v45 = vld [vmem:[%s7333_s5 + $0xe70] sm:$0xf0]  ;;  %v6953_v23 = vld [vmem:[%s7333_s5 + $0xf64] sm:$0xf]  ;;  %v6129_v15 = vor.u32 %v6889_v14, %v6126_v18  ;;  %v3547_v40 = vadd.f32 %v3546_v35, %v3534_v17  ;;  %v6524_v14 = vld [vmem:[%s7333_s5 + $0x1f4] sm:$0xf0] }
 0x13d   : > { %v6382_v24 = vld [vmem:[%s7333_s5 + $0xf70] sm:$0xf0]  ;;  %v6257_v27 = vor.u32 %v6921_v19, %v6254_v45  ;;  %v6853_v28 = vld [vmem:[%s7333_s5 + $0xc44] sm:$0xf]  ;;  %v6556_v17 = vld [vmem:[%s7333_s5 + $0x2f4] sm:$0xf0] }
 0x13e   : > { %3786 = vmatpush.bf16.msrb.mxu1 %v6161_v59  ;;  %3799 = vmatpush.bf16.msrb.mxu2 %v6289_v60  ;;  %v5982_v30 = vld [vmem:[%s7333_s5 + $0xc50] sm:$0xf0]  ;;  %v6885_v33 = vld [vmem:[%s7333_s5 + $0xd44] sm:$0xf]  ;;  %v6385_v34 = vor.u32 %v6953_v23, %v6382_v24  ;;  %v3535_v47 = vpop.f32.mrf.mxu1  ;;  %v7889_v48 = vadd.f32 %v3559_v41, %v3547_v40  ;;  %v4916_v45 = vld [vmem:[%s7333_s5 + $0x3e8] sm:$0xf] }
 0x13f   : > { %3812 = vmatpush.bf16.msrb.mxu3 %v6417_v0  ;;  %v6110_v36 = vld [vmem:[%s7333_s5 + $0xd50] sm:$0xf0]  ;;  %v6917_v37 = vld [vmem:[%s7333_s5 + $0xe44] sm:$0xf]  ;;  %v5985_v46 = vor.u32 %v6853_v28, %v5982_v30  ;;  %v6588_v23 = vld [vmem:[%s7333_s5 + $0x3f4] sm:$0xf0] }
 0x140   : > { %3774 = vmatpush.bf16.msrb.mxu0 %v6017_v8  ;;  %v6238_v39 = vld [vmem:[%s7333_s5 + $0xe50] sm:$0xf0]  ;;  %v6949_v42 = vld [vmem:[%s7333_s5 + $0xf44] sm:$0xf]  ;;  %v6113_v49 = vor.u32 %v6885_v33, %v6110_v36  ;;  %v4516_v28 = vld [vmem:[%s7333_s5 + $0xc8] sm:$0xf] }
 0x141   : > { %v6366_v43 = vld [vmem:[%s7333_s5 + $0xf50] sm:$0xf0]  ;;  %v6241_v50 = vor.u32 %v6917_v37, %v6238_v39  ;;  %v6849_v51 = vld [vmem:[%s7333_s5 + $0xc24] sm:$0xf]  ;;  %v6488_v30 = vld [vmem:[%s7333_s5 + $0xd4] sm:$0xf0] }
 0x142   : > { %3787 = vmatpush.bf16.msrb.mxu1 %v6145_v10  ;;  %3800 = vmatpush.bf16.msrb.mxu2 %v6273_v11  ;;  %v5966_v52 = vld [vmem:[%s7333_s5 + $0xc30] sm:$0xf0]  ;;  %v6881_v53 = vld [vmem:[%s7333_s5 + $0xd24] sm:$0xf]  ;;  %v6369_v54 = vor.u32 %v6949_v42, %v6366_v43  ;;  %v6492_v10 = vld [vmem:[%s7333_s5 + $0xf4] sm:$0xf0]  ;;  %v4517_v41 = vor.u32 %v6488_v30, %v4516_v28 }
 0x143   : > { %3813 = vmatpush.bf16.msrb.mxu3 %v6401_v16  ;;  %v6094_v55 = vld [vmem:[%s7333_s5 + $0xd30] sm:$0xf0]  ;;  %v6913_v56 = vld [vmem:[%s7333_s5 + $0xe24] sm:$0xf]  ;;  %v5969_v60 = vor.u32 %v6849_v51, %v5966_v52  ;;  %v3548_v8 = vpop.f32.mrf.mxu2  ;;  %v4660_v11 = vld [vmem:[%s7333_s5 + $0x1e8] sm:$0xf]  ;;  %v3561_v12 = vpop.f32.mrf.mxu3 }
 0x144   : > { %3775 = vmatpush.bf16.msrb.mxu0 %v6001_v25  ;;  %v6222_v57 = vld [vmem:[%s7333_s5 + $0xe30] sm:$0xf0]  ;;  %v6945_v58 = vld [vmem:[%s7333_s5 + $0xf24] sm:$0xf]  ;;  %v6097_v63 = vor.u32 %v6881_v53, %v6094_v55  ;;  %v4788_v16 = vld [vmem:[%s7333_s5 + $0x2e8] sm:$0xf]  ;;  %v4533_v25 = vor.u32 %v6492_v10, %v4532_v9 }
 0x145   : > { %v6350_v59 = vld [vmem:[%s7333_s5 + $0xf30] sm:$0xf0]  ;;  %v6845_v61 = vld [vmem:[%s7333_s5 + $0xc04] sm:$0xf]  ;;  %v6225_v0 = vor.u32 %v6913_v56, %v6222_v57  ;;  %v4644_v33 = vld [vmem:[%s7333_s5 + $0x1c8] sm:$0xf] }
 0x146   : > { %3788 = vmatpush.bf16.msrb.mxu1 %v6129_v15  ;;  %3801 = vmatpush.bf16.msrb.mxu2 %v6257_v27  ;;  %v5950_v62 = vld [vmem:[%s7333_s5 + $0xc10] sm:$0xf0]  ;;  %v6877_v1 = vld [vmem:[%s7333_s5 + $0xd04] sm:$0xf]  ;;  %v6353_v4 = vor.u32 %v6945_v58, %v6350_v59  ;;  %v4661_v15 = vor.u32 %v6524_v14, %v4660_v11  ;;  %v4789_v27 = vor.u32 %v6556_v17, %v4788_v16  ;;  %v6520_v35 = vld [vmem:[%s7333_s5 + $0x1d4] sm:$0xf0] }
 0x147   : > { %3814 = vmatpush.bf16.msrb.mxu3 %v6385_v34  ;;  %v6078_v2 = vld [vmem:[%s7333_s5 + $0xd10] sm:$0xf0]  ;;  %v6909_v3 = vld [vmem:[%s7333_s5 + $0xe04] sm:$0xf]  ;;  %v5953_v13 = vor.u32 %v6845_v61, %v5950_v62  ;;  %v4917_v34 = vor.u32 %v6588_v23, %v4916_v45  ;;  %v4772_v36 = vld [vmem:[%s7333_s5 + $0x2c8] sm:$0xf]  ;;  %v4645_v42 = vor.u32 %v6520_v35, %v4644_v33 }
 0x148   : > { %3776 = vmatpush.bf16.msrb.mxu0 %v5985_v46  ;;  %v6206_v5 = vld [vmem:[%s7333_s5 + $0xe10] sm:$0xf0]  ;;  %v6941_v6 = vld [vmem:[%s7333_s5 + $0xf04] sm:$0xf]  ;;  %v6081_v18 = vor.u32 %v6877_v1, %v6078_v2  ;;  %v6552_v37 = vld [vmem:[%s7333_s5 + $0x2d4] sm:$0xf0] }
 0x149   : > { %v6334_v7 = vld [vmem:[%s7333_s5 + $0xf10] sm:$0xf0]  ;;  %v6209_v19 = vor.u32 %v6909_v3, %v6206_v5  ;;  %v4900_v39 = vld [vmem:[%s7333_s5 + $0x3c8] sm:$0xf]  ;;  %v6584_v40 = vld [vmem:[%s7333_s5 + $0x3d4] sm:$0xf0]  ;;  %v4773_v43 = vor.u32 %v6552_v37, %v4772_v36 }
 0x14a   : > { %3789 = vmatpush.bf16.msrb.mxu1 %v6113_v49  ;;  %3802 = vmatpush.bf16.msrb.mxu2 %v6241_v50  ;;  %v6337_v24 = vor.u32 %v6941_v6, %v6334_v7  ;;  %v6484_v46 = vld [vmem:[%s7333_s5 + $0xb4] sm:$0xf0]  ;;  %v4628_v47 = vld [vmem:[%s7333_s5 + $0x1a8] sm:$0xf]  ;;  %v7029_v49 = vld [vmem:[#allocation1 + $0x24] sm:$0xff]  ;;  %v4901_v50 = vor.u32 %v6584_v40, %v4900_v39 }
 0x14b   : > { %3815 = vmatpush.bf16.msrb.mxu3 %v6369_v54  ;;  %v6516_v51 = vld [vmem:[%s7333_s5 + $0x1b4] sm:$0xf0]  ;;  %v4756_v52 = vld [vmem:[%s7333_s5 + $0x2a8] sm:$0xf]  ;;  %v7030_v54 = vld [vmem:[#allocation1 + $0x36] sm:$0xff]  ;;  %v4501_v59 = vor.u32 %v6484_v46, %v4500_v44 }
 0x14c   : > { %3777 = vmatpush.bf16.msrb.mxu0 %v5969_v60  ;;  %v6548_v53 = vld [vmem:[%s7333_s5 + $0x2b4] sm:$0xf0]  ;;  %v7031_v55 = vld [vmem:[#allocation1 + $0x2d] sm:$0xff]  ;;  %v4629_v60 = vor.u32 %v6516_v51, %v4628_v47 }
 0x14d   : > { %v4884_v56 = vld [vmem:[%s7333_s5 + $0x3a8] sm:$0xf]  ;;  %v6580_v57 = vld [vmem:[%s7333_s5 + $0x3b4] sm:$0xf0]  ;;  %v4757_v61 = vor.u32 %v6548_v53, %v4756_v52 }
 0x14e   : > { %3790 = vmatpush.bf16.msrb.mxu1 %v6097_v63  ;;  %3803 = vmatpush.bf16.msrb.mxu2 %v6225_v0  ;;  %v7032_v58 = vld [vmem:[#allocation1 + $0x3f] sm:$0xff]  ;;  %v4484_v62 = vld [vmem:[%s7333_s5 + $0x88] sm:$0xf]  ;;  %v4885_v1 = vor.u32 %v6580_v57, %v4884_v56 }
 0x14f   : > { %3816 = vmatpush.bf16.msrb.mxu3 %v6353_v4  ;;  %v6480_v63 = vld [vmem:[%s7333_s5 + $0x94] sm:$0xf0]  ;;  %v4612_v0 = vld [vmem:[%s7333_s5 + $0x188] sm:$0xf] }
 0x150   : > { %3778 = vmatpush.bf16.msrb.mxu0 %v5953_v13  ;;  %v6512_v2 = vld [vmem:[%s7333_s5 + $0x194] sm:$0xf0]  ;;  %v4740_v3 = vld [vmem:[%s7333_s5 + $0x288] sm:$0xf]  ;;  %v3572_v5 = vpop.f32.mrf.mxu0  ;;  %v4485_v9 = vor.u32 %v6480_v63, %v4484_v62 }
 0x151   : > { %v6544_v4 = vld [vmem:[%s7333_s5 + $0x294] sm:$0xf0]  ;;  %v4868_v6 = vld [vmem:[%s7333_s5 + $0x388] sm:$0xf]  ;;  %v3573_v8 = vadd.f32 %v3572_v5, %v7889_v48  ;;  %v4613_v11 = vor.u32 %v6512_v2, %v4612_v0 }
 0x152   : > { %3791 = vmatpush.bf16.msrb.mxu1 %v6081_v18  ;;  %3804 = vmatpush.bf16.msrb.mxu2 %v6209_v19  ;;  %v6576_v7 = vld [vmem:[%s7333_s5 + $0x394] sm:$0xf0]  ;;  %v3585_v10 = vpop.f32.mrf.mxu1  ;;  %v4741_v12 = vor.u32 %v6544_v4, %v4740_v3  ;;  %v4468_v13 = vld [vmem:[%s7333_s5 + $0x68] sm:$0xf] }
 0x153   : > { %3817 = vmatpush.bf16.msrb.mxu3 %v6337_v24  ;;  %3779 = vmatmul.bf16.vlgmr.msrb.gmra.mxu0 %v7029_v49  ;;  %v6476_v14 = vld [vmem:[%s7333_s5 + $0x74] sm:$0xf0]  ;;  %v4596_v16 = vld [vmem:[%s7333_s5 + $0x168] sm:$0xf]  ;;  %v4869_v17 = vor.u32 %v6576_v7, %v4868_v6  ;;  %v3586_v18 = vadd.f32 %v3585_v10, %v3573_v8 }
 0x154   : > { %3823 = vmatpush.bf16.msra.mxu0 %v4533_v25  ;;  %v6508_v19 = vld [vmem:[%s7333_s5 + $0x174] sm:$0xf0]  ;;  %v4724_v45 = vld [vmem:[%s7333_s5 + $0x268] sm:$0xf]  ;;  %v4469_v25 = vor.u32 %v6476_v14, %v4468_v13 }
 0x155   : > { %3805 = vmatmul.bf16.vlgmr.msrb.gmra.mxu2 %v7030_v54  ;;  %3792 = vmatmul.bf16.vlgmr.msrb.gmra.mxu1 %v7031_v55  ;;  %v6540_v48 = vld [vmem:[%s7333_s5 + $0x274] sm:$0xf0]  ;;  %v4852_v23 = vld [vmem:[%s7333_s5 + $0x368] sm:$0xf] }
 0x156   : > { %3836 = vmatpush.bf16.msra.mxu1 %v4661_v15  ;;  %3849 = vmatpush.bf16.msra.mxu2 %v4789_v27  ;;  %v6572_v24 = vld [vmem:[%s7333_s5 + $0x374] sm:$0xf0]  ;;  %v4597_v15 = vor.u32 %v6508_v19, %v4596_v16  ;;  %v4725_v27 = vor.u32 %v6540_v48, %v4724_v45  ;;  %v4452_v28 = vld [vmem:[%s7333_s5 + $0x48] sm:$0xf] }
 0x157   : > { %3862 = vmatpush.bf16.msra.mxu3 %v4917_v34  ;;  %v6472_v30 = vld [vmem:[%s7333_s5 + $0x54] sm:$0xf0]  ;;  %v4580_v33 = vld [vmem:[%s7333_s5 + $0x148] sm:$0xf]  ;;  %v4853_v34 = vor.u32 %v6572_v24, %v4852_v23 }
 0x158   : > { %3818 = vmatmul.bf16.vlgmr.msrb.gmra.mxu3 %v7032_v58  ;;  %3824 = vmatpush.bf16.msra.mxu0 %v4517_v41  ;;  %v3598_v35 = vpop.f32.mrf.mxu2  ;;  %v6504_v36 = vld [vmem:[%s7333_s5 + $0x154] sm:$0xf0]  ;;  %v4708_v37 = vld [vmem:[%s7333_s5 + $0x248] sm:$0xf]  ;;  %v3574_v44 = vpop.f32.mrf.mxu0  ;;  %v4453_v46 = vor.u32 %v6472_v30, %v4452_v28 }
 0x159   : > { %v6536_v39 = vld [vmem:[%s7333_s5 + $0x254] sm:$0xf0]  ;;  %v3599_v40 = vadd.f32 %v3598_v35, %v3586_v18  ;;  %v4436_v52 = vld [vmem:[%s7333_s5 + $0x28] sm:$0xf] }
 0x15a   : > { %3837 = vmatpush.bf16.msra.mxu1 %v4645_v42  ;;  %3850 = vmatpush.bf16.msra.mxu2 %v4773_v43  ;;  %v4836_v42 = vld [vmem:[%s7333_s5 + $0x348] sm:$0xf]  ;;  %v6568_v43 = vld [vmem:[%s7333_s5 + $0x354] sm:$0xf0]  ;;  %v3587_v47 = vpop.f32.mrf.mxu1  ;;  %v4709_v51 = vor.u32 %v6536_v39, %v4708_v37 }
 0x15b   : > { %3863 = vmatpush.bf16.msra.mxu3 %v4901_v50  ;;  %v3611_v41 = vpop.f32.mrf.mxu3  ;;  %v4581_v50 = vor.u32 %v6504_v36, %v4580_v33  ;;  %v6468_v53 = vld [vmem:[%s7333_s5 + $0x34] sm:$0xf0]  ;;  %v4564_v54 = vld [vmem:[%s7333_s5 + $0x128] sm:$0xf]  ;;  %v4837_v55 = vor.u32 %v6568_v43, %v4836_v42 }
 0x15c   : > { %3825 = vmatpush.bf16.msra.mxu0 %v4501_v59  ;;  %v7956_v49 = vadd.f32 %v3611_v41, %v3599_v40  ;;  %v6500_v56 = vld [vmem:[%s7333_s5 + $0x134] sm:$0xf0]  ;;  %v4692_v57 = vld [vmem:[%s7333_s5 + $0x228] sm:$0xf] }
 0x15d   : > { %v6532_v58 = vld [vmem:[%s7333_s5 + $0x234] sm:$0xf0]  ;;  %v4820_v59 = vld [vmem:[%s7333_s5 + $0x328] sm:$0xf]  ;;  %v4565_v0 = vor.u32 %v6500_v56, %v4564_v54 }
 0x15e   : > { %3838 = vmatpush.bf16.msra.mxu1 %v4629_v60  ;;  %3851 = vmatpush.bf16.msra.mxu2 %v4757_v61  ;;  %v6564_v60 = vld [vmem:[%s7333_s5 + $0x334] sm:$0xf0]  ;;  %v4437_v61 = vor.u32 %v6468_v53, %v4436_v52  ;;  %v4420_v62 = vld [vmem:[%s7333_s5 + $0x8] sm:$0xf] }
 0x15f   : > { %3864 = vmatpush.bf16.msra.mxu3 %v4885_v1  ;;  %v6464_v63 = vld [vmem:[%s7333_s5 + $0x14] sm:$0xf0]  ;;  %v4693_v1 = vor.u32 %v6532_v58, %v4692_v57  ;;  %v4548_v2 = vld [vmem:[%s7333_s5 + $0x108] sm:$0xf]  ;;  %v4821_v5 = vor.u32 %v6564_v60, %v4820_v59 }
 0x160   : > { %3826 = vmatpush.bf16.msra.mxu0 %v4485_v9  ;;  %v6496_v3 = vld [vmem:[%s7333_s5 + $0x114] sm:$0xf0]  ;;  %v4676_v4 = vld [vmem:[%s7333_s5 + $0x208] sm:$0xf]  ;;  %v3600_v9 = vpop.f32.mrf.mxu2  ;;  %v4421_v14 = vor.u32 %v6464_v63, %v4420_v62 }
 0x161   : > { %v6528_v6 = vld [vmem:[%s7333_s5 + $0x214] sm:$0xf0]  ;;  %v4804_v7 = vld [vmem:[%s7333_s5 + $0x308] sm:$0xf]  ;;  %v4549_v19 = vor.u32 %v6496_v3, %v4548_v2 }
 0x162   : > { %3839 = vmatpush.bf16.msra.mxu1 %v4613_v11  ;;  %3852 = vmatpush.bf16.msra.mxu2 %v4741_v12  ;;  %v6560_v8 = vld [vmem:[%s7333_s5 + $0x314] sm:$0xf0]  ;;  %v5044_v10 = vld [vmem:[%s7333_s5 + $0x4e8] sm:$0xf]  ;;  %v4677_v45 = vor.u32 %v6528_v6, %v4676_v4 }
 0x163   : > { %3865 = vmatpush.bf16.msra.mxu3 %v4869_v17  ;;  %v6620_v11 = vld [vmem:[%s7333_s5 + $0x4f4] sm:$0xf0]  ;;  %v5172_v12 = vld [vmem:[%s7333_s5 + $0x5e8] sm:$0xf]  ;;  %v3613_v13 = vpop.f32.mrf.mxu3  ;;  %v4805_v24 = vor.u32 %v6560_v8, %v4804_v7 }
 0x164   : > { %3827 = vmatpush.bf16.msra.mxu0 %v4469_v25  ;;  %v6652_v16 = vld [vmem:[%s7333_s5 + $0x5f4] sm:$0xf0]  ;;  %v5300_v17 = vld [vmem:[%s7333_s5 + $0x6e8] sm:$0xf]  ;;  %v5045_v25 = vor.u32 %v6620_v11, %v5044_v10 }
 0x165   : > { %v6684_v18 = vld [vmem:[%s7333_s5 + $0x6f4] sm:$0xf0]  ;;  %v5428_v48 = vld [vmem:[%s7333_s5 + $0x7e8] sm:$0xf] }
 0x166   : > { %3840 = vmatpush.bf16.msra.mxu1 %v4597_v15  ;;  %3853 = vmatpush.bf16.msra.mxu2 %v4725_v27  ;;  %v6716_v23 = vld [vmem:[%s7333_s5 + $0x7f4] sm:$0xf0]  ;;  %v5173_v15 = vor.u32 %v6652_v16, %v5172_v12  ;;  %v5301_v27 = vor.u32 %v6684_v18, %v5300_v17  ;;  %v5028_v28 = vld [vmem:[%s7333_s5 + $0x4c8] sm:$0xf] }
 0x167   : > { %3866 = vmatpush.bf16.msra.mxu3 %v4853_v34  ;;  %v6616_v30 = vld [vmem:[%s7333_s5 + $0x4d4] sm:$0xf0]  ;;  %v5156_v33 = vld [vmem:[%s7333_s5 + $0x5c8] sm:$0xf]  ;;  %v5429_v34 = vor.u32 %v6716_v23, %v5428_v48 }
 0x168   : > { %3828 = vmatpush.bf16.msra.mxu0 %v4453_v46  ;;  %v6648_v35 = vld [vmem:[%s7333_s5 + $0x5d4] sm:$0xf0]  ;;  %v5284_v36 = vld [vmem:[%s7333_s5 + $0x6c8] sm:$0xf]  ;;  %v5029_v41 = vor.u32 %v6616_v30, %v5028_v28 }
 0x169   : > { %v6680_v37 = vld [vmem:[%s7333_s5 + $0x6d4] sm:$0xf0]  ;;  %v5412_v39 = vld [vmem:[%s7333_s5 + $0x7c8] sm:$0xf]  ;;  %v5157_v42 = vor.u32 %v6648_v35, %v5156_v33 }
 0x16a   : > { %3841 = vmatpush.bf16.msra.mxu1 %v4581_v50  ;;  %3854 = vmatpush.bf16.msra.mxu2 %v4709_v51  ;;  %v6712_v40 = vld [vmem:[%s7333_s5 + $0x7d4] sm:$0xf0]  ;;  %v5285_v43 = vor.u32 %v6680_v37, %v5284_v36  ;;  %v5012_v44 = vld [vmem:[%s7333_s5 + $0x4a8] sm:$0xf] }
 0x16b   : > { %3867 = vmatpush.bf16.msra.mxu3 %v4837_v55  ;;  %v6612_v46 = vld [vmem:[%s7333_s5 + $0x4b4] sm:$0xf0]  ;;  %v5140_v47 = vld [vmem:[%s7333_s5 + $0x5a8] sm:$0xf]  ;;  %v5413_v50 = vor.u32 %v6712_v40, %v5412_v39 }
 0x16c   : > { %3829 = vmatpush.bf16.msra.mxu0 %v4437_v61  ;;  %v6644_v51 = vld [vmem:[%s7333_s5 + $0x5b4] sm:$0xf0]  ;;  %v5268_v52 = vld [vmem:[%s7333_s5 + $0x6a8] sm:$0xf]  ;;  %v5013_v56 = vor.u32 %v6612_v46, %v5012_v44 }
 0x16d   : > { %v6676_v53 = vld [vmem:[%s7333_s5 + $0x6b4] sm:$0xf0]  ;;  %v5396_v54 = vld [vmem:[%s7333_s5 + $0x7a8] sm:$0xf]  ;;  %v5141_v57 = vor.u32 %v6644_v51, %v5140_v47 }
 0x16e   : > { %3842 = vmatpush.bf16.msra.mxu1 %v4565_v0  ;;  %3855 = vmatpush.bf16.msra.mxu2 %v4693_v1  ;;  %v6708_v55 = vld [vmem:[%s7333_s5 + $0x7b4] sm:$0xf0]  ;;  %v5269_v58 = vor.u32 %v6676_v53, %v5268_v52  ;;  %v4996_v59 = vld [vmem:[%s7333_s5 + $0x488] sm:$0xf] }
 0x16f   : > { %3868 = vmatpush.bf16.msra.mxu3 %v4821_v5  ;;  %v6608_v60 = vld [vmem:[%s7333_s5 + $0x494] sm:$0xf0]  ;;  %v5124_v61 = vld [vmem:[%s7333_s5 + $0x588] sm:$0xf]  ;;  %v5397_v62 = vor.u32 %v6708_v55, %v5396_v54 }
 0x170   : > { %3830 = vmatpush.bf16.msra.mxu0 %v4421_v14  ;;  %v6640_v63 = vld [vmem:[%s7333_s5 + $0x594] sm:$0xf0]  ;;  %v5252_v0 = vld [vmem:[%s7333_s5 + $0x688] sm:$0xf]  ;;  %v4997_v4 = vor.u32 %v6608_v60, %v4996_v59  ;;  %v3624_v5 = vpop.f32.mrf.mxu0 }
 0x171   : > { %v6672_v1 = vld [vmem:[%s7333_s5 + $0x694] sm:$0xf0]  ;;  %v5380_v2 = vld [vmem:[%s7333_s5 + $0x788] sm:$0xf]  ;;  %v5125_v6 = vor.u32 %v6640_v63, %v5124_v61 }
 0x172   : > { %3843 = vmatpush.bf16.msra.mxu1 %v4549_v19  ;;  %3856 = vmatpush.bf16.msra.mxu2 %v4677_v45  ;;  %v6704_v3 = vld [vmem:[%s7333_s5 + $0x794] sm:$0xf0]  ;;  %v5253_v7 = vor.u32 %v6672_v1, %v5252_v0  ;;  %v4980_v8 = vld [vmem:[%s7333_s5 + $0x468] sm:$0xf]  ;;  %v3637_v11 = vpop.f32.mrf.mxu1 }
 0x173   : > { %3869 = vmatpush.bf16.msra.mxu3 %v4805_v24  ;;  %3831 = vmatmul.bf16.vlgmr.msra.gmra.mxu0 %v7454_v21  ;;  %v6604_v9 = vld [vmem:[%s7333_s5 + $0x474] sm:$0xf0]  ;;  %v5108_v10 = vld [vmem:[%s7333_s5 + $0x568] sm:$0xf]  ;;  %v5381_v12 = vor.u32 %v6704_v3, %v5380_v2  ;;  %v3638_v17 = vadd.f32 %v3637_v11, %v3624_v5 }
 0x174   : > { %3875 = vmatpush.bf16.msrb.mxu0 %v5045_v25  ;;  %v6636_v13 = vld [vmem:[%s7333_s5 + $0x574] sm:$0xf0]  ;;  %v5236_v14 = vld [vmem:[%s7333_s5 + $0x668] sm:$0xf]  ;;  %v4981_v45 = vor.u32 %v6604_v9, %v4980_v8 }
 0x175   : > { %3857 = vmatmul.bf16.vlgmr.msra.gmra.mxu2 %v7452_v20  ;;  %3844 = vmatmul.bf16.vlgmr.msra.gmra.mxu1 %v7461_v26  ;;  %v6668_v16 = vld [vmem:[%s7333_s5 + $0x674] sm:$0xf0]  ;;  %v5364_v18 = vld [vmem:[%s7333_s5 + $0x768] sm:$0xf]  ;;  %v5109_v48 = vor.u32 %v6636_v13, %v5108_v10 }
 0x176   : > { %3888 = vmatpush.bf16.msrb.mxu1 %v5173_v15  ;;  %3901 = vmatpush.bf16.msrb.mxu2 %v5301_v27  ;;  %v6700_v19 = vld [vmem:[%s7333_s5 + $0x774] sm:$0xf0]  ;;  %v5237_v23 = vor.u32 %v6668_v16, %v5236_v14  ;;  %v4964_v24 = vld [vmem:[%s7333_s5 + $0x448] sm:$0xf] }
 0x177   : > { %3914 = vmatpush.bf16.msrb.mxu3 %v5429_v34  ;;  %v6600_v25 = vld [vmem:[%s7333_s5 + $0x454] sm:$0xf0]  ;;  %v5092_v15 = vld [vmem:[%s7333_s5 + $0x548] sm:$0xf]  ;;  %v5365_v28 = vor.u32 %v6700_v19, %v5364_v18 }
 0x178   : > { %3870 = vmatmul.bf16.vlgmr.msra.gmra.mxu3 %v7456_v22  ;;  %3876 = vmatpush.bf16.msrb.mxu0 %v5029_v41  ;;  %v3650_v27 = vpop.f32.mrf.mxu2  ;;  %v6632_v30 = vld [vmem:[%s7333_s5 + $0x554] sm:$0xf0]  ;;  %v5220_v33 = vld [vmem:[%s7333_s5 + $0x648] sm:$0xf]  ;;  %v4965_v40 = vor.u32 %v6600_v25, %v4964_v24 }
 0x179   : > { %v6664_v34 = vld [vmem:[%s7333_s5 + $0x654] sm:$0xf0]  ;;  %v3651_v35 = vadd.f32 %v3650_v27, %v3638_v17  ;;  %v5348_v37 = vld [vmem:[%s7333_s5 + $0x748] sm:$0xf] }
 0x17a   : > { %3889 = vmatpush.bf16.msrb.mxu1 %v5157_v42  ;;  %3902 = vmatpush.bf16.msrb.mxu2 %v5285_v43  ;;  %v6696_v39 = vld [vmem:[%s7333_s5 + $0x754] sm:$0xf0]  ;;  %v3626_v42 = vpop.f32.mrf.mxu0  ;;  %v5093_v43 = vor.u32 %v6632_v30, %v5092_v15  ;;  %v5221_v44 = vor.u32 %v6664_v34, %v5220_v33  ;;  %v4948_v46 = vld [vmem:[%s7333_s5 + $0x428] sm:$0xf]  ;;  %v3639_v51 = vpop.f32.mrf.mxu1 }
 0x17b   : > { %3915 = vmatpush.bf16.msrb.mxu3 %v5413_v50  ;;  %v3663_v36 = vpop.f32.mrf.mxu3  ;;  %v6596_v47 = vld [vmem:[%s7333_s5 + $0x434] sm:$0xf0]  ;;  %v5076_v50 = vld [vmem:[%s7333_s5 + $0x528] sm:$0xf]  ;;  %v5349_v52 = vor.u32 %v6696_v39, %v5348_v37 }
 0x17c   : > { %3877 = vmatpush.bf16.msrb.mxu0 %v5013_v56  ;;  %v8026_v41 = vadd.f32 %v3663_v36, %v3651_v35  ;;  %v6628_v53 = vld [vmem:[%s7333_s5 + $0x534] sm:$0xf0]  ;;  %v5204_v54 = vld [vmem:[%s7333_s5 + $0x628] sm:$0xf] }
 0x17d   : > { %v6660_v55 = vld [vmem:[%s7333_s5 + $0x634] sm:$0xf0]  ;;  %v5332_v56 = vld [vmem:[%s7333_s5 + $0x728] sm:$0xf]  ;;  %v5077_v61 = vor.u32 %v6628_v53, %v5076_v50 }
 0x17e   : > { %3890 = vmatpush.bf16.msrb.mxu1 %v5141_v57  ;;  %3903 = vmatpush.bf16.msrb.mxu2 %v5269_v58  ;;  %v6692_v57 = vld [vmem:[%s7333_s5 + $0x734] sm:$0xf0]  ;;  %v4949_v58 = vor.u32 %v6596_v47, %v4948_v46  ;;  %v4932_v59 = vld [vmem:[%s7333_s5 + $0x408] sm:$0xf] }
 0x17f   : > { %3916 = vmatpush.bf16.msrb.mxu3 %v5397_v62  ;;  %v6592_v60 = vld [vmem:[%s7333_s5 + $0x414] sm:$0xf0]  ;;  %v5205_v62 = vor.u32 %v6660_v55, %v5204_v54  ;;  %v5060_v63 = vld [vmem:[%s7333_s5 + $0x508] sm:$0xf]  ;;  %v5333_v3 = vor.u32 %v6692_v57, %v5332_v56 }
 0x180   : > { %3878 = vmatpush.bf16.msrb.mxu0 %v4997_v4  ;;  %v6624_v0 = vld [vmem:[%s7333_s5 + $0x514] sm:$0xf0]  ;;  %v5188_v1 = vld [vmem:[%s7333_s5 + $0x608] sm:$0xf]  ;;  %v3652_v2 = vpop.f32.mrf.mxu2  ;;  %v4933_v11 = vor.u32 %v6592_v60, %v4932_v59 }
 0x181   : > { %v6656_v4 = vld [vmem:[%s7333_s5 + $0x614] sm:$0xf0]  ;;  %v5316_v5 = vld [vmem:[%s7333_s5 + $0x708] sm:$0xf]  ;;  %v5061_v16 = vor.u32 %v6624_v0, %v5060_v63 }
 0x182   : > { %3891 = vmatpush.bf16.msrb.mxu1 %v5125_v6  ;;  %3904 = vmatpush.bf16.msrb.mxu2 %v5253_v7  ;;  %v6688_v6 = vld [vmem:[%s7333_s5 + $0x714] sm:$0xf0]  ;;  %v5556_v8 = vld [vmem:[%s7333_s5 + $0x8e8] sm:$0xf]  ;;  %v5189_v17 = vor.u32 %v6656_v4, %v5188_v1 }
 0x183   : > { %3917 = vmatpush.bf16.msrb.mxu3 %v5381_v12  ;;  %v3665_v7 = vpop.f32.mrf.mxu3  ;;  %v6748_v9 = vld [vmem:[%s7333_s5 + $0x8f4] sm:$0xf0]  ;;  %v5684_v10 = vld [vmem:[%s7333_s5 + $0x9e8] sm:$0xf] }
 0x184   : > { %3879 = vmatpush.bf16.msrb.mxu0 %v4981_v45  ;;  %v6780_v12 = vld [vmem:[%s7333_s5 + $0x9f4] sm:$0xf0]  ;;  %v5812_v13 = vld [vmem:[%s7333_s5 + $0xae8] sm:$0xf]  ;;  %v5317_v45 = vor.u32 %v6688_v6, %v5316_v5 }
 0x185   : > { %v6812_v14 = vld [vmem:[%s7333_s5 + $0xaf4] sm:$0xf0]  ;;  %v5940_v18 = vld [vmem:[%s7333_s5 + $0xbe8] sm:$0xf] }
 0x186   : > { %3892 = vmatpush.bf16.msrb.mxu1 %v5109_v48  ;;  %3905 = vmatpush.bf16.msrb.mxu2 %v5237_v23  ;;  %v6844_v19 = vld [vmem:[%s7333_s5 + $0xbf4] sm:$0xf0]  ;;  %v5557_v48 = vor.u32 %v6748_v9, %v5556_v8  ;;  %v5685_v23 = vor.u32 %v6780_v12, %v5684_v10  ;;  %v5813_v24 = vor.u32 %v6812_v14, %v5812_v13  ;;  %v5540_v25 = vld [vmem:[%s7333_s5 + $0x8c8] sm:$0xf] }
 0x187   : > { %3918 = vmatpush.bf16.msrb.mxu3 %v5365_v28  ;;  %v6744_v15 = vld [vmem:[%s7333_s5 + $0x8d4] sm:$0xf0]  ;;  %v5668_v27 = vld [vmem:[%s7333_s5 + $0x9c8] sm:$0xf]  ;;  %v5941_v28 = vor.u32 %v6844_v19, %v5940_v18 }
 0x188   : > { %3880 = vmatpush.bf16.msrb.mxu0 %v4965_v40  ;;  %v6776_v30 = vld [vmem:[%s7333_s5 + $0x9d4] sm:$0xf0]  ;;  %v5796_v33 = vld [vmem:[%s7333_s5 + $0xac8] sm:$0xf]  ;;  %v5541_v37 = vor.u32 %v6744_v15, %v5540_v25 }
 0x189   : > { %v6808_v34 = vld [vmem:[%s7333_s5 + $0xad4] sm:$0xf0]  ;;  %v5924_v35 = vld [vmem:[%s7333_s5 + $0xbc8] sm:$0xf]  ;;  %v5669_v39 = vor.u32 %v6776_v30, %v5668_v27 }
 0x18a   : > { %3893 = vmatpush.bf16.msrb.mxu1 %v5093_v43  ;;  %3906 = vmatpush.bf16.msrb.mxu2 %v5221_v44  ;;  %v6840_v36 = vld [vmem:[%s7333_s5 + $0xbd4] sm:$0xf0]  ;;  %v5797_v40 = vor.u32 %v6808_v34, %v5796_v33  ;;  %v5524_v42 = vld [vmem:[%s7333_s5 + $0x8a8] sm:$0xf] }
 0x18b   : > { %3919 = vmatpush.bf16.msrb.mxu3 %v5349_v52  ;;  %v6740_v43 = vld [vmem:[%s7333_s5 + $0x8b4] sm:$0xf0]  ;;  %v5652_v44 = vld [vmem:[%s7333_s5 + $0x9a8] sm:$0xf]  ;;  %v5925_v46 = vor.u32 %v6840_v36, %v5924_v35 }
 0x18c   : > { %3881 = vmatpush.bf16.msrb.mxu0 %v4949_v58  ;;  %v6772_v47 = vld [vmem:[%s7333_s5 + $0x9b4] sm:$0xf0]  ;;  %v5780_v50 = vld [vmem:[%s7333_s5 + $0xaa8] sm:$0xf]  ;;  %v5525_v54 = vor.u32 %v6740_v43, %v5524_v42 }
 0x18d   : > { %v6804_v51 = vld [vmem:[%s7333_s5 + $0xab4] sm:$0xf0]  ;;  %v5908_v52 = vld [vmem:[%s7333_s5 + $0xba8] sm:$0xf]  ;;  %v5653_v55 = vor.u32 %v6772_v47, %v5652_v44 }
 0x18e   : > { %3894 = vmatpush.bf16.msrb.mxu1 %v5077_v61  ;;  %3907 = vmatpush.bf16.msrb.mxu2 %v5205_v62  ;;  %v6836_v53 = vld [vmem:[%s7333_s5 + $0xbb4] sm:$0xf0]  ;;  %v5781_v56 = vor.u32 %v6804_v51, %v5780_v50  ;;  %v5508_v57 = vld [vmem:[%s7333_s5 + $0x888] sm:$0xf] }
 0x18f   : > { %3920 = vmatpush.bf16.msrb.mxu3 %v5333_v3  ;;  %v6736_v58 = vld [vmem:[%s7333_s5 + $0x894] sm:$0xf0]  ;;  %v5636_v59 = vld [vmem:[%s7333_s5 + $0x988] sm:$0xf]  ;;  %v5909_v60 = vor.u32 %v6836_v53, %v5908_v52 }
 0x190   : > { %3882 = vmatpush.bf16.msrb.mxu0 %v4933_v11  ;;  %v6768_v61 = vld [vmem:[%s7333_s5 + $0x994] sm:$0xf0]  ;;  %v5764_v62 = vld [vmem:[%s7333_s5 + $0xa88] sm:$0xf]  ;;  %v5509_v2 = vor.u32 %v6736_v58, %v5508_v57  ;;  %v3676_v3 = vpop.f32.mrf.mxu0 }
 0x191   : > { %v6800_v63 = vld [vmem:[%s7333_s5 + $0xa94] sm:$0xf0]  ;;  %v5892_v0 = vld [vmem:[%s7333_s5 + $0xb88] sm:$0xf]  ;;  %v5637_v4 = vor.u32 %v6768_v61, %v5636_v59  ;;  %v3677_v9 = vadd.f32 %v3676_v3, %v8026_v41 }
 0x192   : > { %3895 = vmatpush.bf16.msrb.mxu1 %v5061_v16  ;;  %3908 = vmatpush.bf16.msrb.mxu2 %v5189_v17  ;;  %v6832_v1 = vld [vmem:[%s7333_s5 + $0xb94] sm:$0xf0]  ;;  %v5765_v5 = vor.u32 %v6800_v63, %v5764_v62  ;;  %v5492_v6 = vld [vmem:[%s7333_s5 + $0x868] sm:$0xf]  ;;  %v3689_v10 = vpop.f32.mrf.mxu1 }
 0x193   : > { %3921 = vmatpush.bf16.msrb.mxu3 %v5317_v45  ;;  %3883 = vmatmul.bf16.vlgmr.msrb.gmra.mxu0 %v7510_v31  ;;  %v6732_v7 = vld [vmem:[%s7333_s5 + $0x874] sm:$0xf0]  ;;  %v5620_v8 = vld [vmem:[%s7333_s5 + $0x968] sm:$0xf]  ;;  %v5893_v11 = vor.u32 %v6832_v1, %v5892_v0  ;;  %v3690_v18 = vadd.f32 %v3689_v10, %v3677_v9 }
 0x194   : > { %3927 = vmatpush.bf16.msra.mxu0 %v5557_v48  ;;  %v6764_v12 = vld [vmem:[%s7333_s5 + $0x974] sm:$0xf0]  ;;  %v5748_v13 = vld [vmem:[%s7333_s5 + $0xa68] sm:$0xf]  ;;  %v5493_v19 = vor.u32 %v6732_v7, %v5492_v6 }
 0x195   : > { %3909 = vmatmul.bf16.vlgmr.msrb.gmra.mxu2 %v7508_v29  ;;  %3896 = vmatmul.bf16.vlgmr.msrb.gmra.mxu1 %v7517_v38  ;;  %v6796_v14 = vld [vmem:[%s7333_s5 + $0xa74] sm:$0xf0]  ;;  %v5876_v16 = vld [vmem:[%s7333_s5 + $0xb68] sm:$0xf]  ;;  %v5621_v41 = vor.u32 %v6764_v12, %v5620_v8 }
 0x196   : > { %3940 = vmatpush.bf16.msra.mxu1 %v5685_v23  ;;  %3953 = vmatpush.bf16.msra.mxu2 %v5813_v24  ;;  %v6828_v17 = vld [vmem:[%s7333_s5 + $0xb74] sm:$0xf0]  ;;  %v5749_v45 = vor.u32 %v6796_v14, %v5748_v13  ;;  %v5476_v48 = vld [vmem:[%s7333_s5 + $0x848] sm:$0xf] }
 0x197   : > { %3966 = vmatpush.bf16.msra.mxu3 %v5941_v28  ;;  %v6728_v23 = vld [vmem:[%s7333_s5 + $0x854] sm:$0xf0]  ;;  %v5604_v24 = vld [vmem:[%s7333_s5 + $0x948] sm:$0xf]  ;;  %v5877_v15 = vor.u32 %v6828_v17, %v5876_v16 }
 0x198   : > { %3922 = vmatmul.bf16.vlgmr.msrb.gmra.mxu3 %v7512_v32  ;;  %3928 = vmatpush.bf16.msra.mxu0 %v5541_v37  ;;  %v3702_v25 = vpop.f32.mrf.mxu2  ;;  %v6760_v27 = vld [vmem:[%s7333_s5 + $0x954] sm:$0xf0]  ;;  %v5732_v28 = vld [vmem:[%s7333_s5 + $0xa48] sm:$0xf]  ;;  %v5477_v37 = vor.u32 %v6728_v23, %v5476_v48 }
 0x199   : > { %v6792_v30 = vld [vmem:[%s7333_s5 + $0xa54] sm:$0xf0]  ;;  %v3703_v33 = vadd.f32 %v3702_v25, %v3690_v18  ;;  %v5860_v35 = vld [vmem:[%s7333_s5 + $0xb48] sm:$0xf]  ;;  %v5605_v42 = vor.u32 %v6760_v27, %v5604_v24 }
 0x19a   : > { %3941 = vmatpush.bf16.msra.mxu1 %v5669_v39  ;;  %3954 = vmatpush.bf16.msra.mxu2 %v5797_v40  ;;  %v6824_v36 = vld [vmem:[%s7333_s5 + $0xb54] sm:$0xf0]  ;;  %v3678_v40 = vpop.f32.mrf.mxu0  ;;  %v5733_v43 = vor.u32 %v6792_v30, %v5732_v28  ;;  %v5460_v44 = vld [vmem:[%s7333_s5 + $0x828] sm:$0xf]  ;;  %v3691_v50 = vpop.f32.mrf.mxu1 }
 0x19b   : > { %3967 = vmatpush.bf16.msra.mxu3 %v5925_v46  ;;  %v3715_v34 = vpop.f32.mrf.mxu3  ;;  %v6724_v46 = vld [vmem:[%s7333_s5 + $0x834] sm:$0xf0]  ;;  %v5588_v47 = vld [vmem:[%s7333_s5 + $0x928] sm:$0xf]  ;;  %v5861_v51 = vor.u32 %v6824_v36, %v5860_v35 }
 0x19c   : > { %3929 = vmatpush.bf16.msra.mxu0 %v5525_v54  ;;  %v8097_v39 = vadd.f32 %v3715_v34, %v3703_v33  ;;  %v6756_v52 = vld [vmem:[%s7333_s5 + $0x934] sm:$0xf0]  ;;  %v5716_v53 = vld [vmem:[%s7333_s5 + $0xa28] sm:$0xf]  ;;  %v5461_v57 = vor.u32 %v6724_v46, %v5460_v44 }
 0x19d   : > { %v6788_v54 = vld [vmem:[%s7333_s5 + $0xa34] sm:$0xf0]  ;;  %v5444_v58 = vld [vmem:[%s7333_s5 + $0x808] sm:$0xf] }
 0x19e   : > { %3942 = vmatpush.bf16.msra.mxu1 %v5653_v55  ;;  %3955 = vmatpush.bf16.msra.mxu2 %v5781_v56  ;;  %v5844_v55 = vld [vmem:[%s7333_s5 + $0xb28] sm:$0xf]  ;;  %v6820_v56 = vld [vmem:[%s7333_s5 + $0xb34] sm:$0xf0]  ;;  %v5717_v61 = vor.u32 %v6788_v54, %v5716_v53 }
 0x19f   : > { %3968 = vmatpush.bf16.msra.mxu3 %v5909_v60  ;;  %v6720_v59 = vld [vmem:[%s7333_s5 + $0x814] sm:$0xf0]  ;;  %v5589_v60 = vor.u32 %v6756_v52, %v5588_v47  ;;  %v5572_v62 = vld [vmem:[%s7333_s5 + $0x908] sm:$0xf] }
 0x1a0   : > { %3930 = vmatpush.bf16.msra.mxu0 %v5509_v2  ;;  %v6752_v63 = vld [vmem:[%s7333_s5 + $0x914] sm:$0xf0]  ;;  %v5700_v0 = vld [vmem:[%s7333_s5 + $0xa08] sm:$0xf]  ;;  %v3704_v1 = vpop.f32.mrf.mxu2  ;;  %v5845_v2 = vor.u32 %v6820_v56, %v5844_v55  ;;  %v5445_v10 = vor.u32 %v6720_v59, %v5444_v58 }
 0x1a1   : > { %v6784_v3 = vld [vmem:[%s7333_s5 + $0xa14] sm:$0xf0]  ;;  %v6068_v7 = vld [vmem:[%s7333_s5 + $0xce8] sm:$0xf]  ;;  %v5573_v14 = vor.u32 %v6752_v63, %v5572_v62 }
 0x1a2   : > { %3943 = vmatpush.bf16.msra.mxu1 %v5637_v4  ;;  %3956 = vmatpush.bf16.msra.mxu2 %v5765_v5  ;;  %v5828_v4 = vld [vmem:[%s7333_s5 + $0xb08] sm:$0xf]  ;;  %v6816_v5 = vld [vmem:[%s7333_s5 + $0xb14] sm:$0xf0]  ;;  %v5701_v16 = vor.u32 %v6784_v3, %v5700_v0 }
 0x1a3   : > { %3969 = vmatpush.bf16.msra.mxu3 %v5893_v11  ;;  %v3717_v6 = vpop.f32.mrf.mxu3  ;;  %v6876_v8 = vld [vmem:[%s7333_s5 + $0xcf4] sm:$0xf0]  ;;  %v6196_v9 = vld [vmem:[%s7333_s5 + $0xde8] sm:$0xf] }
 0x1a4   : > { %3931 = vmatpush.bf16.msra.mxu0 %v5493_v19  ;;  %v6908_v11 = vld [vmem:[%s7333_s5 + $0xdf4] sm:$0xf0]  ;;  %v6324_v12 = vld [vmem:[%s7333_s5 + $0xee8] sm:$0xf]  ;;  %v5829_v19 = vor.u32 %v6816_v5, %v5828_v4 }
 0x1a5   : > { %v6940_v13 = vld [vmem:[%s7333_s5 + $0xef4] sm:$0xf0]  ;;  %v6452_v17 = vld [vmem:[%s7333_s5 + $0xfe8] sm:$0xf] }
 0x1a6   : > { %3944 = vmatpush.bf16.msra.mxu1 %v5621_v41  ;;  %3957 = vmatpush.bf16.msra.mxu2 %v5749_v45  ;;  %v6972_v18 = vld [vmem:[%s7333_s5 + $0xff4] sm:$0xf0]  ;;  %v6069_v41 = vor.u32 %v6876_v8, %v6068_v7  ;;  %v6197_v45 = vor.u32 %v6908_v11, %v6196_v9  ;;  %v6325_v48 = vor.u32 %v6940_v13, %v6324_v12  ;;  %v6052_v23 = vld [vmem:[%s7333_s5 + $0xcc8] sm:$0xf] }
 0x1a7   : > { %3970 = vmatpush.bf16.msra.mxu3 %v5877_v15  ;;  %v6872_v24 = vld [vmem:[%s7333_s5 + $0xcd4] sm:$0xf0]  ;;  %v6180_v25 = vld [vmem:[%s7333_s5 + $0xdc8] sm:$0xf]  ;;  %v6453_v15 = vor.u32 %v6972_v18, %v6452_v17 }
 0x1a8   : > { %3932 = vmatpush.bf16.msra.mxu0 %v5477_v37  ;;  %v6904_v27 = vld [vmem:[%s7333_s5 + $0xdd4] sm:$0xf0]  ;;  %v6308_v28 = vld [vmem:[%s7333_s5 + $0xec8] sm:$0xf]  ;;  %v6053_v35 = vor.u32 %v6872_v24, %v6052_v23 }
 0x1a9   : > { %v6936_v30 = vld [vmem:[%s7333_s5 + $0xed4] sm:$0xf0]  ;;  %v6436_v33 = vld [vmem:[%s7333_s5 + $0xfc8] sm:$0xf]  ;;  %v6181_v36 = vor.u32 %v6904_v27, %v6180_v25 }
 0x1aa   : > { %3945 = vmatpush.bf16.msra.mxu1 %v5605_v42  ;;  %3958 = vmatpush.bf16.msra.mxu2 %v5733_v43  ;;  %v6968_v34 = vld [vmem:[%s7333_s5 + $0xfd4] sm:$0xf0]  ;;  %v6309_v37 = vor.u32 %v6936_v30, %v6308_v28  ;;  %v6036_v40 = vld [vmem:[%s7333_s5 + $0xca8] sm:$0xf] }
 0x1ab   : > { %3971 = vmatpush.bf16.msra.mxu3 %v5861_v51  ;;  %v6868_v42 = vld [vmem:[%s7333_s5 + $0xcb4] sm:$0xf0]  ;;  %v6164_v43 = vld [vmem:[%s7333_s5 + $0xda8] sm:$0xf]  ;;  %v6437_v46 = vor.u32 %v6968_v34, %v6436_v33 }
 0x1ac   : > { %3933 = vmatpush.bf16.msra.mxu0 %v5461_v57  ;;  %v7033_v44 = vld [vmem:[#allocation1] sm:$0xff]  ;;  %v6292_v50 = vld [vmem:[%s7333_s5 + $0xea8] sm:$0xf]  ;;  %v6037_v57 = vor.u32 %v6868_v42, %v6036_v40 }
 0x1ad   : > { %v6900_v47 = vld [vmem:[%s7333_s5 + $0xdb4] sm:$0xf0]  ;;  %v7034_v52 = vld [vmem:[#allocation1 + $0x12] sm:$0xff]  ;;  %v7035_v53 = vld [vmem:[#allocation1 + $0x9] sm:$0xff] }
 0x1ae   : > { %3946 = vmatpush.bf16.msra.mxu1 %v5589_v60  ;;  %3959 = vmatpush.bf16.msra.mxu2 %v5717_v61  ;;  %v6932_v51 = vld [vmem:[%s7333_s5 + $0xeb4] sm:$0xf0]  ;;  %v6420_v54 = vld [vmem:[%s7333_s5 + $0xfa8] sm:$0xf]  ;;  %v6165_v58 = vor.u32 %v6900_v47, %v6164_v43 }
 0x1af   : > { %3972 = vmatpush.bf16.msra.mxu3 %v5845_v2  ;;  %v6964_v55 = vld [vmem:[%s7333_s5 + $0xfb4] sm:$0xf0]  ;;  %v6293_v59 = vor.u32 %v6932_v51, %v6292_v50  ;;  %v6020_v60 = vld [vmem:[%s7333_s5 + $0xc88] sm:$0xf] }
 0x1b0   : > { %3934 = vmatpush.bf16.msra.mxu0 %v5445_v10  ;;  %v7036_v56 = vld [vmem:[#allocation1 + $0x1b] sm:$0xff]  ;;  %v6148_v62 = vld [vmem:[%s7333_s5 + $0xd88] sm:$0xf]  ;;  %v6421_v63 = vor.u32 %v6964_v55, %v6420_v54  ;;  %v3728_v3 = vpop.f32.mrf.mxu0 }
 0x1b1   : > { %v6864_v61 = vld [vmem:[%s7333_s5 + $0xc94] sm:$0xf0]  ;;  %v6276_v1 = vld [vmem:[%s7333_s5 + $0xe88] sm:$0xf]  ;;  %v3729_v6 = vadd.f32 %v3728_v3, %v8097_v39 }
 0x1b2   : > { %3947 = vmatpush.bf16.msra.mxu1 %v5573_v14  ;;  %3960 = vmatpush.bf16.msra.mxu2 %v5701_v16  ;;  %v6896_v0 = vld [vmem:[%s7333_s5 + $0xd94] sm:$0xf0]  ;;  %v6404_v4 = vld [vmem:[%s7333_s5 + $0xf88] sm:$0xf]  ;;  %v6021_v7 = vor.u32 %v6864_v61, %v6020_v60  ;;  %v3741_v8 = vpop.f32.mrf.mxu1 }
 0x1b3   : > { %3973 = vmatpush.bf16.msra.mxu3 %v5829_v19  ;;  %3935 = vmatmul.bf16.vlgmr.msra.gmra.mxu0 %v7033_v44  ;;  %v6928_v2 = vld [vmem:[%s7333_s5 + $0xe94] sm:$0xf0]  ;;  %v6149_v9 = vor.u32 %v6896_v0, %v6148_v62  ;;  %v6004_v11 = vld [vmem:[%s7333_s5 + $0xc68] sm:$0xf]  ;;  %v3742_v16 = vadd.f32 %v3741_v8, %v3729_v6 }
 0x1b4   : > { %3979 = vmatpush.bf16.msrb.mxu0 %v6069_v41  ;;  %v6960_v5 = vld [vmem:[%s7333_s5 + $0xf94] sm:$0xf0]  ;;  %v6277_v10 = vor.u32 %v6928_v2, %v6276_v1  ;;  %v6132_v13 = vld [vmem:[%s7333_s5 + $0xd68] sm:$0xf] }
 0x1b5   : > { %3961 = vmatmul.bf16.vlgmr.msra.gmra.mxu2 %v7034_v52  ;;  %3948 = vmatmul.bf16.vlgmr.msra.gmra.mxu1 %v7035_v53  ;;  %v6860_v12 = vld [vmem:[%s7333_s5 + $0xc74] sm:$0xf0]  ;;  %v6405_v14 = vor.u32 %v6960_v5, %v6404_v4  ;;  %v6260_v18 = vld [vmem:[%s7333_s5 + $0xe68] sm:$0xf] }
 0x1b6   : > { %3992 = vmatpush.bf16.msrb.mxu1 %v6197_v45  ;;  %4005 = vmatpush.bf16.msrb.mxu2 %v6325_v48  ;;  %v6892_v17 = vld [vmem:[%s7333_s5 + $0xd74] sm:$0xf0]  ;;  %v6388_v19 = vld [vmem:[%s7333_s5 + $0xf68] sm:$0xf]  ;;  %v6005_v45 = vor.u32 %v6860_v12, %v6004_v11  ;;  %v6522_v11 = vld [vmem:[%s7333_s5 + $0x1ec] sm:$0xf] }
 0x1b7   : > { %4018 = vmatpush.bf16.msrb.mxu3 %v6453_v15  ;;  %v6924_v39 = vld [vmem:[%s7333_s5 + $0xe74] sm:$0xf0]  ;;  %v6133_v48 = vor.u32 %v6892_v17, %v6132_v13  ;;  %v5988_v24 = vld [vmem:[%s7333_s5 + $0xc48] sm:$0xf]  ;;  %v4790_v17 = vld [vmem:[%s7333_s5 + $0x2f8] sm:$0xf0] }
 0x1b8   : > { %3974 = vmatmul.bf16.vlgmr.msra.gmra.mxu3 %v7036_v56  ;;  %3980 = vmatpush.bf16.msrb.mxu0 %v6053_v35  ;;  %v6956_v41 = vld [vmem:[%s7333_s5 + $0xf74] sm:$0xf0]  ;;  %v6261_v23 = vor.u32 %v6924_v39, %v6260_v18  ;;  %v6116_v15 = vld [vmem:[%s7333_s5 + $0xd48] sm:$0xf]  ;;  %v3754_v28 = vpop.f32.mrf.mxu2  ;;  %v3730_v42 = vpop.f32.mrf.mxu0 }
 0x1b9   : > { %v6856_v25 = vld [vmem:[%s7333_s5 + $0xc54] sm:$0xf0]  ;;  %v6389_v27 = vor.u32 %v6956_v41, %v6388_v19  ;;  %v6244_v33 = vld [vmem:[%s7333_s5 + $0xe48] sm:$0xf]  ;;  %v3755_v35 = vadd.f32 %v3754_v28, %v3742_v16  ;;  %v6554_v16 = vld [vmem:[%s7333_s5 + $0x2ec] sm:$0xf] }
 0x1ba   : > { %3993 = vmatpush.bf16.msrb.mxu1 %v6181_v36  ;;  %4006 = vmatpush.bf16.msrb.mxu2 %v6309_v37  ;;  %v6888_v30 = vld [vmem:[%s7333_s5 + $0xd54] sm:$0xf0]  ;;  %v6372_v37 = vld [vmem:[%s7333_s5 + $0xf48] sm:$0xf]  ;;  %v5989_v43 = vor.u32 %v6856_v25, %v5988_v24  ;;  %v3743_v44 = vpop.f32.mrf.mxu1  ;;  %v6586_v19 = vld [vmem:[%s7333_s5 + $0x3ec] sm:$0xf]  ;;  %v4793_v24 = vor.u32 %v6554_v16, %v4790_v17 }
 0x1bb   : > { %4019 = vmatpush.bf16.msrb.mxu3 %v6437_v46  ;;  %v6920_v34 = vld [vmem:[%s7333_s5 + $0xe54] sm:$0xf0]  ;;  %v3767_v36 = vpop.f32.mrf.mxu3  ;;  %v6117_v47 = vor.u32 %v6888_v30, %v6116_v15  ;;  %v5972_v51 = vld [vmem:[%s7333_s5 + $0xc28] sm:$0xf]  ;;  %v4918_v41 = vld [vmem:[%s7333_s5 + $0x3f8] sm:$0xf0] }
 0x1bc   : > { %3981 = vmatpush.bf16.msrb.mxu0 %v6037_v57  ;;  %v6952_v40 = vld [vmem:[%s7333_s5 + $0xf54] sm:$0xf0]  ;;  %v8164_v46 = vadd.f32 %v3767_v36, %v3755_v35  ;;  %v6245_v50 = vor.u32 %v6920_v34, %v6244_v33  ;;  %v6100_v53 = vld [vmem:[%s7333_s5 + $0xd28] sm:$0xf]  ;;  %v6486_v25 = vld [vmem:[%s7333_s5 + $0xcc] sm:$0xf]  ;;  %v4921_v28 = vor.u32 %v6586_v19, %v4918_v41 }
 0x1bd   : > { %v6852_v52 = vld [vmem:[%s7333_s5 + $0xc34] sm:$0xf0]  ;;  %v6373_v54 = vor.u32 %v6952_v40, %v6372_v37  ;;  %v6228_v56 = vld [vmem:[%s7333_s5 + $0xe28] sm:$0xf]  ;;  %v4518_v15 = vld [vmem:[%s7333_s5 + $0xd8] sm:$0xf0] }
 0x1be   : > { %3994 = vmatpush.bf16.msrb.mxu1 %v6165_v58  ;;  %4007 = vmatpush.bf16.msrb.mxu2 %v6293_v59  ;;  %v6884_v55 = vld [vmem:[%s7333_s5 + $0xd34] sm:$0xf0]  ;;  %v6356_v58 = vld [vmem:[%s7333_s5 + $0xf28] sm:$0xf]  ;;  %v5973_v60 = vor.u32 %v6852_v52, %v5972_v51  ;;  %v4646_v30 = vld [vmem:[%s7333_s5 + $0x1d8] sm:$0xf0]  ;;  %v4521_v37 = vor.u32 %v6486_v25, %v4518_v15 }
 0x1bf   : > { %4020 = vmatpush.bf16.msrb.mxu3 %v6421_v63  ;;  %v6916_v57 = vld [vmem:[%s7333_s5 + $0xe34] sm:$0xf0]  ;;  %v5956_v61 = vld [vmem:[%s7333_s5 + $0xc08] sm:$0xf]  ;;  %v6101_v63 = vor.u32 %v6884_v55, %v6100_v53  ;;  %v6550_v33 = vld [vmem:[%s7333_s5 + $0x2cc] sm:$0xf] }
 0x1c0   : > { %3982 = vmatpush.bf16.msrb.mxu0 %v6021_v7  ;;  %v6948_v59 = vld [vmem:[%s7333_s5 + $0xf34] sm:$0xf0]  ;;  %v6229_v0 = vor.u32 %v6916_v57, %v6228_v56  ;;  %v6084_v1 = vld [vmem:[%s7333_s5 + $0xd08] sm:$0xf]  ;;  %v3756_v8 = vpop.f32.mrf.mxu2  ;;  %v4774_v34 = vld [vmem:[%s7333_s5 + $0x2d8] sm:$0xf0] }
 0x1c1   : > { %v6848_v62 = vld [vmem:[%s7333_s5 + $0xc14] sm:$0xf0]  ;;  %v6212_v3 = vld [vmem:[%s7333_s5 + $0xe08] sm:$0xf]  ;;  %v6357_v4 = vor.u32 %v6948_v59, %v6356_v58  ;;  %v6582_v35 = vld [vmem:[%s7333_s5 + $0x3cc] sm:$0xf]  ;;  %v4777_v42 = vor.u32 %v6550_v33, %v4774_v34 }
 0x1c2   : > { %3995 = vmatpush.bf16.msrb.mxu1 %v6149_v9  ;;  %4008 = vmatpush.bf16.msrb.mxu2 %v6277_v10  ;;  %v6880_v2 = vld [vmem:[%s7333_s5 + $0xd14] sm:$0xf0]  ;;  %v6340_v6 = vld [vmem:[%s7333_s5 + $0xf08] sm:$0xf]  ;;  %v6490_v9 = vld [vmem:[%s7333_s5 + $0xec] sm:$0xf]  ;;  %v5957_v13 = vor.u32 %v6848_v62, %v5956_v61 }
 0x1c3   : > { %4021 = vmatpush.bf16.msrb.mxu3 %v6405_v14  ;;  %v6912_v5 = vld [vmem:[%s7333_s5 + $0xe14] sm:$0xf0]  ;;  %v4534_v10 = vld [vmem:[%s7333_s5 + $0xf8] sm:$0xf0]  ;;  %v3769_v12 = vpop.f32.mrf.mxu3  ;;  %v6085_v18 = vor.u32 %v6880_v2, %v6084_v1  ;;  %v6546_v53 = vld [vmem:[%s7333_s5 + $0x2ac] sm:$0xf] }
 0x1c4   : > { %3983 = vmatpush.bf16.msrb.mxu0 %v6005_v45  ;;  %v6944_v7 = vld [vmem:[%s7333_s5 + $0xf14] sm:$0xf0]  ;;  %v4662_v14 = vld [vmem:[%s7333_s5 + $0x1f8] sm:$0xf0]  ;;  %v6213_v39 = vor.u32 %v6912_v5, %v6212_v3  ;;  %v7038_v55 = vld [vmem:[#allocation1 + $0x36] sm:$0xff] }
 0x1c5   : > { %v6341_v45 = vor.u32 %v6944_v7, %v6340_v6  ;;  %v4902_v36 = vld [vmem:[%s7333_s5 + $0x3d8] sm:$0xf0]  ;;  %v7039_v56 = vld [vmem:[#allocation1 + $0x2d] sm:$0xff] }
 0x1c6   : > { %3996 = vmatpush.bf16.msrb.mxu1 %v6133_v48  ;;  %4009 = vmatpush.bf16.msrb.mxu2 %v6261_v23  ;;  %v4537_v48 = vor.u32 %v6490_v9, %v4534_v10  ;;  %v4665_v23 = vor.u32 %v6522_v11, %v4662_v14  ;;  %v4502_v44 = vld [vmem:[%s7333_s5 + $0xb8] sm:$0xf0]  ;;  %v4905_v51 = vor.u32 %v6582_v35, %v4902_v36  ;;  %v6578_v57 = vld [vmem:[%s7333_s5 + $0x3ac] sm:$0xf]  ;;  %v8215_v9 = vld [vmem:[%s7343_s26] sm:$0xf] }
 0x1c7   : > { %4022 = vmatpush.bf16.msrb.mxu3 %v6389_v27  ;;  %v6518_v27 = vld [vmem:[%s7333_s5 + $0x1cc] sm:$0xf]  ;;  %v4630_v52 = vld [vmem:[%s7333_s5 + $0x1b8] sm:$0xf0] }
 0x1c8   : > { %3984 = vmatpush.bf16.msrb.mxu0 %v5989_v43  ;;  %v4649_v40 = vor.u32 %v6518_v27, %v4646_v30  ;;  %v6482_v43 = vld [vmem:[%s7333_s5 + $0xac] sm:$0xf]  ;;  %v4886_v58 = vld [vmem:[%s7333_s5 + $0x3b8] sm:$0xf0] }
 0x1c9   : > { %v7040_v59 = vld [vmem:[#allocation1 + $0x3f] sm:$0xff]  ;;  %v6510_v1 = vld [vmem:[%s7333_s5 + $0x18c] sm:$0xf]  ;;  %v4889_v2 = vor.u32 %v6578_v57, %v4886_v58 }
 0x1ca   : > { %3997 = vmatpush.bf16.msrb.mxu1 %v6117_v47  ;;  %4010 = vmatpush.bf16.msrb.mxu2 %v6245_v50  ;;  %v6514_v47 = vld [vmem:[%s7333_s5 + $0x1ac] sm:$0xf]  ;;  %v7037_v50 = vld [vmem:[#allocation1 + $0x24] sm:$0xff] }
 0x1cb   : > { %4023 = vmatpush.bf16.msrb.mxu3 %v6373_v54  ;;  %v4758_v54 = vld [vmem:[%s7333_s5 + $0x2b8] sm:$0xf0]  ;;  %v4633_v61 = vor.u32 %v6514_v47, %v4630_v52  ;;  %v6574_v7 = vld [vmem:[%s7333_s5 + $0x38c] sm:$0xf] }
 0x1cc   : > { %3985 = vmatpush.bf16.msrb.mxu0 %v5973_v60  ;;  %v4505_v60 = vor.u32 %v6482_v43, %v4502_v44  ;;  %v4761_v62 = vor.u32 %v6546_v53, %v4758_v54  ;;  %v4614_v3 = vld [vmem:[%s7333_s5 + $0x198] sm:$0xf0]  ;;  %v6474_v16 = vld [vmem:[%s7333_s5 + $0x6c] sm:$0xf] }
 0x1cd   : > { %v4742_v5 = vld [vmem:[%s7333_s5 + $0x298] sm:$0xf0]  ;;  %v4253_v25 = vld [vmem:[%s8229_s14] sm:$0xf] }
 0x1ce   : > { %3998 = vmatpush.bf16.msrb.mxu1 %v6101_v63  ;;  %4011 = vmatpush.bf16.msrb.mxu2 %v6229_v0  ;;  %v6478_v63 = vld [vmem:[%s7333_s5 + $0x8c] sm:$0xf]  ;;  %v4486_v0 = vld [vmem:[%s7333_s5 + $0x98] sm:$0xf0]  ;;  %v4255_v44 = vperm.slane %v4253_v25, 0 }
 0x1cf   : > { %4024 = vmatpush.bf16.msrb.mxu3 %v6357_v4  ;;  %v6542_v4 = vld [vmem:[%s7333_s5 + $0x28c] sm:$0xf]  ;;  %v4870_v8 = vld [vmem:[%s7333_s5 + $0x398] sm:$0xf0]  ;;  %v4489_v11 = vor.u32 %v6478_v63, %v4486_v0 }
 0x1d0   : > { %3986 = vmatpush.bf16.msrb.mxu0 %v5957_v13  ;;  %v3780_v6 = vpop.f32.mrf.mxu0  ;;  %v4617_v13 = vor.u32 %v6510_v1, %v4614_v3  ;;  %v4745_v14 = vor.u32 %v6542_v4, %v4742_v5  ;;  %v4470_v17 = vld [vmem:[%s7333_s5 + $0x78] sm:$0xf0]  ;;  %v6470_v30 = vld [vmem:[%s7333_s5 + $0x4c] sm:$0xf] }
 0x1d1   : > { %v3781_v10 = vadd.f32 %v3780_v6, %v8164_v46  ;;  %v4598_v41 = vld [vmem:[%s7333_s5 + $0x178] sm:$0xf0]  ;;  %v6538_v46 = vld [vmem:[%s7333_s5 + $0x26c] sm:$0xf]  ;;  %v4473_v15 = vor.u32 %v6474_v16, %v4470_v17 }
 0x1d2   : > { %3999 = vmatpush.bf16.msrb.mxu1 %v6085_v18  ;;  %4012 = vmatpush.bf16.msrb.mxu2 %v6213_v39  ;;  %v3793_v12 = vpop.f32.mrf.mxu1  ;;  %v6506_v18 = vld [vmem:[%s7333_s5 + $0x16c] sm:$0xf]  ;;  %v4873_v39 = vor.u32 %v6574_v7, %v4870_v8  ;;  %v4454_v33 = vld [vmem:[%s7333_s5 + $0x58] sm:$0xf0] }
 0x1d3   : > { %4025 = vmatpush.bf16.msrb.mxu3 %v6341_v45  ;;  %3987 = vmatmul.bf16.vlgmr.msrb.gmra.mxu0 %v7037_v50  ;;  %v3794_v19 = vadd.f32 %v3793_v12, %v3781_v10  ;;  %v4726_v45 = vld [vmem:[%s7333_s5 + $0x278] sm:$0xf0]  ;;  %v4601_v27 = vor.u32 %v6506_v18, %v4598_v41  ;;  %v6502_v34 = vld [vmem:[%s7333_s5 + $0x14c] sm:$0xf] }
 0x1d4   : > { %4031 = vmatpush.bf16.msra.mxu0 %v4537_v48  ;;  %v4241_v48 = vperm.slane %v8215_v9, 0  ;;  %v6566_v52 = vld [vmem:[%s7333_s5 + $0x34c] sm:$0xf]  ;;  %v4838_v53 = vld [vmem:[%s7333_s5 + $0x358] sm:$0xf0] }
 0x1d5   : > { %4013 = vmatmul.bf16.vlgmr.msrb.gmra.mxu2 %v7038_v55  ;;  %4000 = vmatmul.bf16.vlgmr.msrb.gmra.mxu1 %v7039_v56  ;;  %v4256_v55 = vperm.slane %v4253_v25, 1  ;;  %v4457_v56 = vor.u32 %v6470_v30, %v4454_v33  ;;  %v4841_v63 = vor.u32 %v6566_v52, %v4838_v53  ;;  %v4566_v0 = vld [vmem:[%s7333_s5 + $0x138] sm:$0xf0]  ;;  %v6530_v1 = vld [vmem:[%s7333_s5 + $0x22c] sm:$0xf] }
 0x1d6   : > { %4044 = vmatpush.bf16.msra.mxu1 %v4665_v23  ;;  %4057 = vmatpush.bf16.msra.mxu2 %v4793_v24  ;;  %v6570_v23 = vld [vmem:[%s7333_s5 + $0x36c] sm:$0xf]  ;;  %v4854_v24 = vld [vmem:[%s7333_s5 + $0x378] sm:$0xf0]  ;;  %v4249_v43 = vmul.f32 %v4241_v48, %v7956_v49 }
 0x1d7   : > { %4070 = vmatpush.bf16.msra.mxu3 %v4921_v28  ;;  %v4729_v28 = vor.u32 %v6538_v46, %v4726_v45  ;;  %v4857_v35 = vor.u32 %v6570_v23, %v4854_v24  ;;  %v6562_v5 = vld [vmem:[%s7333_s5 + $0x32c] sm:$0xf]  ;;  %v4822_v6 = vld [vmem:[%s7333_s5 + $0x338] sm:$0xf0] }
 0x1d8   : > { %4026 = vmatmul.bf16.vlgmr.msrb.gmra.mxu3 %v7040_v59  ;;  %4032 = vmatpush.bf16.msra.mxu0 %v4521_v37  ;;  %v3806_v36 = vpop.f32.mrf.mxu2  ;;  %v4582_v37 = vld [vmem:[%s7333_s5 + $0x158] sm:$0xf0]  ;;  %v3782_v54 = vpop.f32.mrf.mxu0  ;;  %v4263_v3 = vadd.f32 %v4255_v44, %v4249_v43  ;;  %v6462_v8 = vld [vmem:[%s7333_s5 + $0xc] sm:$0xf]  ;;  %v4825_v18 = vor.u32 %v6562_v5, %v4822_v6 }
 0x1d9   : > { %v3807_v47 = vadd.f32 %v3806_v36, %v3794_v19  ;;  %v4585_v58 = vor.u32 %v6502_v34, %v4582_v37  ;;  %v6494_v10 = vld [vmem:[%s7333_s5 + $0x10c] sm:$0xf]  ;;  %v4678_v17 = vld [vmem:[%s7333_s5 + $0x218] sm:$0xf0] }
 0x1da   : > { %4045 = vmatpush.bf16.msra.mxu1 %v4649_v40  ;;  %4058 = vmatpush.bf16.msra.mxu2 %v4777_v42  ;;  %v6534_v40 = vld [vmem:[%s7333_s5 + $0x24c] sm:$0xf]  ;;  %v4710_v42 = vld [vmem:[%s7333_s5 + $0x258] sm:$0xf0]  ;;  %v3795_v57 = vpop.f32.mrf.mxu1  ;;  %v4267_v45 = vmax.f32 %v4263_v3, 0.0 }
 0x1db   : > { %4071 = vmatpush.bf16.msra.mxu3 %v4905_v51  ;;  %v3819_v50 = vpop.f32.mrf.mxu3  ;;  %v4242_v51 = vperm.slane %v8215_v9, 1  ;;  %v4713_v59 = vor.u32 %v6534_v40, %v4710_v42  ;;  %v4422_v9 = vld [vmem:[%s7333_s5 + $0x18] sm:$0xf0]  ;;  %v6526_v16 = vld [vmem:[%s7333_s5 + $0x20c] sm:$0xf] }
 0x1dc   : > { %4033 = vmatpush.bf16.msra.mxu0 %v4505_v60  ;;  %v3820_v49 = vadd.f32 %v3819_v50, %v3807_v47  ;;  %v6466_v60 = vld [vmem:[%s7333_s5 + $0x2c] sm:$0xf]  ;;  %v4806_v19 = vld [vmem:[%s7333_s5 + $0x318] sm:$0xf0] }
 0x1dd   : > { %v6618_v41 = vld [vmem:[%s7333_s5 + $0x4ec] sm:$0xf]  ;;  %v5046_v23 = vld [vmem:[%s7333_s5 + $0x4f8] sm:$0xf0] }
 0x1de   : > { %4046 = vmatpush.bf16.msra.mxu1 %v4633_v61  ;;  %4059 = vmatpush.bf16.msra.mxu2 %v4761_v62  ;;  %v4438_v61 = vld [vmem:[%s7333_s5 + $0x38] sm:$0xf0]  ;;  %v6498_v62 = vld [vmem:[%s7333_s5 + $0x12c] sm:$0xf]  ;;  %v4250_v4 = vmul.f32 %v4242_v51, %v3820_v49  ;;  %v5049_v42 = vor.u32 %v6618_v41, %v5046_v23 }
 0x1df   : > { %4072 = vmatpush.bf16.msra.mxu3 %v4889_v2  ;;  %v4694_v2 = vld [vmem:[%s7333_s5 + $0x238] sm:$0xf0]  ;;  %v4441_v7 = vor.u32 %v6466_v60, %v4438_v61  ;;  %v4569_v12 = vor.u32 %v6498_v62, %v4566_v0  ;;  %v6650_v24 = vld [vmem:[%s7333_s5 + $0x5ec] sm:$0xf] }
 0x1e0   : > { %4034 = vmatpush.bf16.msra.mxu0 %v4489_v11  ;;  %v4264_v11 = vadd.f32 %v4256_v55, %v4250_v4  ;;  %v3808_v46 = vpop.f32.mrf.mxu2  ;;  %v5302_v30 = vld [vmem:[%s7333_s5 + $0x6f8] sm:$0xf0]  ;;  %v6714_v36 = vld [vmem:[%s7333_s5 + $0x7ec] sm:$0xf] }
 0x1e1   : > { %v5430_v37 = vld [vmem:[%s7333_s5 + $0x7f8] sm:$0xf0]  ;;  %v6614_v47 = vld [vmem:[%s7333_s5 + $0x4cc] sm:$0xf] }
 0x1e2   : > { %4047 = vmatpush.bf16.msra.mxu1 %v4617_v13  ;;  %4060 = vmatpush.bf16.msra.mxu2 %v4745_v14  ;;  %v4697_v13 = vor.u32 %v6530_v1, %v4694_v2  ;;  %v4550_v14 = vld [vmem:[%s7333_s5 + $0x118] sm:$0xf0]  ;;  %v4268_v48 = vmax.f32 %v4264_v11, 0.0  ;;  %v6646_v51 = vld [vmem:[%s7333_s5 + $0x5cc] sm:$0xf]  ;;  %v5433_v52 = vor.u32 %v6714_v36, %v5430_v37 }
 0x1e3   : > { %4073 = vmatpush.bf16.msra.mxu3 %v4873_v39  ;;  %v6558_v39 = vld [vmem:[%s7333_s5 + $0x30c] sm:$0xf]  ;;  %v3821_v25 = vpop.f32.mrf.mxu3  ;;  %v4553_v34 = vor.u32 %v6494_v10, %v4550_v14  ;;  %v5030_v50 = vld [vmem:[%s7333_s5 + $0x4d8] sm:$0xf0] }
 0x1e4   : > { %4035 = vmatpush.bf16.msra.mxu0 %v4473_v15  ;;  %v4425_v15 = vor.u32 %v6462_v8, %v4422_v9  ;;  %v8264_v33 = vpack.c.bf16 %v4268_v48, %v4267_v45  ;;  %v4809_v40 = vor.u32 %v6558_v39, %v4806_v19  ;;  %v5158_v53 = vld [vmem:[%s7333_s5 + $0x5d8] sm:$0xf0]  ;;  %v6678_v54 = vld [vmem:[%s7333_s5 + $0x6cc] sm:$0xf]  ;;  %v5033_v49 = vor.u32 %v6614_v47, %v5030_v50 }
 0x1e5   : > { %v5286_v55 = vld [vmem:[%s7333_s5 + $0x6d8] sm:$0xf0]  ;;  %v6610_v60 = vld [vmem:[%s7333_s5 + $0x4ac] sm:$0xf] }
 0x1e6   : > { %4048 = vmatpush.bf16.msra.mxu1 %v4601_v27  ;;  %4061 = vmatpush.bf16.msra.mxu2 %v4729_v28  ;;  %v5174_v27 = vld [vmem:[%s7333_s5 + $0x5f8] sm:$0xf0]  ;;  %v6682_v28 = vld [vmem:[%s7333_s5 + $0x6ec] sm:$0xf] }
 0x1e7   : > { %4074 = vmatpush.bf16.msra.mxu3 %v4857_v35  ;;  %v4681_v35 = vor.u32 %v6526_v16, %v4678_v17  ;;  %v5177_v43 = vor.u32 %v6650_v24, %v5174_v27  ;;  %v5305_v44 = vor.u32 %v6682_v28, %v5302_v30  ;;  %v5414_v57 = vld [vmem:[%s7333_s5 + $0x7d8] sm:$0xf0]  ;;  %v6642_v62 = vld [vmem:[%s7333_s5 + $0x5ac] sm:$0xf] }
 0x1e8   : > { %4036 = vmatpush.bf16.msra.mxu0 %v4457_v56  ;;  %v6710_v56 = vld [vmem:[%s7333_s5 + $0x7cc] sm:$0xf]  ;;  %v5014_v61 = vld [vmem:[%s7333_s5 + $0x4b8] sm:$0xf0] }
 0x1e9   : > { %v5142_v0 = vld [vmem:[%s7333_s5 + $0x5b8] sm:$0xf0]  ;;  %v6674_v1 = vld [vmem:[%s7333_s5 + $0x6ac] sm:$0xf]  ;;  %v5017_v5 = vor.u32 %v6610_v60, %v5014_v61 }
 0x1ea   : > { %4049 = vmatpush.bf16.msra.mxu1 %v4585_v58  ;;  %4062 = vmatpush.bf16.msra.mxu2 %v4713_v59  ;;  %v5161_v58 = vor.u32 %v6646_v51, %v5158_v53  ;;  %v5289_v59 = vor.u32 %v6678_v54, %v5286_v55  ;;  %v5270_v2 = vld [vmem:[%s7333_s5 + $0x6b8] sm:$0xf0]  ;;  %v6706_v3 = vld [vmem:[%s7333_s5 + $0x7ac] sm:$0xf]  ;;  %v5145_v6 = vor.u32 %v6642_v62, %v5142_v0 }
 0x1eb   : > { %4075 = vmatpush.bf16.msra.mxu3 %v4841_v63  ;;  %v5417_v63 = vor.u32 %v6710_v56, %v5414_v57  ;;  %v5398_v4 = vld [vmem:[%s7333_s5 + $0x7b8] sm:$0xf0]  ;;  %v6638_v9 = vld [vmem:[%s7333_s5 + $0x58c] sm:$0xf] }
 0x1ec   : > { %4037 = vmatpush.bf16.msra.mxu0 %v4441_v7  ;;  %v5273_v7 = vor.u32 %v6674_v1, %v5270_v2  ;;  %v4998_v8 = vld [vmem:[%s7333_s5 + $0x498] sm:$0xf0]  ;;  %v6634_v19 = vld [vmem:[%s7333_s5 + $0x56c] sm:$0xf] }
 0x1ed   : > { %v5126_v10 = vld [vmem:[%s7333_s5 + $0x598] sm:$0xf0]  ;;  %v6666_v48 = vld [vmem:[%s7333_s5 + $0x66c] sm:$0xf] }
 0x1ee   : > { %4050 = vmatpush.bf16.msra.mxu1 %v4569_v12  ;;  %4063 = vmatpush.bf16.msra.mxu2 %v4697_v13  ;;  %v5254_v11 = vld [vmem:[%s7333_s5 + $0x698] sm:$0xf0]  ;;  %v6702_v12 = vld [vmem:[%s7333_s5 + $0x78c] sm:$0xf]  ;;  %v5129_v16 = vor.u32 %v6638_v9, %v5126_v10 }
 0x1ef   : > { %4076 = vmatpush.bf16.msra.mxu3 %v4825_v18  ;;  %v5382_v13 = vld [vmem:[%s7333_s5 + $0x798] sm:$0xf0]  ;;  %v6602_v18 = vld [vmem:[%s7333_s5 + $0x46c] sm:$0xf] }
 0x1f0   : > { %4038 = vmatpush.bf16.msra.mxu0 %v4425_v15  ;;  %v3832_v14 = vpop.f32.mrf.mxu0  ;;  %v4982_v39 = vld [vmem:[%s7333_s5 + $0x478] sm:$0xf0]  ;;  %v5385_v46 = vor.u32 %v6702_v12, %v5382_v13  ;;  %v6698_v25 = vld [vmem:[%s7333_s5 + $0x76c] sm:$0xf] }
 0x1f1   : > { %v5110_v45 = vld [vmem:[%s7333_s5 + $0x578] sm:$0xf0]  ;;  %v4985_v27 = vor.u32 %v6602_v18, %v4982_v39  ;;  %v6630_v36 = vld [vmem:[%s7333_s5 + $0x54c] sm:$0xf] }
 0x1f2   : > { %4051 = vmatpush.bf16.msra.mxu1 %v4553_v34  ;;  %4064 = vmatpush.bf16.msra.mxu2 %v4681_v35  ;;  %v3845_v41 = vpop.f32.mrf.mxu1  ;;  %v5238_v23 = vld [vmem:[%s7333_s5 + $0x678] sm:$0xf0]  ;;  %v5113_v28 = vor.u32 %v6634_v19, %v5110_v45  ;;  %v6598_v34 = vld [vmem:[%s7333_s5 + $0x44c] sm:$0xf] }
 0x1f3   : > { %4077 = vmatpush.bf16.msra.mxu3 %v4809_v40  ;;  %4039 = vmatmul.bf16.vlgmr.msra.gmra.mxu0 %v7454_v21  ;;  %v5401_v21 = vor.u32 %v6706_v3, %v5398_v4  ;;  %v3846_v24 = vadd.f32 %v3845_v41, %v3832_v14  ;;  %v5366_v15 = vld [vmem:[%s7333_s5 + $0x778] sm:$0xf0]  ;;  %v5241_v30 = vor.u32 %v6666_v48, %v5238_v23  ;;  %v6694_v51 = vld [vmem:[%s7333_s5 + $0x74c] sm:$0xf] }
 0x1f4   : > { %4083 = vmatpush.bf16.msrb.mxu0 %v5049_v42  ;;  %v4966_v35 = vld [vmem:[%s7333_s5 + $0x458] sm:$0xf0]  ;;  %v5369_v40 = vor.u32 %v6698_v25, %v5366_v15  ;;  %v6690_v1 = vld [vmem:[%s7333_s5 + $0x72c] sm:$0xf] }
 0x1f5   : > { %4065 = vmatmul.bf16.vlgmr.msra.gmra.mxu2 %v7452_v20  ;;  %4052 = vmatmul.bf16.vlgmr.msra.gmra.mxu1 %v7461_v26  ;;  %v6606_v20 = vld [vmem:[%s7333_s5 + $0x48c] sm:$0xf]  ;;  %v5094_v42 = vld [vmem:[%s7333_s5 + $0x558] sm:$0xf0]  ;;  %v4969_v53 = vor.u32 %v6598_v34, %v4966_v35 }
 0x1f6   : > { %4096 = vmatpush.bf16.msrb.mxu1 %v5177_v43  ;;  %4109 = vmatpush.bf16.msrb.mxu2 %v5305_v44  ;;  %v5001_v26 = vor.u32 %v6606_v20, %v4998_v8  ;;  %v6662_v43 = vld [vmem:[%s7333_s5 + $0x64c] sm:$0xf]  ;;  %v5222_v44 = vld [vmem:[%s7333_s5 + $0x658] sm:$0xf0]  ;;  %v5097_v56 = vor.u32 %v6630_v36, %v5094_v42 }
 0x1f7   : > { %4122 = vmatpush.bf16.msrb.mxu3 %v5433_v52  ;;  %v5350_v52 = vld [vmem:[%s7333_s5 + $0x758] sm:$0xf0]  ;;  %v5225_v57 = vor.u32 %v6662_v43, %v5222_v44  ;;  %v6590_v4 = vld [vmem:[%s7333_s5 + $0x40c] sm:$0xf] }
 0x1f8   : > { %4078 = vmatmul.bf16.vlgmr.msra.gmra.mxu3 %v7456_v22  ;;  %4084 = vmatpush.bf16.msrb.mxu0 %v5033_v49  ;;  %v6670_v22 = vld [vmem:[%s7333_s5 + $0x68c] sm:$0xf]  ;;  %v3858_v37 = vpop.f32.mrf.mxu2  ;;  %v3834_v55 = vpop.f32.mrf.mxu0  ;;  %v5353_v61 = vor.u32 %v6694_v51, %v5350_v52  ;;  %v5078_v62 = vld [vmem:[%s7333_s5 + $0x538] sm:$0xf0] }
 0x1f9   : > { %v5257_v17 = vor.u32 %v6670_v22, %v5254_v11  ;;  %v3859_v47 = vadd.f32 %v3858_v37, %v3846_v24  ;;  %v6594_v49 = vld [vmem:[%s7333_s5 + $0x42c] sm:$0xf]  ;;  %v5206_v0 = vld [vmem:[%s7333_s5 + $0x638] sm:$0xf0] }
 0x1fa   : > { %4097 = vmatpush.bf16.msrb.mxu1 %v5161_v58  ;;  %4110 = vmatpush.bf16.msrb.mxu2 %v5289_v59  ;;  %v4950_v58 = vld [vmem:[%s7333_s5 + $0x438] sm:$0xf0]  ;;  %v6626_v59 = vld [vmem:[%s7333_s5 + $0x52c] sm:$0xf]  ;;  %v3847_v60 = vpop.f32.mrf.mxu1 }
 0x1fb   : > { %4123 = vmatpush.bf16.msrb.mxu3 %v5417_v63  ;;  %v3871_v50 = vpop.f32.mrf.mxu3  ;;  %v6658_v63 = vld [vmem:[%s7333_s5 + $0x62c] sm:$0xf]  ;;  %v5334_v2 = vld [vmem:[%s7333_s5 + $0x738] sm:$0xf0]  ;;  %v4953_v3 = vor.u32 %v6594_v49, %v4950_v58 }
 0x1fc   : > { %4085 = vmatpush.bf16.msrb.mxu0 %v5017_v5  ;;  %v8312_v54 = vadd.f32 %v3871_v50, %v3859_v47  ;;  %v4934_v5 = vld [vmem:[%s7333_s5 + $0x418] sm:$0xf0]  ;;  %v6622_v20 = vld [vmem:[%s7333_s5 + $0x50c] sm:$0xf]  ;;  %v5337_v10 = vor.u32 %v6690_v1, %v5334_v2 }
 0x1fd   : > { %v5062_v8 = vld [vmem:[%s7333_s5 + $0x518] sm:$0xf0]  ;;  %v6654_v9 = vld [vmem:[%s7333_s5 + $0x60c] sm:$0xf] }
 0x1fe   : > { %4098 = vmatpush.bf16.msrb.mxu1 %v5145_v6  ;;  %4111 = vmatpush.bf16.msrb.mxu2 %v5273_v7  ;;  %v5081_v6 = vor.u32 %v6626_v59, %v5078_v62  ;;  %v5209_v7 = vor.u32 %v6658_v63, %v5206_v0  ;;  %v5190_v22 = vld [vmem:[%s7333_s5 + $0x618] sm:$0xf0]  ;;  %v6686_v11 = vld [vmem:[%s7333_s5 + $0x70c] sm:$0xf]  ;;  %v5065_v41 = vor.u32 %v6622_v20, %v5062_v8 }
 0x1ff   : > { %4124 = vmatpush.bf16.msrb.mxu3 %v5401_v21  ;;  %v5318_v12 = vld [vmem:[%s7333_s5 + $0x718] sm:$0xf0]  ;;  %v6810_v39 = vld [vmem:[%s7333_s5 + $0xaec] sm:$0xf] }
 0x200   : > { %4086 = vmatpush.bf16.msrb.mxu0 %v5001_v26  ;;  %v3860_v21 = vpop.f32.mrf.mxu2  ;;  %v6746_v26 = vld [vmem:[%s7333_s5 + $0x8ec] sm:$0xf]  ;;  %v5558_v14 = vld [vmem:[%s7333_s5 + $0x8f8] sm:$0xf0]  ;;  %v5321_v23 = vor.u32 %v6686_v11, %v5318_v12 }
 0x201   : > { %v5686_v18 = vld [vmem:[%s7333_s5 + $0x9f8] sm:$0xf0]  ;;  %v6842_v45 = vld [vmem:[%s7333_s5 + $0xbec] sm:$0xf]  ;;  %v5561_v24 = vor.u32 %v6746_v26, %v5558_v14 }
 0x202   : > { %4099 = vmatpush.bf16.msrb.mxu1 %v5129_v16  ;;  %4112 = vmatpush.bf16.msrb.mxu2 %v5257_v17  ;;  %v6778_v16 = vld [vmem:[%s7333_s5 + $0x9ec] sm:$0xf]  ;;  %v4937_v17 = vor.u32 %v6590_v4, %v4934_v5  ;;  %v5814_v19 = vld [vmem:[%s7333_s5 + $0xaf8] sm:$0xf0] }
 0x203   : > { %4125 = vmatpush.bf16.msrb.mxu3 %v5385_v46  ;;  %v3873_v13 = vpop.f32.mrf.mxu3  ;;  %v5193_v46 = vor.u32 %v6654_v9, %v5190_v22  ;;  %v5942_v48 = vld [vmem:[%s7333_s5 + $0xbf8] sm:$0xf0]  ;;  %v5689_v25 = vor.u32 %v6778_v16, %v5686_v18  ;;  %v5817_v15 = vor.u32 %v6810_v39, %v5814_v19  ;;  %v6806_v36 = vld [vmem:[%s7333_s5 + $0xacc] sm:$0xf] }
 0x204   : > { %4087 = vmatpush.bf16.msrb.mxu0 %v4985_v27  ;;  %v6742_v27 = vld [vmem:[%s7333_s5 + $0x8cc] sm:$0xf]  ;;  %v5945_v34 = vor.u32 %v6842_v45, %v5942_v48  ;;  %v5670_v35 = vld [vmem:[%s7333_s5 + $0x9d8] sm:$0xf0] }
 0x205   : > { %v5798_v37 = vld [vmem:[%s7333_s5 + $0xad8] sm:$0xf0]  ;;  %v6738_v50 = vld [vmem:[%s7333_s5 + $0x8ac] sm:$0xf] }
 0x206   : > { %4100 = vmatpush.bf16.msrb.mxu1 %v5113_v28  ;;  %4113 = vmatpush.bf16.msrb.mxu2 %v5241_v30  ;;  %v5542_v28 = vld [vmem:[%s7333_s5 + $0x8d8] sm:$0xf0]  ;;  %v6774_v30 = vld [vmem:[%s7333_s5 + $0x9cc] sm:$0xf]  ;;  %v5801_v47 = vor.u32 %v6806_v36, %v5798_v37 }
 0x207   : > { %4126 = vmatpush.bf16.msrb.mxu3 %v5369_v40  ;;  %v6838_v40 = vld [vmem:[%s7333_s5 + $0xbcc] sm:$0xf]  ;;  %v5926_v42 = vld [vmem:[%s7333_s5 + $0xbd8] sm:$0xf0]  ;;  %v5545_v43 = vor.u32 %v6742_v27, %v5542_v28  ;;  %v5673_v44 = vor.u32 %v6774_v30, %v5670_v35 }
 0x208   : > { %4088 = vmatpush.bf16.msrb.mxu0 %v4969_v53  ;;  %v5526_v51 = vld [vmem:[%s7333_s5 + $0x8b8] sm:$0xf0]  ;;  %v6770_v52 = vld [vmem:[%s7333_s5 + $0x9ac] sm:$0xf]  ;;  %v5929_v53 = vor.u32 %v6838_v40, %v5926_v42 }
 0x209   : > { %v5654_v55 = vld [vmem:[%s7333_s5 + $0x9b8] sm:$0xf0]  ;;  %v6834_v49 = vld [vmem:[%s7333_s5 + $0xbac] sm:$0xf]  ;;  %v5529_v59 = vor.u32 %v6738_v50, %v5526_v51 }
 0x20a   : > { %4101 = vmatpush.bf16.msrb.mxu1 %v5097_v56  ;;  %4114 = vmatpush.bf16.msrb.mxu2 %v5225_v57  ;;  %v6802_v56 = vld [vmem:[%s7333_s5 + $0xaac] sm:$0xf]  ;;  %v5782_v57 = vld [vmem:[%s7333_s5 + $0xab8] sm:$0xf0] }
 0x20b   : > { %4127 = vmatpush.bf16.msrb.mxu3 %v5353_v61  ;;  %v5910_v58 = vld [vmem:[%s7333_s5 + $0xbb8] sm:$0xf0]  ;;  %v5785_v60 = vor.u32 %v6802_v56, %v5782_v57  ;;  %v6734_v61 = vld [vmem:[%s7333_s5 + $0x88c] sm:$0xf] }
 0x20c   : > { %4089 = vmatpush.bf16.msrb.mxu0 %v4953_v3  ;;  %v5510_v62 = vld [vmem:[%s7333_s5 + $0x898] sm:$0xf0]  ;;  %v6798_v0 = vld [vmem:[%s7333_s5 + $0xa8c] sm:$0xf] }
 0x20d   : > { %v5638_v63 = vld [vmem:[%s7333_s5 + $0x998] sm:$0xf0]  ;;  %v6830_v2 = vld [vmem:[%s7333_s5 + $0xb8c] sm:$0xf] }
 0x20e   : > { %4102 = vmatpush.bf16.msrb.mxu1 %v5081_v6  ;;  %4115 = vmatpush.bf16.msrb.mxu2 %v5209_v7  ;;  %v5766_v1 = vld [vmem:[%s7333_s5 + $0xa98] sm:$0xf0]  ;;  %v6730_v7 = vld [vmem:[%s7333_s5 + $0x86c] sm:$0xf] }
 0x20f   : > { %4128 = vmatpush.bf16.msrb.mxu3 %v5337_v10  ;;  %v5894_v3 = vld [vmem:[%s7333_s5 + $0xb98] sm:$0xf0]  ;;  %v5769_v6 = vor.u32 %v6798_v0, %v5766_v1  ;;  %v6762_v8 = vld [vmem:[%s7333_s5 + $0x96c] sm:$0xf] }
 0x210   : > { %4090 = vmatpush.bf16.msrb.mxu0 %v4937_v17  ;;  %v3884_v4 = vpop.f32.mrf.mxu0  ;;  %v5494_v20 = vld [vmem:[%s7333_s5 + $0x878] sm:$0xf0]  ;;  %v5897_v10 = vor.u32 %v6830_v2, %v5894_v3  ;;  %v6794_v11 = vld [vmem:[%s7333_s5 + $0xa6c] sm:$0xf] }
 0x211   : > { %v3885_v9 = vadd.f32 %v3884_v4, %v8312_v54  ;;  %v5622_v22 = vld [vmem:[%s7333_s5 + $0x978] sm:$0xf0]  ;;  %v6826_v13 = vld [vmem:[%s7333_s5 + $0xb6c] sm:$0xf]  ;;  %v5497_v16 = vor.u32 %v6730_v7, %v5494_v20 }
 0x212   : > { %4103 = vmatpush.bf16.msrb.mxu1 %v5065_v41  ;;  %4116 = vmatpush.bf16.msrb.mxu2 %v5193_v46  ;;  %v3897_v21 = vpop.f32.mrf.mxu1  ;;  %v5750_v12 = vld [vmem:[%s7333_s5 + $0xa78] sm:$0xf0]  ;;  %v5625_v54 = vor.u32 %v6762_v8, %v5622_v22  ;;  %v6726_v18 = vld [vmem:[%s7333_s5 + $0x84c] sm:$0xf] }
 0x213   : > { %4129 = vmatpush.bf16.msrb.mxu3 %v5321_v23  ;;  %4091 = vmatmul.bf16.vlgmr.msrb.gmra.mxu0 %v7510_v31  ;;  %v6766_v31 = vld [vmem:[%s7333_s5 + $0x98c] sm:$0xf]  ;;  %v5878_v26 = vld [vmem:[%s7333_s5 + $0xb78] sm:$0xf0]  ;;  %v3898_v14 = vadd.f32 %v3897_v21, %v3885_v9  ;;  %v5753_v17 = vor.u32 %v6794_v11, %v5750_v12 }
 0x214   : > { %4135 = vmatpush.bf16.msra.mxu0 %v5561_v24  ;;  %v5641_v5 = vor.u32 %v6766_v31, %v5638_v63  ;;  %v5478_v39 = vld [vmem:[%s7333_s5 + $0x858] sm:$0xf0]  ;;  %v6758_v19 = vld [vmem:[%s7333_s5 + $0x94c] sm:$0xf]  ;;  %v5881_v46 = vor.u32 %v6826_v13, %v5878_v26 }
 0x215   : > { %4117 = vmatmul.bf16.vlgmr.msrb.gmra.mxu2 %v7508_v29  ;;  %4104 = vmatmul.bf16.vlgmr.msrb.gmra.mxu1 %v7517_v38  ;;  %v5657_v29 = vor.u32 %v6770_v52, %v5654_v55  ;;  %v5513_v38 = vor.u32 %v6734_v61, %v5510_v62  ;;  %v5606_v45 = vld [vmem:[%s7333_s5 + $0x958] sm:$0xf0]  ;;  %v6790_v48 = vld [vmem:[%s7333_s5 + $0xa4c] sm:$0xf]  ;;  %v5481_v28 = vor.u32 %v6726_v18, %v5478_v39 }
 0x216   : > { %4148 = vmatpush.bf16.msra.mxu1 %v5689_v25  ;;  %4161 = vmatpush.bf16.msra.mxu2 %v5817_v15  ;;  %v5734_v23 = vld [vmem:[%s7333_s5 + $0xa58] sm:$0xf0]  ;;  %v6822_v15 = vld [vmem:[%s7333_s5 + $0xb4c] sm:$0xf]  ;;  %v5609_v35 = vor.u32 %v6758_v19, %v5606_v45 }
 0x217   : > { %4174 = vmatpush.bf16.msra.mxu3 %v5945_v34  ;;  %v5862_v27 = vld [vmem:[%s7333_s5 + $0xb58] sm:$0xf0]  ;;  %v5737_v36 = vor.u32 %v6790_v48, %v5734_v23  ;;  %v6722_v37 = vld [vmem:[%s7333_s5 + $0x82c] sm:$0xf] }
 0x218   : > { %4130 = vmatmul.bf16.vlgmr.msrb.gmra.mxu3 %v7512_v32  ;;  %4136 = vmatpush.bf16.msra.mxu0 %v5545_v43  ;;  %v5913_v32 = vor.u32 %v6834_v49, %v5910_v58  ;;  %v3910_v41 = vpop.f32.mrf.mxu2  ;;  %v3886_v34 = vpop.f32.mrf.mxu0  ;;  %v5462_v40 = vld [vmem:[%s7333_s5 + $0x838] sm:$0xf0]  ;;  %v6754_v42 = vld [vmem:[%s7333_s5 + $0x92c] sm:$0xf] }
 0x219   : > { %v3911_v24 = vadd.f32 %v3910_v41, %v3898_v14  ;;  %v6786_v50 = vld [vmem:[%s7333_s5 + $0xa2c] sm:$0xf]  ;;  %v5718_v51 = vld [vmem:[%s7333_s5 + $0xa38] sm:$0xf0]  ;;  %v5465_v55 = vor.u32 %v6722_v37, %v5462_v40  ;;  %v7044_v40 = vld [vmem:[#allocation1 + $0x1b] sm:$0xff] }
 0x21a   : > { %4149 = vmatpush.bf16.msra.mxu1 %v5673_v44  ;;  %4162 = vmatpush.bf16.msra.mxu2 %v5801_v47  ;;  %v3899_v43 = vpop.f32.mrf.mxu1  ;;  %v5865_v44 = vor.u32 %v6822_v15, %v5862_v27  ;;  %v5590_v47 = vld [vmem:[%s7333_s5 + $0x938] sm:$0xf0]  ;;  %v6818_v52 = vld [vmem:[%s7333_s5 + $0xb2c] sm:$0xf]  ;;  %v5721_v58 = vor.u32 %v6786_v50, %v5718_v51 }
 0x21b   : > { %4175 = vmatpush.bf16.msra.mxu3 %v5929_v53  ;;  %v3923_v25 = vpop.f32.mrf.mxu3  ;;  %v5846_v53 = vld [vmem:[%s7333_s5 + $0xb38] sm:$0xf0]  ;;  %v6718_v56 = vld [vmem:[%s7333_s5 + $0x80c] sm:$0xf]  ;;  %v5593_v49 = vor.u32 %v6754_v42, %v5590_v47 }
 0x21c   : > { %4137 = vmatpush.bf16.msra.mxu0 %v5529_v59  ;;  %v8383_v30 = vadd.f32 %v3923_v25, %v3911_v24  ;;  %v5446_v57 = vld [vmem:[%s7333_s5 + $0x818] sm:$0xf0]  ;;  %v6750_v59 = vld [vmem:[%s7333_s5 + $0x90c] sm:$0xf]  ;;  %v5849_v62 = vor.u32 %v6818_v52, %v5846_v53 }
 0x21d   : > { %v5702_v31 = vld [vmem:[%s7333_s5 + $0xa18] sm:$0xf0]  ;;  %v6874_v1 = vld [vmem:[%s7333_s5 + $0xcec] sm:$0xf] }
 0x21e   : > { %4150 = vmatpush.bf16.msra.mxu1 %v5657_v29  ;;  %4163 = vmatpush.bf16.msra.mxu2 %v5785_v60  ;;  %v5574_v29 = vld [vmem:[%s7333_s5 + $0x918] sm:$0xf0]  ;;  %v6782_v60 = vld [vmem:[%s7333_s5 + $0xa0c] sm:$0xf] }
 0x21f   : > { %4176 = vmatpush.bf16.msra.mxu3 %v5913_v32  ;;  %v6814_v32 = vld [vmem:[%s7333_s5 + $0xb0c] sm:$0xf]  ;;  %v5830_v63 = vld [vmem:[%s7333_s5 + $0xb18] sm:$0xf0]  ;;  %v5577_v7 = vor.u32 %v6750_v59, %v5574_v29  ;;  %v5705_v20 = vor.u32 %v6782_v60, %v5702_v31 }
 0x220   : > { %4138 = vmatpush.bf16.msra.mxu0 %v5513_v38  ;;  %v3912_v61 = vpop.f32.mrf.mxu2  ;;  %v6070_v2 = vld [vmem:[%s7333_s5 + $0xcf8] sm:$0xf0]  ;;  %v6906_v3 = vld [vmem:[%s7333_s5 + $0xdec] sm:$0xf]  ;;  %v5449_v38 = vor.u32 %v6718_v56, %v5446_v57  ;;  %v5833_v21 = vor.u32 %v6814_v32, %v5830_v63 }
 0x221   : > { %v6198_v4 = vld [vmem:[%s7333_s5 + $0xdf8] sm:$0xf0]  ;;  %v6970_v8 = vld [vmem:[%s7333_s5 + $0xfec] sm:$0xf] }
 0x222   : > { %4151 = vmatpush.bf16.msra.mxu1 %v5641_v5  ;;  %4164 = vmatpush.bf16.msra.mxu2 %v5769_v6  ;;  %v6938_v5 = vld [vmem:[%s7333_s5 + $0xeec] sm:$0xf]  ;;  %v6326_v6 = vld [vmem:[%s7333_s5 + $0xef8] sm:$0xf0]  ;;  %v6201_v22 = vor.u32 %v6906_v3, %v6198_v4 }
 0x223   : > { %4177 = vmatpush.bf16.msra.mxu3 %v5897_v10  ;;  %v3925_v0 = vpop.f32.mrf.mxu3  ;;  %v6454_v9 = vld [vmem:[%s7333_s5 + $0xff8] sm:$0xf0]  ;;  %v6073_v10 = vor.u32 %v6874_v1, %v6070_v2  ;;  %v6329_v11 = vor.u32 %v6938_v5, %v6326_v6  ;;  %v6870_v12 = vld [vmem:[%s7333_s5 + $0xccc] sm:$0xf] }
 0x224   : > { %4139 = vmatpush.bf16.msra.mxu0 %v5497_v16  ;;  %v6054_v13 = vld [vmem:[%s7333_s5 + $0xcd8] sm:$0xf0]  ;;  %v6902_v26 = vld [vmem:[%s7333_s5 + $0xdcc] sm:$0xf]  ;;  %v6457_v14 = vor.u32 %v6970_v8, %v6454_v9 }
 0x225   : > { %v6182_v16 = vld [vmem:[%s7333_s5 + $0xdd8] sm:$0xf0]  ;;  %v6966_v18 = vld [vmem:[%s7333_s5 + $0xfcc] sm:$0xf]  ;;  %v6057_v19 = vor.u32 %v6870_v12, %v6054_v13 }
 0x226   : > { %4152 = vmatpush.bf16.msra.mxu1 %v5625_v54  ;;  %4165 = vmatpush.bf16.msra.mxu2 %v5753_v17  ;;  %v6934_v54 = vld [vmem:[%s7333_s5 + $0xecc] sm:$0xf]  ;;  %v6310_v17 = vld [vmem:[%s7333_s5 + $0xed8] sm:$0xf0]  ;;  %v6185_v41 = vor.u32 %v6902_v26, %v6182_v16 }
 0x227   : > { %4178 = vmatpush.bf16.msra.mxu3 %v5881_v46  ;;  %v6438_v39 = vld [vmem:[%s7333_s5 + $0xfd8] sm:$0xf0]  ;;  %v6313_v46 = vor.u32 %v6934_v54, %v6310_v17  ;;  %v6866_v45 = vld [vmem:[%s7333_s5 + $0xcac] sm:$0xf] }
 0x228   : > { %4140 = vmatpush.bf16.msra.mxu0 %v5481_v28  ;;  %v6038_v48 = vld [vmem:[%s7333_s5 + $0xcb8] sm:$0xf0]  ;;  %v6898_v23 = vld [vmem:[%s7333_s5 + $0xdac] sm:$0xf]  ;;  %v6441_v25 = vor.u32 %v6966_v18, %v6438_v39 }
 0x229   : > { %v7041_v24 = vld [vmem:[#allocation1] sm:$0xff]  ;;  %v6930_v27 = vld [vmem:[%s7333_s5 + $0xeac] sm:$0xf]  ;;  %v6041_v42 = vor.u32 %v6866_v45, %v6038_v48 }
 0x22a   : > { %4153 = vmatpush.bf16.msra.mxu1 %v5609_v35  ;;  %4166 = vmatpush.bf16.msra.mxu2 %v5737_v36  ;;  %v6166_v15 = vld [vmem:[%s7333_s5 + $0xdb8] sm:$0xf0]  ;;  %v7042_v34 = vld [vmem:[#allocation1 + $0x12] sm:$0xff]  ;;  %v7043_v35 = vld [vmem:[#allocation1 + $0x9] sm:$0xff] }
 0x22b   : > { %4179 = vmatpush.bf16.msra.mxu3 %v5865_v44  ;;  %v6294_v28 = vld [vmem:[%s7333_s5 + $0xeb8] sm:$0xf0]  ;;  %v6962_v36 = vld [vmem:[%s7333_s5 + $0xfac] sm:$0xf]  ;;  %v6169_v43 = vor.u32 %v6898_v23, %v6166_v15 }
 0x22c   : > { %4141 = vmatpush.bf16.msra.mxu0 %v5465_v55  ;;  %v6422_v37 = vld [vmem:[%s7333_s5 + $0xfb8] sm:$0xf0]  ;;  %v6297_v44 = vor.u32 %v6930_v27, %v6294_v28  ;;  %v6862_v47 = vld [vmem:[%s7333_s5 + $0xc8c] sm:$0xf] }
 0x22d   : > { %v6022_v50 = vld [vmem:[%s7333_s5 + $0xc98] sm:$0xf0]  ;;  %v6894_v51 = vld [vmem:[%s7333_s5 + $0xd8c] sm:$0xf]  ;;  %v6425_v52 = vor.u32 %v6962_v36, %v6422_v37 }
 0x22e   : > { %4154 = vmatpush.bf16.msra.mxu1 %v5593_v49  ;;  %4167 = vmatpush.bf16.msra.mxu2 %v5721_v58  ;;  %v6150_v53 = vld [vmem:[%s7333_s5 + $0xd98] sm:$0xf0]  ;;  %v6926_v55 = vld [vmem:[%s7333_s5 + $0xe8c] sm:$0xf]  ;;  %v6025_v29 = vor.u32 %v6862_v47, %v6022_v50 }
 0x22f   : > { %4180 = vmatpush.bf16.msra.mxu3 %v5849_v62  ;;  %v6278_v56 = vld [vmem:[%s7333_s5 + $0xe98] sm:$0xf0]  ;;  %v6958_v49 = vld [vmem:[%s7333_s5 + $0xf8c] sm:$0xf]  ;;  %v6153_v61 = vor.u32 %v6894_v51, %v6150_v53 }
 0x230   : > { %4142 = vmatpush.bf16.msra.mxu0 %v5449_v38  ;;  %v3936_v57 = vpop.f32.mrf.mxu0  ;;  %v6406_v58 = vld [vmem:[%s7333_s5 + $0xf98] sm:$0xf0]  ;;  %v6281_v62 = vor.u32 %v6926_v55, %v6278_v56  ;;  %v6858_v31 = vld [vmem:[%s7333_s5 + $0xc6c] sm:$0xf] }
 0x231   : > { %v3937_v59 = vadd.f32 %v3936_v57, %v8383_v30  ;;  %v6006_v32 = vld [vmem:[%s7333_s5 + $0xc78] sm:$0xf0]  ;;  %v6890_v63 = vld [vmem:[%s7333_s5 + $0xd6c] sm:$0xf]  ;;  %v6409_v0 = vor.u32 %v6958_v49, %v6406_v58 }
 0x232   : > { %4155 = vmatpush.bf16.msra.mxu1 %v5577_v7  ;;  %4168 = vmatpush.bf16.msra.mxu2 %v5705_v20  ;;  %v3949_v60 = vpop.f32.mrf.mxu1  ;;  %v6134_v2 = vld [vmem:[%s7333_s5 + $0xd78] sm:$0xf0]  ;;  %v6922_v3 = vld [vmem:[%s7333_s5 + $0xe6c] sm:$0xf]  ;;  %v6009_v5 = vor.u32 %v6858_v31, %v6006_v32 }
 0x233   : > { %4181 = vmatpush.bf16.msra.mxu3 %v5833_v21  ;;  %4143 = vmatmul.bf16.vlgmr.msra.gmra.mxu0 %v7041_v24  ;;  %v3950_v1 = vadd.f32 %v3949_v60, %v3937_v59  ;;  %v6262_v30 = vld [vmem:[%s7333_s5 + $0xe78] sm:$0xf0]  ;;  %v6954_v38 = vld [vmem:[%s7333_s5 + $0xf6c] sm:$0xf]  ;;  %v6137_v6 = vor.u32 %v6890_v63, %v6134_v2 }
 0x234   : > { %4187 = vmatpush.bf16.msrb.mxu0 %v6073_v10  ;;  %v6390_v4 = vld [vmem:[%s7333_s5 + $0xf78] sm:$0xf0]  ;;  %v6265_v7 = vor.u32 %v6922_v3, %v6262_v30  ;;  %v6854_v20 = vld [vmem:[%s7333_s5 + $0xc4c] sm:$0xf] }
 0x235   : > { %4169 = vmatmul.bf16.vlgmr.msra.gmra.mxu2 %v7042_v34  ;;  %4156 = vmatmul.bf16.vlgmr.msra.gmra.mxu1 %v7043_v35  ;;  %v5990_v8 = vld [vmem:[%s7333_s5 + $0xc58] sm:$0xf0]  ;;  %v6886_v9 = vld [vmem:[%s7333_s5 + $0xd4c] sm:$0xf]  ;;  %v6393_v21 = vor.u32 %v6954_v38, %v6390_v4 }
 0x236   : > { %4200 = vmatpush.bf16.msrb.mxu1 %v6201_v22  ;;  %4213 = vmatpush.bf16.msrb.mxu2 %v6329_v11  ;;  %v6118_v22 = vld [vmem:[%s7333_s5 + $0xd58] sm:$0xf0]  ;;  %v6918_v11 = vld [vmem:[%s7333_s5 + $0xe4c] sm:$0xf]  ;;  %v5993_v17 = vor.u32 %v6854_v20, %v5990_v8 }
 0x237   : > { %4226 = vmatpush.bf16.msrb.mxu3 %v6457_v14  ;;  %v6246_v12 = vld [vmem:[%s7333_s5 + $0xe58] sm:$0xf0]  ;;  %v6950_v14 = vld [vmem:[%s7333_s5 + $0xf4c] sm:$0xf] }
 0x238   : > { %4182 = vmatmul.bf16.vlgmr.msra.gmra.mxu3 %v7044_v40  ;;  %4188 = vmatpush.bf16.msrb.mxu0 %v6057_v19  ;;  %v3962_v10 = vpop.f32.mrf.mxu2  ;;  %v6374_v16 = vld [vmem:[%s7333_s5 + $0xf58] sm:$0xf0]  ;;  %v3938_v54 = vpop.f32.mrf.mxu0  ;;  %v6121_v19 = vor.u32 %v6886_v9, %v6118_v22  ;;  %v6882_v48 = vld [vmem:[%s7333_s5 + $0xd2c] sm:$0xf] }
 0x239   : > { %v3963_v13 = vadd.f32 %v3962_v10, %v3950_v1  ;;  %v5974_v45 = vld [vmem:[%s7333_s5 + $0xc38] sm:$0xf0]  ;;  %v6377_v23 = vor.u32 %v6950_v14, %v6374_v16  ;;  %v6946_v27 = vld [vmem:[%s7333_s5 + $0xf2c] sm:$0xf] }
 0x23a   : > { %4201 = vmatpush.bf16.msrb.mxu1 %v6185_v41  ;;  %4214 = vmatpush.bf16.msrb.mxu2 %v6313_v46  ;;  %v3951_v18 = vpop.f32.mrf.mxu1  ;;  %v6249_v41 = vor.u32 %v6918_v11, %v6246_v12  ;;  %v6850_v46 = vld [vmem:[%s7333_s5 + $0xc2c] sm:$0xf]  ;;  %v6102_v24 = vld [vmem:[%s7333_s5 + $0xd38] sm:$0xf0] }
 0x23b   : > { %4227 = vmatpush.bf16.msrb.mxu3 %v6441_v25  ;;  %v3975_v26 = vpop.f32.mrf.mxu3  ;;  %v6914_v25 = vld [vmem:[%s7333_s5 + $0xe2c] sm:$0xf]  ;;  %v6230_v15 = vld [vmem:[%s7333_s5 + $0xe38] sm:$0xf0]  ;;  %v5977_v34 = vor.u32 %v6850_v46, %v5974_v45  ;;  %v6105_v35 = vor.u32 %v6882_v48, %v6102_v24 }
 0x23c   : > { %4189 = vmatpush.bf16.msrb.mxu0 %v6041_v42  ;;  %v3976_v39 = vadd.f32 %v3975_v26, %v3963_v13  ;;  %v6358_v28 = vld [vmem:[%s7333_s5 + $0xf38] sm:$0xf0]  ;;  %v6233_v36 = vor.u32 %v6914_v25, %v6230_v15  ;;  %v6846_v37 = vld [vmem:[%s7333_s5 + $0xc0c] sm:$0xf] }
 0x23d   : > { %v5958_v40 = vld [vmem:[%s7333_s5 + $0xc18] sm:$0xf0]  ;;  %v6878_v42 = vld [vmem:[%s7333_s5 + $0xd0c] sm:$0xf] }
 0x23e   : > { %4202 = vmatpush.bf16.msrb.mxu1 %v6169_v43  ;;  %4215 = vmatpush.bf16.msrb.mxu2 %v6297_v44  ;;  %v6361_v43 = vor.u32 %v6946_v27, %v6358_v28  ;;  %v6086_v44 = vld [vmem:[%s7333_s5 + $0xd18] sm:$0xf0]  ;;  %v6910_v47 = vld [vmem:[%s7333_s5 + $0xe0c] sm:$0xf]  ;;  %v5961_v56 = vor.u32 %v6846_v37, %v5958_v40 }
 0x23f   : > { %4228 = vmatpush.bf16.msrb.mxu3 %v6425_v52  ;;  %v6214_v50 = vld [vmem:[%s7333_s5 + $0xe18] sm:$0xf0]  ;;  %v6942_v52 = vld [vmem:[%s7333_s5 + $0xf0c] sm:$0xf]  ;;  %v6089_v57 = vor.u32 %v6878_v42, %v6086_v44 }
 0x240   : > { %4190 = vmatpush.bf16.msrb.mxu0 %v6025_v29  ;;  %v3964_v51 = vpop.f32.mrf.mxu2  ;;  %v6342_v53 = vld [vmem:[%s7333_s5 + $0xf18] sm:$0xf0]  ;;  %v6217_v49 = vor.u32 %v6910_v47, %v6214_v50  ;;  %v7046_v29 = vld [vmem:[#allocation1 + $0x2d] sm:$0xff]  ;;  %v7047_v60 = vld [vmem:[#allocation1 + $0x36] sm:$0xff] }
 0x241   : > { %v6345_v58 = vor.u32 %v6942_v52, %v6342_v53  ;;  %v7045_v59 = vld [vmem:[#allocation1 + $0x24] sm:$0xff] }
 0x242   : > { %4203 = vmatpush.bf16.msrb.mxu1 %v6153_v61  ;;  %4216 = vmatpush.bf16.msrb.mxu2 %v6281_v62  ;;  %v7048_v61 = vld [vmem:[#allocation1 + $0x3f] sm:$0xff]  ;;  %v7049_v50 = vld [vmem:[%s7343_s26] sm:$0xf] }
 0x243   : > { %4229 = vmatpush.bf16.msrb.mxu3 %v6409_v0  ;;  %v3977_v55 = vpop.f32.mrf.mxu3  ;;  %v4243_v51 = vperm.slane %v7049_v50, 2 }
 0x244   : > { %4191 = vmatpush.bf16.msrb.mxu0 %v6009_v5 }
 0x246   : > { %4204 = vmatpush.bf16.msrb.mxu1 %v6137_v6  ;;  %4217 = vmatpush.bf16.msrb.mxu2 %v6265_v7 }
 0x247   : > { %4230 = vmatpush.bf16.msrb.mxu3 %v6393_v21 }
 0x248   : > { %4192 = vmatpush.bf16.msrb.mxu0 %v5993_v17 }
 0x24a   : > { %4205 = vmatpush.bf16.msrb.mxu1 %v6121_v19  ;;  %4218 = vmatpush.bf16.msrb.mxu2 %v6249_v41 }
 0x24b   : > { %4231 = vmatpush.bf16.msrb.mxu3 %v6377_v23 }
 0x24c   : > { %4193 = vmatpush.bf16.msrb.mxu0 %v5977_v34 }
 0x24e   : > { %4206 = vmatpush.bf16.msrb.mxu1 %v6105_v35  ;;  %4219 = vmatpush.bf16.msrb.mxu2 %v6233_v36 }
 0x24f   : > { %4232 = vmatpush.bf16.msrb.mxu3 %v6361_v43 }
 0x250   : > { %4194 = vmatpush.bf16.msrb.mxu0 %v5961_v56  ;;  %v3988_v62 = vpop.f32.mrf.mxu0  ;;  %v7050_v56 = vld [vmem:[%s8229_s14] sm:$0xf] }
 0x251   : > { %v3989_v31 = vadd.f32 %v3988_v62, %v3976_v39  ;;  %v4258_v62 = vperm.slane %v7050_v56, 3 }
 0x252   : > { %4207 = vmatpush.bf16.msrb.mxu1 %v6089_v57  ;;  %4220 = vmatpush.bf16.msrb.mxu2 %v6217_v49  ;;  %v4001_v32 = vpop.f32.mrf.mxu1  ;;  %v4257_v57 = vperm.slane %v7050_v56, 2 }
 0x253   : > { %4233 = vmatpush.bf16.msrb.mxu3 %v6345_v58  ;;  %4195 = vmatmul.bf16.vlgmr.msrb.gmra.mxu0 %v7045_v59  ;;  %v4002_v63 = vadd.f32 %v4001_v32, %v3989_v31  ;;  %v4244_v59 = vperm.slane %v7049_v50, 3 }
 0x255   : > { %4208 = vmatmul.bf16.vlgmr.msrb.gmra.mxu1 %v7046_v29  ;;  %4221 = vmatmul.bf16.vlgmr.msrb.gmra.mxu2 %v7047_v60 }
 0x256   : > { %4234 = vmatmul.bf16.vlgmr.msrb.gmra.mxu3 %v7048_v61 }
 0x258   : > { %v4014_v0 = vpop.f32.mrf.mxu2  ;;  %v3990_v3 = vpop.f32.mrf.mxu0 }
 0x259   : > { %v4015_v1 = vadd.f32 %v4014_v0, %v4002_v63 }
 0x25a   : > { %v4003_v30 = vpop.f32.mrf.mxu1 }
 0x25b   : > { %v4027_v2 = vpop.f32.mrf.mxu3  ;;  %v4275_v30 = vrot.slane %v8264_v33, 3 }
 0x25c   : > { %v4028_v38 = vadd.f32 %v4027_v2, %v4015_v1 }
 0x25e   : > { %v4251_v55 = vmul.f32 %v4243_v51, %v4028_v38 }
 0x260   : > { %v4016_v4 = vpop.f32.mrf.mxu2  ;;  %v4265_v31 = vadd.f32 %v4257_v57, %v4251_v55 }
 0x262   : > { %v4269_v1 = vmax.f32 %v4265_v31, 0.0 }
 0x263   : > { %v4029_v5 = vpop.f32.mrf.mxu3 }
 0x270   : > { %v4040_v6 = vpop.f32.mrf.mxu0 }
 0x272   : > { %v4053_v7 = vpop.f32.mrf.mxu1 }
 0x273   : > { %v4054_v20 = vadd.f32 %v4053_v7, %v4040_v6  ;;  %v4281_v6 = vsel %vm4278_vm0, %v8264_v33, %v4275_v30 }
 0x278   : > { %v4066_v8 = vpop.f32.mrf.mxu2  ;;  %v4042_v22 = vpop.f32.mrf.mxu0 }
 0x279   : > { %v4067_v9 = vadd.f32 %v4066_v8, %v4054_v20 }
 0x27a   : > { %v4055_v11 = vpop.f32.mrf.mxu1 }
 0x27b   : > { %v4079_v21 = vpop.f32.mrf.mxu3 }
 0x27c   : > { %v4080_v10 = vadd.f32 %v4079_v21, %v4067_v9 }
 0x280   : > { %v4068_v12 = vpop.f32.mrf.mxu2 }
 0x283   : > { %v4081_v13 = vpop.f32.mrf.mxu3 }
 0x290   : > { %v4092_v26 = vpop.f32.mrf.mxu0 }
 0x291   : > { %v4093_v45 = vadd.f32 %v4092_v26, %v4080_v10 }
 0x292   : > { %v4105_v14 = vpop.f32.mrf.mxu1 }
 0x293   : > { %v4106_v25 = vadd.f32 %v4105_v14, %v4093_v45 }
 0x298   : > { %v4118_v16 = vpop.f32.mrf.mxu2  ;;  %v4094_v17 = vpop.f32.mrf.mxu0 }
 0x299   : > { %v4119_v27 = vadd.f32 %v4118_v16, %v4106_v25 }
 0x29a   : > { %v4107_v18 = vpop.f32.mrf.mxu1 }
 0x29b   : > { %v4131_v54 = vpop.f32.mrf.mxu3 }
 0x29c   : > { %v4132_v35 = vadd.f32 %v4131_v54, %v4119_v27 }
 0x2a0   : > { %v4120_v39 = vpop.f32.mrf.mxu2 }
 0x2a3   : > { %v4133_v19 = vpop.f32.mrf.mxu3 }
 0x2b0   : > { %v4144_v41 = vpop.f32.mrf.mxu0 }
 0x2b1   : > { %v4145_v36 = vadd.f32 %v4144_v41, %v4132_v35 }
 0x2b2   : > { %v4157_v46 = vpop.f32.mrf.mxu1 }
 0x2b3   : > { %v4158_v37 = vadd.f32 %v4157_v46, %v4145_v36 }
 0x2b8   : > { %v4170_v48 = vpop.f32.mrf.mxu2  ;;  %v4146_v24 = vpop.f32.mrf.mxu0 }
 0x2b9   : > { %v4171_v40 = vadd.f32 %v4170_v48, %v4158_v37 }
 0x2ba   : > { %v4159_v15 = vpop.f32.mrf.mxu1 }
 0x2bb   : > { %v4183_v23 = vpop.f32.mrf.mxu3 }
 0x2bc   : > { %v4184_v42 = vadd.f32 %v4183_v23, %v4171_v40 }
 0x2c0   : > { %v4172_v28 = vpop.f32.mrf.mxu2 }
 0x2c3   : > { %v4185_v34 = vpop.f32.mrf.mxu3 }
 0x2d0   : > { %v4196_v43 = vpop.f32.mrf.mxu0 }
 0x2d1   : > { %v4197_v47 = vadd.f32 %v4196_v43, %v4184_v42 }
 0x2d2   : > { %v4209_v44 = vpop.f32.mrf.mxu1 }
 0x2d3   : > { %v4210_v52 = vadd.f32 %v4209_v44, %v4197_v47 }
 0x2d8   : > { %v4222_v53 = vpop.f32.mrf.mxu2  ;;  %v4198_v29 = vpop.f32.mrf.mxu0 }
 0x2d9   : > { %v4223_v49 = vadd.f32 %v4222_v53, %v4210_v52  ;;  %v4235_v58 = vpop.f32.mrf.mxu3 }
 0x2da   : > { %v4211_v60 = vpop.f32.mrf.mxu1 }
 0x2db   : > { %v4236_v61 = vadd.f32 %v4235_v58, %v4223_v49 }
 0x2dd   : > { %v4252_v32 = vmul.f32 %v4244_v59, %v4236_v61 }
 0x2df   : > { %v4266_v63 = vadd.f32 %v4258_v62, %v4252_v32 }
 0x2e0   : > { %v4224_v0 = vpop.f32.mrf.mxu2 }
 0x2e1   : > { %v4270_v2 = vmax.f32 %v4266_v63, 0.0  ;;  %v4237_v3 = vpop.f32.mrf.mxu3 }
 0x2e3   : > { %v4272_v38 = vpack.c.bf16 %v4270_v2, %v4269_v1 }
 0x2e5   : > { %v4276_v4 = vrot.slane %v4272_v38, 6  ;;  %v4277_v5 = vrot.slane %v4272_v38, 1 }
 0x2e7   : > { %v4285_v7 = vsel %vm4282_vm1, %v4276_v4, %v4277_v5 }
 0x2e8   : > { %v4287_v20 = vsel %vm4286_vm2, %v4281_v6, %v4285_v7 }
 0x2e9   : > { %4289 = vst [vmem:[%s295_s18] sm:$0xf] %v4287_v20 }
 0x2ea PF: > { %p17_p8 = scmp.ge.s32.totalorder %s7231_s20, 6   ;;  %s8497_s15 = smov %s7171_s16 }
 0x2eb   : > { %s8498_s16 = smov %s7175_s17  ;;  %s8499_s17 = smov %s7241_s23 }
 0x2ec   : > { %s8500_s18 = smov %s7231_s20  ;;  %19 = sbr.rel (!%p17_p8) target bundleno = 7 (0x7), region = 100 }
 0x2f1   :  { %4310 = vsyncpa [#allocation3], 1 }
 0x2f2   :  { %4312 = vsyncpa [#allocation3 + $0x1], 1 }
 0x2f3   :  { %4313 = vsyncpa [#allocation5], 1 }
 0x2f4   :  { %4315 = vsyncpa [#allocation5 + $0x1], 1 }

</bundles_post_ra>
